<compile_context>
chip_gen: v5e
topology: v5e:2x2
jax: 0.10.0
libtpu: 0.0.40
codegen_flags: <defaults>
</compile_context>

<pallas_src>
import functools

import jax
import jax.numpy as jnp
from jax.experimental import pallas as pl
from jax.experimental.pallas import tpu as pltpu

C_PAD = 128    # lane-dense channel padding for conv1/conv2 *outputs*
C2_IN = 32     # conv2 input channels: 24 live, padded only to 32 (K = 800)
FC1_K = 3200   # fc1 K: 7*7*64 = 3136 live rows, zero-padded to 25*128


# ---------------------------------------------------------------------------
# Pallas kernels
# ---------------------------------------------------------------------------
def _linear_kernel_single(x_ref, w_ref, b_ref, o_ref, *, relu):
    """Single-K-step y = relu?(x @ w + b): no accumulator scratch at all."""
    out = jnp.dot(x_ref[...], w_ref[...],
                  preferred_element_type=jnp.float32) + b_ref[...]
    if relu:
        out = jnp.maximum(out, 0.0)
    o_ref[...] = out.astype(o_ref.dtype)


def _linear_kernel_acc(x_ref, w_ref, b_ref, o_ref, acc_ref, *, relu):
    """K-accumulated (tm,tk)@(tk,tn) step; acc = dot on k==0 (no zero-fill)."""
    prod = jnp.dot(x_ref[...], w_ref[...], preferred_element_type=jnp.float32)
    k = pl.program_id(2)

    @pl.when(k == 0)
    def _():
        acc_ref[...] = prod

    @pl.when(k > 0)
    def _():
        acc_ref[...] += prod

    @pl.when(k == pl.num_programs(2) - 1)
    def _():
        out = acc_ref[...] + b_ref[...]
        if relu:
            out = jnp.maximum(out, 0.0)
        o_ref[...] = out.astype(o_ref.dtype)


def _maxpool_kernel(x_ref, o_ref):
    """2x2/2 max-pool; input block (tr, 2, Wo, 2*C) -> output (tr, Wo, C)."""
    v = x_ref[...]
    h = jnp.maximum(v[:, 0], v[:, 1])                 # max over the row pair
    c = h.shape[-1] // 2
    o_ref[...] = jnp.maximum(h[..., :c], h[..., c:])  # max over the col pair


# ---------------------------------------------------------------------------
# Tiling helpers
# ---------------------------------------------------------------------------
def _pick_m_tile(m, cap=512):
    """Largest of {512,256,...,8} <= cap that still yields >= 2 grid steps
    (ragged cdiv tail is fine: OOB rows only pollute rows never written back).
    Keeps one of v7x's two TensorCores from idling on a size-1 parallel axis.
    """
    if m <= 8:
        return m
    for c in (512, 256, 128, 64, 32, 16, 8):
        if c <= cap and c < m:
            return c
    return m


def _pick_n_tile(n, cap=512):
    """Largest multiple-of-128 divisor of n that is <= cap (n % 128 == 0)."""
    t = min(n, cap)
    while n % t != 0 or t % 128 != 0:
        t -= 128
    return t


def _pick_k_tile(k, tn, tm, max_bytes=4 << 20):
    """Exact-divisor K tile (multiple of 128) whose bf16 blocks fit max_bytes.
    Never returns a ragged tile, so the accumulator is never polluted."""
    def blk_bytes(tk):
        return 2 * (tk * tn + tm * tk)   # bf16 weight block + bf16 x block
    if k % 128 != 0 or blk_bytes(k) <= max_bytes:
        return k                         # single K step
    n128 = k // 128
    best = 128
    for d in range(1, n128 + 1):
        if n128 % d == 0 and blk_bytes(128 * d) <= max_bytes:
            best = 128 * d
    return best


# ---------------------------------------------------------------------------
# pallas_call wrappers
# ---------------------------------------------------------------------------
def linear_pallas(x, w, b, relu=False, out_dtype=jnp.float32):
    """y = relu?(x @ w + b); bf16 MXU operands, f32 accumulate/epilogue."""
    M, K = x.shape
    K2, N = w.shape
    assert K == K2 and N % 128 == 0, (x.shape, w.shape)
    x = x.astype(jnp.bfloat16)
    w = w.astype(jnp.bfloat16)
    b2d = b.reshape(1, N).astype(jnp.float32)

    tm = _pick_m_tile(M)
    tn = _pick_n_tile(N)
    tk = _pick_k_tile(K, tn, tm)
    m_steps = pl.cdiv(M, tm)
    n_steps = N // tn
    k_steps = K // tk

    cost = pl.CostEstimate(
        flops=2 * M * K * N,
        transcendentals=0,
        bytes_accessed=2 * (M * K + K * N)
        + M * N * jnp.dtype(out_dtype).itemsize + 4 * N,
    )

    if k_steps == 1:
        kernel = functools.partial(_linear_kernel_single, relu=relu)
        grid = (m_steps, n_steps)
        in_specs = [
            pl.BlockSpec((tm, K), lambda i, j: (i, 0)),
            pl.BlockSpec((K, tn), lambda i, j: (0, j)),
            pl.BlockSpec((1, tn), lambda i, j: (0, j)),
        ]
        out_specs = pl.BlockSpec((tm, tn), lambda i, j: (i, j))
        scratch = []
        sem = ("parallel", "parallel")
    else:
        kernel = functools.partial(_linear_kernel_acc, relu=relu)
        grid = (m_steps, n_steps, k_steps)        # reduction axis last
        in_specs = [
            pl.BlockSpec((tm, tk), lambda i, j, k: (i, k)),
            pl.BlockSpec((tk, tn), lambda i, j, k: (k, j)),
            pl.BlockSpec((1, tn), lambda i, j, k: (0, j)),
        ]
        out_specs = pl.BlockSpec((tm, tn), lambda i, j, k: (i, j))
        scratch = [pltpu.VMEM((tm, tn), jnp.float32)]
        sem = ("parallel", "parallel", "arbitrary")

    return pl.pallas_call(
        kernel,
        out_shape=jax.ShapeDtypeStruct((M, N), out_dtype),
        grid_spec=pltpu.PrefetchScalarGridSpec(
            num_scalar_prefetch=0,
            grid=grid,
            in_specs=in_specs,
            out_specs=out_specs,
            scratch_shapes=scratch,
        ),
        compiler_params=pltpu.CompilerParams(dimension_semantics=sem),
        cost_estimate=cost,
    )(x, w, b2d)


def maxpool2x2_pallas(x):
    """2x2 stride-2 max pool on NHWC input (H, W even; C multiple of 128)."""
    N, H, W, C = x.shape
    assert H % 2 == 0 and W % 2 == 0 and C % 128 == 0
    Ho, Wo = H // 2, W // 2
    rows = N * Ho
    xr = x.reshape(rows, 2, Wo, 2 * C)     # metadata-only reshape (no HBM copy)
    tr = _pick_m_tile(rows, cap=128)       # >=2 parallel steps; modest VMEM (v5e)
    out = pl.pallas_call(
        _maxpool_kernel,
        out_shape=jax.ShapeDtypeStruct((rows, Wo, C), x.dtype),
        grid_spec=pltpu.PrefetchScalarGridSpec(
            num_scalar_prefetch=0,
            grid=(pl.cdiv(rows, tr),),
            in_specs=[pl.BlockSpec((tr, 2, Wo, 2 * C), lambda i: (i, 0, 0, 0))],
            out_specs=pl.BlockSpec((tr, Wo, C), lambda i: (i, 0, 0)),
        ),
        compiler_params=pltpu.CompilerParams(
            dimension_semantics=("parallel",),
        ),
    )(xr)
    return out.reshape(N, Ho, Wo, C)


# ---------------------------------------------------------------------------
# JAX glue (im2col, parameter setup, forward graph)
# ---------------------------------------------------------------------------
def im2col(x, k=5, pad=2):
    """x: (N,H,W,C) -> (N*H*W, k*k*C) patches, stride 1, 'same' padding.

    TODO(synk): patch extraction remains XLA glue (25x read amplification);
    a fully fused in-kernel im2col/conv would remove this round trip.
    """
    N, H, W, C = x.shape
    xp = jnp.pad(x, ((0, 0), (pad, pad), (pad, pad), (0, 0)))
    cols = []
    for kh in range(k):
        for kw in range(k):
            cols.append(xp[:, kh:kh + H, kw:kw + W, :])
    patches = jnp.stack(cols, axis=3)           # (N, H, W, k*k, C)
    return patches.reshape(N * H * W, k * k * C)


def init_params(key, n_class):
    # NOTE: patches are ordered (kh, kw, cin); loading real PyTorch Conv2d
    # weights (cout, cin, kh, kw) needs a (cout,cin,kh,kw)->(kh,kw,cin,cout)
    # permutation, and fc1 needs the NCHW->NHWC flatten row permutation below.
    assert n_class <= 128
    ks = jax.random.split(key, 8)
    scale = 0.05
    f32 = jnp.float32

    # conv1: 1 -> 24, 5x5; Cout padded 24 -> 128 lanes (padding stays zero).
    w1 = jnp.zeros((5, 5, 1, C_PAD), f32)
    w1 = w1.at[:, :, :, :24].set(
        scale * jax.random.normal(ks[0], (5, 5, 1, 24), f32))
    b1 = jnp.zeros((C_PAD,), f32).at[:24].set(
        scale * jax.random.normal(ks[1], (24,), f32))

    # conv2: 24 -> 64, 5x5; Cin padded only to 32 (K = 5*5*32 = 800), Cout -> 128.
    w2 = jnp.zeros((5, 5, C2_IN, C_PAD), f32)
    w2 = w2.at[:, :, :24, :64].set(
        scale * jax.random.normal(ks[2], (5, 5, 24, 64), f32))
    b2 = jnp.zeros((C_PAD,), f32).at[:64].set(
        scale * jax.random.normal(ks[3], (64,), f32))

    # fc1: 3136 -> 1000.  Logical weight indexed [c, h, w, out] (PyTorch NCHW
    # flatten order c*49 + h*7 + w); rows permuted once here into the runtime
    # NHWC(64ch) flatten order h*448 + w*64 + c, then K zero-padded 3136->3200
    # and out padded 1000->1024, so no transpose is needed at runtime.
    wf1_logical = scale * jax.random.normal(ks[4], (64, 7, 7, 1000), f32)
    wf1 = jnp.zeros((FC1_K, 1024), f32)
    wf1 = wf1.at[:3136, :1000].set(
        jnp.transpose(wf1_logical, (1, 2, 0, 3)).reshape(3136, 1000))
    bf1 = jnp.zeros((1024,), f32).at[:1000].set(
        scale * jax.random.normal(ks[5], (1000,), f32))

    # fc2: 1000 -> n_class; padded to (1024, 128), logits sliced afterwards.
    wf2 = jnp.zeros((1024, 128), f32)
    wf2 = wf2.at[:1000, :n_class].set(
        scale * jax.random.normal(ks[6], (1000, n_class), f32))
    bf2 = jnp.zeros((128,), f32).at[:n_class].set(
        scale * jax.random.normal(ks[7], (n_class,), f32))

    return {
        # matmul operands in bf16 (MXU-native, halves HBM/VMEM bytes);
        # biases stay f32 for the f32 epilogue.
        "w1": w1.reshape(5 * 5 * 1, C_PAD).astype(jnp.bfloat16), "b1": b1,
        "w2": w2.reshape(5 * 5 * C2_IN, C_PAD).astype(jnp.bfloat16), "b2": b2,
        "wf1": wf1.astype(jnp.bfloat16), "bf1": bf1,
        "wf2": wf2.astype(jnp.bfloat16), "bf2": bf2,
    }


def convnet_forward(x_nchw, params, *, n_class):
    N = x_nchw.shape[0]
    x = jnp.transpose(x_nchw, (0, 2, 3, 1)).astype(jnp.bfloat16)  # NHWC, bf16

    # layer1: conv(1->24, 5x5, pad 2) + ReLU + maxpool 2x2 (Cout lane-padded to 128)
    p1 = im2col(x)                                        # (N*28*28, 25)
    h1 = linear_pallas(p1, params["w1"], params["b1"], relu=True,
                       out_dtype=jnp.bfloat16)
    h1 = h1.reshape(N, 28, 28, C_PAD)
    h1 = maxpool2x2_pallas(h1)                            # (N, 14, 14, 128)

    # layer2: slice back to 32 channels (24 live) so conv2's K is 800, not 3200.
    h1c = h1[..., :C2_IN]                                 # (N, 14, 14, 32)
    p2 = im2col(h1c)                                      # (N*14*14, 800)
    h2 = linear_pallas(p2, params["w2"], params["b2"], relu=True,
                       out_dtype=jnp.bfloat16)
    h2 = h2.reshape(N, 14, 14, C_PAD)
    h2 = maxpool2x2_pallas(h2)                            # (N, 7, 7, 128)

    # fc1: keep only the 64 live channels (halves the dominant weight stream),
    # flatten in NHWC order (fc1 rows were permuted at init), pad K to 3200.
    flat = h2[..., :64].reshape(N, 7 * 7 * 64)            # (N, 3136)
    flat = jnp.pad(flat, ((0, 0), (0, FC1_K - 7 * 7 * 64)))

    # TODO(synk): nn.Dropout() applied as identity (inference semantics);
    # stochastic training-mode dropout is not reproduced here.
    f1 = linear_pallas(flat, params["wf1"], params["bf1"], relu=False,
                       out_dtype=jnp.bfloat16)            # (N, 1024); cols 1000+ are 0
    logits = linear_pallas(f1, params["wf2"], params["bf2"], relu=False,
                           out_dtype=jnp.float32)         # (N, 128)
    return logits[:, :n_class]


if __name__ == "__main__":
    n_class = 10
    key = jax.random.PRNGKey(0)
    k_x, k_p = jax.random.split(key)

    # fc1 = Linear(7*7*64, 1000) pins the input to 28x28 single-channel images.
    x = jax.random.normal(k_x, (2, 1, 28, 28), jnp.float32)
    params = init_params(k_p, n_class)

    fwd = jax.jit(functools.partial(convnet_forward, n_class=n_class))
    logits = fwd(x, params)
    logits = jax.block_until_ready(logits)
    assert logits.shape == (2, n_class), logits.shape
    assert logits.dtype == jnp.float32
    print("KERNEL_OK")
</pallas_src>

<mosaic_0001>
module attributes {stable_mosaic.version = 11 : i64} {
  func.func @_linear_kernel_single(%arg0: i32, %arg1: i32, %arg2: memref<512x25xbf16, #tpu.memory_space<vmem>>, %arg3: memref<25x128xbf16, #tpu.memory_space<vmem>>, %arg4: memref<1x128xf32, #tpu.memory_space<vmem>>, %arg5: memref<512x128xbf16, #tpu.memory_space<vmem>>) attributes {dimension_semantics = [#tpu.dimension_semantics<parallel>, #tpu.dimension_semantics<parallel>], iteration_bounds = array<i64: 4, 1>, scalar_prefetch = 0 : i64, scratch_operands = 0 : i64, tpu.core_type = #tpu.core_type<tc>, window_params = [{transform_indices = @transform_0, window_bounds = array<i64: 512, 25>}, {transform_indices = @transform_1, window_bounds = array<i64: 25, 128>}, {transform_indices = @transform_2, window_bounds = array<i64: 1, 128>}, {transform_indices = @transform_3, window_bounds = array<i64: 512, 128>}]} {
    %c0 = arith.constant 0 : index
    %c0_0 = arith.constant 0 : index
    %0 = vector.load %arg2[%c0, %c0_0] : memref<512x25xbf16, #tpu.memory_space<vmem>>, vector<512x25xbf16>
    %c0_1 = arith.constant 0 : index
    %c0_2 = arith.constant 0 : index
    %1 = vector.load %arg3[%c0_1, %c0_2] : memref<25x128xbf16, #tpu.memory_space<vmem>>, vector<25x128xbf16>
    %cst = arith.constant dense<0.000000e+00> : vector<512x128xf32>
    %2 = tpu.matmul %0, %1, %cst {dimension_numbers = #tpu.dot_dimension_numbers<[1], [0], [0], [1], [0, 0, 1, 1], [], []>} : vector<512x25xbf16>, vector<25x128xbf16>, vector<512x128xf32> -> vector<512x128xf32>
    %c0_3 = arith.constant 0 : index
    %c0_4 = arith.constant 0 : index
    %3 = vector.load %arg4[%c0_3, %c0_4] : memref<1x128xf32, #tpu.memory_space<vmem>>, vector<1x128xf32>
    %4 = vector.broadcast %3 : vector<1x128xf32> to vector<512x128xf32>
    %5 = arith.addf %2, %4 : vector<512x128xf32>
    %cst_5 = arith.constant 0.000000e+00 : f32
    %6 = vector.broadcast %cst_5 : f32 to vector<512x128xf32>
    %7 = arith.maximumf %5, %6 : vector<512x128xf32>
    %8 = arith.truncf %7 : vector<512x128xf32> to vector<512x128xbf16>
    %c0_6 = arith.constant 0 : index
    %c0_7 = arith.constant 0 : index
    %9 = vector.load %arg5[%c0_6, %c0_7] : memref<512x128xbf16, #tpu.memory_space<vmem>>, vector<512x128xbf16>
    tpu.vector_store %arg5[%c0_6, %c0_7], %8 {strides = array<i32>} : memref<512x128xbf16, #tpu.memory_space<vmem>>, vector<512x128xbf16>,
    return
  }
  func.func @transform_0(%arg0: i32, %arg1: i32) -> (i32, i32) {
    %c0_i32 = arith.constant 0 : i32
    %c0_i32_0 = arith.constant 0 : i32
    return %arg0, %c0_i32 : i32, i32
  }
  func.func @transform_1(%arg0: i32, %arg1: i32) -> (i32, i32) {
    %c0_i32 = arith.constant 0 : i32
    %c0_i32_0 = arith.constant 0 : i32
    return %c0_i32, %arg1 : i32, i32
  }
  func.func @transform_2(%arg0: i32, %arg1: i32) -> (i32, i32) {
    %c0_i32 = arith.constant 0 : i32
    %c0_i32_0 = arith.constant 0 : i32
    return %c0_i32, %arg1 : i32, i32
  }
  func.func @transform_3(%arg0: i32, %arg1: i32) -> (i32, i32) {
    %c0_i32 = arith.constant 0 : i32
    return %arg0, %arg1 : i32, i32
  }
}

module attributes {stable_mosaic.version = 11 : i64} {
  func.func @_maxpool_kernel(%arg0: i32, %arg1: memref<16x2x14x256xbf16, #tpu.memory_space<vmem>>, %arg2: memref<16x14x128xbf16, #tpu.memory_space<vmem>>) attributes {dimension_semantics = [#tpu.dimension_semantics<parallel>], iteration_bounds = array<i64: 2>, scalar_prefetch = 0 : i64, scratch_operands = 0 : i64, tpu.core_type = #tpu.core_type<tc>, window_params = [{transform_indices = @transform_0, window_bounds = array<i64: 16, 2, 14, 256>}, {transform_indices = @transform_1, window_bounds = array<i64: 16, 14, 128>}]} {
    %c0 = arith.constant 0 : index
    %c0_0 = arith.constant 0 : index
    %c0_1 = arith.constant 0 : index
    %c0_2 = arith.constant 0 : index
    %0 = vector.load %arg1[%c0, %c0_0, %c0_1, %c0_2] : memref<16x2x14x256xbf16, #tpu.memory_space<vmem>>, vector<16x2x14x256xbf16>
    %1 = vector.extract_strided_slice %0 {offsets = [0, 0, 0, 0], sizes = [16, 1, 14, 256], strides = [1, 1, 1, 1]} : vector<16x2x14x256xbf16> to vector<16x1x14x256xbf16>
    %2 = vector.shape_cast %1 : vector<16x1x14x256xbf16> to vector<16x14x256xbf16>
    %3 = vector.extract_strided_slice %0 {offsets = [0, 1, 0, 0], sizes = [16, 1, 14, 256], strides = [1, 1, 1, 1]} : vector<16x2x14x256xbf16> to vector<16x1x14x256xbf16>
    %4 = vector.shape_cast %3 : vector<16x1x14x256xbf16> to vector<16x14x256xbf16>
    %5 = arith.maximumf %2, %4 : vector<16x14x256xbf16>
    %6 = vector.extract_strided_slice %5 {offsets = [0, 0, 0], sizes = [16, 14, 128], strides = [1, 1, 1]} : vector<16x14x256xbf16> to vector<16x14x128xbf16>
    %7 = vector.extract_strided_slice %5 {offsets = [0, 0, 128], sizes = [16, 14, 128], strides = [1, 1, 1]} : vector<16x14x256xbf16> to vector<16x14x128xbf16>
    %8 = arith.maximumf %6, %7 : vector<16x14x128xbf16>
    %c0_3 = arith.constant 0 : index
    %c0_4 = arith.constant 0 : index
    %c0_5 = arith.constant 0 : index
    %9 = vector.load %arg2[%c0_3, %c0_4, %c0_5] : memref<16x14x128xbf16, #tpu.memory_space<vmem>>, vector<16x14x128xbf16>
    tpu.vector_store %arg2[%c0_3, %c0_4, %c0_5], %8 {strides = array<i32>} : memref<16x14x128xbf16, #tpu.memory_space<vmem>>, vector<16x14x128xbf16>,
    return
  }
  func.func @transform_0(%arg0: i32) -> (i32, i32, i32, i32) {
    %c0_i32 = arith.constant 0 : i32
    %c0_i32_0 = arith.constant 0 : i32
    %c0_i32_1 = arith.constant 0 : i32
    %c0_i32_2 = arith.constant 0 : i32
    return %arg0, %c0_i32, %c0_i32_0, %c0_i32_1 : i32, i32, i32, i32
  }
  func.func @transform_1(%arg0: i32) -> (i32, i32, i32) {
    %c0_i32 = arith.constant 0 : i32
    %c0_i32_0 = arith.constant 0 : i32
    %c0_i32_1 = arith.constant 0 : i32
    return %arg0, %c0_i32, %c0_i32_0 : i32, i32, i32
  }
}

module attributes {stable_mosaic.version = 11 : i64} {
  func.func @_linear_kernel_single(%arg0: i32, %arg1: i32, %arg2: memref<256x800xbf16, #tpu.memory_space<vmem>>, %arg3: memref<800x128xbf16, #tpu.memory_space<vmem>>, %arg4: memref<1x128xf32, #tpu.memory_space<vmem>>, %arg5: memref<256x128xbf16, #tpu.memory_space<vmem>>) attributes {dimension_semantics = [#tpu.dimension_semantics<parallel>, #tpu.dimension_semantics<parallel>], iteration_bounds = array<i64: 2, 1>, scalar_prefetch = 0 : i64, scratch_operands = 0 : i64, tpu.core_type = #tpu.core_type<tc>, window_params = [{transform_indices = @transform_0, window_bounds = array<i64: 256, 800>}, {transform_indices = @transform_1, window_bounds = array<i64: 800, 128>}, {transform_indices = @transform_2, window_bounds = array<i64: 1, 128>}, {transform_indices = @transform_3, window_bounds = array<i64: 256, 128>}]} {
    %c0 = arith.constant 0 : index
    %c0_0 = arith.constant 0 : index
    %0 = vector.load %arg2[%c0, %c0_0] : memref<256x800xbf16, #tpu.memory_space<vmem>>, vector<256x800xbf16>
    %c0_1 = arith.constant 0 : index
    %c0_2 = arith.constant 0 : index
    %1 = vector.load %arg3[%c0_1, %c0_2] : memref<800x128xbf16, #tpu.memory_space<vmem>>, vector<800x128xbf16>
    %cst = arith.constant dense<0.000000e+00> : vector<256x128xf32>
    %2 = tpu.matmul %0, %1, %cst {dimension_numbers = #tpu.dot_dimension_numbers<[1], [0], [0], [1], [0, 0, 1, 1], [], []>} : vector<256x800xbf16>, vector<800x128xbf16>, vector<256x128xf32> -> vector<256x128xf32>
    %c0_3 = arith.constant 0 : index
    %c0_4 = arith.constant 0 : index
    %3 = vector.load %arg4[%c0_3, %c0_4] : memref<1x128xf32, #tpu.memory_space<vmem>>, vector<1x128xf32>
    %4 = vector.broadcast %3 : vector<1x128xf32> to vector<256x128xf32>
    %5 = arith.addf %2, %4 : vector<256x128xf32>
    %cst_5 = arith.constant 0.000000e+00 : f32
    %6 = vector.broadcast %cst_5 : f32 to vector<256x128xf32>
    %7 = arith.maximumf %5, %6 : vector<256x128xf32>
    %8 = arith.truncf %7 : vector<256x128xf32> to vector<256x128xbf16>
    %c0_6 = arith.constant 0 : index
    %c0_7 = arith.constant 0 : index
    %9 = vector.load %arg5[%c0_6, %c0_7] : memref<256x128xbf16, #tpu.memory_space<vmem>>, vector<256x128xbf16>
    tpu.vector_store %arg5[%c0_6, %c0_7], %8 {strides = array<i32>} : memref<256x128xbf16, #tpu.memory_space<vmem>>, vector<256x128xbf16>,
    return
  }
  func.func @transform_0(%arg0: i32, %arg1: i32) -> (i32, i32) {
    %c0_i32 = arith.constant 0 : i32
    %c0_i32_0 = arith.constant 0 : i32
    return %arg0, %c0_i32 : i32, i32
  }
  func.func @transform_1(%arg0: i32, %arg1: i32) -> (i32, i32) {
    %c0_i32 = arith.constant 0 : i32
    %c0_i32_0 = arith.constant 0 : i32
    return %c0_i32, %arg1 : i32, i32
  }
  func.func @transform_2(%arg0: i32, %arg1: i32) -> (i32, i32) {
    %c0_i32 = arith.constant 0 : i32
    %c0_i32_0 = arith.constant 0 : i32
    return %c0_i32, %arg1 : i32, i32
  }
  func.func @transform_3(%arg0: i32, %arg1: i32) -> (i32, i32) {
    %c0_i32 = arith.constant 0 : i32
    return %arg0, %arg1 : i32, i32
  }
}

module attributes {stable_mosaic.version = 11 : i64} {
  func.func @_maxpool_kernel(%arg0: i32, %arg1: memref<8x2x7x256xbf16, #tpu.memory_space<vmem>>, %arg2: memref<8x7x128xbf16, #tpu.memory_space<vmem>>) attributes {dimension_semantics = [#tpu.dimension_semantics<parallel>], iteration_bounds = array<i64: 2>, scalar_prefetch = 0 : i64, scratch_operands = 0 : i64, tpu.core_type = #tpu.core_type<tc>, window_params = [{transform_indices = @transform_0, window_bounds = array<i64: 8, 2, 7, 256>}, {transform_indices = @transform_1, window_bounds = array<i64: 8, 7, 128>}]} {
    %c0 = arith.constant 0 : index
    %c0_0 = arith.constant 0 : index
    %c0_1 = arith.constant 0 : index
    %c0_2 = arith.constant 0 : index
    %0 = vector.load %arg1[%c0, %c0_0, %c0_1, %c0_2] : memref<8x2x7x256xbf16, #tpu.memory_space<vmem>>, vector<8x2x7x256xbf16>
    %1 = vector.extract_strided_slice %0 {offsets = [0, 0, 0, 0], sizes = [8, 1, 7, 256], strides = [1, 1, 1, 1]} : vector<8x2x7x256xbf16> to vector<8x1x7x256xbf16>
    %2 = vector.shape_cast %1 : vector<8x1x7x256xbf16> to vector<8x7x256xbf16>
    %3 = vector.extract_strided_slice %0 {offsets = [0, 1, 0, 0], sizes = [8, 1, 7, 256], strides = [1, 1, 1, 1]} : vector<8x2x7x256xbf16> to vector<8x1x7x256xbf16>
    %4 = vector.shape_cast %3 : vector<8x1x7x256xbf16> to vector<8x7x256xbf16>
    %5 = arith.maximumf %2, %4 : vector<8x7x256xbf16>
    %6 = vector.extract_strided_slice %5 {offsets = [0, 0, 0], sizes = [8, 7, 128], strides = [1, 1, 1]} : vector<8x7x256xbf16> to vector<8x7x128xbf16>
    %7 = vector.extract_strided_slice %5 {offsets = [0, 0, 128], sizes = [8, 7, 128], strides = [1, 1, 1]} : vector<8x7x256xbf16> to vector<8x7x128xbf16>
    %8 = arith.maximumf %6, %7 : vector<8x7x128xbf16>
    %c0_3 = arith.constant 0 : index
    %c0_4 = arith.constant 0 : index
    %c0_5 = arith.constant 0 : index
    %9 = vector.load %arg2[%c0_3, %c0_4, %c0_5] : memref<8x7x128xbf16, #tpu.memory_space<vmem>>, vector<8x7x128xbf16>
    tpu.vector_store %arg2[%c0_3, %c0_4, %c0_5], %8 {strides = array<i32>} : memref<8x7x128xbf16, #tpu.memory_space<vmem>>, vector<8x7x128xbf16>,
    return
  }
  func.func @transform_0(%arg0: i32) -> (i32, i32, i32, i32) {
    %c0_i32 = arith.constant 0 : i32
    %c0_i32_0 = arith.constant 0 : i32
    %c0_i32_1 = arith.constant 0 : i32
    %c0_i32_2 = arith.constant 0 : i32
    return %arg0, %c0_i32, %c0_i32_0, %c0_i32_1 : i32, i32, i32, i32
  }
  func.func @transform_1(%arg0: i32) -> (i32, i32, i32) {
    %c0_i32 = arith.constant 0 : i32
    %c0_i32_0 = arith.constant 0 : i32
    %c0_i32_1 = arith.constant 0 : i32
    return %arg0, %c0_i32, %c0_i32_0 : i32, i32, i32
  }
}

module attributes {stable_mosaic.version = 11 : i64} {
  func.func @_linear_kernel_single(%arg0: i32, %arg1: i32, %arg2: memref<2x3200xbf16, #tpu.memory_space<vmem>>, %arg3: memref<3200x512xbf16, #tpu.memory_space<vmem>>, %arg4: memref<1x512xf32, #tpu.memory_space<vmem>>, %arg5: memref<2x512xbf16, #tpu.memory_space<vmem>>) attributes {dimension_semantics = [#tpu.dimension_semantics<parallel>, #tpu.dimension_semantics<parallel>], iteration_bounds = array<i64: 1, 2>, scalar_prefetch = 0 : i64, scratch_operands = 0 : i64, tpu.core_type = #tpu.core_type<tc>, window_params = [{transform_indices = @transform_0, window_bounds = array<i64: 2, 3200>}, {transform_indices = @transform_1, window_bounds = array<i64: 3200, 512>}, {transform_indices = @transform_2, window_bounds = array<i64: 1, 512>}, {transform_indices = @transform_3, window_bounds = array<i64: 2, 512>}]} {
    %c0 = arith.constant 0 : index
    %c0_0 = arith.constant 0 : index
    %0 = vector.load %arg2[%c0, %c0_0] : memref<2x3200xbf16, #tpu.memory_space<vmem>>, vector<2x3200xbf16>
    %c0_1 = arith.constant 0 : index
    %c0_2 = arith.constant 0 : index
    %1 = vector.load %arg3[%c0_1, %c0_2] : memref<3200x512xbf16, #tpu.memory_space<vmem>>, vector<3200x512xbf16>
    %cst = arith.constant dense<0.000000e+00> : vector<2x512xf32>
    %2 = tpu.matmul %0, %1, %cst {dimension_numbers = #tpu.dot_dimension_numbers<[1], [0], [0], [1], [0, 0, 1, 1], [], []>} : vector<2x3200xbf16>, vector<3200x512xbf16>, vector<2x512xf32> -> vector<2x512xf32>
    %c0_3 = arith.constant 0 : index
    %c0_4 = arith.constant 0 : index
    %3 = vector.load %arg4[%c0_3, %c0_4] : memref<1x512xf32, #tpu.memory_space<vmem>>, vector<1x512xf32>
    %4 = vector.broadcast %3 : vector<1x512xf32> to vector<2x512xf32>
    %5 = arith.addf %2, %4 : vector<2x512xf32>
    %6 = arith.truncf %5 : vector<2x512xf32> to vector<2x512xbf16>
    %c0_5 = arith.constant 0 : index
    %c0_6 = arith.constant 0 : index
    %7 = vector.load %arg5[%c0_5, %c0_6] : memref<2x512xbf16, #tpu.memory_space<vmem>>, vector<2x512xbf16>
    tpu.vector_store %arg5[%c0_5, %c0_6], %6 {strides = array<i32>} : memref<2x512xbf16, #tpu.memory_space<vmem>>, vector<2x512xbf16>,
    return
  }
  func.func @transform_0(%arg0: i32, %arg1: i32) -> (i32, i32) {
    %c0_i32 = arith.constant 0 : i32
    %c0_i32_0 = arith.constant 0 : i32
    return %arg0, %c0_i32 : i32, i32
  }
  func.func @transform_1(%arg0: i32, %arg1: i32) -> (i32, i32) {
    %c0_i32 = arith.constant 0 : i32
    %c0_i32_0 = arith.constant 0 : i32
    return %c0_i32, %arg1 : i32, i32
  }
  func.func @transform_2(%arg0: i32, %arg1: i32) -> (i32, i32) {
    %c0_i32 = arith.constant 0 : i32
    %c0_i32_0 = arith.constant 0 : i32
    return %c0_i32, %arg1 : i32, i32
  }
  func.func @transform_3(%arg0: i32, %arg1: i32) -> (i32, i32) {
    %c0_i32 = arith.constant 0 : i32
    return %arg0, %arg1 : i32, i32
  }
}

module attributes {stable_mosaic.version = 11 : i64} {
  func.func @_linear_kernel_single(%arg0: i32, %arg1: i32, %arg2: memref<2x1024xbf16, #tpu.memory_space<vmem>>, %arg3: memref<1024x128xbf16, #tpu.memory_space<vmem>>, %arg4: memref<1x128xf32, #tpu.memory_space<vmem>>, %arg5: memref<2x128xf32, #tpu.memory_space<vmem>>) attributes {dimension_semantics = [#tpu.dimension_semantics<parallel>, #tpu.dimension_semantics<parallel>], iteration_bounds = array<i64: 1, 1>, scalar_prefetch = 0 : i64, scratch_operands = 0 : i64, tpu.core_type = #tpu.core_type<tc>, window_params = [{transform_indices = @transform_0, window_bounds = array<i64: 2, 1024>}, {transform_indices = @transform_1, window_bounds = array<i64: 1024, 128>}, {transform_indices = @transform_2, window_bounds = array<i64: 1, 128>}, {transform_indices = @transform_3, window_bounds = array<i64: 2, 128>}]} {
    %c0 = arith.constant 0 : index
    %c0_0 = arith.constant 0 : index
    %0 = vector.load %arg2[%c0, %c0_0] : memref<2x1024xbf16, #tpu.memory_space<vmem>>, vector<2x1024xbf16>
    %c0_1 = arith.constant 0 : index
    %c0_2 = arith.constant 0 : index
    %1 = vector.load %arg3[%c0_1, %c0_2] : memref<1024x128xbf16, #tpu.memory_space<vmem>>, vector<1024x128xbf16>
    %cst = arith.constant dense<0.000000e+00> : vector<2x128xf32>
    %2 = tpu.matmul %0, %1, %cst {dimension_numbers = #tpu.dot_dimension_numbers<[1], [0], [0], [1], [0, 0, 1, 1], [], []>} : vector<2x1024xbf16>, vector<1024x128xbf16>, vector<2x128xf32> -> vector<2x128xf32>
    %c0_3 = arith.constant 0 : index
    %c0_4 = arith.constant 0 : index
    %3 = vector.load %arg4[%c0_3, %c0_4] : memref<1x128xf32, #tpu.memory_space<vmem>>, vector<1x128xf32>
    %4 = vector.broadcast %3 : vector<1x128xf32> to vector<2x128xf32>
    %5 = arith.addf %2, %4 : vector<2x128xf32>
    %c0_5 = arith.constant 0 : index
    %c0_6 = arith.constant 0 : index
    %6 = vector.load %arg5[%c0_5, %c0_6] : memref<2x128xf32, #tpu.memory_space<vmem>>, vector<2x128xf32>
    tpu.vector_store %arg5[%c0_5, %c0_6], %5 {strides = array<i32>} : memref<2x128xf32, #tpu.memory_space<vmem>>, vector<2x128xf32>,
    return
  }
  func.func @transform_0(%arg0: i32, %arg1: i32) -> (i32, i32) {
    %c0_i32 = arith.constant 0 : i32
    %c0_i32_0 = arith.constant 0 : i32
    return %arg0, %c0_i32 : i32, i32
  }
  func.func @transform_1(%arg0: i32, %arg1: i32) -> (i32, i32) {
    %c0_i32 = arith.constant 0 : i32
    %c0_i32_0 = arith.constant 0 : i32
    return %c0_i32, %arg1 : i32, i32
  }
  func.func @transform_2(%arg0: i32, %arg1: i32) -> (i32, i32) {
    %c0_i32 = arith.constant 0 : i32
    %c0_i32_0 = arith.constant 0 : i32
    return %c0_i32, %arg1 : i32, i32
  }
  func.func @transform_3(%arg0: i32, %arg1: i32) -> (i32, i32) {
    %c0_i32 = arith.constant 0 : i32
    return %arg0, %arg1 : i32, i32
  }
}

</mosaic_0001>

<bundles_post_ra>
// kernel: convnet_forward.6
= control target key start
LH: loop header
LB: loop body
LE: loop exit
PB: predicated region body
PF: predicated region fallthrough
CT: control target
= control target key end

     0   :  { %s1984_s12 = smov 0   ;;  %s1986_s13 = smov 0   ;;  %s2361_s0 = inlined_call_operand.vmem [shape: bf16[1568,25], index: 0, kind: input, shape index: {}]   ;;  %s2362_s1 = inlined_call_operand.vmem [shape: bf16[25,128], index: 1, kind: input, shape index: {}]   ;;  %s2363_s2 = inlined_call_operand.vmem [shape: f32[1,128], index: 2, kind: input, shape index: {}]   ;;  %s2364_s3 = inlined_call_operand.vmem [shape: bf16[1568,128], index: 3, kind: output, shape index: {}]  }
   0x1   :  { %s1988_s14 = smov 0   ;;  %s1990_s15 = smov 0  }
   0x2   :  { %s1992_s16 = smov 0  }
   0x3 LB: > { %s1324_s17 = sadd.s32 4294967295, %s1929_s16   ;;  %s25_s18 = sadd.s32 1, %s1925_s15  ;;  %s1929_s16 = sphi %s1992_s16, %s13_s16   ;;  %s1925_s15 = sphi %s1990_s15, %s2374_s15   ;;  %s1921_s14 = sphi %s1988_s14, %s2373_s14   ;;  %s1917_s13 = sphi %s1986_s13, %s2372_s13   ;;  %s1913_s12 = sphi %s1984_s12, %s2371_s12  }
   0x4   : > { %p27_p0 = scmp.ge.s32.totalorder %s25_s18, 4  ;;  %s112_s19 = sadd.s32 1, %s1917_s13 }
   0x5   : > { %p122_p1 = scmp.ne.s32.totalorder %s1917_s13, %s1913_s12  ;;  %p123_p2 = scmp.eq.s32.totalorder %s1324_s17, 3 }
   0x6   : > { %s2376_s18 = smov (%p27_p0, %s25_s18), 0  ;;  %p1330_p4 = scmp.ge.s32.totalorder %s1929_s16, 1 }
   0x7   : > { %p2016_p3 = por %p123_p2, %p122_p1  ;;  %s107_s21 = ssub.s32 %s1925_s15, %s2376_s18 }
   0x8   : > { %p177_p5 = scmp.lt.s32.totalorder %s1929_s16, 5  ;;  %p110_p6 = scmp.eq.s32.totalorder %s107_s21, 0 }
   0xa   : > { %p178_p7 = pnand %p1330_p4, %p177_p5 }
   0xb   : > { %s2025_s22 = scalar_select %p110_p6, %s1917_s13, %s112_s19  }
   0xc   : > { %181 = sbr.rel (%p178_p7) target bundleno = 355 (0x163), region = 32  ;;  %s2034_s27 = sshll.u32 (!%p178_p7), %s1921_s14, 6 }
   0xd   : > { %p216_p8 = scmp.lt.s32.totalorder (!%p178_p7), %s2034_s27, 195  ;;  %s208_s10 = sand.u32 (!%p178_p7), 1, %s1913_s12  }
   0xe   : > { %s1331_s11 = sshll.u32 (!%p178_p7), %s208_s10, 8 }
   0xf   : > { %s2122_s12 = scalar_lea.vmem (!%p178_p7), [#allocation2], %s1331_s11  }
  0x11   : > { %v1468_v0 = vld [vmem:[%s2362_s1 + $0x8] sm:$0xf]  ;;  %v1552_v1 = vld [vmem:[%s2362_s1 + $0x8] sm:$0x10]  ;;  %vm578_vm0 = vcmask 1043456   ;;  %vm579_vm1 = vcmask 1044480  }
  0x12   : > { %v1469_v2 = vor.u32 %v1552_v1, %v1468_v0  ;;  %v1963_v3 = vmov 65535   ;;  %s217_s28 = scalar_select %p216_p8, %s2034_s27, 195  ;;  %v1551_v7 = vld [vmem:[%s2362_s1] sm:$0xff]  ;;  %vm481_vm2 = vcmask 203776  }
  0x13   : > { %v580_v4 = vsel %vm578_vm0, 4294967295, %v1963_v3  ;;  %v2113_v42 = vld [vmem:[%s2363_s2] ss:$0 sm:$0xff]  ;;  %s954_s17 = ssub.s32 (%p2016_p3), 196, %s2034_s27  ;;  %s1553_s19 = sshll.u32 (%p2016_p3), %s1921_s14, 8 }
  0x14   : > { %v581_v5 = vsel %vm579_vm1, %v580_v4, 0  ;;  %s1333_s4 = sshll.u32 %s217_s28, 2  ;;  %p955_p9 = scmp.lt.s32.totalorder (%p2016_p3), %s954_s17, 64 }
  0x15   : > { %v583_v6 = vand.u32 %v1469_v2, %v581_v5  ;;  %s2044_s7 = scalar_lea.vmem %s2361_s0, %s1333_s4  ;;  %s2221_s24 = scalar_lea.vmem (%p2016_p3), %s2364_s3, %s1553_s19  }
  0x16   : > { %v1519_v8 = vld [vmem:[%s2044_s7] sm:$0xff]  ;;  %v1520_v12 = vld [vmem:[%s2044_s7 + $0x8] sm:$0xff]  ;;  %v1521_v16 = vld [vmem:[%s2044_s7 + $0x10] sm:$0xff] }
  0x17   : > { %591 = vmatpush.bf16.msra.mxu0 %v583_v6  ;;  %1747 = vmatpush.bf16.msra.mxu1 %v583_v6  ;;  %v1527_v9 = vld [vmem:[%s2044_s7 + $0x40] sm:$0xff]  ;;  %v1528_v13 = vld [vmem:[%s2044_s7 + $0x48] sm:$0xff]  ;;  %v1529_v17 = vld [vmem:[%s2044_s7 + $0x50] sm:$0xff] }
  0x18   : > { %1748 = vmatpush.bf16.msra.mxu2 %v583_v6  ;;  %1749 = vmatpush.bf16.msra.mxu3 %v583_v6  ;;  %v1535_v10 = vld [vmem:[%s2044_s7 + $0x80] sm:$0xff]  ;;  %v1536_v14 = vld [vmem:[%s2044_s7 + $0x88] sm:$0xff]  ;;  %v1537_v18 = vld [vmem:[%s2044_s7 + $0x90] sm:$0xff] }
  0x19   : > { %v1543_v11 = vld [vmem:[%s2044_s7 + $0xc0] sm:$0xff]  ;;  %v1544_v15 = vld [vmem:[%s2044_s7 + $0xc8] sm:$0xff]  ;;  %v1545_v19 = vld [vmem:[%s2044_s7 + $0xd0] sm:$0xff] }
  0x1a   : > { %v1522_v20 = vld [vmem:[%s2044_s7 + $0x18] sm:$0xff]  ;;  %v1523_v24 = vld [vmem:[%s2044_s7 + $0x20] sm:$0xff]  ;;  %v1524_v28 = vld [vmem:[%s2044_s7 + $0x28] sm:$0xff] }
  0x1b   : > { %592 = vmatpush.bf16.msra.mxu0 %v1551_v7  ;;  %1750 = vmatpush.bf16.msra.mxu1 %v1551_v7  ;;  %v1530_v21 = vld [vmem:[%s2044_s7 + $0x58] sm:$0xff]  ;;  %v1531_v25 = vld [vmem:[%s2044_s7 + $0x60] sm:$0xff]  ;;  %v1532_v29 = vld [vmem:[%s2044_s7 + $0x68] sm:$0xff] }
  0x1c   : > { %1751 = vmatpush.bf16.msra.mxu2 %v1551_v7  ;;  %1752 = vmatpush.bf16.msra.mxu3 %v1551_v7  ;;  %v1538_v22 = vld [vmem:[%s2044_s7 + $0x98] sm:$0xff]  ;;  %v1539_v26 = vld [vmem:[%s2044_s7 + $0xa0] sm:$0xff]  ;;  %v1540_v30 = vld [vmem:[%s2044_s7 + $0xa8] sm:$0xff] }
  0x1d   : > { %v1546_v23 = vld [vmem:[%s2044_s7 + $0xd8] sm:$0xff]  ;;  %v1547_v27 = vld [vmem:[%s2044_s7 + $0xe0] sm:$0xff]  ;;  %v1548_v31 = vld [vmem:[%s2044_s7 + $0xe8] sm:$0xff] }
  0x1e   : > { %1470 = vmatmul.msk.bf16.vlgmr.msra.gmra.mxu0 %vm481_vm2, %v1519_v8  ;;  %1478 = vmatmul.msk.bf16.vlgmr.msra.gmra.mxu1 %vm481_vm2, %v1527_v9  ;;  %v1525_v32 = vld [vmem:[%s2044_s7 + $0x30] sm:$0xff]  ;;  %v1526_v36 = vld [vmem:[%s2044_s7 + $0x38] sm:$0xff] }
  0x1f   : > { %1486 = vmatmul.msk.bf16.vlgmr.msra.gmra.mxu2 %vm481_vm2, %v1535_v10  ;;  %1494 = vmatmul.msk.bf16.vlgmr.msra.gmra.mxu3 %vm481_vm2, %v1543_v11  ;;  %v1533_v33 = vld [vmem:[%s2044_s7 + $0x70] sm:$0xff]  ;;  %v1534_v37 = vld [vmem:[%s2044_s7 + $0x78] sm:$0xff] }
  0x20   : > { %v1541_v34 = vld [vmem:[%s2044_s7 + $0xb0] sm:$0xff]  ;;  %v1542_v38 = vld [vmem:[%s2044_s7 + $0xb8] sm:$0xff] }
  0x21   : > { %v1549_v35 = vld [vmem:[%s2044_s7 + $0xf0] sm:$0xff]  ;;  %v1550_v39 = vld [vmem:[%s2044_s7 + $0xf8] sm:$0xff] }
  0x2e   : > { %1471 = vmatmul.msk.bf16.gmra.mxu0 %vm481_vm2, %v1520_v12  ;;  %1479 = vmatmul.msk.bf16.gmra.mxu1 %vm481_vm2, %v1528_v13 }
  0x2f   : > { %1487 = vmatmul.msk.bf16.gmra.mxu2 %vm481_vm2, %v1536_v14  ;;  %1495 = vmatmul.msk.bf16.gmra.mxu3 %vm481_vm2, %v1544_v15 }
  0x3e   : > { %1472 = vmatmul.msk.bf16.gmra.mxu0 %vm481_vm2, %v1521_v16  ;;  %1480 = vmatmul.msk.bf16.gmra.mxu1 %vm481_vm2, %v1529_v17 }
  0x3f   : > { %1488 = vmatmul.msk.bf16.gmra.mxu2 %vm481_vm2, %v1537_v18  ;;  %1496 = vmatmul.msk.bf16.gmra.mxu3 %vm481_vm2, %v1545_v19 }
  0x4e   : > { %1473 = vmatmul.msk.bf16.gmra.mxu0 %vm481_vm2, %v1522_v20  ;;  %1481 = vmatmul.msk.bf16.gmra.mxu1 %vm481_vm2, %v1530_v21 }
  0x4f   : > { %1489 = vmatmul.msk.bf16.gmra.mxu2 %vm481_vm2, %v1538_v22  ;;  %1497 = vmatmul.msk.bf16.gmra.mxu3 %vm481_vm2, %v1546_v23 }
  0x5e   : > { %1474 = vmatmul.msk.bf16.gmra.mxu0 %vm481_vm2, %v1523_v24  ;;  %1482 = vmatmul.msk.bf16.gmra.mxu1 %vm481_vm2, %v1531_v25 }
  0x5f   : > { %1490 = vmatmul.msk.bf16.gmra.mxu2 %vm481_vm2, %v1539_v26  ;;  %1498 = vmatmul.msk.bf16.gmra.mxu3 %vm481_vm2, %v1547_v27 }
  0x6e   : > { %1475 = vmatmul.msk.bf16.gmra.mxu0 %vm481_vm2, %v1524_v28  ;;  %1483 = vmatmul.msk.bf16.gmra.mxu1 %vm481_vm2, %v1532_v29 }
  0x6f   : > { %1491 = vmatmul.msk.bf16.gmra.mxu2 %vm481_vm2, %v1540_v30  ;;  %1499 = vmatmul.msk.bf16.gmra.mxu3 %vm481_vm2, %v1548_v31 }
  0x7e   : > { %1476 = vmatmul.msk.bf16.gmra.mxu0 %vm481_vm2, %v1525_v32  ;;  %1484 = vmatmul.msk.bf16.gmra.mxu1 %vm481_vm2, %v1533_v33 }
  0x7f   : > { %1492 = vmatmul.msk.bf16.gmra.mxu2 %vm481_vm2, %v1541_v34  ;;  %1500 = vmatmul.msk.bf16.gmra.mxu3 %vm481_vm2, %v1549_v35 }
  0x8e   : > { %1477 = vmatmul.msk.bf16.gmra.mxu0 %vm481_vm2, %v1526_v36  ;;  %1485 = vmatmul.msk.bf16.gmra.mxu1 %vm481_vm2, %v1534_v37 }
  0x8f   : > { %1493 = vmatmul.msk.bf16.gmra.mxu2 %vm481_vm2, %v1542_v38  ;;  %1501 = vmatmul.msk.bf16.gmra.mxu3 %vm481_vm2, %v1550_v39 }
  0x9b   : > { %v594_v40 = vpop.f32.mrf.mxu0  ;;  %v634_v41 = vpop.f32.mrf.mxu1 }
  0x9c   : > { %v595_v43 = vadd.f32 %v2113_v42, %v594_v40  ;;  %v635_v44 = vadd.f32 %v2113_v42, %v634_v41 }
  0x9e   : > { %v754_v51 = vmax.f32 %v595_v43, 0.0  ;;  %v770_v52 = vmax.f32 %v635_v44, 0.0 }
  0xa2   : > { %v674_v45 = vpop.f32.mrf.mxu2  ;;  %v714_v46 = vpop.f32.mrf.mxu3 }
  0xa3   : > { %v596_v47 = vpop.f32.mrf.mxu0  ;;  %v636_v48 = vpop.f32.mrf.mxu1  ;;  %v675_v57 = vadd.f32 %v2113_v42, %v674_v45  ;;  %v715_v58 = vadd.f32 %v2113_v42, %v714_v46 }
  0xa4   : > { %v597_v49 = vadd.f32 %v2113_v42, %v596_v47  ;;  %v637_v50 = vadd.f32 %v2113_v42, %v636_v48 }
  0xa5   : > { %v786_v1 = vmax.f32 %v675_v57, 0.0  ;;  %v802_v2 = vmax.f32 %v715_v58, 0.0 }
  0xa6   : > { %v755_v53 = vmax.f32 %v597_v49, 0.0  ;;  %v771_v54 = vmax.f32 %v637_v50, 0.0 }
  0xa8   : > { %v1559_v55 = vpack.c.bf16 %v755_v53, %v754_v51  ;;  %v1599_v56 = vpack.c.bf16 %v771_v54, %v770_v52 }
  0xaa   : > { %1560 = vst [vmem:[%s2122_s12] sm:$0xff] %v1559_v55   ;;  %v676_v59 = vpop.f32.mrf.mxu2  ;;  %v716_v60 = vpop.f32.mrf.mxu3 }
  0xab   : > { %1723 = vst [vmem:[%s2122_s12 + $0x40] sm:$0xff] %v1599_v56   ;;  %v677_v61 = vadd.f32 %v2113_v42, %v676_v59  ;;  %v717_v62 = vadd.f32 %v2113_v42, %v716_v60  ;;  %v599_v63 = vpop.f32.mrf.mxu0  ;;  %v639_v0 = vpop.f32.mrf.mxu1 }
  0xac   : > { %v600_v7 = vadd.f32 %v2113_v42, %v599_v63  ;;  %v640_v8 = vadd.f32 %v2113_v42, %v639_v0 }
  0xad   : > { %v787_v3 = vmax.f32 %v677_v61, 0.0  ;;  %v803_v4 = vmax.f32 %v717_v62, 0.0 }
  0xae   : > { %v756_v15 = vmax.f32 %v600_v7, 0.0  ;;  %v772_v16 = vmax.f32 %v640_v8, 0.0 }
  0xaf   : > { %v1639_v5 = vpack.c.bf16 %v787_v3, %v786_v1  ;;  %v1679_v6 = vpack.c.bf16 %v803_v4, %v802_v2 }
  0xb1   : > { %1731 = vst [vmem:[%s2122_s12 + $0x80] sm:$0xff] %v1639_v5  }
  0xb2   : > { %1739 = vst [vmem:[%s2122_s12 + $0xc0] sm:$0xff] %v1679_v6   ;;  %v679_v9 = vpop.f32.mrf.mxu2  ;;  %v719_v10 = vpop.f32.mrf.mxu3 }
  0xb3   : > { %v601_v11 = vpop.f32.mrf.mxu0  ;;  %v641_v12 = vpop.f32.mrf.mxu1  ;;  %v680_v21 = vadd.f32 %v2113_v42, %v679_v9  ;;  %v720_v22 = vadd.f32 %v2113_v42, %v719_v10 }
  0xb4   : > { %v602_v13 = vadd.f32 %v2113_v42, %v601_v11  ;;  %v642_v14 = vadd.f32 %v2113_v42, %v641_v12 }
  0xb5   : > { %v788_v29 = vmax.f32 %v680_v21, 0.0  ;;  %v804_v30 = vmax.f32 %v720_v22, 0.0 }
  0xb6   : > { %v757_v17 = vmax.f32 %v602_v13, 0.0  ;;  %v773_v18 = vmax.f32 %v642_v14, 0.0 }
  0xb8   : > { %v1564_v19 = vpack.c.bf16 %v757_v17, %v756_v15  ;;  %v1604_v20 = vpack.c.bf16 %v773_v18, %v772_v16 }
  0xba   : > { %1716 = vst [vmem:[%s2122_s12 + $0x8] sm:$0xff] %v1564_v19   ;;  %v681_v23 = vpop.f32.mrf.mxu2  ;;  %v721_v24 = vpop.f32.mrf.mxu3 }
  0xbb   : > { %1724 = vst [vmem:[%s2122_s12 + $0x48] sm:$0xff] %v1604_v20   ;;  %v682_v25 = vadd.f32 %v2113_v42, %v681_v23  ;;  %v722_v26 = vadd.f32 %v2113_v42, %v721_v24  ;;  %v604_v27 = vpop.f32.mrf.mxu0  ;;  %v644_v28 = vpop.f32.mrf.mxu1 }
  0xbc   : > { %v605_v35 = vadd.f32 %v2113_v42, %v604_v27  ;;  %v645_v36 = vadd.f32 %v2113_v42, %v644_v28 }
  0xbd   : > { %v789_v31 = vmax.f32 %v682_v25, 0.0  ;;  %v805_v32 = vmax.f32 %v722_v26, 0.0 }
  0xbe   : > { %v758_v44 = vmax.f32 %v605_v35, 0.0  ;;  %v774_v45 = vmax.f32 %v645_v36, 0.0 }
  0xbf   : > { %v1644_v33 = vpack.c.bf16 %v789_v31, %v788_v29  ;;  %v1684_v34 = vpack.c.bf16 %v805_v32, %v804_v30 }
  0xc1   : > { %1732 = vst [vmem:[%s2122_s12 + $0x88] sm:$0xff] %v1644_v33  }
  0xc2   : > { %1740 = vst [vmem:[%s2122_s12 + $0xc8] sm:$0xff] %v1684_v34   ;;  %v684_v37 = vpop.f32.mrf.mxu2  ;;  %v724_v38 = vpop.f32.mrf.mxu3 }
  0xc3   : > { %v606_v39 = vpop.f32.mrf.mxu0  ;;  %v646_v40 = vpop.f32.mrf.mxu1  ;;  %v685_v50 = vadd.f32 %v2113_v42, %v684_v37  ;;  %v725_v51 = vadd.f32 %v2113_v42, %v724_v38 }
  0xc4   : > { %v607_v41 = vadd.f32 %v2113_v42, %v606_v39  ;;  %v647_v43 = vadd.f32 %v2113_v42, %v646_v40 }
  0xc5   : > { %v790_v58 = vmax.f32 %v685_v50, 0.0  ;;  %v806_v59 = vmax.f32 %v725_v51, 0.0 }
  0xc6   : > { %v759_v46 = vmax.f32 %v607_v41, 0.0  ;;  %v775_v47 = vmax.f32 %v647_v43, 0.0 }
  0xc8   : > { %v1569_v48 = vpack.c.bf16 %v759_v46, %v758_v44  ;;  %v1609_v49 = vpack.c.bf16 %v775_v47, %v774_v45 }
  0xca   : > { %1717 = vst [vmem:[%s2122_s12 + $0x10] sm:$0xff] %v1569_v48   ;;  %v686_v52 = vpop.f32.mrf.mxu2  ;;  %v726_v53 = vpop.f32.mrf.mxu3 }
  0xcb   : > { %1725 = vst [vmem:[%s2122_s12 + $0x50] sm:$0xff] %v1609_v49   ;;  %v687_v54 = vadd.f32 %v2113_v42, %v686_v52  ;;  %v727_v55 = vadd.f32 %v2113_v42, %v726_v53  ;;  %v609_v56 = vpop.f32.mrf.mxu0  ;;  %v649_v57 = vpop.f32.mrf.mxu1 }
  0xcc   : > { %v610_v0 = vadd.f32 %v2113_v42, %v609_v56  ;;  %v650_v1 = vadd.f32 %v2113_v42, %v649_v57 }
  0xcd   : > { %v791_v60 = vmax.f32 %v687_v54, 0.0  ;;  %v807_v61 = vmax.f32 %v727_v55, 0.0 }
  0xce   : > { %v760_v8 = vmax.f32 %v610_v0, 0.0  ;;  %v776_v9 = vmax.f32 %v650_v1, 0.0 }
  0xcf   : > { %v1649_v62 = vpack.c.bf16 %v791_v60, %v790_v58  ;;  %v1689_v63 = vpack.c.bf16 %v807_v61, %v806_v59 }
  0xd1   : > { %1733 = vst [vmem:[%s2122_s12 + $0x90] sm:$0xff] %v1649_v62  }
  0xd2   : > { %1741 = vst [vmem:[%s2122_s12 + $0xd0] sm:$0xff] %v1689_v63   ;;  %v689_v2 = vpop.f32.mrf.mxu2  ;;  %v729_v3 = vpop.f32.mrf.mxu3 }
  0xd3   : > { %v611_v4 = vpop.f32.mrf.mxu0  ;;  %v651_v5 = vpop.f32.mrf.mxu1  ;;  %v690_v14 = vadd.f32 %v2113_v42, %v689_v2  ;;  %v730_v15 = vadd.f32 %v2113_v42, %v729_v3 }
  0xd4   : > { %v612_v6 = vadd.f32 %v2113_v42, %v611_v4  ;;  %v652_v7 = vadd.f32 %v2113_v42, %v651_v5 }
  0xd5   : > { %v792_v22 = vmax.f32 %v690_v14, 0.0  ;;  %v808_v23 = vmax.f32 %v730_v15, 0.0 }
  0xd6   : > { %v761_v10 = vmax.f32 %v612_v6, 0.0  ;;  %v777_v11 = vmax.f32 %v652_v7, 0.0 }
  0xd8   : > { %v1574_v12 = vpack.c.bf16 %v761_v10, %v760_v8  ;;  %v1614_v13 = vpack.c.bf16 %v777_v11, %v776_v9 }
  0xda   : > { %1718 = vst [vmem:[%s2122_s12 + $0x18] sm:$0xff] %v1574_v12   ;;  %v691_v16 = vpop.f32.mrf.mxu2  ;;  %v731_v17 = vpop.f32.mrf.mxu3 }
  0xdb   : > { %1726 = vst [vmem:[%s2122_s12 + $0x58] sm:$0xff] %v1614_v13   ;;  %v692_v18 = vadd.f32 %v2113_v42, %v691_v16  ;;  %v732_v19 = vadd.f32 %v2113_v42, %v731_v17  ;;  %v614_v20 = vpop.f32.mrf.mxu0  ;;  %v654_v21 = vpop.f32.mrf.mxu1 }
  0xdc   : > { %v615_v28 = vadd.f32 %v2113_v42, %v614_v20  ;;  %v655_v29 = vadd.f32 %v2113_v42, %v654_v21 }
  0xdd   : > { %v793_v24 = vmax.f32 %v692_v18, 0.0  ;;  %v809_v25 = vmax.f32 %v732_v19, 0.0 }
  0xde   : > { %v762_v36 = vmax.f32 %v615_v28, 0.0  ;;  %v778_v37 = vmax.f32 %v655_v29, 0.0 }
  0xdf   : > { %v1654_v26 = vpack.c.bf16 %v793_v24, %v792_v22  ;;  %v1694_v27 = vpack.c.bf16 %v809_v25, %v808_v23 }
  0xe1   : > { %1734 = vst [vmem:[%s2122_s12 + $0x98] sm:$0xff] %v1654_v26  }
  0xe2   : > { %1742 = vst [vmem:[%s2122_s12 + $0xd8] sm:$0xff] %v1694_v27   ;;  %v694_v30 = vpop.f32.mrf.mxu2  ;;  %v734_v31 = vpop.f32.mrf.mxu3 }
  0xe3   : > { %v616_v32 = vpop.f32.mrf.mxu0  ;;  %v656_v33 = vpop.f32.mrf.mxu1  ;;  %v695_v43 = vadd.f32 %v2113_v42, %v694_v30  ;;  %v735_v44 = vadd.f32 %v2113_v42, %v734_v31 }
  0xe4   : > { %v617_v34 = vadd.f32 %v2113_v42, %v616_v32  ;;  %v657_v35 = vadd.f32 %v2113_v42, %v656_v33 }
  0xe5   : > { %v794_v51 = vmax.f32 %v695_v43, 0.0  ;;  %v810_v52 = vmax.f32 %v735_v44, 0.0 }
  0xe6   : > { %v763_v38 = vmax.f32 %v617_v34, 0.0  ;;  %v779_v39 = vmax.f32 %v657_v35, 0.0 }
  0xe8   : > { %v1579_v40 = vpack.c.bf16 %v763_v38, %v762_v36  ;;  %v1619_v41 = vpack.c.bf16 %v779_v39, %v778_v37 }
  0xea   : > { %1719 = vst [vmem:[%s2122_s12 + $0x20] sm:$0xff] %v1579_v40   ;;  %v696_v45 = vpop.f32.mrf.mxu2  ;;  %v736_v46 = vpop.f32.mrf.mxu3 }
  0xeb   : > { %1727 = vst [vmem:[%s2122_s12 + $0x60] sm:$0xff] %v1619_v41   ;;  %v697_v47 = vadd.f32 %v2113_v42, %v696_v45  ;;  %v737_v48 = vadd.f32 %v2113_v42, %v736_v46  ;;  %v619_v49 = vpop.f32.mrf.mxu0  ;;  %v659_v50 = vpop.f32.mrf.mxu1 }
  0xec   : > { %v620_v57 = vadd.f32 %v2113_v42, %v619_v49  ;;  %v660_v58 = vadd.f32 %v2113_v42, %v659_v50 }
  0xed   : > { %v795_v53 = vmax.f32 %v697_v47, 0.0  ;;  %v811_v54 = vmax.f32 %v737_v48, 0.0 }
  0xee   : > { %v764_v1 = vmax.f32 %v620_v57, 0.0  ;;  %v780_v2 = vmax.f32 %v660_v58, 0.0 }
  0xef   : > { %v1659_v55 = vpack.c.bf16 %v795_v53, %v794_v51  ;;  %v1699_v56 = vpack.c.bf16 %v811_v54, %v810_v52 }
  0xf1   : > { %1735 = vst [vmem:[%s2122_s12 + $0xa0] sm:$0xff] %v1659_v55  }
  0xf2   : > { %1743 = vst [vmem:[%s2122_s12 + $0xe0] sm:$0xff] %v1699_v56   ;;  %v699_v59 = vpop.f32.mrf.mxu2  ;;  %v739_v60 = vpop.f32.mrf.mxu3 }
  0xf3   : > { %v621_v61 = vpop.f32.mrf.mxu0  ;;  %v661_v62 = vpop.f32.mrf.mxu1  ;;  %v700_v7 = vadd.f32 %v2113_v42, %v699_v59  ;;  %v740_v8 = vadd.f32 %v2113_v42, %v739_v60 }
  0xf4   : > { %v622_v63 = vadd.f32 %v2113_v42, %v621_v61  ;;  %v662_v0 = vadd.f32 %v2113_v42, %v661_v62 }
  0xf5   : > { %v796_v15 = vmax.f32 %v700_v7, 0.0  ;;  %v812_v16 = vmax.f32 %v740_v8, 0.0 }
  0xf6   : > { %v765_v3 = vmax.f32 %v622_v63, 0.0  ;;  %v781_v4 = vmax.f32 %v662_v0, 0.0 }
  0xf8   : > { %v1584_v5 = vpack.c.bf16 %v765_v3, %v764_v1  ;;  %v1624_v6 = vpack.c.bf16 %v781_v4, %v780_v2 }
  0xfa   : > { %1720 = vst [vmem:[%s2122_s12 + $0x28] sm:$0xff] %v1584_v5   ;;  %v701_v9 = vpop.f32.mrf.mxu2  ;;  %v741_v10 = vpop.f32.mrf.mxu3 }
  0xfb   : > { %1728 = vst [vmem:[%s2122_s12 + $0x68] sm:$0xff] %v1624_v6   ;;  %v702_v11 = vadd.f32 %v2113_v42, %v701_v9  ;;  %v742_v12 = vadd.f32 %v2113_v42, %v741_v10  ;;  %v624_v13 = vpop.f32.mrf.mxu0  ;;  %v664_v14 = vpop.f32.mrf.mxu1 }
  0xfc   : > { %v625_v21 = vadd.f32 %v2113_v42, %v624_v13  ;;  %v665_v22 = vadd.f32 %v2113_v42, %v664_v14 }
  0xfd   : > { %v797_v17 = vmax.f32 %v702_v11, 0.0  ;;  %v813_v18 = vmax.f32 %v742_v12, 0.0 }
  0xfe   : > { %v766_v29 = vmax.f32 %v625_v21, 0.0  ;;  %v782_v30 = vmax.f32 %v665_v22, 0.0 }
  0xff   : > { %v1664_v19 = vpack.c.bf16 %v797_v17, %v796_v15  ;;  %v1704_v20 = vpack.c.bf16 %v813_v18, %v812_v16 }
 0x101   : > { %1736 = vst [vmem:[%s2122_s12 + $0xa8] sm:$0xff] %v1664_v19  }
 0x102   : > { %1744 = vst [vmem:[%s2122_s12 + $0xe8] sm:$0xff] %v1704_v20   ;;  %v704_v23 = vpop.f32.mrf.mxu2  ;;  %v744_v24 = vpop.f32.mrf.mxu3 }
 0x103   : > { %v626_v25 = vpop.f32.mrf.mxu0  ;;  %v666_v26 = vpop.f32.mrf.mxu1  ;;  %v705_v35 = vadd.f32 %v2113_v42, %v704_v23  ;;  %v745_v36 = vadd.f32 %v2113_v42, %v744_v24 }
 0x104   : > { %v627_v27 = vadd.f32 %v2113_v42, %v626_v25  ;;  %v667_v28 = vadd.f32 %v2113_v42, %v666_v26 }
 0x105   : > { %v798_v44 = vmax.f32 %v705_v35, 0.0  ;;  %v814_v45 = vmax.f32 %v745_v36, 0.0 }
 0x106   : > { %v767_v31 = vmax.f32 %v627_v27, 0.0  ;;  %v783_v32 = vmax.f32 %v667_v28, 0.0 }
 0x108   : > { %v1589_v33 = vpack.c.bf16 %v767_v31, %v766_v29  ;;  %v1629_v34 = vpack.c.bf16 %v783_v32, %v782_v30 }
 0x10a   : > { %1721 = vst [vmem:[%s2122_s12 + $0x30] sm:$0xff] %v1589_v33   ;;  %v706_v37 = vpop.f32.mrf.mxu2  ;;  %v746_v38 = vpop.f32.mrf.mxu3 }
 0x10b   : > { %1729 = vst [vmem:[%s2122_s12 + $0x70] sm:$0xff] %v1629_v34   ;;  %v707_v39 = vadd.f32 %v2113_v42, %v706_v37  ;;  %v747_v40 = vadd.f32 %v2113_v42, %v746_v38  ;;  %v629_v41 = vpop.f32.mrf.mxu0  ;;  %v669_v43 = vpop.f32.mrf.mxu1 }
 0x10c   : > { %v630_v50 = vadd.f32 %v2113_v42, %v629_v41  ;;  %v670_v51 = vadd.f32 %v2113_v42, %v669_v43 }
 0x10d   : > { %v799_v46 = vmax.f32 %v707_v39, 0.0  ;;  %v815_v47 = vmax.f32 %v747_v40, 0.0 }
 0x10e   : > { %v768_v58 = vmax.f32 %v630_v50, 0.0  ;;  %v784_v59 = vmax.f32 %v670_v51, 0.0 }
 0x10f   : > { %v1669_v48 = vpack.c.bf16 %v799_v46, %v798_v44  ;;  %v1709_v49 = vpack.c.bf16 %v815_v47, %v814_v45 }
 0x111   : > { %1737 = vst [vmem:[%s2122_s12 + $0xb0] sm:$0xff] %v1669_v48  }
 0x112   : > { %1745 = vst [vmem:[%s2122_s12 + $0xf0] sm:$0xff] %v1709_v49   ;;  %v709_v52 = vpop.f32.mrf.mxu2  ;;  %v749_v53 = vpop.f32.mrf.mxu3 }
 0x113   : > { %v631_v54 = vpop.f32.mrf.mxu0  ;;  %v671_v55 = vpop.f32.mrf.mxu1  ;;  %v710_v0 = vadd.f32 %v2113_v42, %v709_v52  ;;  %v750_v1 = vadd.f32 %v2113_v42, %v749_v53 }
 0x114   : > { %v632_v56 = vadd.f32 %v2113_v42, %v631_v54  ;;  %v672_v57 = vadd.f32 %v2113_v42, %v671_v55 }
 0x115   : > { %v800_v6 = vmax.f32 %v710_v0, 0.0  ;;  %v816_v7 = vmax.f32 %v750_v1, 0.0 }
 0x116   : > { %v769_v60 = vmax.f32 %v632_v56, 0.0  ;;  %v785_v61 = vmax.f32 %v672_v57, 0.0 }
 0x118   : > { %v1594_v62 = vpack.c.bf16 %v769_v60, %v768_v58  ;;  %v1634_v63 = vpack.c.bf16 %v785_v61, %v784_v59 }
 0x11a   : > { %1722 = vst [vmem:[%s2122_s12 + $0x38] sm:$0xff] %v1594_v62   ;;  %v711_v2 = vpop.f32.mrf.mxu2  ;;  %v751_v3 = vpop.f32.mrf.mxu3 }
 0x11b   : > { %1730 = vst [vmem:[%s2122_s12 + $0x78] sm:$0xff] %v1634_v63   ;;  %v712_v4 = vadd.f32 %v2113_v42, %v711_v2  ;;  %v752_v5 = vadd.f32 %v2113_v42, %v751_v3 }
 0x11d   : > { %v801_v8 = vmax.f32 %v712_v4, 0.0  ;;  %v817_v9 = vmax.f32 %v752_v5, 0.0 }
 0x11e   : > { %952 = sbr.rel (!%p2016_p3) target bundleno = 355 (0x163), region = 36 }
 0x11f   : > { %v1674_v10 = vpack.c.bf16 %v801_v8, %v800_v6  ;;  %v1714_v11 = vpack.c.bf16 %v817_v9, %v816_v7 }
 0x121   : > { %1738 = vst [vmem:[%s2122_s12 + $0xb8] sm:$0xff] %v1674_v10  }
 0x122   : > { %1746 = vst [vmem:[%s2122_s12 + $0xf8] sm:$0xff] %v1714_v11  }
 0x123   : > { %s2378_s17 = smov (!%p955_p9, %s954_s17), 64 }
 0x124   : > { %s1504_s25 = sshll.u32 %s2378_s17, 2 }
 0x125   : > { %p1507_p10 = scmp.eq.s32.totalorder %s1504_s25, 0 }
 0x126   : > { %s2227_s26 = sshrl.u32 (!%p1507_p10), %s2378_s17, 5 }
 0x127   : > { %964 = sbr.rel (%p1507_p10) target bundleno = 355 (0x163), region = 40  ;;  %p1508_p11 = scmp.le.s32.totalorder (!%p1507_p10), %s2227_s26, 0 }
 0x12c   : > { %1254 = sbr.rel (%p1508_p11) target bundleno = 338 (0x152), region = 118  ;;  %s2366_s14 = smov (!%p1508_p11), %s2221_s24 }
 0x12d   : > { %s2367_s20 = smov (!%p1508_p11), %s2122_s12  ;;  %s2236_s27 = smov (!%p1508_p11), 0  }
 0x12e   : > { %s2238_s28 = smov (!%p1508_p11), 0  }
 0x131 LB: >> { %v981_v42 = vld [vmem:[%s1937_s20] sm:$0xf]  ;;  %v983_v12 = vld [vmem:[%s1937_s20 + $0x4] sm:$0xf]  ;;  %v985_v13 = vld [vmem:[%s1937_s20 + $0x8] sm:$0xf]  ;;  %s1945_s28 = sphi %s2238_s28, %s975_s28   ;;  %s1941_s27 = sphi %s2236_s27, %s2370_s27   ;;  %s1937_s20 = sphi %s2367_s20, %s2369_s20   ;;  %s1933_s14 = sphi %s2366_s14, %s2368_s14  }
 0x132   : >> { %982 = vst [vmem:[%s1933_s14] sm:$0xf] %v981_v42  ;;  %v987_v14 = vld [vmem:[%s1937_s20 + $0xc] sm:$0xf]  ;;  %v989_v15 = vld [vmem:[%s1937_s20 + $0x10] sm:$0xf]  ;;  %s1045_s29 = sadd.s32 1, %s1941_s27 }
 0x133   : >> { %984 = vst [vmem:[%s1933_s14 + $0x4] sm:$0xf] %v983_v12  ;;  %v991_v16 = vld [vmem:[%s1937_s20 + $0x14] sm:$0xf]  ;;  %v993_v17 = vld [vmem:[%s1937_s20 + $0x18] sm:$0xf]  ;;  %p1046_p12 = scmp.ge.s32.totalorder %s1045_s29, %s2227_s26 }
 0x134   : >> { %986 = vst [vmem:[%s1933_s14 + $0x8] sm:$0xf] %v985_v13  ;;  %v995_v18 = vld [vmem:[%s1937_s20 + $0x1c] sm:$0xf]  ;;  %v997_v19 = vld [vmem:[%s1937_s20 + $0x20] sm:$0xf] }
 0x135   : >> { %988 = vst [vmem:[%s1933_s14 + $0xc] sm:$0xf] %v987_v14  ;;  %v999_v20 = vld [vmem:[%s1937_s20 + $0x24] sm:$0xf]  ;;  %v1001_v21 = vld [vmem:[%s1937_s20 + $0x28] sm:$0xf] }
 0x136   : >> { %990 = vst [vmem:[%s1933_s14 + $0x10] sm:$0xf] %v989_v15  ;;  %v1003_v22 = vld [vmem:[%s1937_s20 + $0x2c] sm:$0xf]  ;;  %v1005_v23 = vld [vmem:[%s1937_s20 + $0x30] sm:$0xf] }
 0x137   : >> { %992 = vst [vmem:[%s1933_s14 + $0x14] sm:$0xf] %v991_v16  ;;  %v1007_v24 = vld [vmem:[%s1937_s20 + $0x34] sm:$0xf]  ;;  %v1009_v25 = vld [vmem:[%s1937_s20 + $0x38] sm:$0xf] }
 0x138   : >> { %994 = vst [vmem:[%s1933_s14 + $0x18] sm:$0xf] %v993_v17  ;;  %v1011_v26 = vld [vmem:[%s1937_s20 + $0x3c] sm:$0xf]  ;;  %v1013_v27 = vld [vmem:[%s1937_s20 + $0x40] sm:$0xf] }
 0x139   : >> { %996 = vst [vmem:[%s1933_s14 + $0x1c] sm:$0xf] %v995_v18  ;;  %v1015_v28 = vld [vmem:[%s1937_s20 + $0x44] sm:$0xf]  ;;  %s2380_s29 = smov (%p1046_p12, %s1045_s29), 0  ;;  %s975_s28 = sadd.s32 1, %s1945_s28  }
 0x13a   : >> { %998 = vst [vmem:[%s1933_s14 + $0x20] sm:$0xf] %v997_v19  ;;  %v1017_v29 = vld [vmem:[%s1937_s20 + $0x48] sm:$0xf]  ;;  %v1019_v30 = vld [vmem:[%s1937_s20 + $0x4c] sm:$0xf]  ;;  %p974_p13 = scmp.ge.s32.totalorder %s975_s28, %s2227_s26  ;;  %s2370_s27 = smov %s2380_s29 }
 0x13b   : >> { %1000 = vst [vmem:[%s1933_s14 + $0x24] sm:$0xf] %v999_v20  ;;  %s1509_s30 = sshll.u32 %s2380_s29, 7  ;;  %v1021_v31 = vld [vmem:[%s1937_s20 + $0x50] sm:$0xf] }
 0x13c   : >> { %1002 = vst [vmem:[%s1933_s14 + $0x28] sm:$0xf] %v1001_v21  ;;  %s2297_s4 = scalar_lea.vmem %s2122_s12, %s1509_s30 [#allocation2]   ;;  %s1051_s5 = scalar_lea.vmem %s2221_s24, %s1509_s30   ;;  %v1023_v32 = vld [vmem:[%s1937_s20 + $0x54] sm:$0xf]  ;;  %v1025_v33 = vld [vmem:[%s1937_s20 + $0x58] sm:$0xf] }
 0x13d   : >> { %1004 = vst [vmem:[%s1933_s14 + $0x2c] sm:$0xf] %v1003_v22  ;;  %v1027_v34 = vld [vmem:[%s1937_s20 + $0x5c] sm:$0xf]  ;;  %v1029_v35 = vld [vmem:[%s1937_s20 + $0x60] sm:$0xf] }
 0x13e   : >> { %1006 = vst [vmem:[%s1933_s14 + $0x30] sm:$0xf] %v1005_v23  ;;  %v1031_v36 = vld [vmem:[%s1937_s20 + $0x64] sm:$0xf]  ;;  %v1033_v37 = vld [vmem:[%s1937_s20 + $0x68] sm:$0xf] }
 0x13f   : >> { %1008 = vst [vmem:[%s1933_s14 + $0x34] sm:$0xf] %v1007_v24  ;;  %v1035_v38 = vld [vmem:[%s1937_s20 + $0x6c] sm:$0xf]  ;;  %v1037_v39 = vld [vmem:[%s1937_s20 + $0x70] sm:$0xf] }
 0x140   : >> { %1010 = vst [vmem:[%s1933_s14 + $0x38] sm:$0xf] %v1009_v25  ;;  %v1039_v40 = vld [vmem:[%s1937_s20 + $0x74] sm:$0xf]  ;;  %v1041_v41 = vld [vmem:[%s1937_s20 + $0x78] sm:$0xf] }
 0x141   : >> { %1012 = vst [vmem:[%s1933_s14 + $0x3c] sm:$0xf] %v1011_v26  ;;  %v1043_v43 = vld [vmem:[%s1937_s20 + $0x7c] sm:$0xf]  ;;  %s2369_s20 = smov %s2297_s4 }
 0x142   : >> { %1014 = vst [vmem:[%s1933_s14 + $0x40] sm:$0xf] %v1013_v27 }
 0x143   : >> { %1016 = vst [vmem:[%s1933_s14 + $0x44] sm:$0xf] %v1015_v28 }
 0x144   : >> { %1018 = vst [vmem:[%s1933_s14 + $0x48] sm:$0xf] %v1017_v29 }
 0x145   : >> { %1020 = vst [vmem:[%s1933_s14 + $0x4c] sm:$0xf] %v1019_v30 }
 0x146   : >> { %1022 = vst [vmem:[%s1933_s14 + $0x50] sm:$0xf] %v1021_v31 }
 0x147   : >> { %1024 = vst [vmem:[%s1933_s14 + $0x54] sm:$0xf] %v1023_v32 }
 0x148   : >> { %1026 = vst [vmem:[%s1933_s14 + $0x58] sm:$0xf] %v1025_v33 }
 0x149   : >> { %1028 = vst [vmem:[%s1933_s14 + $0x5c] sm:$0xf] %v1027_v34 }
 0x14a   : >> { %1030 = vst [vmem:[%s1933_s14 + $0x60] sm:$0xf] %v1029_v35 }
 0x14b   : >> { %1032 = vst [vmem:[%s1933_s14 + $0x64] sm:$0xf] %v1031_v36 }
 0x14c   : >> { %1034 = vst [vmem:[%s1933_s14 + $0x68] sm:$0xf] %v1033_v37 }
 0x14d   : >> { %1036 = vst [vmem:[%s1933_s14 + $0x6c] sm:$0xf] %v1035_v38  ;;  %977 = sbr.rel (!%p974_p13) target bundleno = 305 (0x131), region = 124 }
 0x14e   : >> { %1038 = vst [vmem:[%s1933_s14 + $0x70] sm:$0xf] %v1037_v39 }
 0x14f   : >> { %1040 = vst [vmem:[%s1933_s14 + $0x74] sm:$0xf] %v1039_v40 }
 0x150   : >> { %1042 = vst [vmem:[%s1933_s14 + $0x78] sm:$0xf] %v1041_v41 }
 0x151   : >> { %1044 = vst [vmem:[%s1933_s14 + $0x7c] sm:$0xf] %v1043_v43  ;;  %s2368_s14 = smov %s1051_s5 }
 0x152 PF: > { %s2338_s6 = sand.u32 31, %s2378_s17   ;;  %s1554_s7 = sshll.u32 %s2227_s26, 7 }
 0x153   : > { %s1056_s8 = scalar_lea.vmem %s2122_s12, %s1554_s7 [#allocation2]   ;;  %s1058_s9 = scalar_lea.vmem %s2221_s24, %s1554_s7  }
 0x154   : > { %p1514_p0 = scmp.le.s32.totalorder %s2338_s6, 0 }
 0x155   : > { %s1947_s10 = smov (!%p1514_p0), %s1058_s9   ;;  %s1951_s11 = smov (!%p1514_p0), %s1056_s8  }
 0x156   : > { %1268 = sbr.rel (%p1514_p0) target bundleno = 355 (0x163), region = 129  ;;  %s1955_s19 = smov (!%p1514_p0), 0  }
 0x157   : > { %s1959_s21 = smov (!%p1514_p0), 0  }
 0x15b LB: >> { %v1068_v44 = vld [vmem:[%s1953_s11] sm:$0xf]  ;;  %s1070_s17 = sadd.s32 1, %s1957_s19  ;;  %s1062_s21 = sadd.s32 1, %s1961_s21   ;;  %s1961_s21 = sphi %s1959_s21, %s1062_s21   ;;  %s1957_s19 = sphi %s1955_s19, %s1956_s19   ;;  %s1953_s11 = sphi %s1951_s11, %s1075_s11   ;;  %s1949_s10 = sphi %s1947_s10, %s1076_s10  }
 0x15c   : >> { %1069 = vst [vmem:[%s1949_s10] sm:$0xf] %v1068_v44  ;;  %p1071_p1 = scmp.ge.s32.totalorder %s1070_s17, %s2338_s6  ;;  %p1061_p2 = scmp.ge.s32.totalorder %s1062_s21, %s2338_s6 }
 0x15e   : >> { %s2382_s17 = smov (%p1071_p1, %s1070_s17), 0  ;;  %1064 = sbr.rel (!%p1061_p2) target bundleno = 347 (0x15b), region = 135 }
 0x15f   : >> { %s1515_s12 = sshll.u32 %s2382_s17, 2  ;;  %s1956_s19 = smov %s2382_s17  }
 0x160   : >> { %s1075_s11 = scalar_lea.vmem %s1056_s8, %s1515_s12 [#allocation2]   ;;  %s1076_s10 = scalar_lea.vmem %s1058_s9, %s1515_s12  }
 0x163 PF: > { %s13_s16 = sadd.s32 1, %s1929_s16   ;;  %s2371_s12 = smov %s1917_s13 }
 0x164   : > { %p10_p3 = scmp.ge.s32.totalorder %s13_s16, 6   ;;  %s2372_s13 = smov %s2025_s22 }
 0x165   : > { %s2373_s14 = smov %s1925_s15  ;;  %s2374_s15 = smov %s2376_s18 }
 0x166   :  { %12 = sbr.rel (!%p10_p3) target bundleno = 3 (0x3), region = 146 }

// kernel: convnet_forward.7
= control target key start
LH: loop header
LB: loop body
LE: loop exit
PB: predicated region body
PF: predicated region fallthrough
CT: control target
= control target key end

     0   :  { %s1264_s6 = smov 0   ;;  %s1266_s7 = smov 0   ;;  %s1547_s0 = inlined_call_operand.vmem [shape: bf16[28,2,14,256], index: 0, kind: input, shape index: {}]   ;;  %s1548_s1 = inlined_call_operand.vmem [shape: bf16[28,14,128], index: 1, kind: output, shape index: {}]  }
   0x1   :  { %s1268_s8 = smov 0  }
   0x2 LB: > { %s1277_s9 = sadd.s32 4294967295, %s1220_s8   ;;  %s1279_s10 = sadd.s32 1, %s1220_s8   ;;  %s1220_s8 = sphi %s1268_s8, %s1557_s8   ;;  %s1216_s7 = sphi %s1266_s7, %s1556_s7   ;;  %s1212_s6 = sphi %s1264_s6, %s1555_s6  }
   0x3   : > { %s41_s11 = ssub.s32 %s1220_s8, %s1279_s10  ;;  %s44_s12 = sadd.s32 1, %s1216_s7 }
   0x4   : > { %p42_p0 = scmp.eq.s32.totalorder %s41_s11, 0  ;;  %p54_p1 = scmp.ne.s32.totalorder %s1216_s7, %s1212_s6 }
   0x5   : > { %p55_p2 = scmp.eq.s32.totalorder %s1277_s9, 1  ;;  %p1047_p3 = scmp.ge.s32.totalorder %s1220_s8, 1 }
   0x6   : > { %s1287_s13 = scalar_select %p42_p0, %s1216_s7, %s44_s12  }
   0x7   : > { %p1289_p4 = por %p55_p2, %p54_p1  ;;  %p103_p5 = scmp.lt.s32.totalorder %s1220_s8, 3 }
   0x9   : > { %p104_p6 = pnand %p1047_p3, %p103_p5 }
   0xa   : > { %s1294_s15 = sshll.u32 (!%p104_p6), %s1277_s9, 4  ;;  %s127_s21 = sand.u32 (!%p104_p6), 1, %s1212_s6  }
   0xb   : > { %107 = sbr.rel (%p104_p6) target bundleno = 183 (0xb7), region = 24  ;;  %p138_p7 = scmp.lt.s32.totalorder (!%p104_p6), %s1294_s15, 27 }
   0xc   : > { %s1048_s22 = sshll.u32 (!%p104_p6), %s127_s21, 7 }
   0xd   : > { %s1319_s23 = scalar_lea.vmem (!%p104_p6), [#allocation2], %s1048_s22  }
  0x10   : > { %s139_s16 = scalar_select %p138_p7, %s1294_s15, 27 }
  0x11   : > { %s709_s24 = ssub.s32 (%p1289_p4), 28, %s1294_s15  ;;  %s1075_s25 = sshll.u32 (%p1289_p4), %s1277_s9, 7 }
  0x12   : > { %s1072_s17 = sshll.u32 %s139_s16, 5  ;;  %p710_p8 = scmp.lt.s32.totalorder (%p1289_p4), %s709_s24, 16 }
  0x13   : > { %s1301_s20 = scalar_lea.vmem %s1547_s0, %s1072_s17  ;;  %s1409_s28 = scalar_lea.vmem (%p1289_p4), %s1548_s1, %s1075_s25  }
  0x14   : > { %v157_v0 = vld [vmem:[%s1301_s20] sm:$0xff]  ;;  %v159_v1 = vld [vmem:[%s1301_s20 + $0x10] sm:$0xff]  ;;  %v158_v2 = vld [vmem:[%s1301_s20 + $0x8] sm:$0x77] }
  0x15   : > { %v221_v3 = vunpack.c.l.bf16 %v157_v0  ;;  %v222_v4 = vunpack.c.h.bf16 %v157_v0  ;;  %v285_v5 = vunpack.c.l.bf16 %v159_v1  ;;  %v286_v6 = vunpack.c.h.bf16 %v159_v1  ;;  %v160_v7 = vld [vmem:[%s1301_s20 + $0x18] sm:$0x77]  ;;  %v161_v8 = vld [vmem:[%s1301_s20 + $0x20] sm:$0xff]  ;;  %v163_v9 = vld [vmem:[%s1301_s20 + $0x30] sm:$0xff] }
  0x16   : > { %v223_v10 = vunpack.c.l.bf16 %v158_v2  ;;  %v224_v11 = vunpack.c.h.bf16 %v158_v2  ;;  %v287_v12 = vunpack.c.l.bf16 %v160_v7  ;;  %v288_v13 = vunpack.c.h.bf16 %v160_v7  ;;  %v162_v14 = vld [vmem:[%s1301_s20 + $0x28] sm:$0x77]  ;;  %v164_v15 = vld [vmem:[%s1301_s20 + $0x38] sm:$0x77]  ;;  %v165_v24 = vld [vmem:[%s1301_s20 + $0x40] sm:$0xff] }
  0x17   : > { %v349_v16 = vmax.f32 %v221_v3, %v285_v5  ;;  %v350_v17 = vmax.f32 %v222_v4, %v286_v6  ;;  %v225_v18 = vunpack.c.l.bf16 %v161_v8  ;;  %v226_v19 = vunpack.c.h.bf16 %v161_v8  ;;  %v167_v29 = vld [vmem:[%s1301_s20 + $0x50] sm:$0xff]  ;;  %v166_v34 = vld [vmem:[%s1301_s20 + $0x48] sm:$0x77]  ;;  %v168_v43 = vld [vmem:[%s1301_s20 + $0x58] sm:$0x77] }
  0x18   : > { %v351_v20 = vmax.f32 %v223_v10, %v287_v12  ;;  %v352_v21 = vmax.f32 %v224_v11, %v288_v13  ;;  %v289_v22 = vunpack.c.l.bf16 %v163_v9  ;;  %v290_v23 = vunpack.c.h.bf16 %v163_v9  ;;  %v169_v48 = vld [vmem:[%s1301_s20 + $0x60] sm:$0xff]  ;;  %v171_v60 = vld [vmem:[%s1301_s20 + $0x70] sm:$0xff]  ;;  %v170_v2 = vld [vmem:[%s1301_s20 + $0x68] sm:$0x77] }
  0x19   : > { %v413_v25 = vpack.c.bf16 %v350_v17, %v349_v16  ;;  %v227_v26 = vunpack.c.l.bf16 %v162_v14  ;;  %v228_v27 = vunpack.c.h.bf16 %v162_v14  ;;  %v291_v28 = vunpack.c.l.bf16 %v164_v15  ;;  %v172_v11 = vld [vmem:[%s1301_s20 + $0x78] sm:$0x77]  ;;  %v173_v12 = vld [vmem:[%s1301_s20 + $0x80] sm:$0xff] }
  0x1a   : > { %v414_v30 = vpack.c.bf16 %v352_v21, %v351_v20  ;;  %v353_v31 = vmax.f32 %v225_v18, %v289_v22  ;;  %v354_v32 = vmax.f32 %v226_v19, %v290_v23  ;;  %v292_v33 = vunpack.c.h.bf16 %v164_v15  ;;  %v175_v21 = vld [vmem:[%s1301_s20 + $0x90] sm:$0xff] }
  0x1b   : > { %v509_v35 = vrot.slane %v413_v25, 4  ;;  %v355_v36 = vmax.f32 %v227_v26, %v291_v28  ;;  %v229_v37 = vunpack.c.l.bf16 %v165_v24  ;;  %v230_v38 = vunpack.c.h.bf16 %v165_v24  ;;  %v174_v26 = vld [vmem:[%s1301_s20 + $0x88] sm:$0x77] }
  0x1c   : > { %v510_v39 = vrot.slane %v414_v30, 4  ;;  %v415_v40 = vpack.c.bf16 %v354_v32, %v353_v31  ;;  %v356_v41 = vmax.f32 %v228_v27, %v292_v33  ;;  %v293_v42 = vunpack.c.l.bf16 %v167_v29 }
  0x1d   : > { %v573_v44 = vunpack.c.l.bf16 %v509_v35  ;;  %v294_v45 = vunpack.c.h.bf16 %v167_v29  ;;  %v231_v46 = vunpack.c.l.bf16 %v166_v34  ;;  %v232_v47 = vunpack.c.h.bf16 %v166_v34  ;;  %v176_v35 = vld [vmem:[%s1301_s20 + $0x98] sm:$0x77] }
  0x1e   : > { %v574_v49 = vunpack.c.l.bf16 %v510_v39  ;;  %v511_v50 = vrot.slane %v415_v40, 4  ;;  %v416_v51 = vpack.c.bf16 %v356_v41, %v355_v36  ;;  %v357_v52 = vmax.f32 %v229_v37, %v293_v42  ;;  %v177_v40 = vld [vmem:[%s1301_s20 + $0xa0] sm:$0xff] }
  0x1f   : > { %v605_v53 = vmax.f32 %v349_v16, %v573_v44  ;;  %v358_v54 = vmax.f32 %v230_v38, %v294_v45  ;;  %v295_v55 = vunpack.c.l.bf16 %v168_v43  ;;  %v296_v56 = vunpack.c.h.bf16 %v168_v43  ;;  %v179_v45 = vld [vmem:[%s1301_s20 + $0xb0] sm:$0xff] }
  0x20   : > { %v606_v57 = vmax.f32 %v351_v20, %v574_v49  ;;  %v575_v58 = vunpack.c.l.bf16 %v511_v50  ;;  %v512_v59 = vrot.slane %v416_v51, 4  ;;  %v233_v61 = vunpack.c.l.bf16 %v169_v48  ;;  %v178_v50 = vld [vmem:[%s1301_s20 + $0xa8] sm:$0x77] }
  0x21   : > { %v637_v62 = vpack.c.bf16 %v605_v53, %v605_v53  ;;  %v417_v63 = vpack.c.bf16 %v358_v54, %v357_v52  ;;  %v359_v0 = vmax.f32 %v231_v46, %v295_v55  ;;  %v360_v1 = vmax.f32 %v232_v47, %v296_v56 }
  0x22   : > { %v638_v3 = vpack.c.bf16 %v606_v57, %v606_v57  ;;  %v607_v4 = vmax.f32 %v353_v31, %v575_v58  ;;  %v576_v5 = vunpack.c.l.bf16 %v512_v59  ;;  %v234_v6 = vunpack.c.h.bf16 %v169_v48  ;;  %v180_v59 = vld [vmem:[%s1301_s20 + $0xb8] sm:$0x77] }
  0x23   : > { %669 = vst [vmem:[%s1319_s23] sm:$0xf] %v637_v62  ;;  %v513_v7 = vrot.slane %v417_v63, 4  ;;  %v418_v8 = vpack.c.bf16 %v360_v1, %v359_v0  ;;  %v297_v9 = vunpack.c.l.bf16 %v171_v60  ;;  %v298_v10 = vunpack.c.h.bf16 %v171_v60 }
  0x24   : > { %670 = vst [vmem:[%s1319_s23 + $0x4] sm:$0x7] %v638_v3  ;;  %v639_v13 = vpack.c.bf16 %v607_v4, %v607_v4  ;;  %v608_v14 = vmax.f32 %v355_v36, %v576_v5  ;;  %v235_v15 = vunpack.c.l.bf16 %v170_v2  ;;  %v236_v16 = vunpack.c.h.bf16 %v170_v2 }
  0x25   : > { %v577_v17 = vunpack.c.l.bf16 %v513_v7  ;;  %v514_v18 = vrot.slane %v418_v8, 4  ;;  %v361_v19 = vmax.f32 %v233_v61, %v297_v9  ;;  %v362_v20 = vmax.f32 %v234_v6, %v298_v10  ;;  %v183_v9 = vld [vmem:[%s1301_s20 + $0xd0] sm:$0xff] }
  0x26   : > { %671 = vst [vmem:[%s1319_s23 + $0x8] sm:$0xf] %v639_v13  ;;  %v640_v22 = vpack.c.bf16 %v608_v14, %v608_v14  ;;  %v299_v23 = vunpack.c.l.bf16 %v172_v11  ;;  %v300_v24 = vunpack.c.h.bf16 %v172_v11  ;;  %v237_v25 = vunpack.c.l.bf16 %v173_v12  ;;  %v182_v14 = vld [vmem:[%s1301_s20 + $0xc8] sm:$0x77] }
  0x27   : > { %v609_v27 = vmax.f32 %v357_v52, %v577_v17  ;;  %v578_v28 = vunpack.c.l.bf16 %v514_v18  ;;  %v419_v29 = vpack.c.bf16 %v362_v20, %v361_v19  ;;  %v238_v30 = vunpack.c.h.bf16 %v173_v12 }
  0x28   : > { %672 = vst [vmem:[%s1319_s23 + $0xc] sm:$0x7] %v640_v22  ;;  %v363_v31 = vmax.f32 %v235_v15, %v299_v23  ;;  %v364_v32 = vmax.f32 %v236_v16, %v300_v24  ;;  %v301_v33 = vunpack.c.l.bf16 %v175_v21  ;;  %v302_v34 = vunpack.c.h.bf16 %v175_v21  ;;  %v184_v23 = vld [vmem:[%s1301_s20 + $0xd8] sm:$0x77]  ;;  %v185_v24 = vld [vmem:[%s1301_s20 + $0xe0] sm:$0xff] }
  0x29   : > { %v641_v36 = vpack.c.bf16 %v609_v27, %v609_v27  ;;  %v610_v37 = vmax.f32 %v359_v0, %v578_v28  ;;  %v515_v38 = vrot.slane %v419_v29, 4  ;;  %v239_v39 = vunpack.c.l.bf16 %v174_v26  ;;  %v181_v0 = vld [vmem:[%s1301_s20 + $0xc0] sm:$0xff] }
  0x2a   : > { %v420_v41 = vpack.c.bf16 %v364_v32, %v363_v31  ;;  %v365_v42 = vmax.f32 %v237_v25, %v301_v33  ;;  %v366_v43 = vmax.f32 %v238_v30, %v302_v34  ;;  %v240_v44 = vunpack.c.h.bf16 %v174_v26  ;;  %v187_v33 = vld [vmem:[%s1301_s20 + $0xf0] sm:$0xff] }
  0x2b   : > { %673 = vst [vmem:[%s1319_s23 + $0x10] sm:$0xf] %v641_v36  ;;  %v642_v46 = vpack.c.bf16 %v610_v37, %v610_v37  ;;  %v579_v47 = vunpack.c.l.bf16 %v515_v38  ;;  %v303_v48 = vunpack.c.l.bf16 %v176_v35  ;;  %v304_v49 = vunpack.c.h.bf16 %v176_v35  ;;  %v186_v38 = vld [vmem:[%s1301_s20 + $0xe8] sm:$0x77] }
  0x2c   : > { %v516_v51 = vrot.slane %v420_v41, 4  ;;  %v421_v52 = vpack.c.bf16 %v366_v43, %v365_v42  ;;  %v241_v53 = vunpack.c.l.bf16 %v177_v40  ;;  %v242_v54 = vunpack.c.h.bf16 %v177_v40 }
  0x2d   : > { %674 = vst [vmem:[%s1319_s23 + $0x14] sm:$0x7] %v642_v46  ;;  %v611_v55 = vmax.f32 %v361_v19, %v579_v47  ;;  %v367_v56 = vmax.f32 %v239_v39, %v303_v48  ;;  %v368_v57 = vmax.f32 %v240_v44, %v304_v49  ;;  %v305_v58 = vunpack.c.l.bf16 %v179_v45  ;;  %v188_v47 = vld [vmem:[%s1301_s20 + $0xf8] sm:$0x77] }
  0x2e   : > { %v580_v60 = vunpack.c.l.bf16 %v516_v51  ;;  %v517_v61 = vrot.slane %v421_v52, 4  ;;  %v306_v62 = vunpack.c.h.bf16 %v179_v45  ;;  %v243_v63 = vunpack.c.l.bf16 %v178_v50  ;;  %v189_v52 = vld [vmem:[%s1301_s20 + $0x100] sm:$0xff] }
  0x2f   : > { %v643_v1 = vpack.c.bf16 %v611_v55, %v611_v55  ;;  %v422_v2 = vpack.c.bf16 %v368_v57, %v367_v56  ;;  %v369_v3 = vmax.f32 %v241_v53, %v305_v58  ;;  %v244_v4 = vunpack.c.h.bf16 %v178_v50 }
  0x30   : > { %v612_v5 = vmax.f32 %v363_v31, %v580_v60  ;;  %v581_v6 = vunpack.c.l.bf16 %v517_v61  ;;  %v370_v7 = vmax.f32 %v242_v54, %v306_v62  ;;  %v307_v8 = vunpack.c.l.bf16 %v180_v59  ;;  %v191_v61 = vld [vmem:[%s1301_s20 + $0x110] sm:$0xff] }
  0x31   : > { %675 = vst [vmem:[%s1319_s23 + $0x18] sm:$0xf] %v643_v1  ;;  %v518_v10 = vrot.slane %v422_v2, 4  ;;  %v308_v11 = vunpack.c.h.bf16 %v180_v59  ;;  %v245_v12 = vunpack.c.l.bf16 %v181_v0  ;;  %v246_v13 = vunpack.c.h.bf16 %v181_v0  ;;  %v190_v2 = vld [vmem:[%s1301_s20 + $0x108] sm:$0x77] }
  0x32   : > { %v644_v15 = vpack.c.bf16 %v612_v5, %v612_v5  ;;  %v613_v16 = vmax.f32 %v365_v42, %v581_v6  ;;  %v423_v17 = vpack.c.bf16 %v370_v7, %v369_v3  ;;  %v371_v18 = vmax.f32 %v243_v63, %v307_v8 }
  0x33   : > { %v582_v19 = vunpack.c.l.bf16 %v518_v10  ;;  %v372_v20 = vmax.f32 %v244_v4, %v308_v11  ;;  %v309_v21 = vunpack.c.l.bf16 %v183_v9  ;;  %v310_v22 = vunpack.c.h.bf16 %v183_v9  ;;  %v192_v11 = vld [vmem:[%s1301_s20 + $0x118] sm:$0x77] }
  0x34   : > { %676 = vst [vmem:[%s1319_s23 + $0x1c] sm:$0x7] %v644_v15  ;;  %v645_v25 = vpack.c.bf16 %v613_v16, %v613_v16  ;;  %v519_v26 = vrot.slane %v423_v17, 4  ;;  %v247_v27 = vunpack.c.l.bf16 %v182_v14  ;;  %v248_v28 = vunpack.c.h.bf16 %v182_v14 }
  0x35   : > { %v614_v29 = vmax.f32 %v367_v56, %v582_v19  ;;  %v424_v30 = vpack.c.bf16 %v372_v20, %v371_v18  ;;  %v373_v31 = vmax.f32 %v245_v12, %v309_v21  ;;  %v374_v32 = vmax.f32 %v246_v13, %v310_v22  ;;  %v193_v12 = vld [vmem:[%s1301_s20 + $0x120] sm:$0xff]  ;;  %v195_v21 = vld [vmem:[%s1301_s20 + $0x130] sm:$0xff] }
  0x36   : > { %677 = vst [vmem:[%s1319_s23 + $0x20] sm:$0xf] %v645_v25  ;;  %v583_v34 = vunpack.c.l.bf16 %v519_v26  ;;  %v311_v35 = vunpack.c.l.bf16 %v184_v23  ;;  %v312_v36 = vunpack.c.h.bf16 %v184_v23  ;;  %v249_v37 = vunpack.c.l.bf16 %v185_v24  ;;  %v194_v26 = vld [vmem:[%s1301_s20 + $0x128] sm:$0x77] }
  0x37   : > { %v646_v39 = vpack.c.bf16 %v614_v29, %v614_v29  ;;  %v520_v40 = vrot.slane %v424_v30, 4  ;;  %v425_v41 = vpack.c.bf16 %v374_v32, %v373_v31  ;;  %v250_v42 = vunpack.c.h.bf16 %v185_v24 }
  0x38   : > { %v615_v43 = vmax.f32 %v369_v3, %v583_v34  ;;  %v375_v44 = vmax.f32 %v247_v27, %v311_v35  ;;  %v376_v45 = vmax.f32 %v248_v28, %v312_v36  ;;  %v313_v46 = vunpack.c.l.bf16 %v187_v33  ;;  %v196_v35 = vld [vmem:[%s1301_s20 + $0x138] sm:$0x77] }
  0x39   : > { %678 = vst [vmem:[%s1319_s23 + $0x24] sm:$0x7] %v646_v39  ;;  %v584_v48 = vunpack.c.l.bf16 %v520_v40  ;;  %v521_v49 = vrot.slane %v425_v41, 4  ;;  %v314_v50 = vunpack.c.h.bf16 %v187_v33  ;;  %v251_v51 = vunpack.c.l.bf16 %v186_v38  ;;  %v197_v40 = vld [vmem:[%s1301_s20 + $0x140] sm:$0xff] }
  0x3a   : > { %v647_v53 = vpack.c.bf16 %v615_v43, %v615_v43  ;;  %v426_v54 = vpack.c.bf16 %v376_v45, %v375_v44  ;;  %v377_v55 = vmax.f32 %v249_v37, %v313_v46  ;;  %v252_v56 = vunpack.c.h.bf16 %v186_v38 }
  0x3b   : > { %v616_v57 = vmax.f32 %v371_v18, %v584_v48  ;;  %v585_v58 = vunpack.c.l.bf16 %v521_v49  ;;  %v378_v59 = vmax.f32 %v250_v42, %v314_v50  ;;  %v315_v60 = vunpack.c.l.bf16 %v188_v47  ;;  %v199_v49 = vld [vmem:[%s1301_s20 + $0x150] sm:$0xff] }
  0x3c   : > { %679 = vst [vmem:[%s1319_s23 + $0x28] sm:$0xf] %v647_v53  ;;  %v522_v62 = vrot.slane %v426_v54, 4  ;;  %v316_v63 = vunpack.c.h.bf16 %v188_v47  ;;  %v253_v0 = vunpack.c.l.bf16 %v189_v52  ;;  %v254_v1 = vunpack.c.h.bf16 %v189_v52  ;;  %v198_v54 = vld [vmem:[%s1301_s20 + $0x148] sm:$0x77] }
  0x3d   : > { %v648_v3 = vpack.c.bf16 %v616_v57, %v616_v57  ;;  %v617_v4 = vmax.f32 %v373_v31, %v585_v58  ;;  %v427_v5 = vpack.c.bf16 %v378_v59, %v377_v55  ;;  %v379_v6 = vmax.f32 %v251_v51, %v315_v60 }
  0x3e   : > { %v586_v7 = vunpack.c.l.bf16 %v522_v62  ;;  %v380_v8 = vmax.f32 %v252_v56, %v316_v63  ;;  %v317_v9 = vunpack.c.l.bf16 %v191_v61  ;;  %v318_v10 = vunpack.c.h.bf16 %v191_v61  ;;  %v200_v63 = vld [vmem:[%s1301_s20 + $0x158] sm:$0x77] }
  0x3f   : > { %680 = vst [vmem:[%s1319_s23 + $0x2c] sm:$0x7] %v648_v3  ;;  %v649_v13 = vpack.c.bf16 %v617_v4, %v617_v4  ;;  %v523_v14 = vrot.slane %v427_v5, 4  ;;  %v255_v15 = vunpack.c.l.bf16 %v190_v2  ;;  %v256_v16 = vunpack.c.h.bf16 %v190_v2 }
  0x40   : > { %v618_v17 = vmax.f32 %v375_v44, %v586_v7  ;;  %v428_v18 = vpack.c.bf16 %v380_v8, %v379_v6  ;;  %v381_v19 = vmax.f32 %v253_v0, %v317_v9  ;;  %v382_v20 = vmax.f32 %v254_v1, %v318_v10  ;;  %v201_v0 = vld [vmem:[%s1301_s20 + $0x160] sm:$0xff]  ;;  %v203_v9 = vld [vmem:[%s1301_s20 + $0x170] sm:$0xff] }
  0x41   : > { %681 = vst [vmem:[%s1319_s23 + $0x30] sm:$0xf] %v649_v13  ;;  %v587_v22 = vunpack.c.l.bf16 %v523_v14  ;;  %v319_v23 = vunpack.c.l.bf16 %v192_v11  ;;  %v320_v24 = vunpack.c.h.bf16 %v192_v11  ;;  %v257_v25 = vunpack.c.l.bf16 %v193_v12  ;;  %v202_v14 = vld [vmem:[%s1301_s20 + $0x168] sm:$0x77] }
  0x42   : > { %v650_v27 = vpack.c.bf16 %v618_v17, %v618_v17  ;;  %v524_v28 = vrot.slane %v428_v18, 4  ;;  %v429_v29 = vpack.c.bf16 %v382_v20, %v381_v19  ;;  %v258_v30 = vunpack.c.h.bf16 %v193_v12 }
  0x43   : > { %v619_v31 = vmax.f32 %v377_v55, %v587_v22  ;;  %v383_v32 = vmax.f32 %v255_v15, %v319_v23  ;;  %v384_v33 = vmax.f32 %v256_v16, %v320_v24  ;;  %v321_v34 = vunpack.c.l.bf16 %v195_v21  ;;  %v204_v23 = vld [vmem:[%s1301_s20 + $0x178] sm:$0x77] }
  0x44   : > { %682 = vst [vmem:[%s1319_s23 + $0x34] sm:$0x7] %v650_v27  ;;  %v588_v36 = vunpack.c.l.bf16 %v524_v28  ;;  %v525_v37 = vrot.slane %v429_v29, 4  ;;  %v322_v38 = vunpack.c.h.bf16 %v195_v21  ;;  %v259_v39 = vunpack.c.l.bf16 %v194_v26  ;;  %v205_v28 = vld [vmem:[%s1301_s20 + $0x180] sm:$0xff] }
  0x45   : > { %v651_v41 = vpack.c.bf16 %v619_v31, %v619_v31  ;;  %v430_v42 = vpack.c.bf16 %v384_v33, %v383_v32  ;;  %v385_v43 = vmax.f32 %v257_v25, %v321_v34  ;;  %v260_v44 = vunpack.c.h.bf16 %v194_v26 }
  0x46   : > { %v620_v45 = vmax.f32 %v379_v6, %v588_v36  ;;  %v589_v46 = vunpack.c.l.bf16 %v525_v37  ;;  %v386_v47 = vmax.f32 %v258_v30, %v322_v38  ;;  %v323_v48 = vunpack.c.l.bf16 %v196_v35  ;;  %v207_v37 = vld [vmem:[%s1301_s20 + $0x190] sm:$0xff] }
  0x47   : > { %683 = vst [vmem:[%s1319_s23 + $0x38] sm:$0xf] %v651_v41  ;;  %v526_v50 = vrot.slane %v430_v42, 4  ;;  %v324_v51 = vunpack.c.h.bf16 %v196_v35  ;;  %v261_v52 = vunpack.c.l.bf16 %v197_v40  ;;  %v262_v53 = vunpack.c.h.bf16 %v197_v40  ;;  %v206_v42 = vld [vmem:[%s1301_s20 + $0x188] sm:$0x77] }
  0x48   : > { %v652_v55 = vpack.c.bf16 %v620_v45, %v620_v45  ;;  %v621_v56 = vmax.f32 %v381_v19, %v589_v46  ;;  %v431_v57 = vpack.c.bf16 %v386_v47, %v385_v43  ;;  %v387_v58 = vmax.f32 %v259_v39, %v323_v48 }
  0x49   : > { %v590_v59 = vunpack.c.l.bf16 %v526_v50  ;;  %v388_v60 = vmax.f32 %v260_v44, %v324_v51  ;;  %v325_v61 = vunpack.c.l.bf16 %v199_v49  ;;  %v326_v62 = vunpack.c.h.bf16 %v199_v49  ;;  %v208_v51 = vld [vmem:[%s1301_s20 + $0x198] sm:$0x77] }
  0x4a   : > { %684 = vst [vmem:[%s1319_s23 + $0x3c] sm:$0x7] %v652_v55  ;;  %v653_v1 = vpack.c.bf16 %v621_v56, %v621_v56  ;;  %v527_v2 = vrot.slane %v431_v57, 4  ;;  %v263_v3 = vunpack.c.l.bf16 %v198_v54  ;;  %v264_v4 = vunpack.c.h.bf16 %v198_v54 }
  0x4b   : > { %v622_v5 = vmax.f32 %v383_v32, %v590_v59  ;;  %v432_v6 = vpack.c.bf16 %v388_v60, %v387_v58  ;;  %v389_v7 = vmax.f32 %v261_v52, %v325_v61  ;;  %v390_v8 = vmax.f32 %v262_v53, %v326_v62  ;;  %v209_v52 = vld [vmem:[%s1301_s20 + $0x1a0] sm:$0xff]  ;;  %v211_v61 = vld [vmem:[%s1301_s20 + $0x1b0] sm:$0xff] }
  0x4c   : > { %685 = vst [vmem:[%s1319_s23 + $0x40] sm:$0xf] %v653_v1  ;;  %v591_v10 = vunpack.c.l.bf16 %v527_v2  ;;  %v327_v11 = vunpack.c.l.bf16 %v200_v63  ;;  %v328_v12 = vunpack.c.h.bf16 %v200_v63  ;;  %v265_v13 = vunpack.c.l.bf16 %v201_v0  ;;  %v210_v2 = vld [vmem:[%s1301_s20 + $0x1a8] sm:$0x77] }
  0x4d   : > { %v654_v15 = vpack.c.bf16 %v622_v5, %v622_v5  ;;  %v528_v16 = vrot.slane %v432_v6, 4  ;;  %v433_v17 = vpack.c.bf16 %v390_v8, %v389_v7  ;;  %v266_v18 = vunpack.c.h.bf16 %v201_v0 }
  0x4e   : > { %v623_v19 = vmax.f32 %v385_v43, %v591_v10  ;;  %v391_v20 = vmax.f32 %v263_v3, %v327_v11  ;;  %v392_v21 = vmax.f32 %v264_v4, %v328_v12  ;;  %v329_v22 = vunpack.c.l.bf16 %v203_v9  ;;  %v212_v11 = vld [vmem:[%s1301_s20 + $0x1b8] sm:$0x77] }
  0x4f   : > { %686 = vst [vmem:[%s1319_s23 + $0x44] sm:$0x7] %v654_v15  ;;  %v592_v24 = vunpack.c.l.bf16 %v528_v16  ;;  %v529_v25 = vrot.slane %v433_v17, 4  ;;  %v330_v26 = vunpack.c.h.bf16 %v203_v9  ;;  %v267_v27 = vunpack.c.l.bf16 %v202_v14  ;;  %v213_v16 = vld [vmem:[%s1301_s20 + $0x1c0] sm:$0xff] }
  0x50   : > { %v655_v29 = vpack.c.bf16 %v623_v19, %v623_v19  ;;  %v434_v30 = vpack.c.bf16 %v392_v21, %v391_v20  ;;  %v393_v31 = vmax.f32 %v265_v13, %v329_v22  ;;  %v268_v32 = vunpack.c.h.bf16 %v202_v14 }
  0x51   : > { %v624_v33 = vmax.f32 %v387_v58, %v592_v24  ;;  %v593_v34 = vunpack.c.l.bf16 %v529_v25  ;;  %v394_v35 = vmax.f32 %v266_v18, %v330_v26  ;;  %v331_v36 = vunpack.c.l.bf16 %v204_v23  ;;  %v215_v25 = vld [vmem:[%s1301_s20 + $0x1d0] sm:$0xff] }
  0x52   : > { %687 = vst [vmem:[%s1319_s23 + $0x48] sm:$0xf] %v655_v29  ;;  %v530_v38 = vrot.slane %v434_v30, 4  ;;  %v332_v39 = vunpack.c.h.bf16 %v204_v23  ;;  %v269_v40 = vunpack.c.l.bf16 %v205_v28  ;;  %v270_v41 = vunpack.c.h.bf16 %v205_v28  ;;  %v214_v30 = vld [vmem:[%s1301_s20 + $0x1c8] sm:$0x77] }
  0x53   : > { %v656_v43 = vpack.c.bf16 %v624_v33, %v624_v33  ;;  %v625_v44 = vmax.f32 %v389_v7, %v593_v34  ;;  %v435_v45 = vpack.c.bf16 %v394_v35, %v393_v31  ;;  %v395_v46 = vmax.f32 %v267_v27, %v331_v36 }
  0x54   : > { %v594_v47 = vunpack.c.l.bf16 %v530_v38  ;;  %v396_v48 = vmax.f32 %v268_v32, %v332_v39  ;;  %v333_v49 = vunpack.c.l.bf16 %v207_v37  ;;  %v334_v50 = vunpack.c.h.bf16 %v207_v37  ;;  %v216_v39 = vld [vmem:[%s1301_s20 + $0x1d8] sm:$0x77] }
  0x55   : > { %688 = vst [vmem:[%s1319_s23 + $0x4c] sm:$0x7] %v656_v43  ;;  %v657_v53 = vpack.c.bf16 %v625_v44, %v625_v44  ;;  %v531_v54 = vrot.slane %v435_v45, 4  ;;  %v271_v55 = vunpack.c.l.bf16 %v206_v42  ;;  %v272_v56 = vunpack.c.h.bf16 %v206_v42 }
  0x56   : > { %v626_v57 = vmax.f32 %v391_v20, %v594_v47  ;;  %v436_v58 = vpack.c.bf16 %v396_v48, %v395_v46  ;;  %v397_v59 = vmax.f32 %v269_v40, %v333_v49  ;;  %v398_v60 = vmax.f32 %v270_v41, %v334_v50  ;;  %v217_v40 = vld [vmem:[%s1301_s20 + $0x1e0] sm:$0xff]  ;;  %v219_v49 = vld [vmem:[%s1301_s20 + $0x1f0] sm:$0xff] }
  0x57   : > { %689 = vst [vmem:[%s1319_s23 + $0x50] sm:$0xf] %v657_v53  ;;  %v595_v62 = vunpack.c.l.bf16 %v531_v54  ;;  %v335_v63 = vunpack.c.l.bf16 %v208_v51  ;;  %v336_v0 = vunpack.c.h.bf16 %v208_v51  ;;  %v273_v1 = vunpack.c.l.bf16 %v209_v52  ;;  %v218_v54 = vld [vmem:[%s1301_s20 + $0x1e8] sm:$0x77] }
  0x58   : > { %v658_v3 = vpack.c.bf16 %v626_v57, %v626_v57  ;;  %v532_v4 = vrot.slane %v436_v58, 4  ;;  %v437_v5 = vpack.c.bf16 %v398_v60, %v397_v59  ;;  %v274_v6 = vunpack.c.h.bf16 %v209_v52 }
  0x59   : > { %v627_v7 = vmax.f32 %v393_v31, %v595_v62  ;;  %v399_v8 = vmax.f32 %v271_v55, %v335_v63  ;;  %v400_v9 = vmax.f32 %v272_v56, %v336_v0  ;;  %v337_v10 = vunpack.c.l.bf16 %v211_v61  ;;  %v220_v63 = vld [vmem:[%s1301_s20 + $0x1f8] sm:$0x77] }
  0x5a   : > { %690 = vst [vmem:[%s1319_s23 + $0x54] sm:$0x7] %v658_v3  ;;  %v596_v12 = vunpack.c.l.bf16 %v532_v4  ;;  %v533_v13 = vrot.slane %v437_v5, 4  ;;  %v338_v14 = vunpack.c.h.bf16 %v211_v61  ;;  %v275_v15 = vunpack.c.l.bf16 %v210_v2 }
  0x5b   : > { %v659_v17 = vpack.c.bf16 %v627_v7, %v627_v7  ;;  %v438_v18 = vpack.c.bf16 %v400_v9, %v399_v8  ;;  %v401_v19 = vmax.f32 %v273_v1, %v337_v10  ;;  %v276_v20 = vunpack.c.h.bf16 %v210_v2 }
  0x5c   : > { %v628_v21 = vmax.f32 %v395_v46, %v596_v12  ;;  %v597_v22 = vunpack.c.l.bf16 %v533_v13  ;;  %v402_v23 = vmax.f32 %v274_v6, %v338_v14  ;;  %v339_v24 = vunpack.c.l.bf16 %v212_v11 }
  0x5d   : > { %691 = vst [vmem:[%s1319_s23 + $0x58] sm:$0xf] %v659_v17  ;;  %v534_v26 = vrot.slane %v438_v18, 4  ;;  %v340_v27 = vunpack.c.h.bf16 %v212_v11  ;;  %v277_v28 = vunpack.c.l.bf16 %v213_v16  ;;  %v278_v29 = vunpack.c.h.bf16 %v213_v16 }
  0x5e   : > { %v660_v31 = vpack.c.bf16 %v628_v21, %v628_v21  ;;  %v629_v32 = vmax.f32 %v397_v59, %v597_v22  ;;  %v439_v33 = vpack.c.bf16 %v402_v23, %v401_v19  ;;  %v403_v34 = vmax.f32 %v275_v15, %v339_v24 }
  0x5f   : > { %v598_v35 = vunpack.c.l.bf16 %v534_v26  ;;  %v404_v36 = vmax.f32 %v276_v20, %v340_v27  ;;  %v341_v37 = vunpack.c.l.bf16 %v215_v25  ;;  %v342_v38 = vunpack.c.h.bf16 %v215_v25 }
  0x60   : > { %692 = vst [vmem:[%s1319_s23 + $0x5c] sm:$0x7] %v660_v31  ;;  %v661_v41 = vpack.c.bf16 %v629_v32, %v629_v32  ;;  %v535_v42 = vrot.slane %v439_v33, 4  ;;  %v279_v43 = vunpack.c.l.bf16 %v214_v30  ;;  %v280_v44 = vunpack.c.h.bf16 %v214_v30 }
  0x61   : > { %v630_v45 = vmax.f32 %v399_v8, %v598_v35  ;;  %v440_v46 = vpack.c.bf16 %v404_v36, %v403_v34  ;;  %v405_v47 = vmax.f32 %v277_v28, %v341_v37  ;;  %v406_v48 = vmax.f32 %v278_v29, %v342_v38 }
  0x62   : > { %693 = vst [vmem:[%s1319_s23 + $0x60] sm:$0xf] %v661_v41  ;;  %v599_v50 = vunpack.c.l.bf16 %v535_v42  ;;  %v343_v51 = vunpack.c.l.bf16 %v216_v39  ;;  %v344_v52 = vunpack.c.h.bf16 %v216_v39  ;;  %v281_v53 = vunpack.c.l.bf16 %v217_v40 }
  0x63   : > { %v662_v55 = vpack.c.bf16 %v630_v45, %v630_v45  ;;  %v536_v56 = vrot.slane %v440_v46, 4  ;;  %v441_v57 = vpack.c.bf16 %v406_v48, %v405_v47  ;;  %v282_v58 = vunpack.c.h.bf16 %v217_v40 }
  0x64   : > { %v631_v59 = vmax.f32 %v401_v19, %v599_v50  ;;  %v407_v60 = vmax.f32 %v279_v43, %v343_v51  ;;  %v408_v61 = vmax.f32 %v280_v44, %v344_v52  ;;  %v345_v62 = vunpack.c.l.bf16 %v219_v49 }
  0x65   : > { %694 = vst [vmem:[%s1319_s23 + $0x64] sm:$0x7] %v662_v55  ;;  %v600_v0 = vunpack.c.l.bf16 %v536_v56  ;;  %v537_v1 = vrot.slane %v441_v57, 4  ;;  %v346_v2 = vunpack.c.h.bf16 %v219_v49  ;;  %v283_v3 = vunpack.c.l.bf16 %v218_v54 }
  0x66   : > { %v663_v4 = vpack.c.bf16 %v631_v59, %v631_v59  ;;  %v442_v5 = vpack.c.bf16 %v408_v61, %v407_v60  ;;  %v409_v6 = vmax.f32 %v281_v53, %v345_v62  ;;  %v284_v7 = vunpack.c.h.bf16 %v218_v54 }
  0x67   : > { %v632_v8 = vmax.f32 %v403_v34, %v600_v0  ;;  %v601_v9 = vunpack.c.l.bf16 %v537_v1  ;;  %v410_v10 = vmax.f32 %v282_v58, %v346_v2  ;;  %v347_v11 = vunpack.c.l.bf16 %v220_v63 }
  0x68   : > { %695 = vst [vmem:[%s1319_s23 + $0x68] sm:$0xf] %v663_v4  ;;  %v538_v12 = vrot.slane %v442_v5, 4  ;;  %v348_v13 = vunpack.c.h.bf16 %v220_v63 }
  0x69   : > { %v664_v14 = vpack.c.bf16 %v632_v8, %v632_v8  ;;  %v633_v15 = vmax.f32 %v405_v47, %v601_v9  ;;  %v443_v16 = vpack.c.bf16 %v410_v10, %v409_v6  ;;  %v411_v17 = vmax.f32 %v283_v3, %v347_v11 }
  0x6a   : > { %v602_v18 = vunpack.c.l.bf16 %v538_v12  ;;  %v412_v19 = vmax.f32 %v284_v7, %v348_v13 }
  0x6b   : > { %696 = vst [vmem:[%s1319_s23 + $0x6c] sm:$0x7] %v664_v14  ;;  %v665_v20 = vpack.c.bf16 %v633_v15, %v633_v15  ;;  %v539_v21 = vrot.slane %v443_v16, 4 }
  0x6c   : > { %v634_v22 = vmax.f32 %v407_v60, %v602_v18  ;;  %v444_v23 = vpack.c.bf16 %v412_v19, %v411_v17 }
  0x6d   : > { %697 = vst [vmem:[%s1319_s23 + $0x70] sm:$0xf] %v665_v20  ;;  %v603_v24 = vunpack.c.l.bf16 %v539_v21 }
  0x6e   : > { %v666_v25 = vpack.c.bf16 %v634_v22, %v634_v22  ;;  %v540_v26 = vrot.slane %v444_v23, 4 }
  0x6f   : > { %v635_v27 = vmax.f32 %v409_v6, %v603_v24 }
  0x70   : > { %698 = vst [vmem:[%s1319_s23 + $0x74] sm:$0x7] %v666_v25  ;;  %v604_v28 = vunpack.c.l.bf16 %v540_v26 }
  0x71   : > { %v667_v29 = vpack.c.bf16 %v635_v27, %v635_v27 }
  0x72   : > { %v636_v30 = vmax.f32 %v411_v17, %v604_v28  ;;  %707 = sbr.rel (!%p1289_p4) target bundleno = 183 (0xb7), region = 28 }
  0x73   : > { %699 = vst [vmem:[%s1319_s23 + $0x78] sm:$0xf] %v667_v29 }
  0x74   : > { %v668_v31 = vpack.c.bf16 %v636_v30, %v636_v30 }
  0x76   : > { %700 = vst [vmem:[%s1319_s23 + $0x7c] sm:$0x7] %v668_v31 }
  0x77   : > { %s1559_s24 = smov (!%p710_p8, %s709_s24), 16 }
  0x78   : > { %s1073_s29 = sshll.u32 %s1559_s24, 3  ;;  %s1059_s30 = sshll.u32 %s1559_s24, 1 }
  0x79   : > { %p1060_p9 = scmp.eq.s32.totalorder %s1073_s29, 0 }
  0x7a   : > { %s1417_s2 = sshrl.u32 (!%p1060_p9), %s1059_s30, 5 }
  0x7b   : > { %721 = sbr.rel (%p1060_p9) target bundleno = 183 (0xb7), region = 32  ;;  %p1061_p10 = scmp.le.s32.totalorder (!%p1060_p9), %s1417_s2, 0 }
  0x80   : > { %1000 = sbr.rel (%p1061_p10) target bundleno = 166 (0xa6), region = 104  ;;  %s1550_s3 = smov (!%p1061_p10), %s1409_s28 }
  0x81   : > { %s1551_s4 = smov (!%p1061_p10), %s1319_s23  ;;  %s1426_s5 = smov (!%p1061_p10), 0  }
  0x82   : > { %s1428_s6 = smov (!%p1061_p10), 0  }
  0x85 LB: >> { %v738_v32 = vld [vmem:[%s1228_s4] sm:$0xf]  ;;  %v740_v33 = vld [vmem:[%s1228_s4 + $0x4] sm:$0xf]  ;;  %v742_v34 = vld [vmem:[%s1228_s4 + $0x8] sm:$0xf]  ;;  %s1236_s6 = sphi %s1428_s6, %s732_s6   ;;  %s1232_s5 = sphi %s1426_s5, %s1554_s5   ;;  %s1228_s4 = sphi %s1551_s4, %s1553_s4   ;;  %s1224_s3 = sphi %s1550_s3, %s1552_s3  }
  0x86   : >> { %739 = vst [vmem:[%s1224_s3] sm:$0xf] %v738_v32  ;;  %v744_v35 = vld [vmem:[%s1228_s4 + $0xc] sm:$0xf]  ;;  %v746_v36 = vld [vmem:[%s1228_s4 + $0x10] sm:$0xf]  ;;  %s802_s8 = sadd.s32 1, %s1232_s5 }
  0x87   : >> { %741 = vst [vmem:[%s1224_s3 + $0x4] sm:$0xf] %v740_v33  ;;  %v748_v37 = vld [vmem:[%s1228_s4 + $0x14] sm:$0xf]  ;;  %v750_v38 = vld [vmem:[%s1228_s4 + $0x18] sm:$0xf]  ;;  %p803_p11 = scmp.ge.s32.totalorder %s802_s8, %s1417_s2 }
  0x88   : >> { %743 = vst [vmem:[%s1224_s3 + $0x8] sm:$0xf] %v742_v34  ;;  %v752_v39 = vld [vmem:[%s1228_s4 + $0x1c] sm:$0xf]  ;;  %v754_v40 = vld [vmem:[%s1228_s4 + $0x20] sm:$0xf] }
  0x89   : >> { %745 = vst [vmem:[%s1224_s3 + $0xc] sm:$0xf] %v744_v35  ;;  %v756_v41 = vld [vmem:[%s1228_s4 + $0x24] sm:$0xf]  ;;  %v758_v42 = vld [vmem:[%s1228_s4 + $0x28] sm:$0xf] }
  0x8a   : >> { %747 = vst [vmem:[%s1224_s3 + $0x10] sm:$0xf] %v746_v36  ;;  %v760_v43 = vld [vmem:[%s1228_s4 + $0x2c] sm:$0xf]  ;;  %v762_v44 = vld [vmem:[%s1228_s4 + $0x30] sm:$0xf] }
  0x8b   : >> { %749 = vst [vmem:[%s1224_s3 + $0x14] sm:$0xf] %v748_v37  ;;  %v764_v45 = vld [vmem:[%s1228_s4 + $0x34] sm:$0xf]  ;;  %v766_v46 = vld [vmem:[%s1228_s4 + $0x38] sm:$0xf] }
  0x8c   : >> { %751 = vst [vmem:[%s1224_s3 + $0x18] sm:$0xf] %v750_v38  ;;  %v768_v47 = vld [vmem:[%s1228_s4 + $0x3c] sm:$0xf]  ;;  %v770_v48 = vld [vmem:[%s1228_s4 + $0x40] sm:$0xf] }
  0x8d   : >> { %753 = vst [vmem:[%s1224_s3 + $0x1c] sm:$0xf] %v752_v39  ;;  %v772_v49 = vld [vmem:[%s1228_s4 + $0x44] sm:$0xf]  ;;  %s1561_s8 = smov (%p803_p11, %s802_s8), 0  ;;  %s732_s6 = sadd.s32 1, %s1236_s6  }
  0x8e   : >> { %755 = vst [vmem:[%s1224_s3 + $0x20] sm:$0xf] %v754_v40  ;;  %v774_v50 = vld [vmem:[%s1228_s4 + $0x48] sm:$0xf]  ;;  %v776_v51 = vld [vmem:[%s1228_s4 + $0x4c] sm:$0xf]  ;;  %p731_p12 = scmp.ge.s32.totalorder %s732_s6, %s1417_s2  ;;  %s1554_s5 = smov %s1561_s8 }
  0x8f   : >> { %757 = vst [vmem:[%s1224_s3 + $0x24] sm:$0xf] %v756_v41  ;;  %s1062_s9 = sshll.u32 %s1561_s8, 7  ;;  %v778_v52 = vld [vmem:[%s1228_s4 + $0x50] sm:$0xf] }
  0x90   : >> { %759 = vst [vmem:[%s1224_s3 + $0x28] sm:$0xf] %v758_v42  ;;  %s1487_s11 = scalar_lea.vmem %s1319_s23, %s1062_s9 [#allocation2]   ;;  %s808_s12 = scalar_lea.vmem %s1409_s28, %s1062_s9   ;;  %v780_v53 = vld [vmem:[%s1228_s4 + $0x54] sm:$0xf]  ;;  %v782_v54 = vld [vmem:[%s1228_s4 + $0x58] sm:$0xf] }
  0x91   : >> { %761 = vst [vmem:[%s1224_s3 + $0x2c] sm:$0xf] %v760_v43  ;;  %v784_v55 = vld [vmem:[%s1228_s4 + $0x5c] sm:$0xf]  ;;  %v786_v56 = vld [vmem:[%s1228_s4 + $0x60] sm:$0xf] }
  0x92   : >> { %763 = vst [vmem:[%s1224_s3 + $0x30] sm:$0xf] %v762_v44  ;;  %v788_v57 = vld [vmem:[%s1228_s4 + $0x64] sm:$0xf]  ;;  %v790_v58 = vld [vmem:[%s1228_s4 + $0x68] sm:$0xf] }
  0x93   : >> { %765 = vst [vmem:[%s1224_s3 + $0x34] sm:$0xf] %v764_v45  ;;  %v792_v59 = vld [vmem:[%s1228_s4 + $0x6c] sm:$0xf]  ;;  %v794_v60 = vld [vmem:[%s1228_s4 + $0x70] sm:$0xf] }
  0x94   : >> { %767 = vst [vmem:[%s1224_s3 + $0x38] sm:$0xf] %v766_v46  ;;  %v796_v61 = vld [vmem:[%s1228_s4 + $0x74] sm:$0xf]  ;;  %v798_v62 = vld [vmem:[%s1228_s4 + $0x78] sm:$0xf] }
  0x95   : >> { %769 = vst [vmem:[%s1224_s3 + $0x3c] sm:$0xf] %v768_v47  ;;  %v800_v63 = vld [vmem:[%s1228_s4 + $0x7c] sm:$0xf]  ;;  %s1553_s4 = smov %s1487_s11 }
  0x96   : >> { %771 = vst [vmem:[%s1224_s3 + $0x40] sm:$0xf] %v770_v48 }
  0x97   : >> { %773 = vst [vmem:[%s1224_s3 + $0x44] sm:$0xf] %v772_v49 }
  0x98   : >> { %775 = vst [vmem:[%s1224_s3 + $0x48] sm:$0xf] %v774_v50 }
  0x99   : >> { %777 = vst [vmem:[%s1224_s3 + $0x4c] sm:$0xf] %v776_v51 }
  0x9a   : >> { %779 = vst [vmem:[%s1224_s3 + $0x50] sm:$0xf] %v778_v52 }
  0x9b   : >> { %781 = vst [vmem:[%s1224_s3 + $0x54] sm:$0xf] %v780_v53 }
  0x9c   : >> { %783 = vst [vmem:[%s1224_s3 + $0x58] sm:$0xf] %v782_v54 }
  0x9d   : >> { %785 = vst [vmem:[%s1224_s3 + $0x5c] sm:$0xf] %v784_v55 }
  0x9e   : >> { %787 = vst [vmem:[%s1224_s3 + $0x60] sm:$0xf] %v786_v56 }
  0x9f   : >> { %789 = vst [vmem:[%s1224_s3 + $0x64] sm:$0xf] %v788_v57 }
  0xa0   : >> { %791 = vst [vmem:[%s1224_s3 + $0x68] sm:$0xf] %v790_v58 }
  0xa1   : >> { %793 = vst [vmem:[%s1224_s3 + $0x6c] sm:$0xf] %v792_v59  ;;  %734 = sbr.rel (!%p731_p12) target bundleno = 133 (0x85), region = 110 }
  0xa2   : >> { %795 = vst [vmem:[%s1224_s3 + $0x70] sm:$0xf] %v794_v60 }
  0xa3   : >> { %797 = vst [vmem:[%s1224_s3 + $0x74] sm:$0xf] %v796_v61 }
  0xa4   : >> { %799 = vst [vmem:[%s1224_s3 + $0x78] sm:$0xf] %v798_v62 }
  0xa5   : >> { %801 = vst [vmem:[%s1224_s3 + $0x7c] sm:$0xf] %v800_v63  ;;  %s1552_s3 = smov %s808_s12 }
  0xa6 PF: > { %s1529_s14 = sand.u32 31, %s1059_s30   ;;  %s1076_s15 = sshll.u32 %s1417_s2, 7 }
  0xa7   : > { %s813_s16 = scalar_lea.vmem %s1319_s23, %s1076_s15 [#allocation2]   ;;  %s815_s17 = scalar_lea.vmem %s1409_s28, %s1076_s15  }
  0xa8   : > { %p1067_p13 = scmp.le.s32.totalorder %s1529_s14, 0 }
  0xa9   : > { %s1238_s18 = smov (!%p1067_p13), %s815_s17   ;;  %s1242_s19 = smov (!%p1067_p13), %s813_s16  }
  0xaa   : > { %1014 = sbr.rel (%p1067_p13) target bundleno = 183 (0xb7), region = 115  ;;  %s1246_s20 = smov (!%p1067_p13), 0  }
  0xab   : > { %s1250_s21 = smov (!%p1067_p13), 0  }
  0xaf LB: >> { %v825_v0 = vld [vmem:[%s1244_s19] sm:$0xf]  ;;  %s827_s22 = sadd.s32 1, %s1248_s20  ;;  %s819_s21 = sadd.s32 1, %s1252_s21   ;;  %s1252_s21 = sphi %s1250_s21, %s819_s21   ;;  %s1248_s20 = sphi %s1246_s20, %s1247_s20   ;;  %s1244_s19 = sphi %s1242_s19, %s832_s19   ;;  %s1240_s18 = sphi %s1238_s18, %s833_s18  }
  0xb0   : >> { %826 = vst [vmem:[%s1240_s18] sm:$0xf] %v825_v0  ;;  %p828_p0 = scmp.ge.s32.totalorder %s827_s22, %s1529_s14  ;;  %p818_p1 = scmp.ge.s32.totalorder %s819_s21, %s1529_s14 }
  0xb2   : >> { %s1563_s22 = smov (%p828_p0, %s827_s22), 0  ;;  %821 = sbr.rel (!%p818_p1) target bundleno = 175 (0xaf), region = 121 }
  0xb3   : >> { %s1068_s23 = sshll.u32 %s1563_s22, 2  ;;  %s1247_s20 = smov %s1563_s22  }
  0xb4   : >> { %s832_s19 = scalar_lea.vmem %s813_s16, %s1068_s23 [#allocation2]   ;;  %s833_s18 = scalar_lea.vmem %s815_s17, %s1068_s23  }
  0xb7 PF: > { %p8_p2 = scmp.ge.s32.totalorder %s1279_s10, 4   ;;  %s1555_s6 = smov %s1216_s7 }
  0xb8   : > { %s1556_s7 = smov %s1287_s13  ;;  %s1557_s8 = smov %s1279_s10 }
  0xb9   :  { %10 = sbr.rel (!%p8_p2) target bundleno = 2 (0x2), region = 132 }

// kernel: convnet_forward.9
= control target key start
LH: loop header
LB: loop body
LE: loop exit
PB: predicated region body
PF: predicated region fallthrough
CT: control target
= control target key end

     0   :  { %s765_s6 = smov 0   ;;  %s767_s7 = smov 0   ;;  %s922_s0 = inlined_call_operand.vmem [shape: bf16[14,2,7,256], index: 0, kind: input, shape index: {}]   ;;  %s923_s1 = inlined_call_operand.vmem [shape: bf16[14,7,128], index: 1, kind: output, shape index: {}]  }
   0x1   :  { %s769_s8 = smov 0  }
   0x2 LB: > { %s778_s9 = sadd.s32 4294967295, %s721_s8   ;;  %s780_s10 = sadd.s32 1, %s721_s8   ;;  %s721_s8 = sphi %s769_s8, %s933_s8   ;;  %s717_s7 = sphi %s767_s7, %s932_s7   ;;  %s713_s6 = sphi %s765_s6, %s931_s6  }
   0x3   : > { %s41_s11 = ssub.s32 %s721_s8, %s780_s10  ;;  %s44_s12 = sadd.s32 1, %s717_s7 }
   0x4   : > { %p42_p0 = scmp.eq.s32.totalorder %s41_s11, 0  ;;  %p54_p1 = scmp.ne.s32.totalorder %s717_s7, %s713_s6 }
   0x5   : > { %p55_p2 = scmp.eq.s32.totalorder %s778_s9, 1  ;;  %p553_p3 = scmp.ge.s32.totalorder %s721_s8, 1 }
   0x6   : > { %s788_s13 = scalar_select %p42_p0, %s717_s7, %s44_s12  }
   0x7   : > { %p790_p4 = por %p55_p2, %p54_p1  ;;  %p101_p5 = scmp.lt.s32.totalorder %s721_s8, 3 }
   0x9   : > { %p102_p6 = pnand %p553_p3, %p101_p5 }
   0xa   : > { %s795_s15 = sshll.u32 (!%p102_p6), %s778_s9, 3  ;;  %s124_s21 = sand.u32 (!%p102_p6), 1, %s713_s6  }
   0xb   : > { %105 = sbr.rel (%p102_p6) target bundleno = 98 (0x62), region = 24  ;;  %p134_p7 = scmp.lt.s32.totalorder (!%p102_p6), %s795_s15, 13 }
   0xc   : > { %s554_s22 = sshll.u32 (!%p102_p6), %s124_s21, 5 }
   0xd   : > { %s824_s23 = scalar_lea.vmem (!%p102_p6), [#allocation2], %s554_s22  }
  0x10   : > { %s135_s16 = scalar_select %p134_p7, %s795_s15, 13  ;;  %vm279_vm0 = vcmask 1043456   ;;  %vm280_vm1 = vsmask.f32 3328  ;;  %v282_v58 = vld [vmem:[%s824_s23] sm:$0xf] }
  0x11   : > { %vm820_vm2 = vmand %vm279_vm0, %vm280_vm1  ;;  %s314_s24 = ssub.s32 (%p790_p4), 14, %s795_s15  ;;  %s576_s25 = sshll.u32 (%p790_p4), %s778_s9, 5 }
  0x12   : > { %s575_s17 = sshll.u32 %s135_s16, 4  ;;  %p315_p8 = scmp.lt.s32.totalorder (%p790_p4), %s314_s24, 8 }
  0x13   : > { %s802_s20 = scalar_lea.vmem %s922_s0, %s575_s17  ;;  %s868_s28 = scalar_lea.vmem (%p790_p4), %s923_s1, %s576_s25  }
  0x14   : > { %v151_v0 = vld [vmem:[%s802_s20] sm:$0xff]  ;;  %v152_v1 = vld [vmem:[%s802_s20 + $0x8] sm:$0xff]  ;;  %v153_v2 = vld [vmem:[%s802_s20 + $0x10] sm:$0xff] }
  0x15   : > { %v167_v3 = vunpack.c.l.bf16 %v151_v0  ;;  %v168_v4 = vunpack.c.h.bf16 %v151_v0  ;;  %v183_v5 = vunpack.c.l.bf16 %v152_v1  ;;  %v184_v6 = vunpack.c.h.bf16 %v152_v1  ;;  %v154_v7 = vld [vmem:[%s802_s20 + $0x18] sm:$0xff]  ;;  %v155_v8 = vld [vmem:[%s802_s20 + $0x20] sm:$0xff]  ;;  %v156_v9 = vld [vmem:[%s802_s20 + $0x28] sm:$0xff] }
  0x16   : > { %v169_v10 = vunpack.c.l.bf16 %v153_v2  ;;  %v170_v11 = vunpack.c.h.bf16 %v153_v2  ;;  %v185_v12 = vunpack.c.l.bf16 %v154_v7  ;;  %v186_v13 = vunpack.c.h.bf16 %v154_v7  ;;  %v157_v14 = vld [vmem:[%s802_s20 + $0x30] sm:$0xff]  ;;  %v158_v15 = vld [vmem:[%s802_s20 + $0x38] sm:$0xff]  ;;  %v159_v24 = vld [vmem:[%s802_s20 + $0x40] sm:$0xff] }
  0x17   : > { %v199_v16 = vmax.f32 %v167_v3, %v183_v5  ;;  %v200_v17 = vmax.f32 %v168_v4, %v184_v6  ;;  %v171_v18 = vunpack.c.l.bf16 %v155_v8  ;;  %v172_v19 = vunpack.c.h.bf16 %v155_v8  ;;  %v160_v29 = vld [vmem:[%s802_s20 + $0x48] sm:$0xff]  ;;  %v161_v34 = vld [vmem:[%s802_s20 + $0x50] sm:$0xff]  ;;  %v162_v43 = vld [vmem:[%s802_s20 + $0x58] sm:$0xff] }
  0x18   : > { %v201_v20 = vmax.f32 %v169_v10, %v185_v12  ;;  %v202_v21 = vmax.f32 %v170_v11, %v186_v13  ;;  %v187_v22 = vunpack.c.l.bf16 %v156_v9  ;;  %v188_v23 = vunpack.c.h.bf16 %v156_v9  ;;  %v163_v48 = vld [vmem:[%s802_s20 + $0x60] sm:$0xff]  ;;  %v164_v62 = vld [vmem:[%s802_s20 + $0x68] sm:$0xff]  ;;  %v165_v9 = vld [vmem:[%s802_s20 + $0x70] sm:$0xff] }
  0x19   : > { %v215_v25 = vpack.c.bf16 %v200_v17, %v199_v16  ;;  %v173_v26 = vunpack.c.l.bf16 %v157_v14  ;;  %v174_v27 = vunpack.c.h.bf16 %v157_v14  ;;  %v189_v28 = vunpack.c.l.bf16 %v158_v15  ;;  %v285_v1 = vld [vmem:[%s824_s23 + $0x4] sm:$0xf]  ;;  %v288_v11 = vld [vmem:[%s824_s23 + $0x8] sm:$0xf] }
  0x1a   : > { %v216_v30 = vpack.c.bf16 %v202_v21, %v201_v20  ;;  %v203_v31 = vmax.f32 %v171_v18, %v187_v22  ;;  %v204_v32 = vmax.f32 %v172_v19, %v188_v23  ;;  %v190_v33 = vunpack.c.h.bf16 %v158_v15  ;;  %v166_v19 = vld [vmem:[%s802_s20 + $0x78] sm:$0xff] }
  0x1b   : > { %v239_v35 = vrot.slane %v215_v25, 4  ;;  %v205_v36 = vmax.f32 %v173_v26, %v189_v28  ;;  %v175_v37 = vunpack.c.l.bf16 %v159_v24  ;;  %v176_v38 = vunpack.c.h.bf16 %v159_v24 }
  0x1c   : > { %v240_v39 = vrot.slane %v216_v30, 4  ;;  %v217_v40 = vpack.c.bf16 %v204_v32, %v203_v31  ;;  %v206_v41 = vmax.f32 %v174_v27, %v190_v33  ;;  %v191_v42 = vunpack.c.l.bf16 %v160_v29 }
  0x1d   : > { %v255_v44 = vunpack.c.l.bf16 %v239_v35  ;;  %v192_v45 = vunpack.c.h.bf16 %v160_v29  ;;  %v177_v46 = vunpack.c.l.bf16 %v161_v34  ;;  %v178_v47 = vunpack.c.h.bf16 %v161_v34  ;;  %v294_v34 = vld [vmem:[%s824_s23 + $0x10] sm:$0xf] }
  0x1e   : > { %v256_v49 = vunpack.c.l.bf16 %v240_v39  ;;  %v241_v50 = vrot.slane %v217_v40, 4  ;;  %v218_v51 = vpack.c.bf16 %v206_v41, %v205_v36  ;;  %v207_v52 = vmax.f32 %v175_v37, %v191_v42  ;;  %v297_v40 = vld [vmem:[%s824_s23 + $0x14] sm:$0xf] }
  0x1f   : > { %v263_v53 = vmax.f32 %v199_v16, %v255_v44  ;;  %v208_v54 = vmax.f32 %v176_v38, %v192_v45  ;;  %v193_v55 = vunpack.c.l.bf16 %v162_v43  ;;  %v194_v56 = vunpack.c.h.bf16 %v162_v43 }
  0x20   : > { %v264_v59 = vmax.f32 %v201_v20, %v256_v49  ;;  %v257_v60 = vunpack.c.l.bf16 %v241_v50  ;;  %v242_v61 = vrot.slane %v218_v51, 4  ;;  %v179_v63 = vunpack.c.l.bf16 %v163_v48  ;;  %v291_v20 = vld [vmem:[%s824_s23 + $0xc] sm:$0xf]  ;;  %v300_v49 = vld [vmem:[%s824_s23 + $0x18] sm:$0xf] }
  0x21   : > { %v271_v0 = vpack.c.bf16 %v263_v53, %v263_v53  ;;  %v219_v2 = vpack.c.bf16 %v208_v54, %v207_v52  ;;  %v209_v3 = vmax.f32 %v177_v46, %v193_v55  ;;  %v210_v4 = vmax.f32 %v178_v47, %v194_v56  ;;  %v303_v54 = vld [vmem:[%s824_s23 + $0x1c] sm:$0xf] }
  0x22   : > { %v272_v5 = vpack.c.bf16 %v264_v59, %v264_v59  ;;  %v265_v6 = vmax.f32 %v203_v31, %v257_v60  ;;  %v258_v7 = vunpack.c.l.bf16 %v242_v61  ;;  %v180_v8 = vunpack.c.h.bf16 %v163_v48 }
  0x23   : > { %v283_v10 = vsel %vm820_vm2, %v271_v0, %v282_v58  ;;  %v243_v12 = vrot.slane %v219_v2, 4  ;;  %v220_v13 = vpack.c.bf16 %v210_v4, %v209_v3  ;;  %v195_v14 = vunpack.c.l.bf16 %v164_v62 }
  0x24   : > { %284 = vst [vmem:[%s824_s23] sm:$0xf] %v283_v10  ;;  %v286_v15 = vsel %vm820_vm2, %v272_v5, %v285_v1  ;;  %v273_v16 = vpack.c.bf16 %v265_v6, %v265_v6  ;;  %v266_v17 = vmax.f32 %v205_v36, %v258_v7  ;;  %v196_v18 = vunpack.c.h.bf16 %v164_v62 }
  0x25   : > { %287 = vst [vmem:[%s824_s23 + $0x4] sm:$0xf] %v286_v15  ;;  %v259_v21 = vunpack.c.l.bf16 %v243_v12  ;;  %v244_v22 = vrot.slane %v220_v13, 4  ;;  %v211_v23 = vmax.f32 %v179_v63, %v195_v14  ;;  %v181_v24 = vunpack.c.l.bf16 %v165_v9 }
  0x26   : > { %v289_v25 = vsel %vm820_vm2, %v273_v16, %v288_v11  ;;  %v274_v26 = vpack.c.bf16 %v266_v17, %v266_v17  ;;  %v212_v27 = vmax.f32 %v180_v8, %v196_v18  ;;  %v182_v28 = vunpack.c.h.bf16 %v165_v9 }
  0x27   : > { %290 = vst [vmem:[%s824_s23 + $0x8] sm:$0xf] %v289_v25  ;;  %v267_v29 = vmax.f32 %v207_v52, %v259_v21  ;;  %v260_v30 = vunpack.c.l.bf16 %v244_v22  ;;  %v197_v31 = vunpack.c.l.bf16 %v166_v19  ;;  %v198_v32 = vunpack.c.h.bf16 %v166_v19 }
  0x28   : > { %v292_v33 = vsel %vm820_vm2, %v274_v26, %v291_v20  ;;  %v221_v35 = vpack.c.bf16 %v212_v27, %v211_v23 }
  0x29   : > { %293 = vst [vmem:[%s824_s23 + $0xc] sm:$0xf] %v292_v33  ;;  %v275_v36 = vpack.c.bf16 %v267_v29, %v267_v29  ;;  %v268_v37 = vmax.f32 %v209_v3, %v260_v30  ;;  %v213_v38 = vmax.f32 %v181_v24, %v197_v31  ;;  %v214_v39 = vmax.f32 %v182_v28, %v198_v32 }
  0x2a   : > { %v245_v41 = vrot.slane %v221_v35, 4 }
  0x2b   : > { %v295_v42 = vsel %vm820_vm2, %v275_v36, %v294_v34  ;;  %v276_v43 = vpack.c.bf16 %v268_v37, %v268_v37  ;;  %v222_v44 = vpack.c.bf16 %v214_v39, %v213_v38 }
  0x2c   : > { %296 = vst [vmem:[%s824_s23 + $0x10] sm:$0xf] %v295_v42  ;;  %v261_v45 = vunpack.c.l.bf16 %v245_v41 }
  0x2d   : > { %v298_v46 = vsel %vm820_vm2, %v276_v43, %v297_v40  ;;  %v246_v47 = vrot.slane %v222_v44, 4 }
  0x2e   : > { %299 = vst [vmem:[%s824_s23 + $0x14] sm:$0xf] %v298_v46  ;;  %v269_v48 = vmax.f32 %v211_v23, %v261_v45 }
  0x2f   : > { %v262_v50 = vunpack.c.l.bf16 %v246_v47 }
  0x30   : > { %v277_v51 = vpack.c.bf16 %v269_v48, %v269_v48 }
  0x31   : > { %v270_v52 = vmax.f32 %v213_v38, %v262_v50 }
  0x32   : > { %v301_v53 = vsel %vm820_vm2, %v277_v51, %v300_v49  ;;  %312 = sbr.rel (!%p790_p4) target bundleno = 98 (0x62), region = 28 }
  0x33   : > { %302 = vst [vmem:[%s824_s23 + $0x18] sm:$0xf] %v301_v53  ;;  %v278_v55 = vpack.c.bf16 %v270_v52, %v270_v52 }
  0x35   : > { %v304_v56 = vsel %vm820_vm2, %v278_v55, %v303_v54 }
  0x36   : > { %305 = vst [vmem:[%s824_s23 + $0x1c] sm:$0xf] %v304_v56 }
  0x37   : > { %s935_s24 = smov (!%p315_p8, %s314_s24), 8 }
  0x38   : > { %s560_s29 = sshll.u32 %s935_s24, 2 }
  0x39   : > { %p563_p9 = scmp.eq.s32.totalorder %s560_s29, 0 }
  0x3a   : > { %s874_s30 = sshrl.u32 (!%p563_p9), %s935_s24, 3 }
  0x3b   : > { %323 = sbr.rel (%p563_p9) target bundleno = 98 (0x62), region = 32  ;;  %p564_p10 = scmp.le.s32.totalorder (!%p563_p9), %s874_s30, 0 }
  0x40   : > { %506 = sbr.rel (%p564_p10) target bundleno = 81 (0x51), region = 104  ;;  %s927_s2 = smov (!%p564_p10), %s868_s28 }
  0x41   : > { %s928_s3 = smov (!%p564_p10), %s824_s23  ;;  %s883_s4 = smov (!%p564_p10), 0  }
  0x42   : > { %s885_s5 = smov (!%p564_p10), 0  }
  0x45 LB: >> { %v340_v57 = vld [vmem:[%s729_s3] sm:$0xf]  ;;  %v342_v58 = vld [vmem:[%s729_s3 + $0x4] sm:$0xf]  ;;  %v344_v59 = vld [vmem:[%s729_s3 + $0x8] sm:$0xf]  ;;  %s737_s5 = sphi %s885_s5, %s334_s5   ;;  %s733_s4 = sphi %s883_s4, %s930_s4   ;;  %s729_s3 = sphi %s928_s3, %s361_s3   ;;  %s725_s2 = sphi %s927_s2, %s929_s2  }
  0x46   : >> { %341 = vst [vmem:[%s725_s2] sm:$0xf] %v340_v57  ;;  %v346_v60 = vld [vmem:[%s729_s3 + $0xc] sm:$0xf]  ;;  %s356_s6 = sadd.s32 1, %s733_s4  ;;  %v348_v61 = vld [vmem:[%s729_s3 + $0x10] sm:$0xf] }
  0x47   : >> { %343 = vst [vmem:[%s725_s2 + $0x4] sm:$0xf] %v342_v58  ;;  %p357_p11 = scmp.ge.s32.totalorder %s356_s6, %s874_s30  ;;  %v350_v62 = vld [vmem:[%s729_s3 + $0x14] sm:$0xf]  ;;  %v352_v63 = vld [vmem:[%s729_s3 + $0x18] sm:$0xf] }
  0x48   : >> { %345 = vst [vmem:[%s725_s2 + $0x8] sm:$0xf] %v344_v59  ;;  %v354_v0 = vld [vmem:[%s729_s3 + $0x1c] sm:$0xf]  ;;  %s334_s5 = sadd.s32 1, %s737_s5  }
  0x49   : >> { %347 = vst [vmem:[%s725_s2 + $0xc] sm:$0xf] %v346_v60  ;;  %s937_s6 = smov (%p357_p11, %s356_s6), 0  ;;  %p333_p12 = scmp.ge.s32.totalorder %s334_s5, %s874_s30 }
  0x4a   : >> { %349 = vst [vmem:[%s725_s2 + $0x10] sm:$0xf] %v348_v61  ;;  %s565_s8 = sshll.u32 %s937_s6, 5  ;;  %s930_s4 = smov %s937_s6 }
  0x4b   : >> { %351 = vst [vmem:[%s725_s2 + $0x14] sm:$0xf] %v350_v62  ;;  %s361_s3 = scalar_lea.vmem %s824_s23, %s565_s8 [#allocation2]   ;;  %s362_s9 = scalar_lea.vmem %s868_s28, %s565_s8  }
  0x4c   : >> { %353 = vst [vmem:[%s725_s2 + $0x18] sm:$0xf] %v352_v63  ;;  %336 = sbr.rel (!%p333_p12) target bundleno = 69 (0x45), region = 110 }
  0x4d   : >> { %355 = vst [vmem:[%s725_s2 + $0x1c] sm:$0xf] %v354_v0  ;;  %s929_s2 = smov %s362_s9 }
  0x51 PF: > { %s904_s11 = sand.u32 7, %s935_s24   ;;  %s577_s12 = sshll.u32 %s874_s30, 5 }
  0x52   : > { %s367_s14 = scalar_lea.vmem %s824_s23, %s577_s12 [#allocation2]   ;;  %s369_s15 = scalar_lea.vmem %s868_s28, %s577_s12  }
  0x53   : > { %p570_p13 = scmp.le.s32.totalorder %s904_s11, 0 }
  0x54   : > { %s739_s16 = smov (!%p570_p13), %s369_s15   ;;  %s743_s17 = smov (!%p570_p13), %s367_s14  }
  0x55   : > { %520 = sbr.rel (%p570_p13) target bundleno = 98 (0x62), region = 115  ;;  %s747_s18 = smov (!%p570_p13), 0  }
  0x56   : > { %s751_s19 = smov (!%p570_p13), 0  }
  0x5a LB: >> { %v379_v1 = vld [vmem:[%s745_s17] sm:$0xf]  ;;  %s381_s20 = sadd.s32 1, %s749_s18  ;;  %s373_s19 = sadd.s32 1, %s753_s19   ;;  %s753_s19 = sphi %s751_s19, %s373_s19   ;;  %s749_s18 = sphi %s747_s18, %s748_s18   ;;  %s745_s17 = sphi %s743_s17, %s386_s17   ;;  %s741_s16 = sphi %s739_s16, %s387_s16  }
  0x5b   : >> { %380 = vst [vmem:[%s741_s16] sm:$0xf] %v379_v1  ;;  %p382_p0 = scmp.ge.s32.totalorder %s381_s20, %s904_s11  ;;  %p372_p1 = scmp.ge.s32.totalorder %s373_s19, %s904_s11 }
  0x5d   : >> { %s939_s20 = smov (%p382_p0, %s381_s20), 0  ;;  %375 = sbr.rel (!%p372_p1) target bundleno = 90 (0x5a), region = 121 }
  0x5e   : >> { %s571_s21 = sshll.u32 %s939_s20, 2  ;;  %s748_s18 = smov %s939_s20  }
  0x5f   : >> { %s386_s17 = scalar_lea.vmem %s367_s14, %s571_s21 [#allocation2]   ;;  %s387_s16 = scalar_lea.vmem %s369_s15, %s571_s21  }
  0x62 PF: > { %p8_p2 = scmp.ge.s32.totalorder %s780_s10, 4   ;;  %s931_s6 = smov %s717_s7 }
  0x63   : > { %s932_s7 = smov %s788_s13  ;;  %s933_s8 = smov %s780_s10 }
  0x64   :  { %10 = sbr.rel (!%p8_p2) target bundleno = 2 (0x2), region = 132 }

// kernel: convnet_forward.8
= control target key start
LH: loop header
LB: loop body
LE: loop exit
PB: predicated region body
PF: predicated region fallthrough
CT: control target
= control target key end

     0   :  { %s3689_s12 = smov 0   ;;  %s3691_s13 = smov 0   ;;  %s4543_s0 = inlined_call_operand.vmem [shape: bf16[392,800], index: 0, kind: input, shape index: {}]   ;;  %s4544_s1 = inlined_call_operand.vmem [shape: bf16[800,128], index: 1, kind: input, shape index: {}]   ;;  %s4545_s2 = inlined_call_operand.vmem [shape: f32[1,128], index: 2, kind: input, shape index: {}]   ;;  %s4546_s3 = inlined_call_operand.vmem [shape: bf16[392,128], index: 3, kind: output, shape index: {}]  }
   0x1   :  { %s3693_s14 = smov 0   ;;  %s3695_s15 = smov 0  }
   0x2   :  { %s3697_s16 = smov 0  }
   0x3 LB: > { %s2484_s17 = sadd.s32 4294967295, %s3635_s16   ;;  %s25_s18 = sadd.s32 1, %s3631_s15  ;;  %s3635_s16 = sphi %s3697_s16, %s13_s16   ;;  %s3631_s15 = sphi %s3695_s15, %s4556_s15   ;;  %s3627_s14 = sphi %s3693_s14, %s4555_s14   ;;  %s3623_s13 = sphi %s3691_s13, %s4554_s13   ;;  %s3619_s12 = sphi %s3689_s12, %s4553_s12  }
   0x4   : > { %p27_p0 = scmp.ge.s32.totalorder %s25_s18, 2  ;;  %s112_s19 = sadd.s32 1, %s3623_s13 }
   0x5   : > { %p122_p1 = scmp.ne.s32.totalorder %s3623_s13, %s3619_s12  ;;  %p123_p2 = scmp.eq.s32.totalorder %s2484_s17, 1 }
   0x6   : > { %s4558_s18 = smov (%p27_p0, %s25_s18), 0  ;;  %p2490_p4 = scmp.ge.s32.totalorder %s3635_s16, 1 }
   0x7   : > { %p3721_p3 = por %p123_p2, %p122_p1  ;;  %s107_s21 = ssub.s32 %s3631_s15, %s4558_s18 }
   0x8   : > { %p180_p5 = scmp.lt.s32.totalorder %s3635_s16, 3  ;;  %p110_p6 = scmp.eq.s32.totalorder %s107_s21, 0 }
   0xa   : > { %p181_p7 = pnand %p2490_p4, %p180_p5 }
   0xb   : > { %s3730_s22 = scalar_select %p110_p6, %s3623_s13, %s112_s19  }
   0xc   : > { %184 = sbr.rel (%p181_p7) target bundleno = 698 (0x2ba), region = 32  ;;  %s3776_s21 = sshll.u32 (!%p181_p7), %s3627_s14, 5 }
   0xd   : > { %p222_p8 = scmp.lt.s32.totalorder (!%p181_p7), %s3776_s21, 48  ;;  %s213_s25 = sand.u32 (!%p181_p7), 1, %s3619_s12  }
   0xe   : > { %s2491_s26 = sshll.u32 (!%p181_p7), %s213_s25, 7 }
   0xf   : > { %s4295_s12 = scalar_lea.vmem (!%p181_p7), [#allocation2], %s2491_s26  }
  0x11   : > { %v3294_v0 = vld [vmem:[%s4544_s1 + $0x38] sm:$0xff]  ;;  %v3293_v3 = vld [vmem:[%s4544_s1 + $0x30] sm:$0xff]  ;;  %v3292_v6 = vld [vmem:[%s4544_s1 + $0x28] sm:$0xff]  ;;  %s223_s4 = scalar_select %p222_p8, %s3776_s21, 48  ;;  %vm1338_vm0 = vcmask 261120  }
  0x12   : > { %v3738_v1 = vld [vmem:[%s4544_s1 + $0xb8] sm:$0xff]  ;;  %1387 = vmatpush.bf16.msra.mxu0 %v3294_v0  ;;  %3435 = vmatpush.bf16.msra.mxu3 %v3294_v0  ;;  %v3753_v4 = vld [vmem:[%s4544_s1 + $0xb0] sm:$0xff]  ;;  %v3768_v7 = vld [vmem:[%s4544_s1 + $0xa8] sm:$0xff]  ;;  %s3337_s27 = sshll.u32 (%p3721_p3), %s3627_s14, 7 }
  0x13   : > { %v3743_v2 = vld [vmem:[%s4544_s1 + $0x78] sm:$0xff]  ;;  %1565 = vmatpush.bf16.msra.mxu2 %v3738_v1  ;;  %v3758_v5 = vld [vmem:[%s4544_s1 + $0x70] sm:$0xff]  ;;  %v3773_v8 = vld [vmem:[%s4544_s1 + $0x68] sm:$0xff]  ;;  %s3459_s11 = smul.u32 28, %s223_s4  ;;  %s4403_s4 = scalar_lea.vmem (%p3721_p3), %s4546_s3, %s3337_s27  }
  0x14   : > { %1476 = vmatpush.bf16.msra.mxu1 %v3743_v2  ;;  %v3291_v9 = vld [vmem:[%s4544_s1 + $0x20] sm:$0xff]  ;;  %v3290_v12 = vld [vmem:[%s4544_s1 + $0x18] sm:$0xff]  ;;  %v3289_v15 = vld [vmem:[%s4544_s1 + $0x10] sm:$0xff] }
  0x15   : > { %v3787_v10 = vld [vmem:[%s4544_s1 + $0xa0] sm:$0xff]  ;;  %v3803_v13 = vld [vmem:[%s4544_s1 + $0x98] sm:$0xff]  ;;  %v3818_v16 = vld [vmem:[%s4544_s1 + $0x90] sm:$0xff]  ;;  %s3831_s29 = scalar_lea.vmem %s4543_s0, %s3459_s11 }
  0x16   : > { %1388 = vmatpush.bf16.msra.mxu0 %v3293_v3  ;;  %3436 = vmatpush.bf16.msra.mxu3 %v3293_v3  ;;  %v3792_v11 = vld [vmem:[%s4544_s1 + $0x60] sm:$0xff]  ;;  %v3808_v14 = vld [vmem:[%s4544_s1 + $0x58] sm:$0xff]  ;;  %v3823_v17 = vld [vmem:[%s4544_s1 + $0x50] sm:$0xff] }
  0x17   : > { %1566 = vmatpush.bf16.msra.mxu2 %v3753_v4  ;;  %v3288_v18 = vld [vmem:[%s4544_s1 + $0x8] sm:$0xff]  ;;  %v3287_v21 = vld [vmem:[%s4544_s1] sm:$0xff]  ;;  %v3178_v25 = vld [vmem:[%s3831_s29 + $0x18] sm:$0xf0] }
  0x18   : > { %1477 = vmatpush.bf16.msra.mxu1 %v3758_v5  ;;  %v3838_v19 = vld [vmem:[%s4544_s1 + $0x88] sm:$0xff]  ;;  %v3851_v22 = vld [vmem:[%s4544_s1 + $0x80] sm:$0xff]  ;;  %v3262_v27 = vld [vmem:[%s3831_s29 + $0x2b8] sm:$0xf0] }
  0x19   : > { %v3843_v20 = vld [vmem:[%s4544_s1 + $0x48] sm:$0xff]  ;;  %v3856_v23 = vld [vmem:[%s4544_s1 + $0x40] sm:$0xff]  ;;  %v3326_v37 = vld [vmem:[%s4544_s1 + $0x138] sm:$0xff] }
  0x1a   : > { %1389 = vmatpush.bf16.msra.mxu0 %v3292_v6  ;;  %3437 = vmatpush.bf16.msra.mxu3 %v3292_v6  ;;  %v2496_v24 = vld [vmem:[%s3831_s29] sm:$0xf]  ;;  %v2504_v28 = vld [vmem:[%s3831_s29 + $0x8] sm:$0xf]  ;;  %v3179_v29 = vld [vmem:[%s3831_s29 + $0x20] sm:$0xf0] }
  0x1b   : > { %1567 = vmatpush.bf16.msra.mxu2 %v3768_v7  ;;  %v2832_v26 = vld [vmem:[%s3831_s29 + $0x2a0] sm:$0xf]  ;;  %v3175_v30 = vld [vmem:[%s3831_s29 + $0x4] sm:$0xf]  ;;  %v3336_v32 = vld [vmem:[%s4544_s1 + $0x188] sm:$0xff]  ;;  %v2497_v33 = vor.u32 %v3178_v25, %v2496_v24  ;;  %v2505_v35 = vor.u32 %v3179_v29, %v2504_v28 }
  0x1c   : > { %1478 = vmatpush.bf16.msra.mxu1 %v3773_v8  ;;  %v2498_v31 = vld [vmem:[%s3831_s29 + $0x1c] sm:$0xf0]  ;;  %v2833_v34 = vor.u32 %v3262_v27, %v2832_v26  ;;  %v3334_v38 = vld [vmem:[%s4544_s1 + $0x178] sm:$0xff]  ;;  %v3325_v39 = vld [vmem:[%s4544_s1 + $0x130] sm:$0xff] }
  0x1d   : > { %v2501_v36 = vor.u32 %v3175_v30, %v2498_v31  ;;  %v3333_v40 = vld [vmem:[%s4544_s1 + $0x170] sm:$0xff]  ;;  %v2524_v41 = vld [vmem:[%s3831_s29 + $0x38] sm:$0xf]  ;;  %v2532_v45 = vld [vmem:[%s3831_s29 + $0x40] sm:$0xf] }
  0x1e   : > { %1390 = vmatpush.bf16.msra.mxu0 %v3291_v9  ;;  %3438 = vmatpush.bf16.msra.mxu3 %v3291_v9  ;;  %v3185_v42 = vld [vmem:[%s3831_s29 + $0x50] sm:$0xf0]  ;;  %v2860_v43 = vld [vmem:[%s3831_s29 + $0x2d8] sm:$0xf]  ;;  %v3186_v46 = vld [vmem:[%s3831_s29 + $0x58] sm:$0xf0] }
  0x1f   : > { %1568 = vmatpush.bf16.msra.mxu2 %v3787_v10  ;;  %v3269_v44 = vld [vmem:[%s3831_s29 + $0x2f0] sm:$0xf0]  ;;  %v3182_v47 = vld [vmem:[%s3831_s29 + $0x3c] sm:$0xf]  ;;  %v2526_v48 = vld [vmem:[%s3831_s29 + $0x54] sm:$0xf0]  ;;  %v2525_v49 = vor.u32 %v3185_v42, %v2524_v41  ;;  %v2533_v51 = vor.u32 %v3186_v46, %v2532_v45 }
  0x20   : > { %1479 = vmatpush.bf16.msra.mxu1 %v3792_v11  ;;  %v2861_v50 = vor.u32 %v3269_v44, %v2860_v43  ;;  %v2529_v52 = vor.u32 %v3182_v47, %v2526_v48  ;;  %v3324_v53 = vld [vmem:[%s4544_s1 + $0x128] sm:$0xff]  ;;  %v2552_v55 = vld [vmem:[%s3831_s29 + $0x70] sm:$0xf]  ;;  %v2560_v59 = vld [vmem:[%s3831_s29 + $0x78] sm:$0xf] }
  0x21   : > { %v3332_v54 = vld [vmem:[%s4544_s1 + $0x168] sm:$0xff]  ;;  %v2888_v57 = vld [vmem:[%s3831_s29 + $0x310] sm:$0xf]  ;;  %v3193_v60 = vld [vmem:[%s3831_s29 + $0x90] sm:$0xf0] }
  0x22   : > { %1391 = vmatpush.bf16.msra.mxu0 %v3290_v12  ;;  %3439 = vmatpush.bf16.msra.mxu3 %v3290_v12  ;;  %v3192_v56 = vld [vmem:[%s3831_s29 + $0x88] sm:$0xf0]  ;;  %v3189_v61 = vld [vmem:[%s3831_s29 + $0x74] sm:$0xf]  ;;  %v2554_v62 = vld [vmem:[%s3831_s29 + $0x8c] sm:$0xf0] }
  0x23   : > { %1569 = vmatpush.bf16.msra.mxu2 %v3803_v13  ;;  %v3276_v58 = vld [vmem:[%s3831_s29 + $0x328] sm:$0xf0]  ;;  %v2553_v63 = vor.u32 %v3192_v56, %v2552_v55  ;;  %v2557_v3 = vor.u32 %v3189_v61, %v2554_v62  ;;  %v3199_v6 = vld [vmem:[%s3831_s29 + $0xc0] sm:$0xf0]  ;;  %v2616_v24 = vld [vmem:[%s3831_s29 + $0xe8] sm:$0xf] }
  0x24   : > { %1480 = vmatpush.bf16.msra.mxu1 %v3808_v14  ;;  %v2889_v0 = vor.u32 %v3276_v58, %v2888_v57  ;;  %v3283_v9 = vld [vmem:[%s3831_s29 + $0x360] sm:$0xf0]  ;;  %v3200_v12 = vld [vmem:[%s3831_s29 + $0xc8] sm:$0xf0]  ;;  %v2610_v27 = vld [vmem:[%s3831_s29 + $0xfc] sm:$0xf0] }
  0x25   : > { %v3207_v25 = vld [vmem:[%s3831_s29 + $0x100] sm:$0xf0]  ;;  %v3330_v31 = vld [vmem:[%s4544_s1 + $0x158] sm:$0xff]  ;;  %v2664_v44 = vld [vmem:[%s3831_s29 + $0x150] sm:$0xf] }
  0x26   : > { %1392 = vmatpush.bf16.msra.mxu0 %v3289_v15  ;;  %3440 = vmatpush.bf16.msra.mxu3 %v3289_v15  ;;  %v2582_v15 = vld [vmem:[%s3831_s29 + $0xc4] sm:$0xf0]  ;;  %v3203_v26 = vld [vmem:[%s3831_s29 + $0xe4] sm:$0xf]  ;;  %v3220_v45 = vld [vmem:[%s3831_s29 + $0x168] sm:$0xf0] }
  0x27   : > { %1570 = vmatpush.bf16.msra.mxu2 %v3818_v16  ;;  %v2613_v30 = vor.u32 %v3203_v26, %v2610_v27  ;;  %v3273_v46 = vld [vmem:[%s3831_s29 + $0x314] sm:$0xf]  ;;  %v2890_v47 = vld [vmem:[%s3831_s29 + $0x32c] sm:$0xf0]  ;;  %v2672_v48 = vld [vmem:[%s3831_s29 + $0x158] sm:$0xf] }
  0x28   : > { %1481 = vmatpush.bf16.msra.mxu1 %v3823_v17  ;;  %v3318_v56 = vld [vmem:[%s4544_s1 + $0xf8] sm:$0xff]  ;;  %v3321_v57 = vld [vmem:[%s4544_s1 + $0x110] sm:$0xff]  ;;  %v3280_v62 = vld [vmem:[%s3831_s29 + $0x34c] sm:$0xf] }
  0x29   : > { %v3329_v58 = vld [vmem:[%s4544_s1 + $0x150] sm:$0xff] }
  0x2a   : > { %1393 = vmatpush.bf16.msra.mxu0 %v3288_v18  ;;  %3441 = vmatpush.bf16.msra.mxu3 %v3288_v18  ;;  %v3317_v61 = vld [vmem:[%s4544_s1 + $0xf0] sm:$0xff] }
  0x2b   : > { %1571 = vmatpush.bf16.msra.mxu2 %v3838_v19 }
  0x2c   : > { %1482 = vmatpush.bf16.msra.mxu1 %v3843_v20 }
  0x2e   : > { %1394 = vmatpush.bf16.msra.mxu0 %v3287_v21  ;;  %3442 = vmatpush.bf16.msra.mxu3 %v3287_v21  ;;  %v3259_v21 = vld [vmem:[%s3831_s29 + $0x2a4] sm:$0xf] }
  0x2f   : > { %1572 = vmatpush.bf16.msra.mxu2 %v3851_v22 }
  0x30   : > { %1483 = vmatpush.bf16.msra.mxu1 %v3856_v23 }
  0x31   : > { %1395 = vmatmul.bf16.vlgmr.msra.gmra.mxu0 %v2497_v33  ;;  %1455 = vmatmul.bf16.vlgmr.msra.gmra.mxu3 %v2833_v34  ;;  %v3213_v33 = vld [vmem:[%s3831_s29 + $0x130] sm:$0xf0]  ;;  %v3266_v34 = vld [vmem:[%s3831_s29 + $0x2dc] sm:$0xf] }
  0x32   : > { %3443 = vmatpush.bf16.msrb.mxu3 %v3743_v2  ;;  %1573 = vmatmul.bf16.vlgmr.msra.gmra.mxu2 %v2505_v35  ;;  %v2561_v2 = vor.u32 %v3193_v60, %v2560_v59  ;;  %v2862_v35 = vld [vmem:[%s3831_s29 + $0x2f4] sm:$0xf0]  ;;  %v2692_v59 = vld [vmem:[%s3831_s29 + $0x188] sm:$0xf]  ;;  %v3227_v60 = vld [vmem:[%s3831_s29 + $0x1a0] sm:$0xf0] }
  0x33   : > { %1927 = vmatpush.bf16.msrb.mxu2 %v3336_v32  ;;  %1484 = vmatmul.bf16.vlgmr.msra.gmra.mxu1 %v2501_v36  ;;  %v2636_v32 = vld [vmem:[%s3831_s29 + $0x118] sm:$0xf]  ;;  %v2644_v36 = vld [vmem:[%s3831_s29 + $0x120] sm:$0xf]  ;;  %v2865_v41 = vor.u32 %v3266_v34, %v2862_v35 }
  0x34   : > { %1743 = vmatpush.bf16.msrb.mxu0 %v3326_v37  ;;  %1832 = vmatpush.bf16.msrb.mxu1 %v3334_v38  ;;  %v3214_v37 = vld [vmem:[%s3831_s29 + $0x138] sm:$0xf0] }
  0x35   : > { %v3210_v38 = vld [vmem:[%s3831_s29 + $0x11c] sm:$0xf]  ;;  %v2645_v42 = vor.u32 %v3214_v37, %v2644_v36  ;;  %v2748_v37 = vld [vmem:[%s3831_s29 + $0x1f8] sm:$0xf] }
  0x36   : > { %3444 = vmatpush.bf16.msrb.mxu3 %v3758_v5  ;;  %v2580_v5 = vld [vmem:[%s3831_s29 + $0xa8] sm:$0xf] }
  0x38   : > { %1744 = vmatpush.bf16.msrb.mxu0 %v3325_v39  ;;  %1833 = vmatpush.bf16.msrb.mxu1 %v3333_v40  ;;  %v2638_v39 = vld [vmem:[%s3831_s29 + $0x134] sm:$0xf0]  ;;  %v2637_v40 = vor.u32 %v3213_v33, %v2636_v32 }
  0x39   : > { %v2641_v43 = vor.u32 %v3210_v38, %v2638_v39  ;;  %v3241_v38 = vld [vmem:[%s3831_s29 + $0x210] sm:$0xf0] }
  0x3a   : > { %3445 = vmatpush.bf16.msrb.mxu3 %v3773_v8  ;;  %v2916_v8 = vld [vmem:[%s3831_s29 + $0x348] sm:$0xf]  ;;  %v3313_v39 = vld [vmem:[%s4544_s1 + $0xd0] sm:$0xff] }
  0x3c   : > { %1745 = vmatpush.bf16.msrb.mxu0 %v3324_v53  ;;  %1834 = vmatpush.bf16.msrb.mxu1 %v3332_v54  ;;  %v2893_v53 = vor.u32 %v3273_v46, %v2890_v47 }
  0x3e   : > { %3446 = vmatpush.bf16.msrb.mxu3 %v3792_v11  ;;  %v2588_v11 = vld [vmem:[%s3831_s29 + $0xb0] sm:$0xf] }
  0x3f   : > { %v2589_v18 = vor.u32 %v3200_v12, %v2588_v11  ;;  %v3316_v12 = vld [vmem:[%s4544_s1 + $0xe8] sm:$0xff] }
  0x41   : > { %1400 = vmatmul.bf16.gmra.mxu0 %v2525_v49  ;;  %1460 = vmatmul.bf16.gmra.mxu3 %v2861_v50  ;;  %v3221_v49 = vld [vmem:[%s3831_s29 + $0x170] sm:$0xf0] }
  0x42   : > { %3447 = vmatpush.bf16.msrb.mxu3 %v3808_v14  ;;  %1578 = vmatmul.bf16.gmra.mxu2 %v2533_v51  ;;  %v3196_v14 = vld [vmem:[%s3831_s29 + $0xac] sm:$0xf]  ;;  %v3217_v50 = vld [vmem:[%s3831_s29 + $0x154] sm:$0xf]  ;;  %v2666_v51 = vld [vmem:[%s3831_s29 + $0x16c] sm:$0xf0]  ;;  %v2673_v54 = vor.u32 %v3221_v49, %v2672_v48  ;;  %v2749_v48 = vor.u32 %v3241_v38, %v2748_v37 }
  0x43   : > { %1489 = vmatmul.bf16.gmra.mxu1 %v2529_v52  ;;  %v2665_v52 = vor.u32 %v3220_v45, %v2664_v44  ;;  %v2669_v55 = vor.u32 %v3217_v50, %v2666_v51  ;;  %v3238_v44 = vld [vmem:[%s3831_s29 + $0x1fc] sm:$0xf]  ;;  %v2750_v45 = vld [vmem:[%s3831_s29 + $0x214] sm:$0xf0]  ;;  %v3284_v37 = vld [vmem:[%s3831_s29 + $0x368] sm:$0xf0] }
  0x44   : > { %v3256_v38 = vld [vmem:[%s3831_s29 + $0x288] sm:$0xf0] }
  0x46   : > { %3448 = vmatpush.bf16.msrb.mxu3 %v3823_v17  ;;  %v2917_v17 = vor.u32 %v3283_v9, %v2916_v8 }
  0x4a   : > { %3449 = vmatpush.bf16.msrb.mxu3 %v3843_v20  ;;  %v3206_v20 = vld [vmem:[%s3831_s29 + $0xf8] sm:$0xf0] }
  0x4e   : > { %3450 = vmatpush.bf16.msrb.mxu3 %v3856_v23  ;;  %v2834_v23 = vld [vmem:[%s3831_s29 + $0x2bc] sm:$0xf0] }
  0x4f   : > { %v2837_v29 = vor.u32 %v3259_v21, %v2834_v23  ;;  %v2722_v21 = vld [vmem:[%s3831_s29 + $0x1dc] sm:$0xf0] }
  0x50   : > { %v4013_v23 = vld [vmem:[%s4545_s2] ss:$0 sm:$0xff] }
  0x51   : > { %1405 = vmatmul.bf16.gmra.mxu0 %v2553_v63  ;;  %1465 = vmatmul.bf16.gmra.mxu3 %v2889_v0  ;;  %v2918_v63 = vld [vmem:[%s3831_s29 + $0x364] sm:$0xf0]  ;;  %v2700_v0 = vld [vmem:[%s3831_s29 + $0x190] sm:$0xf] }
  0x52   : > { %3451 = vmatpush.bf16.msra.mxu3 %v3738_v1  ;;  %1583 = vmatmul.bf16.gmra.mxu2 %v2561_v2  ;;  %v2581_v1 = vor.u32 %v3199_v6, %v2580_v5  ;;  %v3228_v2 = vld [vmem:[%s3831_s29 + $0x1a8] sm:$0xf0]  ;;  %v2694_v5 = vld [vmem:[%s3831_s29 + $0x1a4] sm:$0xf0]  ;;  %v2693_v6 = vor.u32 %v3227_v60, %v2692_v59  ;;  %v2921_v8 = vor.u32 %v3280_v62, %v2918_v63  ;;  %v3327_v59 = vld [vmem:[%s4544_s1 + $0x140] sm:$0xff] }
  0x53   : > { %1494 = vmatmul.bf16.gmra.mxu1 %v2557_v3  ;;  %v3224_v3 = vld [vmem:[%s3831_s29 + $0x18c] sm:$0xf]  ;;  %v2701_v9 = vor.u32 %v3228_v2, %v2700_v0 }
  0x54   : > { %v2697_v11 = vor.u32 %v3224_v3, %v2694_v5  ;;  %v2776_v5 = vld [vmem:[%s3831_s29 + $0x230] sm:$0xf] }
  0x56   : > { %3452 = vmatpush.bf16.msra.mxu3 %v3753_v4  ;;  %v2585_v4 = vor.u32 %v3196_v14, %v2582_v15  ;;  %v2720_v14 = vld [vmem:[%s3831_s29 + $0x1c0] sm:$0xf]  ;;  %v3234_v15 = vld [vmem:[%s3831_s29 + $0x1d8] sm:$0xf0] }
  0x5a   : > { %3453 = vmatpush.bf16.msra.mxu3 %v3768_v7  ;;  %v3323_v7 = vld [vmem:[%s4544_s1 + $0x120] sm:$0xff] }
  0x5b   : > { %1746 = vmatpush.bf16.msrb.mxu0 %v3323_v7  ;;  %v2840_v7 = vld [vmem:[%s3831_s29 + $0x2a8] sm:$0xf] }
  0x5e   : > { %3454 = vmatpush.bf16.msra.mxu3 %v3787_v10  ;;  %v3331_v10 = vld [vmem:[%s4544_s1 + $0x160] sm:$0xff] }
  0x5f   : > { %1835 = vmatpush.bf16.msrb.mxu1 %v3331_v10  ;;  %v3263_v10 = vld [vmem:[%s3831_s29 + $0x2c0] sm:$0xf0] }
  0x61   : > { %1410 = vmatmul.bf16.gmra.mxu0 %v2581_v1  ;;  %1470 = vmatmul.bf16.gmra.mxu3 %v2917_v17  ;;  %v3315_v1 = vld [vmem:[%s4544_s1 + $0xe0] sm:$0xff]  ;;  %v3320_v17 = vld [vmem:[%s4544_s1 + $0x108] sm:$0xff] }
  0x62   : > { %3455 = vmatpush.bf16.msra.mxu3 %v3803_v13  ;;  %1588 = vmatmul.bf16.gmra.mxu2 %v2589_v18  ;;  %v2608_v13 = vld [vmem:[%s3831_s29 + $0xe0] sm:$0xf]  ;;  %v3328_v18 = vld [vmem:[%s4544_s1 + $0x148] sm:$0xff] }
  0x63   : > { %1499 = vmatmul.bf16.gmra.mxu1 %v2585_v4  ;;  %v2609_v28 = vor.u32 %v3206_v20, %v2608_v13  ;;  %v2728_v4 = vld [vmem:[%s3831_s29 + $0x1c8] sm:$0xf]  ;;  %v3235_v13 = vld [vmem:[%s3831_s29 + $0x1e0] sm:$0xf0] }
  0x64   : > { %1836 = vmatpush.bf16.msrb.mxu1 %v3330_v31  ;;  %v3231_v20 = vld [vmem:[%s3831_s29 + $0x1c4] sm:$0xf]  ;;  %v2729_v27 = vor.u32 %v3235_v13, %v2728_v4 }
  0x66   : > { %3456 = vmatpush.bf16.msra.mxu3 %v3818_v16  ;;  %v2617_v16 = vor.u32 %v3207_v25, %v2616_v24  ;;  %v2721_v24 = vor.u32 %v3234_v15, %v2720_v14  ;;  %v2841_v25 = vor.u32 %v3263_v10, %v2840_v7  ;;  %v3249_v14 = vld [vmem:[%s3831_s29 + $0x250] sm:$0xf0] }
  0x67   : > { %v3245_v15 = vld [vmem:[%s3831_s29 + $0x234] sm:$0xf] }
  0x68   : > { %1837 = vmatpush.bf16.msrb.mxu1 %v3329_v58  ;;  %v3319_v58 = vld [vmem:[%s4544_s1 + $0x100] sm:$0xff] }
  0x6a   : > { %3457 = vmatpush.bf16.msra.mxu3 %v3838_v19  ;;  %v3335_v19 = vld [vmem:[%s4544_s1 + $0x180] sm:$0xff] }
  0x6b   : > { %1928 = vmatpush.bf16.msrb.mxu2 %v3335_v19  ;;  %v3314_v19 = vld [vmem:[%s4544_s1 + $0xd8] sm:$0xff] }
  0x6c   : > { %1838 = vmatpush.bf16.msrb.mxu1 %v3328_v18 }
  0x6e   : > { %3458 = vmatpush.bf16.msra.mxu3 %v3851_v22  ;;  %v3322_v22 = vld [vmem:[%s4544_s1 + $0x118] sm:$0xff] }
  0x6f   : > { %1747 = vmatpush.bf16.msrb.mxu0 %v3322_v22 }
  0x70   : > { %1839 = vmatpush.bf16.msrb.mxu1 %v3327_v59 }
  0x71   : > { %1415 = vmatmul.bf16.gmra.mxu0 %v2609_v28  ;;  %1544 = vmatmul.bf16.vlgmr.msrb.gmra.mxu3 %v2837_v29  ;;  %v2725_v28 = vor.u32 %v3231_v20, %v2722_v21 }
  0x72   : > { %1593 = vmatmul.bf16.gmra.mxu2 %v2617_v16  ;;  %1654 = vmatpush.bf16.msrb.mxu3 %v3318_v56 }
  0x73   : > { %1504 = vmatmul.bf16.gmra.mxu1 %v2613_v30  ;;  %1748 = vmatpush.bf16.msrb.mxu0 %v3321_v57  ;;  %v3312_v57 = vld [vmem:[%s4544_s1 + $0xc8] sm:$0xff] }
  0x76   : > { %1655 = vmatpush.bf16.msrb.mxu3 %v3317_v61 }
  0x77   : > { %1749 = vmatpush.bf16.msrb.mxu0 %v3320_v17 }
  0x7a   : > { %1656 = vmatpush.bf16.msrb.mxu3 %v3316_v12  ;;  %v3277_v12 = vld [vmem:[%s3831_s29 + $0x330] sm:$0xf0] }
  0x7b   : > { %1750 = vmatpush.bf16.msrb.mxu0 %v3319_v58 }
  0x7e   : > { %1657 = vmatpush.bf16.msrb.mxu3 %v3315_v1  ;;  %v2778_v1 = vld [vmem:[%s3831_s29 + $0x24c] sm:$0xf0] }
  0x7f   : > { %v2781_v21 = vor.u32 %v3245_v15, %v2778_v1 }
  0x81   : > { %1420 = vmatmul.bf16.gmra.mxu0 %v2637_v40  ;;  %1549 = vmatmul.bf16.gmra.mxu3 %v2865_v41  ;;  %v2756_v40 = vld [vmem:[%s3831_s29 + $0x200] sm:$0xf] }
  0x82   : > { %1598 = vmatmul.bf16.gmra.mxu2 %v2645_v42  ;;  %1658 = vmatpush.bf16.msrb.mxu3 %v3314_v19  ;;  %v2868_v41 = vld [vmem:[%s3831_s29 + $0x2e0] sm:$0xf]  ;;  %v3270_v42 = vld [vmem:[%s3831_s29 + $0x2f8] sm:$0xf0] }
  0x83   : > { %1509 = vmatmul.bf16.gmra.mxu1 %v2641_v43  ;;  %v3242_v43 = vld [vmem:[%s3831_s29 + $0x218] sm:$0xf0]  ;;  %v2869_v49 = vor.u32 %v3270_v42, %v2868_v41 }
  0x86   : > { %1659 = vmatpush.bf16.msrb.mxu3 %v3313_v39  ;;  %v3252_v39 = vld [vmem:[%s3831_s29 + $0x26c] sm:$0xf] }
  0x8a   : > { %1660 = vmatpush.bf16.msrb.mxu3 %v3312_v57 }
  0x91   : > { %1425 = vmatmul.bf16.gmra.mxu0 %v2665_v52  ;;  %1554 = vmatmul.bf16.gmra.mxu3 %v2893_v53  ;;  %v2757_v52 = vor.u32 %v3242_v43, %v2756_v40  ;;  %v2753_v53 = vor.u32 %v3238_v44, %v2750_v45  ;;  %v2806_v40 = vld [vmem:[%s3831_s29 + $0x284] sm:$0xf0] }
  0x92   : > { %1603 = vmatmul.bf16.gmra.mxu2 %v2673_v54 }
  0x93   : > { %1514 = vmatmul.bf16.gmra.mxu1 %v2669_v55 }
  0xa1   : > { %1430 = vmatmul.bf16.gmra.mxu0 %v2693_v6  ;;  %1559 = vmatmul.bf16.gmra.mxu3 %v2921_v8  ;;  %v3248_v6 = vld [vmem:[%s3831_s29 + $0x248] sm:$0xf0]  ;;  %v3311_v8 = vld [vmem:[%s4544_s1 + $0xc0] sm:$0xff] }
  0xa2   : > { %1608 = vmatmul.bf16.gmra.mxu2 %v2701_v9  ;;  %v2784_v9 = vld [vmem:[%s3831_s29 + $0x238] sm:$0xf]  ;;  %1661 = vmatpush.bf16.msrb.mxu3 %v3311_v8  ;;  %v2777_v4 = vor.u32 %v3248_v6, %v2776_v5  ;;  %v3181_v6 = vld [vmem:[%s3831_s29 + $0x30] sm:$0xf0] }
  0xa3   : > { %1519 = vmatmul.bf16.gmra.mxu1 %v2697_v11  ;;  %v2896_v11 = vld [vmem:[%s3831_s29 + $0x318] sm:$0xf]  ;;  %v2785_v20 = vor.u32 %v3249_v14, %v2784_v9  ;;  %v3177_v8 = vld [vmem:[%s3831_s29 + $0x14] sm:$0xf]  ;;  %v2514_v9 = vld [vmem:[%s3831_s29 + $0x2c] sm:$0xf0] }
  0xa4   : > { %v2897_v7 = vor.u32 %v3277_v12, %v2896_v11  ;;  %v2520_v5 = vld [vmem:[%s3831_s29 + $0x18] sm:$0xf] }
  0xae   : > { %v1396_v26 = vpop.f32.mrf.mxu0 }
  0xaf   : > { %v1397_v29 = vadd.f32 %v4013_v23, %v1396_v26 }
  0xb0   : > { %v1485_v16 = vpop.f32.mrf.mxu1 }
  0xb1   : > { %v1486_v30 = vadd.f32 %v1485_v16, %v1397_v29  ;;  %1435 = vmatmul.bf16.gmra.mxu0 %v2721_v24  ;;  %1633 = vmatmul.bf16.vlgmr.msra.gmra.mxu3 %v2841_v25 }
  0xb2   : > { %1613 = vmatmul.bf16.gmra.mxu2 %v2729_v27 }
  0xb3   : > { %1524 = vmatmul.bf16.gmra.mxu1 %v2725_v28 }
  0xb4   : > { %v4019_v22 = vpop.f32.mrf.mxu3 }
  0xb5   : > { %v1574_v31 = vpop.f32.mrf.mxu2 }
  0xb6   : > { %v4021_v32 = vadd.f32 %v1574_v31, %v1486_v30  ;;  %v1398_v33 = vpop.f32.mrf.mxu0 }
  0xb7   : > { %v1399_v34 = vadd.f32 %v4013_v23, %v1398_v33  ;;  %v2804_v33 = vld [vmem:[%s3831_s29 + $0x268] sm:$0xf] }
  0xb8   : > { %v1487_v35 = vpop.f32.mrf.mxu1 }
  0xb9   : > { %v1488_v36 = vadd.f32 %v1487_v35, %v1399_v34  ;;  %v3255_v34 = vld [vmem:[%s3831_s29 + $0x280] sm:$0xf0]  ;;  %v2812_v35 = vld [vmem:[%s3831_s29 + $0x270] sm:$0xf] }
  0xba   : > { %v2805_v43 = vor.u32 %v3255_v34, %v2804_v33  ;;  %v3183_v34 = vld [vmem:[%s3831_s29 + $0x44] sm:$0xf] }
  0xbc   : > { %v4035_v46 = vpop.f32.mrf.mxu3 }
  0xbd   : > { %v1576_v47 = vpop.f32.mrf.mxu2 }
  0xbe   : > { %v4037_v50 = vadd.f32 %v1576_v47, %v1488_v36  ;;  %v1401_v51 = vpop.f32.mrf.mxu0  ;;  %v2924_v36 = vld [vmem:[%s3831_s29 + $0x350] sm:$0xf] }
  0xbf   : > { %v1402_v54 = vadd.f32 %v4013_v23, %v1401_v51  ;;  %v2925_v44 = vor.u32 %v3284_v37, %v2924_v36  ;;  %v2540_v36 = vld [vmem:[%s3831_s29 + $0x48] sm:$0xf]  ;;  %v3187_v37 = vld [vmem:[%s3831_s29 + $0x60] sm:$0xf0] }
  0xc0   : > { %v1490_v55 = vpop.f32.mrf.mxu1 }
  0xc1   : > { %v1491_v56 = vadd.f32 %v1490_v55, %v1402_v54  ;;  %1440 = vmatmul.bf16.gmra.mxu0 %v2749_v48  ;;  %1638 = vmatmul.bf16.gmra.mxu3 %v2869_v49  ;;  %v2813_v48 = vor.u32 %v3256_v38, %v2812_v35  ;;  %v2809_v49 = vor.u32 %v3252_v39, %v2806_v40  ;;  %v2534_v35 = vld [vmem:[%s3831_s29 + $0x5c] sm:$0xf0]  ;;  %v2548_v38 = vld [vmem:[%s3831_s29 + $0x50] sm:$0xf]  ;;  %v3188_v39 = vld [vmem:[%s3831_s29 + $0x68] sm:$0xf0] }
  0xc2   : > { %1618 = vmatmul.bf16.gmra.mxu2 %v2757_v52  ;;  %v3184_v40 = vld [vmem:[%s3831_s29 + $0x4c] sm:$0xf] }
  0xc3   : > { %1529 = vmatmul.bf16.gmra.mxu1 %v2753_v53 }
  0xc4   : > { %v4049_v60 = vpop.f32.mrf.mxu3 }
  0xc5   : > { %v1579_v61 = vpop.f32.mrf.mxu2 }
  0xc6   : > { %v4051_v62 = vadd.f32 %v1579_v61, %v1491_v56  ;;  %v1403_v63 = vpop.f32.mrf.mxu0 }
  0xc7   : > { %v1404_v0 = vadd.f32 %v4013_v23, %v1403_v63  ;;  %v3176_v63 = vld [vmem:[%s3831_s29 + $0xc] sm:$0xf] }
  0xc8   : > { %v1492_v2 = vpop.f32.mrf.mxu1 }
  0xc9   : > { %v1493_v3 = vadd.f32 %v1492_v2, %v1404_v0  ;;  %v2506_v0 = vld [vmem:[%s3831_s29 + $0x24] sm:$0xf0]  ;;  %v2512_v2 = vld [vmem:[%s3831_s29 + $0x10] sm:$0xf] }
  0xca   : > { %v2509_v14 = vor.u32 %v3176_v63, %v2506_v0 }
  0xcc   : > { %v4065_v17 = vpop.f32.mrf.mxu3 }
  0xcd   : > { %v1581_v18 = vpop.f32.mrf.mxu2 }
  0xce   : > { %v4067_v10 = vadd.f32 %v1581_v18, %v1493_v3  ;;  %v1406_v13 = vpop.f32.mrf.mxu0  ;;  %v3180_v3 = vld [vmem:[%s3831_s29 + $0x28] sm:$0xf0] }
  0xcf   : > { %v1407_v24 = vadd.f32 %v4013_v23, %v1406_v13  ;;  %v2513_v15 = vor.u32 %v3180_v3, %v2512_v2 }
  0xd0   : > { %v1495_v25 = vpop.f32.mrf.mxu1 }
  0xd1   : > { %v1496_v26 = vadd.f32 %v1495_v25, %v1407_v24  ;;  %1445 = vmatmul.bf16.gmra.mxu0 %v2777_v4  ;;  %1643 = vmatmul.bf16.gmra.mxu3 %v2897_v7  ;;  %v2521_v4 = vor.u32 %v3181_v6, %v2520_v5  ;;  %v2517_v7 = vor.u32 %v3177_v8, %v2514_v9  ;;  %v3190_v9 = vld [vmem:[%s3831_s29 + $0x7c] sm:$0xf] }
  0xd2   : > { %1623 = vmatmul.bf16.gmra.mxu2 %v2785_v20  ;;  %v1457_v24 = vadd.f32 %v4013_v23, %v4019_v22  ;;  %v1459_v22 = vadd.f32 %v4013_v23, %v4035_v46 }
  0xd3   : > { %1534 = vmatmul.bf16.gmra.mxu1 %v2781_v21 }
  0xd4   : > { %v4070_v27 = vpop.f32.mrf.mxu3 }
  0xd5   : > { %v1584_v28 = vpop.f32.mrf.mxu2 }
  0xd6   : > { %v4072_v29 = vadd.f32 %v1584_v28, %v1496_v26  ;;  %v1408_v16 = vpop.f32.mrf.mxu0 }
  0xd7   : > { %v1409_v30 = vadd.f32 %v4013_v23, %v1408_v16 }
  0xd8   : > { %v1497_v19 = vpop.f32.mrf.mxu1 }
  0xd9   : > { %v1498_v31 = vadd.f32 %v1497_v19, %v1409_v30 }
  0xdc   : > { %v4083_v41 = vpop.f32.mrf.mxu3 }
  0xdd   : > { %v1586_v42 = vpop.f32.mrf.mxu2 }
  0xde   : > { %v4085_v45 = vadd.f32 %v1586_v42, %v1498_v31  ;;  %v1411_v47 = vpop.f32.mrf.mxu0  ;;  %v2542_v42 = vld [vmem:[%s3831_s29 + $0x64] sm:$0xf0] }
  0xdf   : > { %v1412_v51 = vadd.f32 %v4013_v23, %v1411_v47 }
  0xe0   : > { %v1500_v52 = vpop.f32.mrf.mxu1 }
  0xe1   : > { %v1501_v53 = vadd.f32 %v1500_v52, %v1412_v51  ;;  %1450 = vmatmul.bf16.gmra.mxu0 %v2805_v43  ;;  %1648 = vmatmul.bf16.gmra.mxu3 %v2925_v44 }
  0xe2   : > { %1628 = vmatmul.bf16.gmra.mxu2 %v2813_v48  ;;  %v2537_v48 = vor.u32 %v3183_v34, %v2534_v35 }
  0xe3   : > { %1539 = vmatmul.bf16.gmra.mxu1 %v2809_v49  ;;  %v2541_v49 = vor.u32 %v3187_v37, %v2540_v36  ;;  %v1467_v36 = vadd.f32 %v4013_v23, %v4070_v27  ;;  %v1469_v27 = vadd.f32 %v4013_v23, %v4083_v41 }
  0xe4   : > { %v4088_v54 = vpop.f32.mrf.mxu3 }
  0xe5   : > { %v1589_v55 = vpop.f32.mrf.mxu2 }
  0xe6   : > { %v4090_v56 = vadd.f32 %v1589_v55, %v1501_v53  ;;  %v1413_v57 = vpop.f32.mrf.mxu0  ;;  %v2549_v53 = vor.u32 %v3188_v39, %v2548_v38  ;;  %v2545_v55 = vor.u32 %v3184_v40, %v2542_v42 }
  0xe7   : > { %v1414_v58 = vadd.f32 %v4013_v23, %v1413_v57 }
  0xe8   : > { %v1502_v59 = vpop.f32.mrf.mxu1 }
  0xe9   : > { %v1503_v61 = vadd.f32 %v1502_v59, %v1414_v58  ;;  %v1462_v59 = vadd.f32 %v4013_v23, %v4049_v60  ;;  %v1464_v60 = vadd.f32 %v4013_v23, %v4065_v17 }
  0xec   : > { %v4101_v11 = vpop.f32.mrf.mxu3 }
  0xed   : > { %v1591_v12 = vpop.f32.mrf.mxu2 }
  0xee   : > { %v4103_v1 = vadd.f32 %v1591_v12, %v1503_v61  ;;  %v1416_v18 = vpop.f32.mrf.mxu0  ;;  %v2562_v12 = vld [vmem:[%s3831_s29 + $0x94] sm:$0xf0] }
  0xef   : > { %v1417_v13 = vadd.f32 %v4013_v23, %v1416_v18  ;;  %v2576_v18 = vld [vmem:[%s3831_s29 + $0x88] sm:$0xf] }
  0xf0   : > { %v1505_v20 = vpop.f32.mrf.mxu1 }
  0xf1   : > { %v1506_v21 = vadd.f32 %v1505_v20, %v1417_v13  ;;  %1662 = vmatmul.bf16.vlgmr.msrb.gmra.mxu3 %v2509_v14  ;;  %1751 = vmatmul.bf16.vlgmr.msrb.gmra.mxu0 %v2513_v15  ;;  %v2568_v14 = vld [vmem:[%s3831_s29 + $0x80] sm:$0xf]  ;;  %v3194_v15 = vld [vmem:[%s3831_s29 + $0x98] sm:$0xf0] }
  0xf2   : > { %3142 = vmatmul.msk.bf16.vlgmr.msrb.gmra.mxu2 %vm1338_vm0, %v2521_v4  ;;  %v3195_v4 = vld [vmem:[%s3831_s29 + $0xa0] sm:$0xf0]  ;;  %v2570_v13 = vld [vmem:[%s3831_s29 + $0x9c] sm:$0xf0] }
  0xf3   : > { %1840 = vmatmul.bf16.vlgmr.msrb.gmra.mxu1 %v2517_v7  ;;  %v3191_v7 = vld [vmem:[%s3831_s29 + $0x84] sm:$0xf] }
  0xf4   : > { %v1545_v25 = vpop.f32.mrf.mxu3 }
  0xf5   : > { %v4109_v26 = vadd.f32 %v1545_v25, %v1457_v24  ;;  %v1594_v28 = vpop.f32.mrf.mxu2  ;;  %v2565_v25 = vor.u32 %v3190_v9, %v2562_v12 }
  0xf6   : > { %v4111_v16 = vadd.f32 %v1594_v28, %v1506_v21  ;;  %v1418_v30 = vpop.f32.mrf.mxu0  ;;  %v2569_v28 = vor.u32 %v3194_v15, %v2568_v14 }
  0xf7   : > { %v1419_v19 = vadd.f32 %v4013_v23, %v1418_v30 }
  0xf8   : > { %v1507_v31 = vpop.f32.mrf.mxu1 }
  0xf9   : > { %v1508_v33 = vadd.f32 %v1507_v31, %v1419_v19  ;;  %v2577_v31 = vor.u32 %v3195_v4, %v2576_v18  ;;  %v1472_v18 = vadd.f32 %v4013_v23, %v4088_v54  ;;  %v1474_v54 = vadd.f32 %v4013_v23, %v4101_v11 }
  0xfc   : > { %v1547_v43 = vpop.f32.mrf.mxu3 }
  0xfd   : > { %v4124_v44 = vadd.f32 %v1547_v43, %v1459_v22  ;;  %v1596_v47 = vpop.f32.mrf.mxu2 }
  0xfe   : > { %v4126_v51 = vadd.f32 %v1596_v47, %v1508_v33  ;;  %v1421_v52 = vpop.f32.mrf.mxu0  ;;  %v2573_v33 = vor.u32 %v3191_v7, %v2570_v13 }
  0xff   : > { %v1422_v57 = vadd.f32 %v4013_v23, %v1421_v52  ;;  %v2596_v52 = vld [vmem:[%s3831_s29 + $0xb8] sm:$0xf] }
 0x100   : > { %v1510_v58 = vpop.f32.mrf.mxu1 }
 0x101   : > { %v1511_v46 = vadd.f32 %v1510_v58, %v1422_v57  ;;  %1667 = vmatmul.bf16.gmra.mxu3 %v2537_v48  ;;  %1756 = vmatmul.bf16.gmra.mxu0 %v2541_v49  ;;  %v3197_v48 = vld [vmem:[%s3831_s29 + $0xb4] sm:$0xf]  ;;  %v2590_v49 = vld [vmem:[%s3831_s29 + $0xcc] sm:$0xf0]  ;;  %v3202_v57 = vld [vmem:[%s3831_s29 + $0xd8] sm:$0xf0] }
 0x102   : > { %3143 = vmatmul.msk.bf16.gmra.mxu2 %vm1338_vm0, %v2549_v53  ;;  %v3201_v53 = vld [vmem:[%s3831_s29 + $0xd0] sm:$0xf0]  ;;  %v3198_v58 = vld [vmem:[%s3831_s29 + $0xbc] sm:$0xf] }
 0x103   : > { %1845 = vmatmul.bf16.gmra.mxu1 %v2545_v55  ;;  %v2604_v55 = vld [vmem:[%s3831_s29 + $0xc0] sm:$0xf] }
 0x104   : > { %v1550_v61 = vpop.f32.mrf.mxu3  ;;  %v2605_v9 = vor.u32 %v3202_v57, %v2604_v55 }
 0x105   : > { %v4132_v63 = vadd.f32 %v1550_v61, %v1462_v59  ;;  %v1599_v0 = vpop.f32.mrf.mxu2 }
 0x106   : > { %v4134_v2 = vadd.f32 %v1599_v0, %v1511_v46  ;;  %v1423_v3 = vpop.f32.mrf.mxu0  ;;  %v2598_v46 = vld [vmem:[%s3831_s29 + $0xd4] sm:$0xf0] }
 0x107   : > { %v1424_v5 = vadd.f32 %v4013_v23, %v1423_v3  ;;  %v2593_v3 = vor.u32 %v3197_v48, %v2590_v49  ;;  %v2601_v12 = vor.u32 %v3198_v58, %v2598_v46 }
 0x108   : > { %v1512_v6 = vpop.f32.mrf.mxu1 }
 0x109   : > { %v1513_v8 = vadd.f32 %v1512_v6, %v1424_v5  ;;  %v2597_v5 = vor.u32 %v3201_v53, %v2596_v52 }
 0x10c   : > { %v1552_v20 = vpop.f32.mrf.mxu3 }
 0x10d   : > { %v4147_v21 = vadd.f32 %v1552_v20, %v1464_v60  ;;  %v1601_v24 = vpop.f32.mrf.mxu2 }
 0x10e   : > { %v4149_v30 = vadd.f32 %v1601_v24, %v1513_v8  ;;  %v1426_v19 = vpop.f32.mrf.mxu0 }
 0x10f   : > { %v1427_v34 = vadd.f32 %v4013_v23, %v1426_v19  ;;  %v3204_v19 = vld [vmem:[%s3831_s29 + $0xec] sm:$0xf] }
 0x110   : > { %v1515_v35 = vpop.f32.mrf.mxu1 }
 0x111   : > { %v1516_v17 = vadd.f32 %v1515_v35, %v1427_v34  ;;  %1672 = vmatmul.bf16.gmra.mxu3 %v2565_v25  ;;  %1761 = vmatmul.bf16.gmra.mxu0 %v2569_v28  ;;  %v3208_v34 = vld [vmem:[%s3831_s29 + $0x108] sm:$0xf0]  ;;  %v2632_v35 = vld [vmem:[%s3831_s29 + $0xf8] sm:$0xf] }
 0x112   : > { %3144 = vmatmul.msk.bf16.gmra.mxu2 %vm1338_vm0, %v2577_v31  ;;  %v2618_v31 = vld [vmem:[%s3831_s29 + $0x104] sm:$0xf0] }
 0x113   : > { %1850 = vmatmul.bf16.gmra.mxu1 %v2573_v33  ;;  %v2624_v33 = vld [vmem:[%s3831_s29 + $0xf0] sm:$0xf] }
 0x114   : > { %v1555_v37 = vpop.f32.mrf.mxu3 }
 0x115   : > { %v4155_v38 = vadd.f32 %v1555_v37, %v1467_v36  ;;  %v1604_v22 = vpop.f32.mrf.mxu2  ;;  %v3205_v36 = vld [vmem:[%s3831_s29 + $0xf4] sm:$0xf]  ;;  %v2626_v37 = vld [vmem:[%s3831_s29 + $0x10c] sm:$0xf0] }
 0x116   : > { %v4157_v39 = vadd.f32 %v1604_v22, %v1516_v17  ;;  %v1428_v40 = vpop.f32.mrf.mxu0  ;;  %v3209_v17 = vld [vmem:[%s3831_s29 + $0x110] sm:$0xf0]  ;;  %v2629_v53 = vor.u32 %v3205_v36, %v2626_v37 }
 0x117   : > { %v1429_v42 = vadd.f32 %v4013_v23, %v1428_v40  ;;  %v2633_v52 = vor.u32 %v3209_v17, %v2632_v35 }
 0x118   : > { %v1517_v43 = vpop.f32.mrf.mxu1 }
 0x119   : > { %v1518_v47 = vadd.f32 %v1517_v43, %v1429_v42  ;;  %v2621_v43 = vor.u32 %v3204_v19, %v2618_v31 }
 0x11c   : > { %v1557_v59 = vpop.f32.mrf.mxu3 }
 0x11d   : > { %v4170_v61 = vadd.f32 %v1557_v59, %v1469_v27  ;;  %v1606_v0 = vpop.f32.mrf.mxu2 }
 0x11e   : > { %v4172_v6 = vadd.f32 %v1606_v0, %v1518_v47  ;;  %v1431_v8 = vpop.f32.mrf.mxu0  ;;  %v2625_v47 = vor.u32 %v3208_v34, %v2624_v33 }
 0x11f   : > { %v1432_v14 = vadd.f32 %v4013_v23, %v1431_v8 }
 0x120   : > { %v1520_v15 = vpop.f32.mrf.mxu1 }
 0x121   : > { %v1521_v41 = vadd.f32 %v1520_v15, %v1432_v14  ;;  %1677 = vmatmul.bf16.gmra.mxu3 %v2593_v3  ;;  %1766 = vmatmul.bf16.gmra.mxu0 %v2597_v5  ;;  %v2652_v14 = vld [vmem:[%s3831_s29 + $0x128] sm:$0xf]  ;;  %v3215_v15 = vld [vmem:[%s3831_s29 + $0x140] sm:$0xf0] }
 0x122   : > { %3145 = vmatmul.msk.bf16.gmra.mxu2 %vm1338_vm0, %v2605_v9  ;;  %v3211_v9 = vld [vmem:[%s3831_s29 + $0x124] sm:$0xf] }
 0x123   : > { %1855 = vmatmul.bf16.gmra.mxu1 %v2601_v12  ;;  %v2646_v12 = vld [vmem:[%s3831_s29 + $0x13c] sm:$0xf0] }
 0x124   : > { %v1560_v60 = vpop.f32.mrf.mxu3 }
 0x125   : > { %v4178_v4 = vadd.f32 %v1560_v60, %v1472_v18  ;;  %v1609_v7 = vpop.f32.mrf.mxu2  ;;  %v3216_v18 = vld [vmem:[%s3831_s29 + $0x148] sm:$0xf0] }
 0x126   : > { %v4180_v13 = vadd.f32 %v1609_v7, %v1521_v41  ;;  %v1433_v20 = vpop.f32.mrf.mxu0  ;;  %v2660_v41 = vld [vmem:[%s3831_s29 + $0x130] sm:$0xf]  ;;  %v3212_v60 = vld [vmem:[%s3831_s29 + $0x12c] sm:$0xf]  ;;  %v2654_v7 = vld [vmem:[%s3831_s29 + $0x144] sm:$0xf0] }
 0x127   : > { %v1434_v24 = vadd.f32 %v4013_v23, %v1433_v20  ;;  %v2661_v33 = vor.u32 %v3216_v18, %v2660_v41  ;;  %v2657_v34 = vor.u32 %v3212_v60, %v2654_v7 }
 0x128   : > { %v1522_v25 = vpop.f32.mrf.mxu1 }
 0x129   : > { %v1523_v28 = vadd.f32 %v1522_v25, %v1434_v24  ;;  %v2649_v25 = vor.u32 %v3211_v9, %v2646_v12 }
 0x12c   : > { %v1562_v22 = vpop.f32.mrf.mxu3 }
 0x12d   : > { %v4193_v40 = vadd.f32 %v1562_v22, %v1474_v54  ;;  %v1611_v42 = vpop.f32.mrf.mxu2 }
 0x12e   : > { %v4195_v48 = vadd.f32 %v1611_v42, %v1523_v28  ;;  %v1436_v49 = vpop.f32.mrf.mxu0  ;;  %v2653_v28 = vor.u32 %v3215_v15, %v2652_v14 }
 0x12f   : > { %v1437_v55 = vadd.f32 %v4013_v23, %v1436_v49 }
 0x130   : > { %v1525_v27 = vpop.f32.mrf.mxu1 }
 0x131   : > { %v1526_v11 = vadd.f32 %v1525_v27, %v1437_v55  ;;  %1682 = vmatmul.bf16.gmra.mxu3 %v2621_v43  ;;  %1771 = vmatmul.bf16.gmra.mxu0 %v2625_v47  ;;  %v2680_v55 = vld [vmem:[%s3831_s29 + $0x160] sm:$0xf]  ;;  %v3222_v27 = vld [vmem:[%s3831_s29 + $0x178] sm:$0xf0] }
 0x132   : > { %3146 = vmatmul.msk.bf16.gmra.mxu2 %vm1338_vm0, %v2633_v52  ;;  %v3218_v52 = vld [vmem:[%s3831_s29 + $0x15c] sm:$0xf]  ;;  %v2681_v9 = vor.u32 %v3222_v27, %v2680_v55 }
 0x133   : > { %1860 = vmatmul.bf16.gmra.mxu1 %v2629_v53  ;;  %v2674_v53 = vld [vmem:[%s3831_s29 + $0x174] sm:$0xf0] }
 0x134   : > { %v1634_v57 = vpop.f32.mrf.mxu3 }
 0x135   : > { %v1614_v58 = vpop.f32.mrf.mxu2  ;;  %v4200_v46 = vadd.f32 %v1634_v57, %v4109_v26  ;;  %v3223_v57 = vld [vmem:[%s3831_s29 + $0x180] sm:$0xf0] }
 0x136   : > { %v4202_v59 = vadd.f32 %v1614_v58, %v1526_v11  ;;  %v1438_v0 = vpop.f32.mrf.mxu0  ;;  %v2688_v11 = vld [vmem:[%s3831_s29 + $0x168] sm:$0xf]  ;;  %v3219_v58 = vld [vmem:[%s3831_s29 + $0x164] sm:$0xf] }
 0x137   : > { %v1439_v3 = vadd.f32 %v4013_v23, %v1438_v0  ;;  %v2682_v0 = vld [vmem:[%s3831_s29 + $0x17c] sm:$0xf0]  ;;  %v2689_v15 = vor.u32 %v3223_v57, %v2688_v11 }
 0x138   : > { %v1527_v5 = vpop.f32.mrf.mxu1  ;;  %v2685_v41 = vor.u32 %v3219_v58, %v2682_v0 }
 0x139   : > { %v1528_v8 = vadd.f32 %v1527_v5, %v1439_v3 }
 0x13c   : > { %v1636_v20 = vpop.f32.mrf.mxu3 }
 0x13d   : > { %v1616_v24 = vpop.f32.mrf.mxu2  ;;  %v4214_v26 = vadd.f32 %v1636_v20, %v4124_v44 }
 0x13e   : > { %v4216_v19 = vadd.f32 %v1616_v24, %v1528_v8  ;;  %v1441_v31 = vpop.f32.mrf.mxu0  ;;  %v2677_v8 = vor.u32 %v3218_v52, %v2674_v53 }
 0x13f   : > { %v1442_v35 = vadd.f32 %v4013_v23, %v1441_v31 }
 0x140   : > { %v1530_v54 = vpop.f32.mrf.mxu1 }
 0x141   : > { %v1531_v17 = vadd.f32 %v1530_v54, %v1442_v35  ;;  %1687 = vmatmul.bf16.gmra.mxu3 %v2649_v25  ;;  %1776 = vmatmul.bf16.gmra.mxu0 %v2653_v28  ;;  %v3225_v35 = vld [vmem:[%s3831_s29 + $0x194] sm:$0xf]  ;;  %v2702_v54 = vld [vmem:[%s3831_s29 + $0x1ac] sm:$0xf0] }
 0x142   : > { %3147 = vmatmul.msk.bf16.gmra.mxu2 %vm1338_vm0, %v2661_v33  ;;  %v2705_v53 = vor.u32 %v3225_v35, %v2702_v54  ;;  %v2738_v35 = vld [vmem:[%s3831_s29 + $0x1ec] sm:$0xf0] }
 0x143   : > { %1865 = vmatmul.bf16.gmra.mxu1 %v2657_v34 }
 0x144   : > { %v1639_v44 = vpop.f32.mrf.mxu3 }
 0x145   : > { %v1619_v36 = vpop.f32.mrf.mxu2  ;;  %v4221_v37 = vadd.f32 %v1639_v44, %v4132_v63  ;;  %v3229_v44 = vld [vmem:[%s3831_s29 + $0x1b0] sm:$0xf0] }
 0x146   : > { %v4223_v22 = vadd.f32 %v1619_v36, %v1531_v17  ;;  %v1443_v42 = vpop.f32.mrf.mxu0  ;;  %v2708_v17 = vld [vmem:[%s3831_s29 + $0x198] sm:$0xf]  ;;  %v2716_v36 = vld [vmem:[%s3831_s29 + $0x1a0] sm:$0xf] }
 0x147   : > { %v1444_v43 = vadd.f32 %v4013_v23, %v1443_v42  ;;  %v3230_v42 = vld [vmem:[%s3831_s29 + $0x1b8] sm:$0xf0]  ;;  %v2709_v55 = vor.u32 %v3229_v44, %v2708_v17 }
 0x148   : > { %v1532_v47 = vpop.f32.mrf.mxu1  ;;  %v2717_v57 = vor.u32 %v3230_v42, %v2716_v36 }
 0x149   : > { %v1533_v49 = vadd.f32 %v1532_v47, %v1444_v43  ;;  %v3226_v43 = vld [vmem:[%s3831_s29 + $0x19c] sm:$0xf]  ;;  %v2710_v47 = vld [vmem:[%s3831_s29 + $0x1b4] sm:$0xf0] }
 0x14a   : > { %v2713_v58 = vor.u32 %v3226_v43, %v2710_v47 }
 0x14c   : > { %v1641_v3 = vpop.f32.mrf.mxu3 }
 0x14d   : > { %v1621_v5 = vpop.f32.mrf.mxu2  ;;  %v4235_v63 = vadd.f32 %v1641_v3, %v4147_v21 }
 0x14e   : > { %v4237_v12 = vadd.f32 %v1621_v5, %v1533_v49  ;;  %v1446_v14 = vpop.f32.mrf.mxu0 }
 0x14f   : > { %v1447_v18 = vadd.f32 %v4013_v23, %v1446_v14 }
 0x150   : > { %v1535_v60 = vpop.f32.mrf.mxu1 }
 0x151   : > { %v1536_v7 = vadd.f32 %v1535_v60, %v1447_v18  ;;  %1692 = vmatmul.bf16.gmra.mxu3 %v2677_v8  ;;  %1781 = vmatmul.bf16.gmra.mxu0 %v2681_v9 }
 0x152   : > { %3148 = vmatmul.msk.bf16.gmra.mxu2 %vm1338_vm0, %v2689_v15 }
 0x153   : > { %1870 = vmatmul.bf16.gmra.mxu1 %v2685_v41 }
 0x154   : > { %v1644_v21 = vpop.f32.mrf.mxu3 }
 0x155   : > { %v1624_v20 = vpop.f32.mrf.mxu2  ;;  %v4242_v24 = vadd.f32 %v1644_v21, %v4155_v38  ;;  %v2730_v21 = vld [vmem:[%s3831_s29 + $0x1e4] sm:$0xf0] }
 0x156   : > { %v4244_v25 = vadd.f32 %v1624_v20, %v1536_v7  ;;  %v1448_v28 = vpop.f32.mrf.mxu0  ;;  %v3232_v7 = vld [vmem:[%s3831_s29 + $0x1cc] sm:$0xf]  ;;  %v2736_v20 = vld [vmem:[%s3831_s29 + $0x1d0] sm:$0xf] }
 0x157   : > { %v1449_v31 = vadd.f32 %v4013_v23, %v1448_v28  ;;  %v3236_v28 = vld [vmem:[%s3831_s29 + $0x1e8] sm:$0xf0]  ;;  %v2733_v44 = vor.u32 %v3232_v7, %v2730_v21 }
 0x158   : > { %v1537_v33 = vpop.f32.mrf.mxu1  ;;  %v2737_v36 = vor.u32 %v3236_v28, %v2736_v20 }
 0x159   : > { %v1538_v34 = vadd.f32 %v1537_v33, %v1449_v31  ;;  %v2744_v31 = vld [vmem:[%s3831_s29 + $0x1d8] sm:$0xf]  ;;  %v3237_v33 = vld [vmem:[%s3831_s29 + $0x1f0] sm:$0xf0] }
 0x15a   : > { %v2745_v43 = vor.u32 %v3237_v33, %v2744_v31 }
 0x15c   : > { %v1646_v49 = vpop.f32.mrf.mxu3 }
 0x15d   : > { %v1626_v52 = vpop.f32.mrf.mxu2  ;;  %v4256_v38 = vadd.f32 %v1646_v49, %v4170_v61 }
 0x15e   : > { %v4258_v27 = vadd.f32 %v1626_v52, %v1538_v34  ;;  %v1451_v11 = vpop.f32.mrf.mxu0  ;;  %v3233_v34 = vld [vmem:[%s3831_s29 + $0x1d4] sm:$0xf] }
 0x15f   : > { %v1452_v0 = vadd.f32 %v4013_v23, %v1451_v11  ;;  %v2741_v47 = vor.u32 %v3233_v34, %v2738_v35 }
 0x160   : > { %v1540_v3 = vpop.f32.mrf.mxu1 }
 0x161   : > { %v1541_v5 = vadd.f32 %v1540_v3, %v1452_v0  ;;  %1697 = vmatmul.bf16.gmra.mxu3 %v2705_v53  ;;  %1786 = vmatmul.bf16.gmra.mxu0 %v2709_v55  ;;  %v2758_v0 = vld [vmem:[%s3831_s29 + $0x21c] sm:$0xf0]  ;;  %v2764_v3 = vld [vmem:[%s3831_s29 + $0x208] sm:$0xf] }
 0x162   : > { %3149 = vmatmul.msk.bf16.gmra.mxu2 %vm1338_vm0, %v2717_v57 }
 0x163   : > { %1875 = vmatmul.bf16.gmra.mxu1 %v2713_v58  ;;  %v3239_v58 = vld [vmem:[%s3831_s29 + $0x204] sm:$0xf] }
 0x164   : > { %v1649_v61 = vpop.f32.mrf.mxu3  ;;  %v2761_v20 = vor.u32 %v3239_v58, %v2758_v0  ;;  %v3250_v58 = vld [vmem:[%s3831_s29 + $0x258] sm:$0xf0]  ;;  %v2800_v0 = vld [vmem:[%s3831_s29 + $0x248] sm:$0xf] }
 0x165   : > { %v1629_v8 = vpop.f32.mrf.mxu2  ;;  %v4263_v9 = vadd.f32 %v1649_v61, %v4178_v4  ;;  %v2772_v61 = vld [vmem:[%s3831_s29 + $0x210] sm:$0xf] }
 0x166   : > { %v4265_v14 = vadd.f32 %v1629_v8, %v1541_v5  ;;  %v1453_v15 = vpop.f32.mrf.mxu0  ;;  %v3243_v5 = vld [vmem:[%s3831_s29 + $0x220] sm:$0xf0]  ;;  %v3244_v8 = vld [vmem:[%s3831_s29 + $0x228] sm:$0xf0] }
 0x167   : > { %v1454_v41 = vadd.f32 %v4013_v23, %v1453_v15  ;;  %v3240_v15 = vld [vmem:[%s3831_s29 + $0x20c] sm:$0xf]  ;;  %v2773_v31 = vor.u32 %v3244_v8, %v2772_v61  ;;  %v2794_v61 = vld [vmem:[%s3831_s29 + $0x25c] sm:$0xf0] }
 0x168   : > { %v1542_v18 = vpop.f32.mrf.mxu1 }
 0x169   : > { %v1543_v60 = vadd.f32 %v1542_v18, %v1454_v41  ;;  %v2766_v41 = vld [vmem:[%s3831_s29 + $0x224] sm:$0xf0] }
 0x16a   : > { %v2769_v33 = vor.u32 %v3240_v15, %v2766_v41 }
 0x16c   : > { %v1651_v54 = vpop.f32.mrf.mxu3 }
 0x16d   : > { %v1631_v17 = vpop.f32.mrf.mxu2  ;;  %v4277_v4 = vadd.f32 %v1651_v54, %v4193_v40 }
 0x16e   : > { %v4279_v42 = vadd.f32 %v1631_v17, %v1543_v60  ;;  %v1752_v23 = vpop.f32.mrf.mxu0 }
 0x170   : > { %v1841_v49 = vpop.f32.mrf.mxu1 }
 0x171   : > { %1702 = vmatmul.bf16.gmra.mxu3 %v2733_v44  ;;  %1791 = vmatmul.bf16.gmra.mxu0 %v2737_v36 }
 0x172   : > { %3150 = vmatmul.msk.bf16.gmra.mxu2 %vm1338_vm0, %v2745_v43 }
 0x173   : > { %1880 = vmatmul.bf16.gmra.mxu1 %v2741_v47 }
 0x174   : > { %v1663_v40 = vpop.f32.mrf.mxu3 }
 0x175   : > { %v1664_v52 = vadd.f32 %v1663_v40, %v4021_v32  ;;  %v1930_v53 = vpop.f32.mrf.mxu2  ;;  %v2765_v32 = vor.u32 %v3243_v5, %v2764_v3  ;;  %v3251_v3 = vld [vmem:[%s3831_s29 + $0x260] sm:$0xf0] }
 0x176   : > { %v1754_v55 = vpop.f32.mrf.mxu0  ;;  %v3247_v5 = vld [vmem:[%s3831_s29 + $0x244] sm:$0xf] }
 0x177   : > { %v1753_v57 = vadd.f32 %v1752_v23, %v1664_v52 }
 0x178   : > { %v1843_v11 = vpop.f32.mrf.mxu1 }
 0x179   : > { %v1842_v60 = vadd.f32 %v1841_v49, %v1753_v57  ;;  %v2792_v57 = vld [vmem:[%s3831_s29 + $0x240] sm:$0xf] }
 0x17b   : > { %v1931_v54 = vadd.f32 %v1930_v53, %v1842_v60  ;;  %v2793_v60 = vor.u32 %v3250_v58, %v2792_v57  ;;  %v2822_v57 = vld [vmem:[%s3831_s29 + $0x294] sm:$0xf0] }
 0x17c   : > { %v1665_v18 = vpop.f32.mrf.mxu3 }
 0x17d   : > { %v1666_v7 = vadd.f32 %v1665_v18, %v4037_v50  ;;  %v1932_v21 = vpop.f32.mrf.mxu2  ;;  %v2010_v36 = vmax.f32 %v1931_v54, 0.0 }
 0x17e   : > { %v1757_v28 = vpop.f32.mrf.mxu0 }
 0x17f   : > { %v1755_v34 = vadd.f32 %v1754_v55, %v1666_v7  ;;  %v3246_v55 = vld [vmem:[%s3831_s29 + $0x23c] sm:$0xf] }
 0x180   : > { %v1846_v35 = vpop.f32.mrf.mxu1 }
 0x181   : > { %v1844_v17 = vadd.f32 %v1843_v11, %v1755_v34  ;;  %1707 = vmatmul.bf16.gmra.mxu3 %v2761_v20  ;;  %1796 = vmatmul.bf16.gmra.mxu0 %v2765_v32  ;;  %v2786_v11 = vld [vmem:[%s3831_s29 + $0x254] sm:$0xf0]  ;;  %v2797_v20 = vor.u32 %v3247_v5, %v2794_v61 }
 0x182   : > { %3151 = vmatmul.msk.bf16.gmra.mxu2 %vm1338_vm0, %v2773_v31  ;;  %v2789_v18 = vor.u32 %v3246_v55, %v2786_v11  ;;  %v3258_v55 = vld [vmem:[%s3831_s29 + $0x298] sm:$0xf0] }
 0x183   : > { %1885 = vmatmul.bf16.gmra.mxu1 %v2769_v33  ;;  %v1933_v50 = vadd.f32 %v1932_v21, %v1844_v17  ;;  %v2801_v21 = vor.u32 %v3251_v3, %v2800_v0  ;;  %v3254_v11 = vld [vmem:[%s3831_s29 + $0x27c] sm:$0xf] }
 0x184   : > { %v1668_v44 = vpop.f32.mrf.mxu3 }
 0x185   : > { %v2011_v23 = vmax.f32 %v1933_v50, 0.0  ;;  %v1669_v43 = vadd.f32 %v1668_v44, %v4051_v62  ;;  %v1935_v47 = vpop.f32.mrf.mxu2 }
 0x186   : > { %v1759_v49 = vpop.f32.mrf.mxu0 }
 0x187   : > { %v3343_v40 = vpack.c.bf16 %v2011_v23, %v2010_v36  ;;  %v1758_v53 = vadd.f32 %v1757_v28, %v1669_v43 }
 0x188   : > { %v1848_v52 = vpop.f32.mrf.mxu1 }
 0x189   : > { %3344 = vst [vmem:[%s4295_s12] sm:$0xff] %v3343_v40   ;;  %v1847_v15 = vadd.f32 %v1846_v35, %v1758_v53  ;;  %v2820_v40 = vld [vmem:[%s3831_s29 + $0x278] sm:$0xf]  ;;  %v2828_v53 = vld [vmem:[%s3831_s29 + $0x280] sm:$0xf] }
 0x18b   : > { %v1936_v31 = vadd.f32 %v1935_v47, %v1847_v15  ;;  %v3253_v47 = vld [vmem:[%s3831_s29 + $0x274] sm:$0xf]  ;;  %v2829_v15 = vor.u32 %v3258_v55, %v2828_v53 }
 0x18c   : > { %v1670_v8 = vpop.f32.mrf.mxu3 }
 0x18d   : > { %v1671_v62 = vadd.f32 %v1670_v8, %v4067_v10  ;;  %v1937_v41 = vpop.f32.mrf.mxu2  ;;  %v2012_v35 = vmax.f32 %v1936_v31, 0.0 }
 0x18e   : > { %v1762_v7 = vpop.f32.mrf.mxu0 }
 0x18f   : > { %v1760_v32 = vadd.f32 %v1759_v49, %v1671_v62  ;;  %v2814_v49 = vld [vmem:[%s3831_s29 + $0x28c] sm:$0xf0]  ;;  %v2825_v62 = vor.u32 %v3254_v11, %v2822_v57 }
 0x190   : > { %v1851_v28 = vpop.f32.mrf.mxu1 }
 0x191   : > { %v1849_v33 = vadd.f32 %v1848_v52, %v1760_v32  ;;  %1712 = vmatmul.bf16.gmra.mxu3 %v2789_v18  ;;  %1801 = vmatmul.bf16.gmra.mxu0 %v2793_v60  ;;  %v3257_v52 = vld [vmem:[%s3831_s29 + $0x290] sm:$0xf0] }
 0x192   : > { %3152 = vmatmul.msk.bf16.gmra.mxu2 %vm1338_vm0, %v2801_v21  ;;  %v2821_v61 = vor.u32 %v3257_v52, %v2820_v40 }
 0x193   : > { %1890 = vmatmul.bf16.gmra.mxu1 %v2797_v20  ;;  %v1938_v10 = vadd.f32 %v1937_v41, %v1849_v33 }
 0x194   : > { %v1673_v34 = vpop.f32.mrf.mxu3 }
 0x195   : > { %v2013_v54 = vmax.f32 %v1938_v10, 0.0  ;;  %v1674_v17 = vadd.f32 %v1673_v34, %v4072_v29  ;;  %v1940_v50 = vpop.f32.mrf.mxu2  ;;  %v2817_v29 = vor.u32 %v3253_v47, %v2814_v49  ;;  %v2850_v47 = vld [vmem:[%s3831_s29 + $0x2cc] sm:$0xf0] }
 0x196   : > { %v1764_v44 = vpop.f32.mrf.mxu0 }
 0x197   : > { %v3348_v36 = vpack.c.bf16 %v2013_v54, %v2012_v35  ;;  %v1763_v43 = vadd.f32 %v1762_v7, %v1674_v17  ;;  %v3260_v54 = vld [vmem:[%s3831_s29 + $0x2ac] sm:$0xf]  ;;  %v2842_v17 = vld [vmem:[%s3831_s29 + $0x2c4] sm:$0xf0] }
 0x198   : > { %v1853_v23 = vpop.f32.mrf.mxu1 }
 0x199   : > { %3420 = vst [vmem:[%s4295_s12 + $0x8] sm:$0xff] %v3348_v36   ;;  %v1852_v0 = vadd.f32 %v1851_v28, %v1763_v43  ;;  %v2856_v36 = vld [vmem:[%s3831_s29 + $0x2b8] sm:$0xf]  ;;  %v3261_v43 = vld [vmem:[%s3831_s29 + $0x2b4] sm:$0xf] }
 0x19b   : > { %v1941_v60 = vadd.f32 %v1940_v50, %v1852_v0  ;;  %v2848_v50 = vld [vmem:[%s3831_s29 + $0x2b0] sm:$0xf] }
 0x19c   : > { %v1675_v58 = vpop.f32.mrf.mxu3 }
 0x19d   : > { %v1676_v3 = vadd.f32 %v1675_v58, %v4085_v45  ;;  %v1942_v5 = vpop.f32.mrf.mxu2  ;;  %v2014_v20 = vmax.f32 %v1941_v60, 0.0  ;;  %v2853_v58 = vor.u32 %v3261_v43, %v2850_v47 }
 0x19e   : > { %v1767_v8 = vpop.f32.mrf.mxu0 }
 0x19f   : > { %v1765_v41 = vadd.f32 %v1764_v44, %v1676_v3  ;;  %v3264_v44 = vld [vmem:[%s3831_s29 + $0x2c8] sm:$0xf0] }
 0x1a0   : > { %v1856_v18 = vpop.f32.mrf.mxu1  ;;  %v2849_v55 = vor.u32 %v3264_v44, %v2848_v50 }
 0x1a1   : > { %v1854_v7 = vadd.f32 %v1853_v23, %v1765_v41  ;;  %1717 = vmatmul.bf16.gmra.mxu3 %v2817_v29  ;;  %1806 = vmatmul.bf16.gmra.mxu0 %v2821_v61  ;;  %v3265_v23 = vld [vmem:[%s3831_s29 + $0x2d0] sm:$0xf0] }
 0x1a2   : > { %3153 = vmatmul.msk.bf16.gmra.mxu2 %vm1338_vm0, %v2829_v15  ;;  %v2857_v57 = vor.u32 %v3265_v23, %v2856_v36 }
 0x1a3   : > { %1895 = vmatmul.bf16.gmra.mxu1 %v2825_v62  ;;  %v1943_v45 = vadd.f32 %v1942_v5, %v1854_v7 }
 0x1a4   : > { %v1678_v21 = vpop.f32.mrf.mxu3 }
 0x1a5   : > { %v2015_v32 = vmax.f32 %v1943_v45, 0.0  ;;  %v1679_v28 = vadd.f32 %v1678_v21, %v4090_v56  ;;  %v1945_v31 = vpop.f32.mrf.mxu2  ;;  %v2845_v56 = vor.u32 %v3260_v54, %v2842_v17  ;;  %v3267_v21 = vld [vmem:[%s3831_s29 + $0x2e4] sm:$0xf] }
 0x1a6   : > { %v1769_v33 = vpop.f32.mrf.mxu0 }
 0x1a7   : > { %v3353_v10 = vpack.c.bf16 %v2015_v32, %v2014_v20  ;;  %v1768_v35 = vadd.f32 %v1767_v8, %v1679_v28  ;;  %v2870_v20 = vld [vmem:[%s3831_s29 + $0x2fc] sm:$0xf0]  ;;  %v2876_v32 = vld [vmem:[%s3831_s29 + $0x2e8] sm:$0xf]  ;;  %v3271_v28 = vld [vmem:[%s3831_s29 + $0x300] sm:$0xf0] }
 0x1a8   : > { %v1858_v34 = vpop.f32.mrf.mxu1  ;;  %v2877_v44 = vor.u32 %v3271_v28, %v2876_v32 }
 0x1a9   : > { %3421 = vst [vmem:[%s4295_s12 + $0x10] sm:$0xff] %v3353_v10   ;;  %v1857_v40 = vadd.f32 %v1856_v18, %v1768_v35  ;;  %v3268_v10 = vld [vmem:[%s3831_s29 + $0x2ec] sm:$0xf] }
 0x1ab   : > { %v1946_v5 = vadd.f32 %v1945_v31, %v1857_v40  ;;  %v2884_v31 = vld [vmem:[%s3831_s29 + $0x2f0] sm:$0xf] }
 0x1ac   : > { %v1680_v49 = vpop.f32.mrf.mxu3 }
 0x1ad   : > { %v1681_v52 = vadd.f32 %v1680_v49, %v4103_v1  ;;  %v1947_v53 = vpop.f32.mrf.mxu2  ;;  %v2016_v8 = vmax.f32 %v1946_v5, 0.0 }
 0x1ae   : > { %v1772_v11 = vpop.f32.mrf.mxu0 }
 0x1af   : > { %v1770_v0 = vadd.f32 %v1769_v33, %v1681_v52  ;;  %v3272_v33 = vld [vmem:[%s3831_s29 + $0x308] sm:$0xf0] }
 0x1b0   : > { %v1861_v3 = vpop.f32.mrf.mxu1  ;;  %v2885_v23 = vor.u32 %v3272_v33, %v2884_v31 }
 0x1b1   : > { %v1859_v29 = vadd.f32 %v1858_v34, %v1770_v0  ;;  %1722 = vmatmul.bf16.gmra.mxu3 %v2845_v56  ;;  %1811 = vmatmul.bf16.gmra.mxu0 %v2849_v55  ;;  %v2878_v34 = vld [vmem:[%s3831_s29 + $0x304] sm:$0xf0] }
 0x1b2   : > { %3154 = vmatmul.msk.bf16.gmra.mxu2 %vm1338_vm0, %v2857_v57  ;;  %v2881_v43 = vor.u32 %v3268_v10, %v2878_v34 }
 0x1b3   : > { %1900 = vmatmul.bf16.gmra.mxu1 %v2853_v58  ;;  %v1948_v1 = vadd.f32 %v1947_v53, %v1859_v29  ;;  %v3274_v29 = vld [vmem:[%s3831_s29 + $0x31c] sm:$0xf] }
 0x1b4   : > { %v1683_v61 = vpop.f32.mrf.mxu3 }
 0x1b5   : > { %v2017_v15 = vmax.f32 %v1948_v1, 0.0  ;;  %v1684_v62 = vadd.f32 %v1683_v61, %v4111_v16  ;;  %v1950_v41 = vpop.f32.mrf.mxu2  ;;  %v2873_v16 = vor.u32 %v3267_v21, %v2870_v20  ;;  %v2898_v1 = vld [vmem:[%s3831_s29 + $0x334] sm:$0xf0]  ;;  %v2904_v61 = vld [vmem:[%s3831_s29 + $0x320] sm:$0xf] }
 0x1b6   : > { %v1774_v18 = vpop.f32.mrf.mxu0 }
 0x1b7   : > { %v3358_v60 = vpack.c.bf16 %v2017_v15, %v2016_v8  ;;  %v1773_v45 = vadd.f32 %v1772_v11, %v1684_v62  ;;  %v3278_v8 = vld [vmem:[%s3831_s29 + $0x338] sm:$0xf0]  ;;  %v2912_v15 = vld [vmem:[%s3831_s29 + $0x328] sm:$0xf]  ;;  %v3279_v62 = vld [vmem:[%s3831_s29 + $0x340] sm:$0xf0] }
 0x1b8   : > { %v1863_v7 = vpop.f32.mrf.mxu1  ;;  %v2905_v20 = vor.u32 %v3278_v8, %v2904_v61  ;;  %v2913_v28 = vor.u32 %v3279_v62, %v2912_v15 }
 0x1b9   : > { %3422 = vst [vmem:[%s4295_s12 + $0x18] sm:$0xff] %v3358_v60   ;;  %v1862_v54 = vadd.f32 %v1861_v3, %v1773_v45 }
 0x1bb   : > { %v1951_v40 = vadd.f32 %v1950_v41, %v1862_v54  ;;  %v3275_v41 = vld [vmem:[%s3831_s29 + $0x324] sm:$0xf] }
 0x1bc   : > { %v1685_v35 = vpop.f32.mrf.mxu3 }
 0x1bd   : > { %v1686_v17 = vadd.f32 %v1685_v35, %v4126_v51  ;;  %v1952_v50 = vpop.f32.mrf.mxu2  ;;  %v2018_v56 = vmax.f32 %v1951_v40, 0.0  ;;  %v2926_v40 = vld [vmem:[%s3831_s29 + $0x36c] sm:$0xf0] }
 0x1be   : > { %v1777_v36 = vpop.f32.mrf.mxu0 }
 0x1bf   : > { %v1775_v47 = vadd.f32 %v1774_v18, %v1686_v17  ;;  %v2906_v18 = vld [vmem:[%s3831_s29 + $0x33c] sm:$0xf0] }
 0x1c0   : > { %v1866_v49 = vpop.f32.mrf.mxu1  ;;  %v2909_v31 = vor.u32 %v3275_v41, %v2906_v18 }
 0x1c1   : > { %v1864_v52 = vadd.f32 %v1863_v7, %v1775_v47  ;;  %1727 = vmatmul.bf16.gmra.mxu3 %v2873_v16  ;;  %1816 = vmatmul.bf16.gmra.mxu0 %v2877_v44 }
 0x1c2   : > { %3155 = vmatmul.msk.bf16.gmra.mxu2 %vm1338_vm0, %v2885_v23 }
 0x1c3   : > { %1905 = vmatmul.bf16.gmra.mxu1 %v2881_v43  ;;  %v1953_v51 = vadd.f32 %v1952_v50, %v1864_v52  ;;  %v2932_v52 = vld [vmem:[%s3831_s29 + $0x358] sm:$0xf] }
 0x1c4   : > { %v1688_v53 = vpop.f32.mrf.mxu3 }
 0x1c5   : > { %v2019_v55 = vmax.f32 %v1953_v51, 0.0  ;;  %v1689_v11 = vadd.f32 %v1688_v53, %v4134_v2  ;;  %v1955_v57 = vpop.f32.mrf.mxu2  ;;  %v2901_v2 = vor.u32 %v3274_v29, %v2898_v1  ;;  %v3285_v51 = vld [vmem:[%s3831_s29 + $0x370] sm:$0xf0]  ;;  %v2940_v53 = vld [vmem:[%s3831_s29 + $0x360] sm:$0xf] }
 0x1c6   : > { %v1779_v58 = vpop.f32.mrf.mxu0 }
 0x1c7   : > { %v3363_v0 = vpack.c.bf16 %v2019_v55, %v2018_v56  ;;  %v1778_v5 = vadd.f32 %v1777_v36, %v1689_v11  ;;  %v3286_v56 = vld [vmem:[%s3831_s29 + $0x378] sm:$0xf0]  ;;  %v2934_v11 = vld [vmem:[%s3831_s29 + $0x374] sm:$0xf0] }
 0x1c8   : > { %v1868_v3 = vpop.f32.mrf.mxu1  ;;  %v3282_v55 = vld [vmem:[%s3831_s29 + $0x35c] sm:$0xf]  ;;  %v2941_v1 = vor.u32 %v3286_v56, %v2940_v53 }
 0x1c9   : > { %3423 = vst [vmem:[%s4295_s12 + $0x20] sm:$0xff] %v3363_v0   ;;  %v1867_v7 = vadd.f32 %v1866_v49, %v1778_v5  ;;  %v3281_v49 = vld [vmem:[%s3831_s29 + $0x354] sm:$0xf]  ;;  %v2933_v5 = vor.u32 %v3285_v51, %v2932_v52  ;;  %v2937_v61 = vor.u32 %v3282_v55, %v2934_v11  ;;  %s2114_s29 = ssub.s32 (%p3721_p3), 49, %s3776_s21 }
 0x1ca   : > { %p2115_p9 = scmp.lt.s32.totalorder (%p3721_p3), %s2114_s29, 32 }
 0x1cb   : > { %v1956_v34 = vadd.f32 %v1955_v57, %v1867_v7 }
 0x1cc   : > { %v1690_v60 = vpop.f32.mrf.mxu3 }
 0x1cd   : > { %v1691_v45 = vadd.f32 %v1690_v60, %v4149_v30  ;;  %v1957_v21 = vpop.f32.mrf.mxu2  ;;  %v2020_v17 = vmax.f32 %v1956_v34, 0.0 }
 0x1ce   : > { %v1782_v32 = vpop.f32.mrf.mxu0 }
 0x1cf   : > { %v1780_v33 = vadd.f32 %v1779_v58, %v1691_v45 }
 0x1d0   : > { %v1871_v10 = vpop.f32.mrf.mxu1 }
 0x1d1   : > { %v1869_v35 = vadd.f32 %v1868_v3, %v1780_v33  ;;  %1732 = vmatmul.bf16.gmra.mxu3 %v2901_v2  ;;  %1821 = vmatmul.bf16.gmra.mxu0 %v2905_v20 }
 0x1d2   : > { %3156 = vmatmul.msk.bf16.gmra.mxu2 %vm1338_vm0, %v2913_v28 }
 0x1d3   : > { %1910 = vmatmul.bf16.gmra.mxu1 %v2909_v31  ;;  %v1958_v30 = vadd.f32 %v1957_v21, %v1869_v35 }
 0x1d4   : > { %v1693_v54 = vpop.f32.mrf.mxu3 }
 0x1d5   : > { %v2021_v50 = vmax.f32 %v1958_v30, 0.0  ;;  %v1694_v16 = vadd.f32 %v1693_v54, %v4157_v39  ;;  %v1960_v44 = vpop.f32.mrf.mxu2  ;;  %v2929_v39 = vor.u32 %v3281_v49, %v2926_v40 }
 0x1d6   : > { %v1784_v36 = vpop.f32.mrf.mxu0 }
 0x1d7   : > { %v3368_v23 = vpack.c.bf16 %v2021_v50, %v2020_v17  ;;  %v1783_v47 = vadd.f32 %v1782_v32, %v1694_v16 }
 0x1d8   : > { %v1873_v43 = vpop.f32.mrf.mxu1 }
 0x1d9   : > { %3424 = vst [vmem:[%s4295_s12 + $0x28] sm:$0xff] %v3368_v23   ;;  %v1872_v58 = vadd.f32 %v1871_v10, %v1783_v47 }
 0x1db   : > { %v1961_v62 = vadd.f32 %v1960_v44, %v1872_v58 }
 0x1dc   : > { %v1695_v57 = vpop.f32.mrf.mxu3 }
 0x1dd   : > { %v1696_v0 = vadd.f32 %v1695_v57, %v4172_v6  ;;  %v1962_v3 = vpop.f32.mrf.mxu2  ;;  %v2022_v7 = vmax.f32 %v1961_v62, 0.0 }
 0x1de   : > { %v1787_v29 = vpop.f32.mrf.mxu0 }
 0x1df   : > { %v1785_v8 = vadd.f32 %v1784_v36, %v1696_v0 }
 0x1e0   : > { %v1876_v15 = vpop.f32.mrf.mxu1 }
 0x1e1   : > { %v1874_v41 = vadd.f32 %v1873_v43, %v1785_v8  ;;  %1737 = vmatmul.bf16.gmra.mxu3 %v2929_v39  ;;  %1826 = vmatmul.bf16.gmra.mxu0 %v2933_v5 }
 0x1e2   : > { %3157 = vmatmul.msk.bf16.gmra.mxu2 %vm1338_vm0, %v2941_v1 }
 0x1e3   : > { %1915 = vmatmul.bf16.gmra.mxu1 %v2937_v61  ;;  %v1963_v18 = vadd.f32 %v1962_v3, %v1874_v41 }
 0x1e4   : > { %v1698_v60 = vpop.f32.mrf.mxu3 }
 0x1e5   : > { %v2023_v6 = vmax.f32 %v1963_v18, 0.0  ;;  %v1699_v45 = vadd.f32 %v1698_v60, %v4180_v13  ;;  %v1965_v21 = vpop.f32.mrf.mxu2 }
 0x1e6   : > { %v1789_v2 = vpop.f32.mrf.mxu0 }
 0x1e7   : > { %v3373_v20 = vpack.c.bf16 %v2023_v6, %v2022_v7  ;;  %v1788_v28 = vadd.f32 %v1787_v29, %v1699_v45 }
 0x1e8   : > { %v1878_v32 = vpop.f32.mrf.mxu1 }
 0x1e9   : > { %3425 = vst [vmem:[%s4295_s12 + $0x30] sm:$0xff] %v3373_v20   ;;  %v1877_v33 = vadd.f32 %v1876_v15, %v1788_v28 }
 0x1eb   : > { %v1966_v17 = vadd.f32 %v1965_v21, %v1877_v33 }
 0x1ec   : > { %v1700_v31 = vpop.f32.mrf.mxu3 }
 0x1ed   : > { %v1701_v10 = vadd.f32 %v1700_v31, %v4195_v48  ;;  %v1967_v34 = vpop.f32.mrf.mxu2  ;;  %v2024_v13 = vmax.f32 %v1966_v17, 0.0 }
 0x1ee   : > { %v1792_v35 = vpop.f32.mrf.mxu0 }
 0x1ef   : > { %v1790_v30 = vadd.f32 %v1789_v2, %v1701_v10 }
 0x1f0   : > { %v1881_v54 = vpop.f32.mrf.mxu1 }
 0x1f1   : > { %v1879_v50 = vadd.f32 %v1878_v32, %v1790_v30 }
 0x1f3   : > { %v1968_v16 = vadd.f32 %v1967_v34, %v1879_v50 }
 0x1f4   : > { %v1703_v44 = vpop.f32.mrf.mxu3 }
 0x1f5   : > { %v2025_v36 = vmax.f32 %v1968_v16, 0.0  ;;  %v1704_v23 = vadd.f32 %v1703_v44, %v4202_v59  ;;  %v1970_v43 = vpop.f32.mrf.mxu2 }
 0x1f6   : > { %v1794_v47 = vpop.f32.mrf.mxu0 }
 0x1f7   : > { %v3378_v49 = vpack.c.bf16 %v2025_v36, %v2024_v13  ;;  %v1793_v52 = vadd.f32 %v1792_v35, %v1704_v23 }
 0x1f8   : > { %v1883_v40 = vpop.f32.mrf.mxu1 }
 0x1f9   : > { %3426 = vst [vmem:[%s4295_s12 + $0x38] sm:$0xff] %v3378_v49   ;;  %v1882_v51 = vadd.f32 %v1881_v54, %v1793_v52 }
 0x1fb   : > { %v1971_v58 = vadd.f32 %v1970_v43, %v1882_v51 }
 0x1fc   : > { %v1705_v48 = vpop.f32.mrf.mxu3 }
 0x1fd   : > { %v1706_v53 = vadd.f32 %v1705_v48, %v4216_v19  ;;  %v1972_v56 = vpop.f32.mrf.mxu2  ;;  %v2026_v59 = vmax.f32 %v1971_v58, 0.0 }
 0x1fe   : > { %v1797_v55 = vpop.f32.mrf.mxu0 }
 0x1ff   : > { %v1795_v11 = vadd.f32 %v1794_v47, %v1706_v53 }
 0x200   : > { %v1886_v57 = vpop.f32.mrf.mxu1 }
 0x201   : > { %v1884_v0 = vadd.f32 %v1883_v40, %v1795_v11 }
 0x203   : > { %v1973_v3 = vadd.f32 %v1972_v56, %v1884_v0 }
 0x204   : > { %v1708_v39 = vpop.f32.mrf.mxu3 }
 0x205   : > { %v2027_v5 = vmax.f32 %v1973_v3, 0.0  ;;  %v1709_v29 = vadd.f32 %v1708_v39, %v4223_v22  ;;  %v1975_v1 = vpop.f32.mrf.mxu2 }
 0x206   : > { %v1799_v61 = vpop.f32.mrf.mxu0 }
 0x207   : > { %v3383_v8 = vpack.c.bf16 %v2027_v5, %v2026_v59  ;;  %v1798_v62 = vadd.f32 %v1797_v55, %v1709_v29 }
 0x208   : > { %v1888_v15 = vpop.f32.mrf.mxu1 }
 0x209   : > { %3427 = vst [vmem:[%s4295_s12 + $0x40] sm:$0xff] %v3383_v8   ;;  %v1887_v41 = vadd.f32 %v1886_v57, %v1798_v62 }
 0x20b   : > { %v1976_v21 = vadd.f32 %v1975_v1, %v1887_v41 }
 0x20c   : > { %v1710_v19 = vpop.f32.mrf.mxu3 }
 0x20d   : > { %v1711_v18 = vadd.f32 %v1710_v19, %v4237_v12  ;;  %v1977_v60 = vpop.f32.mrf.mxu2  ;;  %v2028_v22 = vmax.f32 %v1976_v21, 0.0 }
 0x20e   : > { %v1802_v7 = vpop.f32.mrf.mxu0 }
 0x20f   : > { %v1800_v6 = vadd.f32 %v1799_v61, %v1711_v18 }
 0x210   : > { %v1891_v45 = vpop.f32.mrf.mxu1 }
 0x211   : > { %v1889_v2 = vadd.f32 %v1888_v15, %v1800_v6 }
 0x213   : > { %v1978_v20 = vadd.f32 %v1977_v60, %v1889_v2 }
 0x214   : > { %v1713_v32 = vpop.f32.mrf.mxu3 }
 0x215   : > { %v2029_v28 = vmax.f32 %v1978_v20, 0.0  ;;  %v1714_v31 = vadd.f32 %v1713_v32, %v4244_v25  ;;  %v1980_v33 = vpop.f32.mrf.mxu2 }
 0x216   : > { %v1804_v10 = vpop.f32.mrf.mxu0 }
 0x217   : > { %v3388_v34 = vpack.c.bf16 %v2029_v28, %v2028_v22  ;;  %v1803_v30 = vadd.f32 %v1802_v7, %v1714_v31 }
 0x218   : > { %v1893_v35 = vpop.f32.mrf.mxu1 }
 0x219   : > { %3428 = vst [vmem:[%s4295_s12 + $0x48] sm:$0xff] %v3388_v34   ;;  %v1892_v54 = vadd.f32 %v1891_v45, %v1803_v30 }
 0x21b   : > { %v1981_v36 = vadd.f32 %v1980_v33, %v1892_v54 }
 0x21c   : > { %v1715_v12 = vpop.f32.mrf.mxu3 }
 0x21d   : > { %v1716_v17 = vadd.f32 %v1715_v12, %v4258_v27  ;;  %v1982_v50 = vpop.f32.mrf.mxu2  ;;  %v2030_v25 = vmax.f32 %v1981_v36, 0.0 }
 0x21e   : > { %v1807_v16 = vpop.f32.mrf.mxu0 }
 0x21f   : > { %v1805_v44 = vadd.f32 %v1804_v10, %v1716_v17 }
 0x220   : > { %v1896_v13 = vpop.f32.mrf.mxu1 }
 0x221   : > { %v1894_v23 = vadd.f32 %v1893_v35, %v1805_v44 }
 0x223   : > { %v1983_v43 = vadd.f32 %v1982_v50, %v1894_v23 }
 0x224   : > { %v1718_v47 = vpop.f32.mrf.mxu3 }
 0x225   : > { %v2031_v49 = vmax.f32 %v1983_v43, 0.0  ;;  %v1719_v40 = vadd.f32 %v1718_v47, %v4265_v14  ;;  %v1985_v52 = vpop.f32.mrf.mxu2 }
 0x226   : > { %v1809_v48 = vpop.f32.mrf.mxu0 }
 0x227   : > { %v3393_v51 = vpack.c.bf16 %v2031_v49, %v2030_v25  ;;  %v1808_v56 = vadd.f32 %v1807_v16, %v1719_v40 }
 0x228   : > { %v1898_v53 = vpop.f32.mrf.mxu1 }
 0x229   : > { %3429 = vst [vmem:[%s4295_s12 + $0x50] sm:$0xff] %v3393_v51   ;;  %v1897_v55 = vadd.f32 %v1896_v13, %v1808_v56 }
 0x22b   : > { %v1986_v39 = vadd.f32 %v1985_v52, %v1897_v55 }
 0x22c   : > { %v1720_v27 = vpop.f32.mrf.mxu3 }
 0x22d   : > { %v1721_v11 = vadd.f32 %v1720_v27, %v4279_v42  ;;  %v1987_v57 = vpop.f32.mrf.mxu2  ;;  %v2032_v14 = vmax.f32 %v1986_v39, 0.0 }
 0x22e   : > { %v1812_v58 = vpop.f32.mrf.mxu0 }
 0x22f   : > { %v1810_v0 = vadd.f32 %v1809_v48, %v1721_v11 }
 0x230   : > { %v1901_v3 = vpop.f32.mrf.mxu1 }
 0x231   : > { %v1899_v59 = vadd.f32 %v1898_v53, %v1810_v0 }
 0x233   : > { %v1988_v5 = vadd.f32 %v1987_v57, %v1899_v59 }
 0x234   : > { %v1723_v29 = vpop.f32.mrf.mxu3 }
 0x235   : > { %v2033_v1 = vmax.f32 %v1988_v5, 0.0  ;;  %v1724_v61 = vadd.f32 %v1723_v29, %v4200_v46  ;;  %v1990_v8 = vpop.f32.mrf.mxu2 }
 0x236   : > { %v1814_v15 = vpop.f32.mrf.mxu0 }
 0x237   : > { %v3398_v62 = vpack.c.bf16 %v2033_v1, %v2032_v14  ;;  %v1813_v41 = vadd.f32 %v1812_v58, %v1724_v61 }
 0x238   : > { %v1903_v19 = vpop.f32.mrf.mxu1 }
 0x239   : > { %3430 = vst [vmem:[%s4295_s12 + $0x58] sm:$0xff] %v3398_v62   ;;  %v1902_v18 = vadd.f32 %v1901_v3, %v1813_v41 }
 0x23b   : > { %v1991_v2 = vadd.f32 %v1990_v8, %v1902_v18 }
 0x23c   : > { %v1725_v42 = vpop.f32.mrf.mxu3 }
 0x23d   : > { %v1726_v60 = vadd.f32 %v1725_v42, %v4214_v26  ;;  %v1992_v7 = vpop.f32.mrf.mxu2  ;;  %v2034_v46 = vmax.f32 %v1991_v2, 0.0 }
 0x23e   : > { %v1817_v6 = vpop.f32.mrf.mxu0 }
 0x23f   : > { %v1815_v45 = vadd.f32 %v1814_v15, %v1726_v60 }
 0x240   : > { %v1906_v21 = vpop.f32.mrf.mxu1 }
 0x241   : > { %v1904_v20 = vadd.f32 %v1903_v19, %v1815_v45 }
 0x243   : > { %v1993_v32 = vadd.f32 %v1992_v7, %v1904_v20 }
 0x244   : > { %v1728_v22 = vpop.f32.mrf.mxu3 }
 0x245   : > { %v2035_v28 = vmax.f32 %v1993_v32, 0.0  ;;  %v1729_v31 = vadd.f32 %v1728_v22, %v4221_v37  ;;  %v1995_v33 = vpop.f32.mrf.mxu2 }
 0x246   : > { %v1819_v10 = vpop.f32.mrf.mxu0 }
 0x247   : > { %v3403_v34 = vpack.c.bf16 %v2035_v28, %v2034_v46  ;;  %v1818_v30 = vadd.f32 %v1817_v6, %v1729_v31 }
 0x248   : > { %v1908_v35 = vpop.f32.mrf.mxu1 }
 0x249   : > { %3431 = vst [vmem:[%s4295_s12 + $0x60] sm:$0xff] %v3403_v34   ;;  %v1907_v12 = vadd.f32 %v1906_v21, %v1818_v30 }
 0x24b   : > { %v1996_v44 = vadd.f32 %v1995_v33, %v1907_v12 }
 0x24c   : > { %v1730_v26 = vpop.f32.mrf.mxu3 }
 0x24d   : > { %v1731_v54 = vadd.f32 %v1730_v26, %v4235_v63  ;;  %v1997_v17 = vpop.f32.mrf.mxu2  ;;  %v2036_v37 = vmax.f32 %v1996_v44, 0.0 }
 0x24e   : > { %v1822_v16 = vpop.f32.mrf.mxu0 }
 0x24f   : > { %v1820_v50 = vadd.f32 %v1819_v10, %v1731_v54 }
 0x250   : > { %v1911_v36 = vpop.f32.mrf.mxu1 }
 0x251   : > { %v1909_v13 = vadd.f32 %v1908_v35, %v1820_v50 }
 0x253   : > { %v1998_v23 = vadd.f32 %v1997_v17, %v1909_v13 }
 0x254   : > { %v1733_v43 = vpop.f32.mrf.mxu3 }
 0x255   : > { %v2037_v47 = vmax.f32 %v1998_v23, 0.0  ;;  %v1734_v25 = vadd.f32 %v1733_v43, %v4242_v24  ;;  %v2000_v49 = vpop.f32.mrf.mxu2 }
 0x256   : > { %v1824_v48 = vpop.f32.mrf.mxu0 }
 0x257   : > { %v3408_v40 = vpack.c.bf16 %v2037_v47, %v2036_v37  ;;  %v1823_v52 = vadd.f32 %v1822_v16, %v1734_v25 }
 0x258   : > { %v1913_v51 = vpop.f32.mrf.mxu1 }
 0x259   : > { %3432 = vst [vmem:[%s4295_s12 + $0x68] sm:$0xff] %v3408_v40   ;;  %v1912_v63 = vadd.f32 %v1911_v36, %v1823_v52 }
 0x25b   : > { %v2001_v11 = vadd.f32 %v2000_v49, %v1912_v63 }
 0x25c   : > { %v1735_v53 = vpop.f32.mrf.mxu3 }
 0x25d   : > { %v1736_v56 = vadd.f32 %v1735_v53, %v4256_v38  ;;  %v2002_v27 = vpop.f32.mrf.mxu2  ;;  %v2038_v39 = vmax.f32 %v2001_v11, 0.0 }
 0x25e   : > { %v1827_v0 = vpop.f32.mrf.mxu0 }
 0x25f   : > { %v1825_v55 = vadd.f32 %v1824_v48, %v1736_v56 }
 0x260   : > { %v1916_v5 = vpop.f32.mrf.mxu1 }
 0x261   : > { %v1914_v57 = vadd.f32 %v1913_v51, %v1825_v55 }
 0x263   : > { %v2003_v58 = vadd.f32 %v2002_v27, %v1914_v57 }
 0x264   : > { %v1738_v3 = vpop.f32.mrf.mxu3 }
 0x265   : > { %v2039_v24 = vmax.f32 %v2003_v58, 0.0  ;;  %v1739_v59 = vadd.f32 %v1738_v3, %v4263_v9  ;;  %v2005_v14 = vpop.f32.mrf.mxu2 }
 0x266   : > { %v1829_v15 = vpop.f32.mrf.mxu0 }
 0x267   : > { %v3413_v29 = vpack.c.bf16 %v2039_v24, %v2038_v39  ;;  %v1828_v1 = vadd.f32 %v1827_v0, %v1739_v59 }
 0x268   : > { %v1918_v19 = vpop.f32.mrf.mxu1 }
 0x269   : > { %3433 = vst [vmem:[%s4295_s12 + $0x70] sm:$0xff] %v3413_v29   ;;  %v1917_v8 = vadd.f32 %v1916_v5, %v1828_v1 }
 0x26b   : > { %v2006_v41 = vadd.f32 %v2005_v14, %v1917_v8 }
 0x26c   : > { %v1740_v61 = vpop.f32.mrf.mxu3 }
 0x26d   : > { %v1741_v38 = vadd.f32 %v1740_v61, %v4277_v4  ;;  %v2007_v18 = vpop.f32.mrf.mxu2  ;;  %v2040_v7 = vmax.f32 %v2006_v41, 0.0 }
 0x26f   : > { %v1830_v62 = vadd.f32 %v1829_v15, %v1741_v38 }
 0x271   : > { %v1919_v42 = vadd.f32 %v1918_v19, %v1830_v62 }
 0x273   : > { %v2008_v60 = vadd.f32 %v2007_v18, %v1919_v42 }
 0x275   : > { %v2041_v6 = vmax.f32 %v2008_v60, 0.0  ;;  %2112 = sbr.rel (!%p3721_p3) target bundleno = 698 (0x2ba), region = 36 }
 0x277   : > { %v3418_v9 = vpack.c.bf16 %v2041_v6, %v2040_v7 }
 0x279   : > { %3434 = vst [vmem:[%s4295_s12 + $0x78] sm:$0xff] %v3418_v9  }
 0x27a   : > { %s4560_s29 = smov (!%p2115_p9, %s2114_s29), 32 }
 0x27b   : > { %s3160_s5 = sshll.u32 %s4560_s29, 2 }
 0x27c   : > { %p3163_p10 = scmp.eq.s32.totalorder %s3160_s5, 0 }
 0x27d   : > { %s4409_s6 = sshrl.u32 (!%p3163_p10), %s4560_s29, 5 }
 0x27e   : > { %2124 = sbr.rel (%p3163_p10) target bundleno = 698 (0x2ba), region = 40  ;;  %p3164_p11 = scmp.le.s32.totalorder (!%p3163_p10), %s4409_s6, 0 }
 0x283   : > { %2414 = sbr.rel (%p3164_p11) target bundleno = 681 (0x2a9), region = 118  ;;  %s4548_s14 = smov (!%p3164_p11), %s4403_s4 }
 0x284   : > { %s4549_s20 = smov (!%p3164_p11), %s4295_s12  ;;  %s4418_s21 = smov (!%p3164_p11), 0  }
 0x285   : > { %s4420_s7 = smov (!%p3164_p11), 0  }
 0x288 LB: >> { %v2141_v4 = vld [vmem:[%s3643_s20] sm:$0xf]  ;;  %v2143_v45 = vld [vmem:[%s3643_s20 + $0x4] sm:$0xf]  ;;  %v2145_v21 = vld [vmem:[%s3643_s20 + $0x8] sm:$0xf]  ;;  %s3651_s7 = sphi %s4420_s7, %s2135_s7   ;;  %s3647_s21 = sphi %s4418_s21, %s4552_s21   ;;  %s3643_s20 = sphi %s4549_s20, %s4551_s20   ;;  %s3639_s14 = sphi %s4548_s14, %s4550_s14  }
 0x289   : >> { %2142 = vst [vmem:[%s3639_s14] sm:$0xf] %v2141_v4  ;;  %v2147_v2 = vld [vmem:[%s3643_s20 + $0xc] sm:$0xf]  ;;  %v2149_v20 = vld [vmem:[%s3643_s20 + $0x10] sm:$0xf]  ;;  %s2205_s8 = sadd.s32 1, %s3647_s21 }
 0x28a   : >> { %2144 = vst [vmem:[%s3639_s14 + $0x4] sm:$0xf] %v2143_v45  ;;  %v2151_v32 = vld [vmem:[%s3643_s20 + $0x14] sm:$0xf]  ;;  %v2153_v22 = vld [vmem:[%s3643_s20 + $0x18] sm:$0xf]  ;;  %p2206_p12 = scmp.ge.s32.totalorder %s2205_s8, %s4409_s6 }
 0x28b   : >> { %2146 = vst [vmem:[%s3639_s14 + $0x8] sm:$0xf] %v2145_v21  ;;  %v2155_v46 = vld [vmem:[%s3643_s20 + $0x1c] sm:$0xf]  ;;  %v2157_v28 = vld [vmem:[%s3643_s20 + $0x20] sm:$0xf] }
 0x28c   : >> { %2148 = vst [vmem:[%s3639_s14 + $0xc] sm:$0xf] %v2147_v2  ;;  %v2159_v31 = vld [vmem:[%s3643_s20 + $0x24] sm:$0xf]  ;;  %v2161_v33 = vld [vmem:[%s3643_s20 + $0x28] sm:$0xf] }
 0x28d   : >> { %2150 = vst [vmem:[%s3639_s14 + $0x10] sm:$0xf] %v2149_v20  ;;  %v2163_v10 = vld [vmem:[%s3643_s20 + $0x2c] sm:$0xf]  ;;  %v2165_v34 = vld [vmem:[%s3643_s20 + $0x30] sm:$0xf] }
 0x28e   : >> { %2152 = vst [vmem:[%s3639_s14 + $0x14] sm:$0xf] %v2151_v32  ;;  %v2167_v35 = vld [vmem:[%s3643_s20 + $0x34] sm:$0xf]  ;;  %v2169_v30 = vld [vmem:[%s3643_s20 + $0x38] sm:$0xf] }
 0x28f   : >> { %2154 = vst [vmem:[%s3639_s14 + $0x18] sm:$0xf] %v2153_v22  ;;  %v2171_v26 = vld [vmem:[%s3643_s20 + $0x3c] sm:$0xf]  ;;  %v2173_v12 = vld [vmem:[%s3643_s20 + $0x40] sm:$0xf] }
 0x290   : >> { %2156 = vst [vmem:[%s3639_s14 + $0x1c] sm:$0xf] %v2155_v46  ;;  %v2175_v54 = vld [vmem:[%s3643_s20 + $0x44] sm:$0xf]  ;;  %s4562_s8 = smov (%p2206_p12, %s2205_s8), 0  ;;  %s2135_s7 = sadd.s32 1, %s3651_s7  }
 0x291   : >> { %2158 = vst [vmem:[%s3639_s14 + $0x20] sm:$0xf] %v2157_v28  ;;  %v2177_v17 = vld [vmem:[%s3643_s20 + $0x48] sm:$0xf]  ;;  %v2179_v50 = vld [vmem:[%s3643_s20 + $0x4c] sm:$0xf]  ;;  %p2134_p13 = scmp.ge.s32.totalorder %s2135_s7, %s4409_s6  ;;  %s4552_s21 = smov %s4562_s8 }
 0x292   : >> { %2160 = vst [vmem:[%s3639_s14 + $0x24] sm:$0xf] %v2159_v31  ;;  %s3165_s9 = sshll.u32 %s4562_s8, 7  ;;  %v2181_v16 = vld [vmem:[%s3643_s20 + $0x50] sm:$0xf] }
 0x293   : >> { %2162 = vst [vmem:[%s3639_s14 + $0x28] sm:$0xf] %v2161_v33  ;;  %s4479_s10 = scalar_lea.vmem %s4295_s12, %s3165_s9 [#allocation2]   ;;  %s2211_s11 = scalar_lea.vmem %s4403_s4, %s3165_s9   ;;  %v2183_v44 = vld [vmem:[%s3643_s20 + $0x54] sm:$0xf]  ;;  %v2185_v13 = vld [vmem:[%s3643_s20 + $0x58] sm:$0xf] }
 0x294   : >> { %2164 = vst [vmem:[%s3639_s14 + $0x2c] sm:$0xf] %v2163_v10  ;;  %v2187_v36 = vld [vmem:[%s3643_s20 + $0x5c] sm:$0xf]  ;;  %v2189_v23 = vld [vmem:[%s3643_s20 + $0x60] sm:$0xf] }
 0x295   : >> { %2166 = vst [vmem:[%s3639_s14 + $0x30] sm:$0xf] %v2165_v34  ;;  %v2191_v43 = vld [vmem:[%s3643_s20 + $0x64] sm:$0xf]  ;;  %v2193_v37 = vld [vmem:[%s3643_s20 + $0x68] sm:$0xf] }
 0x296   : >> { %2168 = vst [vmem:[%s3639_s14 + $0x34] sm:$0xf] %v2167_v35  ;;  %v2195_v47 = vld [vmem:[%s3643_s20 + $0x6c] sm:$0xf]  ;;  %v2197_v25 = vld [vmem:[%s3643_s20 + $0x70] sm:$0xf] }
 0x297   : >> { %2170 = vst [vmem:[%s3639_s14 + $0x38] sm:$0xf] %v2169_v30  ;;  %v2199_v49 = vld [vmem:[%s3643_s20 + $0x74] sm:$0xf]  ;;  %v2201_v40 = vld [vmem:[%s3643_s20 + $0x78] sm:$0xf] }
 0x298   : >> { %2172 = vst [vmem:[%s3639_s14 + $0x3c] sm:$0xf] %v2171_v26  ;;  %v2203_v52 = vld [vmem:[%s3643_s20 + $0x7c] sm:$0xf]  ;;  %s4551_s20 = smov %s4479_s10 }
 0x299   : >> { %2174 = vst [vmem:[%s3639_s14 + $0x40] sm:$0xf] %v2173_v12 }
 0x29a   : >> { %2176 = vst [vmem:[%s3639_s14 + $0x44] sm:$0xf] %v2175_v54 }
 0x29b   : >> { %2178 = vst [vmem:[%s3639_s14 + $0x48] sm:$0xf] %v2177_v17 }
 0x29c   : >> { %2180 = vst [vmem:[%s3639_s14 + $0x4c] sm:$0xf] %v2179_v50 }
 0x29d   : >> { %2182 = vst [vmem:[%s3639_s14 + $0x50] sm:$0xf] %v2181_v16 }
 0x29e   : >> { %2184 = vst [vmem:[%s3639_s14 + $0x54] sm:$0xf] %v2183_v44 }
 0x29f   : >> { %2186 = vst [vmem:[%s3639_s14 + $0x58] sm:$0xf] %v2185_v13 }
 0x2a0   : >> { %2188 = vst [vmem:[%s3639_s14 + $0x5c] sm:$0xf] %v2187_v36 }
 0x2a1   : >> { %2190 = vst [vmem:[%s3639_s14 + $0x60] sm:$0xf] %v2189_v23 }
 0x2a2   : >> { %2192 = vst [vmem:[%s3639_s14 + $0x64] sm:$0xf] %v2191_v43 }
 0x2a3   : >> { %2194 = vst [vmem:[%s3639_s14 + $0x68] sm:$0xf] %v2193_v37 }
 0x2a4   : >> { %2196 = vst [vmem:[%s3639_s14 + $0x6c] sm:$0xf] %v2195_v47  ;;  %2137 = sbr.rel (!%p2134_p13) target bundleno = 648 (0x288), region = 124 }
 0x2a5   : >> { %2198 = vst [vmem:[%s3639_s14 + $0x70] sm:$0xf] %v2197_v25 }
 0x2a6   : >> { %2200 = vst [vmem:[%s3639_s14 + $0x74] sm:$0xf] %v2199_v49 }
 0x2a7   : >> { %2202 = vst [vmem:[%s3639_s14 + $0x78] sm:$0xf] %v2201_v40 }
 0x2a8   : >> { %2204 = vst [vmem:[%s3639_s14 + $0x7c] sm:$0xf] %v2203_v52  ;;  %s4550_s14 = smov %s2211_s11 }
 0x2a9 PF: > { %s4520_s17 = sand.u32 31, %s4560_s29   ;;  %s3338_s19 = sshll.u32 %s4409_s6, 7 }
 0x2aa   : > { %s2216_s23 = scalar_lea.vmem %s4295_s12, %s3338_s19 [#allocation2]   ;;  %s2218_s24 = scalar_lea.vmem %s4403_s4, %s3338_s19  }
 0x2ab   : > { %p3170_p0 = scmp.le.s32.totalorder %s4520_s17, 0 }
 0x2ac   : > { %s3653_s25 = smov (!%p3170_p0), %s2218_s24   ;;  %s3657_s26 = smov (!%p3170_p0), %s2216_s23  }
 0x2ad   : > { %2428 = sbr.rel (%p3170_p0) target bundleno = 698 (0x2ba), region = 129  ;;  %s3661_s27 = smov (!%p3170_p0), 0  }
 0x2ae   : > { %s3665_s28 = smov (!%p3170_p0), 0  }
 0x2b2 LB: >> { %v2228_v48 = vld [vmem:[%s3659_s26] sm:$0xf]  ;;  %s2230_s29 = sadd.s32 1, %s3663_s27  ;;  %s2222_s28 = sadd.s32 1, %s3667_s28   ;;  %s3667_s28 = sphi %s3665_s28, %s2222_s28   ;;  %s3663_s27 = sphi %s3661_s27, %s3662_s27   ;;  %s3659_s26 = sphi %s3657_s26, %s2235_s26   ;;  %s3655_s25 = sphi %s3653_s25, %s2236_s25  }
 0x2b3   : >> { %2229 = vst [vmem:[%s3655_s25] sm:$0xf] %v2228_v48  ;;  %p2231_p1 = scmp.ge.s32.totalorder %s2230_s29, %s4520_s17  ;;  %p2221_p2 = scmp.ge.s32.totalorder %s2222_s28, %s4520_s17 }
 0x2b5   : >> { %s4564_s29 = smov (%p2231_p1, %s2230_s29), 0  ;;  %2224 = sbr.rel (!%p2221_p2) target bundleno = 690 (0x2b2), region = 135 }
 0x2b6   : >> { %s3171_s12 = sshll.u32 %s4564_s29, 2  ;;  %s3662_s27 = smov %s4564_s29  }
 0x2b7   : >> { %s2235_s26 = scalar_lea.vmem %s2216_s23, %s3171_s12 [#allocation2]   ;;  %s2236_s25 = scalar_lea.vmem %s2218_s24, %s3171_s12  }
 0x2ba PF: > { %s13_s16 = sadd.s32 1, %s3635_s16   ;;  %s4553_s12 = smov %s3623_s13 }
 0x2bb   : > { %p10_p3 = scmp.ge.s32.totalorder %s13_s16, 4   ;;  %s4554_s13 = smov %s3730_s22 }
 0x2bc   : > { %s4555_s14 = smov %s3631_s15  ;;  %s4556_s15 = smov %s4558_s18 }
 0x2bd   :  { %12 = sbr.rel (!%p10_p3) target bundleno = 3 (0x3), region = 146 }

// kernel: convnet_forward.11
= control target key start
LH: loop header
LB: loop body
LE: loop exit
PB: predicated region body
PF: predicated region fallthrough
CT: control target
= control target key end

     0   :  { %s1241_s0 = inlined_call_operand.vmem [shape: bf16[2,1024], index: 0, kind: input, shape index: {}]   ;;  %s1242_s1 = inlined_call_operand.vmem [shape: bf16[1024,128], index: 1, kind: input, shape index: {}]   ;;  %s1243_s2 = inlined_call_operand.vmem [shape: f32[1,128], index: 2, kind: input, shape index: {}]   ;;  %s1244_s3 = inlined_call_operand.hbm [shape: f32[2,128], index: 3, kind: output, shape index: {}]  }
   0x1   :  { %v934_v0 = vld [vmem:[%s1242_s1 + $0x38] sm:$0xff]  ;;  %v933_v4 = vld [vmem:[%s1242_s1 + $0x30] sm:$0xff]  ;;  %v932_v8 = vld [vmem:[%s1242_s1 + $0x28] sm:$0xff] }
   0x2   :  { %v942_v1 = vld [vmem:[%s1242_s1 + $0x78] sm:$0xff]  ;;  %550 = vmatpush.bf16.msra.mxu0 %v934_v0  ;;  %v941_v5 = vld [vmem:[%s1242_s1 + $0x70] sm:$0xff]  ;;  %v940_v9 = vld [vmem:[%s1242_s1 + $0x68] sm:$0xff] }
   0x3   :  { %v950_v2 = vld [vmem:[%s1242_s1 + $0xb8] sm:$0xff]  ;;  %563 = vmatpush.bf16.msra.mxu1 %v942_v1  ;;  %v949_v6 = vld [vmem:[%s1242_s1 + $0xb0] sm:$0xff]  ;;  %v948_v10 = vld [vmem:[%s1242_s1 + $0xa8] sm:$0xff] }
   0x4   :  { %v958_v3 = vld [vmem:[%s1242_s1 + $0xf8] sm:$0xff]  ;;  %576 = vmatpush.bf16.msra.mxu2 %v950_v2  ;;  %v957_v7 = vld [vmem:[%s1242_s1 + $0xf0] sm:$0xff]  ;;  %v956_v11 = vld [vmem:[%s1242_s1 + $0xe8] sm:$0xff] }
   0x5   :  { %589 = vmatpush.bf16.msra.mxu3 %v958_v3  ;;  %v931_v12 = vld [vmem:[%s1242_s1 + $0x20] sm:$0xff]  ;;  %v930_v17 = vld [vmem:[%s1242_s1 + $0x18] sm:$0xff]  ;;  %v929_v21 = vld [vmem:[%s1242_s1 + $0x10] sm:$0xff] }
   0x6   :  { %551 = vmatpush.bf16.msra.mxu0 %v933_v4  ;;  %v939_v13 = vld [vmem:[%s1242_s1 + $0x60] sm:$0xff]  ;;  %v938_v18 = vld [vmem:[%s1242_s1 + $0x58] sm:$0xff]  ;;  %v937_v22 = vld [vmem:[%s1242_s1 + $0x50] sm:$0xff] }
   0x7   :  { %564 = vmatpush.bf16.msra.mxu1 %v941_v5  ;;  %v947_v14 = vld [vmem:[%s1242_s1 + $0xa0] sm:$0xff]  ;;  %v946_v19 = vld [vmem:[%s1242_s1 + $0x98] sm:$0xff] }
   0x8   :  { %577 = vmatpush.bf16.msra.mxu2 %v949_v6  ;;  %v955_v15 = vld [vmem:[%s1242_s1 + $0xe0] sm:$0xff]  ;;  %v954_v20 = vld [vmem:[%s1242_s1 + $0xd8] sm:$0xff] }
   0x9   :  { %590 = vmatpush.bf16.msra.mxu3 %v957_v7  ;;  %v15_v16 = vld [vmem:[%s1241_s0] sm:$0xff] }
   0xa   :  { %552 = vmatpush.bf16.msra.mxu0 %v932_v8  ;;  %149 = vst [vmem:[#allocation1] ss:$9 sm:$0xff] %v15_v16 }
   0xb   :  { %565 = vmatpush.bf16.msra.mxu1 %v940_v9 }
   0xc   :  { %578 = vmatpush.bf16.msra.mxu2 %v948_v10 }
   0xd   :  { %591 = vmatpush.bf16.msra.mxu3 %v956_v11 }
   0xe   :  { %553 = vmatpush.bf16.msra.mxu0 %v931_v12 }
   0xf   :  { %566 = vmatpush.bf16.msra.mxu1 %v939_v13 }
  0x10   :  { %579 = vmatpush.bf16.msra.mxu2 %v947_v14 }
  0x11   :  { %592 = vmatpush.bf16.msra.mxu3 %v955_v15 }
  0x12   :  { %554 = vmatpush.bf16.msra.mxu0 %v930_v17 }
  0x13   :  { %567 = vmatpush.bf16.msra.mxu1 %v938_v18 }
  0x14   :  { %8 = vsyncpa [#allocation3], 0  ;;  %580 = vmatpush.bf16.msra.mxu2 %v946_v19  ;;  %v945_v23 = vld [vmem:[%s1242_s1 + $0x90] sm:$0xff]  ;;  %v928_v25 = vld [vmem:[%s1242_s1 + $0x8] sm:$0xff]  ;;  %s1019_s4 = smov [#allocation2]   ;;  %s662_s8 = sshll.u32 %s1244_s3, 4  ;;  %s663_s8 = int_to_ptr.hbm [resolvable:$true] %s662_s8 }
  0x15   :  { %593 = vmatpush.bf16.msra.mxu3 %v954_v20  ;;  %v953_v24 = vld [vmem:[%s1242_s1 + $0xd0] sm:$0xff]  ;;  %v936_v26 = vld [vmem:[%s1242_s1 + $0x48] sm:$0xff]  ;;  %v927_v29 = vld [vmem:[%s1242_s1] sm:$0xff]  ;;  %s660_s5 = sshll.u32 %s1019_s4, 4  ;;  %s661_s5 = int_to_ptr.vmem [resolvable:$true] %s660_s5 }
  0x16   :  { %555 = vmatpush.bf16.msra.mxu0 %v929_v21  ;;  %v944_v27 = vld [vmem:[%s1242_s1 + $0x88] sm:$0xff]  ;;  %v935_v30 = vld [vmem:[%s1242_s1 + $0x40] sm:$0xff]  ;;  %v966_v33 = vld [vmem:[%s1242_s1 + $0x138] sm:$0xff] }
  0x17   :  { %568 = vmatpush.bf16.msra.mxu1 %v937_v22  ;;  %v952_v28 = vld [vmem:[%s1242_s1 + $0xc8] sm:$0xff]  ;;  %v943_v31 = vld [vmem:[%s1242_s1 + $0x80] sm:$0xff]  ;;  %v974_v34 = vld [vmem:[%s1242_s1 + $0x178] sm:$0xff] }
  0x18   :  { %581 = vmatpush.bf16.msra.mxu2 %v945_v23  ;;  %v951_v32 = vld [vmem:[%s1242_s1 + $0xc0] sm:$0xff]  ;;  %v982_v35 = vld [vmem:[%s1242_s1 + $0x1b8] sm:$0xff]  ;;  %v965_v37 = vld [vmem:[%s1242_s1 + $0x130] sm:$0xff] }
  0x19   :  { %594 = vmatpush.bf16.msra.mxu3 %v953_v24  ;;  %v990_v36 = vld [vmem:[%s1242_s1 + $0x1f8] sm:$0xff]  ;;  %v973_v40 = vld [vmem:[%s1242_s1 + $0x170] sm:$0xff]  ;;  %v150_v41 = vld [vmem:[#allocation1] sm:$0xff] }
  0x1a   :  { %556 = vmatpush.bf16.msra.mxu0 %v928_v25  ;;  %v152_v38 = vld [vmem:[#allocation1 + $0x12] sm:$0xff]  ;;  %v153_v39 = vld [vmem:[#allocation1 + $0x1b] sm:$0xff]  ;;  %v151_v42 = vld [vmem:[#allocation1 + $0x9] sm:$0xff] }
  0x1b   :  { %569 = vmatpush.bf16.msra.mxu1 %v936_v26  ;;  %v981_v43 = vld [vmem:[%s1242_s1 + $0x1b0] sm:$0xff]  ;;  %v964_v45 = vld [vmem:[%s1242_s1 + $0x128] sm:$0xff]  ;;  %v963_v49 = vld [vmem:[%s1242_s1 + $0x120] sm:$0xff] }
  0x1c   :  { %582 = vmatpush.bf16.msra.mxu2 %v944_v27  ;;  %v989_v44 = vld [vmem:[%s1242_s1 + $0x1f0] sm:$0xff]  ;;  %v972_v46 = vld [vmem:[%s1242_s1 + $0x168] sm:$0xff]  ;;  %v971_v50 = vld [vmem:[%s1242_s1 + $0x160] sm:$0xff] }
  0x1d   :  { %595 = vmatpush.bf16.msra.mxu3 %v952_v28  ;;  %v980_v47 = vld [vmem:[%s1242_s1 + $0x1a8] sm:$0xff]  ;;  %v979_v51 = vld [vmem:[%s1242_s1 + $0x1a0] sm:$0xff]  ;;  %v962_v53 = vld [vmem:[%s1242_s1 + $0x118] sm:$0xff] }
  0x1e   :  { %557 = vmatpush.bf16.msra.mxu0 %v927_v29  ;;  %v988_v48 = vld [vmem:[%s1242_s1 + $0x1e8] sm:$0xff]  ;;  %v987_v52 = vld [vmem:[%s1242_s1 + $0x1e0] sm:$0xff]  ;;  %v970_v54 = vld [vmem:[%s1242_s1 + $0x158] sm:$0xff] }
  0x1f   :  { %570 = vmatpush.bf16.msra.mxu1 %v935_v30  ;;  %v978_v55 = vld [vmem:[%s1242_s1 + $0x198] sm:$0xff]  ;;  %v961_v57 = vld [vmem:[%s1242_s1 + $0x110] sm:$0xff]  ;;  %v960_v61 = vld [vmem:[%s1242_s1 + $0x108] sm:$0xff] }
  0x20   :  { %583 = vmatpush.bf16.msra.mxu2 %v943_v31  ;;  %v986_v56 = vld [vmem:[%s1242_s1 + $0x1d8] sm:$0xff]  ;;  %v969_v58 = vld [vmem:[%s1242_s1 + $0x150] sm:$0xff]  ;;  %v968_v62 = vld [vmem:[%s1242_s1 + $0x148] sm:$0xff] }
  0x21   :  { %596 = vmatpush.bf16.msra.mxu3 %v951_v32  ;;  %558 = vmatmul.bf16.vlgmr.msra.gmra.mxu0 %v150_v41  ;;  %v977_v59 = vld [vmem:[%s1242_s1 + $0x190] sm:$0xff]  ;;  %v976_v63 = vld [vmem:[%s1242_s1 + $0x188] sm:$0xff]  ;;  %v959_v1 = vld [vmem:[%s1242_s1 + $0x100] sm:$0xff] }
  0x22   :  { %602 = vmatpush.bf16.msrb.mxu0 %v966_v33  ;;  %571 = vmatmul.bf16.vlgmr.msra.gmra.mxu1 %v151_v42  ;;  %v985_v60 = vld [vmem:[%s1242_s1 + $0x1d0] sm:$0xff]  ;;  %v984_v0 = vld [vmem:[%s1242_s1 + $0x1c8] sm:$0xff]  ;;  %v967_v2 = vld [vmem:[%s1242_s1 + $0x140] sm:$0xff] }
  0x23   :  { %615 = vmatpush.bf16.msrb.mxu1 %v974_v34  ;;  %584 = vmatmul.bf16.vlgmr.msra.gmra.mxu2 %v152_v38  ;;  %v975_v3 = vld [vmem:[%s1242_s1 + $0x180] sm:$0xff]  ;;  %v155_v6 = vld [vmem:[#allocation1 + $0x2d] sm:$0xff]  ;;  %v156_v7 = vld [vmem:[#allocation1 + $0x36] sm:$0xff] }
  0x24   :  { %628 = vmatpush.bf16.msrb.mxu2 %v982_v35  ;;  %597 = vmatmul.bf16.vlgmr.msra.gmra.mxu3 %v153_v39  ;;  %v983_v4 = vld [vmem:[%s1242_s1 + $0x1c0] sm:$0xff] }
  0x25   :  { %641 = vmatpush.bf16.msrb.mxu3 %v990_v36  ;;  %v154_v5 = vld [vmem:[#allocation1 + $0x24] sm:$0xff]  ;;  %v992_v15 = vld [vmem:[%s1243_s2] ss:$0 sm:$0xff] }
  0x26   :  { %603 = vmatpush.bf16.msrb.mxu0 %v965_v37  ;;  %v157_v8 = vld [vmem:[#allocation1 + $0x3f] sm:$0xff] }
  0x27   :  { %616 = vmatpush.bf16.msrb.mxu1 %v973_v40 }
  0x28   :  { %629 = vmatpush.bf16.msrb.mxu2 %v981_v43 }
  0x29   :  { %642 = vmatpush.bf16.msrb.mxu3 %v989_v44 }
  0x2a   :  { %604 = vmatpush.bf16.msrb.mxu0 %v964_v45 }
  0x2b   :  { %617 = vmatpush.bf16.msrb.mxu1 %v972_v46 }
  0x2c   :  { %630 = vmatpush.bf16.msrb.mxu2 %v980_v47 }
  0x2d   :  { %643 = vmatpush.bf16.msrb.mxu3 %v988_v48 }
  0x2e   :  { %605 = vmatpush.bf16.msrb.mxu0 %v963_v49 }
  0x2f   :  { %618 = vmatpush.bf16.msrb.mxu1 %v971_v50 }
  0x30   :  { %631 = vmatpush.bf16.msrb.mxu2 %v979_v51 }
  0x31   :  { %644 = vmatpush.bf16.msrb.mxu3 %v987_v52 }
  0x32   :  { %606 = vmatpush.bf16.msrb.mxu0 %v962_v53 }
  0x33   :  { %619 = vmatpush.bf16.msrb.mxu1 %v970_v54 }
  0x34   :  { %632 = vmatpush.bf16.msrb.mxu2 %v978_v55 }
  0x35   :  { %645 = vmatpush.bf16.msrb.mxu3 %v986_v56 }
  0x36   :  { %607 = vmatpush.bf16.msrb.mxu0 %v961_v57 }
  0x37   :  { %620 = vmatpush.bf16.msrb.mxu1 %v969_v58 }
  0x38   :  { %633 = vmatpush.bf16.msrb.mxu2 %v977_v59 }
  0x39   :  { %646 = vmatpush.bf16.msrb.mxu3 %v985_v60 }
  0x3a   :  { %608 = vmatpush.bf16.msrb.mxu0 %v960_v61 }
  0x3b   :  { %621 = vmatpush.bf16.msrb.mxu1 %v968_v62 }
  0x3c   :  { %634 = vmatpush.bf16.msrb.mxu2 %v976_v63 }
  0x3d   :  { %647 = vmatpush.bf16.msrb.mxu3 %v984_v0 }
  0x3e   :  { %609 = vmatpush.bf16.msrb.mxu0 %v959_v1 }
  0x3f   :  { %622 = vmatpush.bf16.msrb.mxu1 %v967_v2 }
  0x40   :  { %635 = vmatpush.bf16.msrb.mxu2 %v975_v3 }
  0x41   :  { %648 = vmatpush.bf16.msrb.mxu3 %v983_v4  ;;  %610 = vmatmul.bf16.vlgmr.msrb.gmra.mxu0 %v154_v5 }
  0x42   :  { %623 = vmatmul.bf16.vlgmr.msrb.gmra.mxu1 %v155_v6 }
  0x43   :  { %636 = vmatmul.bf16.vlgmr.msrb.gmra.mxu2 %v156_v7 }
  0x44   :  { %649 = vmatmul.bf16.vlgmr.msrb.gmra.mxu3 %v157_v8 }
  0x9e   :  { %v559_v9 = vpop.f32.mrf.mxu0 }
  0x9f   :  { %v572_v10 = vpop.f32.mrf.mxu1  ;;  %v560_v18 = vadd.f32 %v992_v15, %v559_v9 }
  0xa1   :  { %v573_v19 = vadd.f32 %v572_v10, %v560_v18 }
  0xa6   :  { %v585_v11 = vpop.f32.mrf.mxu2  ;;  %v561_v13 = vpop.f32.mrf.mxu0 }
  0xa7   :  { %v598_v12 = vpop.f32.mrf.mxu3  ;;  %v574_v14 = vpop.f32.mrf.mxu1  ;;  %v586_v20 = vadd.f32 %v585_v11, %v573_v19 }
  0xa9   :  { %v599_v21 = vadd.f32 %v598_v12, %v586_v20 }
  0xae   :  { %v587_v16 = vpop.f32.mrf.mxu2 }
  0xaf   :  { %v600_v17 = vpop.f32.mrf.mxu3 }
  0xbe   :  { %v611_v22 = vpop.f32.mrf.mxu0 }
  0xbf   :  { %v624_v23 = vpop.f32.mrf.mxu1  ;;  %v612_v24 = vadd.f32 %v611_v22, %v599_v21 }
  0xc1   :  { %v625_v25 = vadd.f32 %v624_v23, %v612_v24 }
  0xc6   :  { %v637_v26 = vpop.f32.mrf.mxu2  ;;  %v613_v29 = vpop.f32.mrf.mxu0 }
  0xc7   :  { %v650_v27 = vpop.f32.mrf.mxu3  ;;  %v638_v28 = vadd.f32 %v637_v26, %v625_v25  ;;  %v626_v30 = vpop.f32.mrf.mxu1 }
  0xc9   :  { %v651_v31 = vadd.f32 %v650_v27, %v638_v28 }
  0xcb   :  { %654 = vst [vmem:[#allocation2] sm:$0x3] %v651_v31 }
  0xcc   :  { %665 = dma.vmem_to_hbm [thread:$0]  %s661_s5, 32, %s663_s8, [#allocation3]  }
  0xce   :  { %v639_v32 = vpop.f32.mrf.mxu2 }
  0xcf   :  { %v652_v33 = vpop.f32.mrf.mxu3 }
  0xd0   :  { %1017 = dma.done.wait [#allocation3], 32  }
  0xd1   :  { %1018 = vsyncadd [#allocation3], 4294967264 }
  0xd2   :  { %670 = vsyncpa [#allocation3], 1 }

// kernel: convnet_forward.10
= control target key start
LH: loop header
LB: loop body
LE: loop exit
PB: predicated region body
PF: predicated region fallthrough
CT: control target
= control target key end

     0   :  { %s13184_s12 = smov 0   ;;  %s13186_s13 = smov 0   ;;  %s15945_s0 = inlined_call_operand.vmem [shape: bf16[2,3200], index: 0, kind: input, shape index: {}]   ;;  %s15946_s1 = inlined_call_operand.vmem [shape: bf16[3200,1024], index: 1, kind: input, shape index: {}]   ;;  %s15947_s2 = inlined_call_operand.vmem [shape: f32[1,1024], index: 2, kind: input, shape index: {}]   ;;  %s15948_s3 = inlined_call_operand.vmem [shape: bf16[2,1024], index: 3, kind: output, shape index: {}]  }
   0x1   :  { %s13188_s14 = smov 0   ;;  %s13190_s15 = smov 0  }
   0x2   :  { %s13192_s16 = smov 0  }
   0x3 LB: > { %s22_s17 = sadd.s32 1, %s13142_s15  ;;  %p65_p1 = scmp.ne.s32.totalorder %s13134_s13, %s13130_s12  ;;  %s13146_s16 = sphi %s13192_s16, %s13_s16   ;;  %s13142_s15 = sphi %s13190_s15, %s15958_s15   ;;  %s13138_s14 = sphi %s13188_s14, %s15957_s14   ;;  %s13134_s13 = sphi %s13186_s13, %s15956_s13   ;;  %s13130_s12 = sphi %s13184_s12, %s15955_s12  }
   0x4   : > { %p23_p0 = scmp.ge.s32.totalorder %s22_s17, 2  ;;  %p66_p2 = scmp.eq.s32.totalorder %s13146_s16, 0 }
   0x5   : > { %s58_s19 = sadd.s32 1, %s13134_s13  ;;  %p9001_p5 = scmp.ge.s32.totalorder %s13146_s16, 2 }
   0x6   : > { %s15960_s17 = smov (%p23_p0, %s22_s17), 0  ;;  %p67_p3 = por %p66_p2, %p65_p1 }
   0x7   : > { %s55_s18 = ssub.s32 %s13142_s15, %s15960_s17  ;;  %152 = sbr.rel (%p9001_p5) target bundleno = 418 (0x1a2), region = 20 }
   0x8   : > { %p56_p4 = scmp.eq.s32.totalorder %s55_s18, 0 }
   0xa   : > { %s13219_s20 = scalar_select %p56_p4, %s13134_s13, %s58_s19  }
   0xc   : > { %155 = sbr.rel (!%p67_p3) target bundleno = 418 (0x1a2), region = 24  ;;  %s157_s21 = sand.u32 (%p67_p3), 1, %s13134_s13  }
   0xd   : > { %s12211_s22 = sshll.u32 (%p67_p3), %s13142_s15, 4  ;;  %s13224_s23 = smul.u32 (%p67_p3), 6400, %s157_s21 }
   0xe   : > { %s13229_s26 = scalar_lea.vmem (%p67_p3), %s15946_s1, %s12211_s22   ;;  %s13239_s30 = smov (%p67_p3), 0  }
   0xf   : > { %s159_s27 = scalar_lea.vmem (%p67_p3), [#allocation2], %s13224_s23   ;;  %s15950_s29 = smov (%p67_p3), %s13229_s26 }
  0x10   : > { %s15949_s28 = smov (%p67_p3), %s159_s27  ;;  %s13241_s4 = smov (%p67_p3), 0  }
  0x11 LB: >> { %v176_v0 = vld [vmem:[%s13154_s29] sm:$0xff]  ;;  %s976_s5 = sadd.s32 1, %s13158_s30  ;;  %s172_s4 = sadd.s32 1, %s13162_s4   ;;  %s13162_s4 = sphi %s13241_s4, %s172_s4   ;;  %s13158_s30 = sphi %s13239_s30, %s15953_s30   ;;  %s13154_s29 = sphi %s15950_s29, %s15952_s29   ;;  %s13150_s28 = sphi %s15949_s28, %s15951_s28  }
  0x12   : >> { %v178_v1 = vld [vmem:[%s13154_s29 + $0x20] sm:$0xff]  ;;  %177 = vst [vmem:[%s13150_s28] sm:$0xff] %v176_v0  ;;  %p977_p6 = scmp.ge.s32.totalorder %s976_s5, 2  ;;  %p169_p7 = scmp.ge.s32.totalorder %s172_s4, 2  }
  0x13   : >> { %v180_v2 = vld [vmem:[%s13154_s29 + $0x40] sm:$0xff]  ;;  %179 = vst [vmem:[%s13150_s28 + $0x10] sm:$0xff] %v178_v1 }
  0x14   : >> { %v182_v3 = vld [vmem:[%s13154_s29 + $0x60] sm:$0xff]  ;;  %181 = vst [vmem:[%s13150_s28 + $0x20] sm:$0xff] %v180_v2  ;;  %s15962_s5 = smov (%p977_p6, %s976_s5), 0 }
  0x15   : >> { %v184_v4 = vld [vmem:[%s13154_s29 + $0x80] sm:$0xff]  ;;  %183 = vst [vmem:[%s13150_s28 + $0x30] sm:$0xff] %v182_v3  ;;  %s9004_s6 = sshll.u32 %s15962_s5, 3  ;;  %s15953_s30 = smov %s15962_s5 }
  0x16   : >> { %v186_v5 = vld [vmem:[%s13154_s29 + $0xa0] sm:$0xff]  ;;  %185 = vst [vmem:[%s13150_s28 + $0x40] sm:$0xff] %v184_v4  ;;  %s13807_s7 = scalar_lea.vmem %s13229_s26, %s9004_s6   ;;  %s13811_s8 = scalar_lea.vmem %s159_s27, %s9004_s6 [#allocation2]  }
  0x17   : >> { %v188_v6 = vld [vmem:[%s13154_s29 + $0xc0] sm:$0xff]  ;;  %187 = vst [vmem:[%s13150_s28 + $0x50] sm:$0xff] %v186_v5 }
  0x18   : >> { %v190_v7 = vld [vmem:[%s13154_s29 + $0xe0] sm:$0xff]  ;;  %189 = vst [vmem:[%s13150_s28 + $0x60] sm:$0xff] %v188_v6 }
  0x19   : >> { %v192_v8 = vld [vmem:[%s13154_s29 + $0x100] sm:$0xff]  ;;  %191 = vst [vmem:[%s13150_s28 + $0x70] sm:$0xff] %v190_v7 }
  0x1a   : >> { %v194_v9 = vld [vmem:[%s13154_s29 + $0x120] sm:$0xff]  ;;  %193 = vst [vmem:[%s13150_s28 + $0x80] sm:$0xff] %v192_v8 }
  0x1b   : >> { %v196_v10 = vld [vmem:[%s13154_s29 + $0x140] sm:$0xff]  ;;  %195 = vst [vmem:[%s13150_s28 + $0x90] sm:$0xff] %v194_v9 }
  0x1c   : >> { %v198_v11 = vld [vmem:[%s13154_s29 + $0x160] sm:$0xff]  ;;  %197 = vst [vmem:[%s13150_s28 + $0xa0] sm:$0xff] %v196_v10 }
  0x1d   : >> { %v200_v12 = vld [vmem:[%s13154_s29 + $0x180] sm:$0xff]  ;;  %199 = vst [vmem:[%s13150_s28 + $0xb0] sm:$0xff] %v198_v11 }
  0x1e   : >> { %v202_v13 = vld [vmem:[%s13154_s29 + $0x1a0] sm:$0xff]  ;;  %201 = vst [vmem:[%s13150_s28 + $0xc0] sm:$0xff] %v200_v12 }
  0x1f   : >> { %v204_v14 = vld [vmem:[%s13154_s29 + $0x1c0] sm:$0xff]  ;;  %203 = vst [vmem:[%s13150_s28 + $0xd0] sm:$0xff] %v202_v13 }
  0x20   : >> { %v206_v15 = vld [vmem:[%s13154_s29 + $0x1e0] sm:$0xff]  ;;  %205 = vst [vmem:[%s13150_s28 + $0xe0] sm:$0xff] %v204_v14 }
  0x21   : >> { %v208_v16 = vld [vmem:[%s13154_s29 + $0x200] sm:$0xff]  ;;  %207 = vst [vmem:[%s13150_s28 + $0xf0] sm:$0xff] %v206_v15 }
  0x22   : >> { %v210_v17 = vld [vmem:[%s13154_s29 + $0x220] sm:$0xff]  ;;  %209 = vst [vmem:[%s13150_s28 + $0x100] sm:$0xff] %v208_v16 }
  0x23   : >> { %v212_v18 = vld [vmem:[%s13154_s29 + $0x240] sm:$0xff]  ;;  %211 = vst [vmem:[%s13150_s28 + $0x110] sm:$0xff] %v210_v17 }
  0x24   : >> { %v214_v19 = vld [vmem:[%s13154_s29 + $0x260] sm:$0xff]  ;;  %213 = vst [vmem:[%s13150_s28 + $0x120] sm:$0xff] %v212_v18 }
  0x25   : >> { %v216_v20 = vld [vmem:[%s13154_s29 + $0x280] sm:$0xff]  ;;  %215 = vst [vmem:[%s13150_s28 + $0x130] sm:$0xff] %v214_v19 }
  0x26   : >> { %v218_v21 = vld [vmem:[%s13154_s29 + $0x2a0] sm:$0xff]  ;;  %217 = vst [vmem:[%s13150_s28 + $0x140] sm:$0xff] %v216_v20 }
  0x27   : >> { %v220_v22 = vld [vmem:[%s13154_s29 + $0x2c0] sm:$0xff]  ;;  %219 = vst [vmem:[%s13150_s28 + $0x150] sm:$0xff] %v218_v21 }
  0x28   : >> { %v222_v23 = vld [vmem:[%s13154_s29 + $0x2e0] sm:$0xff]  ;;  %221 = vst [vmem:[%s13150_s28 + $0x160] sm:$0xff] %v220_v22 }
  0x29   : >> { %v224_v24 = vld [vmem:[%s13154_s29 + $0x300] sm:$0xff]  ;;  %223 = vst [vmem:[%s13150_s28 + $0x170] sm:$0xff] %v222_v23 }
  0x2a   : >> { %v226_v25 = vld [vmem:[%s13154_s29 + $0x320] sm:$0xff]  ;;  %225 = vst [vmem:[%s13150_s28 + $0x180] sm:$0xff] %v224_v24 }
  0x2b   : >> { %v228_v26 = vld [vmem:[%s13154_s29 + $0x340] sm:$0xff]  ;;  %227 = vst [vmem:[%s13150_s28 + $0x190] sm:$0xff] %v226_v25 }
  0x2c   : >> { %v230_v27 = vld [vmem:[%s13154_s29 + $0x360] sm:$0xff]  ;;  %229 = vst [vmem:[%s13150_s28 + $0x1a0] sm:$0xff] %v228_v26 }
  0x2d   : >> { %v232_v28 = vld [vmem:[%s13154_s29 + $0x380] sm:$0xff]  ;;  %231 = vst [vmem:[%s13150_s28 + $0x1b0] sm:$0xff] %v230_v27 }
  0x2e   : >> { %v234_v29 = vld [vmem:[%s13154_s29 + $0x3a0] sm:$0xff]  ;;  %233 = vst [vmem:[%s13150_s28 + $0x1c0] sm:$0xff] %v232_v28 }
  0x2f   : >> { %v236_v30 = vld [vmem:[%s13154_s29 + $0x3c0] sm:$0xff]  ;;  %235 = vst [vmem:[%s13150_s28 + $0x1d0] sm:$0xff] %v234_v29 }
  0x30   : >> { %v238_v31 = vld [vmem:[%s13154_s29 + $0x3e0] sm:$0xff]  ;;  %237 = vst [vmem:[%s13150_s28 + $0x1e0] sm:$0xff] %v236_v30 }
  0x31   : >> { %v240_v32 = vld [vmem:[%s13154_s29 + $0x400] sm:$0xff]  ;;  %239 = vst [vmem:[%s13150_s28 + $0x1f0] sm:$0xff] %v238_v31 }
  0x32   : >> { %v242_v33 = vld [vmem:[%s13154_s29 + $0x420] sm:$0xff]  ;;  %241 = vst [vmem:[%s13150_s28 + $0x200] sm:$0xff] %v240_v32 }
  0x33   : >> { %v244_v34 = vld [vmem:[%s13154_s29 + $0x440] sm:$0xff]  ;;  %243 = vst [vmem:[%s13150_s28 + $0x210] sm:$0xff] %v242_v33 }
  0x34   : >> { %v246_v35 = vld [vmem:[%s13154_s29 + $0x460] sm:$0xff]  ;;  %245 = vst [vmem:[%s13150_s28 + $0x220] sm:$0xff] %v244_v34 }
  0x35   : >> { %v248_v36 = vld [vmem:[%s13154_s29 + $0x480] sm:$0xff]  ;;  %247 = vst [vmem:[%s13150_s28 + $0x230] sm:$0xff] %v246_v35 }
  0x36   : >> { %v250_v37 = vld [vmem:[%s13154_s29 + $0x4a0] sm:$0xff]  ;;  %249 = vst [vmem:[%s13150_s28 + $0x240] sm:$0xff] %v248_v36 }
  0x37   : >> { %v252_v38 = vld [vmem:[%s13154_s29 + $0x4c0] sm:$0xff]  ;;  %251 = vst [vmem:[%s13150_s28 + $0x250] sm:$0xff] %v250_v37 }
  0x38   : >> { %v254_v39 = vld [vmem:[%s13154_s29 + $0x4e0] sm:$0xff]  ;;  %253 = vst [vmem:[%s13150_s28 + $0x260] sm:$0xff] %v252_v38 }
  0x39   : >> { %v256_v40 = vld [vmem:[%s13154_s29 + $0x500] sm:$0xff]  ;;  %255 = vst [vmem:[%s13150_s28 + $0x270] sm:$0xff] %v254_v39 }
  0x3a   : >> { %v258_v41 = vld [vmem:[%s13154_s29 + $0x520] sm:$0xff]  ;;  %257 = vst [vmem:[%s13150_s28 + $0x280] sm:$0xff] %v256_v40 }
  0x3b   : >> { %v260_v42 = vld [vmem:[%s13154_s29 + $0x540] sm:$0xff]  ;;  %259 = vst [vmem:[%s13150_s28 + $0x290] sm:$0xff] %v258_v41 }
  0x3c   : >> { %v262_v43 = vld [vmem:[%s13154_s29 + $0x560] sm:$0xff]  ;;  %261 = vst [vmem:[%s13150_s28 + $0x2a0] sm:$0xff] %v260_v42 }
  0x3d   : >> { %v264_v44 = vld [vmem:[%s13154_s29 + $0x580] sm:$0xff]  ;;  %263 = vst [vmem:[%s13150_s28 + $0x2b0] sm:$0xff] %v262_v43 }
  0x3e   : >> { %v266_v45 = vld [vmem:[%s13154_s29 + $0x5a0] sm:$0xff]  ;;  %265 = vst [vmem:[%s13150_s28 + $0x2c0] sm:$0xff] %v264_v44 }
  0x3f   : >> { %v268_v46 = vld [vmem:[%s13154_s29 + $0x5c0] sm:$0xff]  ;;  %267 = vst [vmem:[%s13150_s28 + $0x2d0] sm:$0xff] %v266_v45 }
  0x40   : >> { %v270_v47 = vld [vmem:[%s13154_s29 + $0x5e0] sm:$0xff]  ;;  %269 = vst [vmem:[%s13150_s28 + $0x2e0] sm:$0xff] %v268_v46 }
  0x41   : >> { %v272_v48 = vld [vmem:[%s13154_s29 + $0x600] sm:$0xff]  ;;  %271 = vst [vmem:[%s13150_s28 + $0x2f0] sm:$0xff] %v270_v47 }
  0x42   : >> { %v274_v49 = vld [vmem:[%s13154_s29 + $0x620] sm:$0xff]  ;;  %273 = vst [vmem:[%s13150_s28 + $0x300] sm:$0xff] %v272_v48 }
  0x43   : >> { %v276_v50 = vld [vmem:[%s13154_s29 + $0x640] sm:$0xff]  ;;  %275 = vst [vmem:[%s13150_s28 + $0x310] sm:$0xff] %v274_v49 }
  0x44   : >> { %v278_v51 = vld [vmem:[%s13154_s29 + $0x660] sm:$0xff]  ;;  %277 = vst [vmem:[%s13150_s28 + $0x320] sm:$0xff] %v276_v50 }
  0x45   : >> { %v280_v52 = vld [vmem:[%s13154_s29 + $0x680] sm:$0xff]  ;;  %279 = vst [vmem:[%s13150_s28 + $0x330] sm:$0xff] %v278_v51 }
  0x46   : >> { %v282_v53 = vld [vmem:[%s13154_s29 + $0x6a0] sm:$0xff]  ;;  %281 = vst [vmem:[%s13150_s28 + $0x340] sm:$0xff] %v280_v52 }
  0x47   : >> { %v284_v54 = vld [vmem:[%s13154_s29 + $0x6c0] sm:$0xff]  ;;  %283 = vst [vmem:[%s13150_s28 + $0x350] sm:$0xff] %v282_v53 }
  0x48   : >> { %v286_v55 = vld [vmem:[%s13154_s29 + $0x6e0] sm:$0xff]  ;;  %285 = vst [vmem:[%s13150_s28 + $0x360] sm:$0xff] %v284_v54 }
  0x49   : >> { %v288_v56 = vld [vmem:[%s13154_s29 + $0x700] sm:$0xff]  ;;  %287 = vst [vmem:[%s13150_s28 + $0x370] sm:$0xff] %v286_v55 }
  0x4a   : >> { %v290_v57 = vld [vmem:[%s13154_s29 + $0x720] sm:$0xff]  ;;  %289 = vst [vmem:[%s13150_s28 + $0x380] sm:$0xff] %v288_v56 }
  0x4b   : >> { %v292_v58 = vld [vmem:[%s13154_s29 + $0x740] sm:$0xff]  ;;  %291 = vst [vmem:[%s13150_s28 + $0x390] sm:$0xff] %v290_v57 }
  0x4c   : >> { %v294_v59 = vld [vmem:[%s13154_s29 + $0x760] sm:$0xff]  ;;  %293 = vst [vmem:[%s13150_s28 + $0x3a0] sm:$0xff] %v292_v58 }
  0x4d   : >> { %v296_v60 = vld [vmem:[%s13154_s29 + $0x780] sm:$0xff]  ;;  %295 = vst [vmem:[%s13150_s28 + $0x3b0] sm:$0xff] %v294_v59 }
  0x4e   : >> { %v298_v61 = vld [vmem:[%s13154_s29 + $0x7a0] sm:$0xff]  ;;  %297 = vst [vmem:[%s13150_s28 + $0x3c0] sm:$0xff] %v296_v60 }
  0x4f   : >> { %v300_v62 = vld [vmem:[%s13154_s29 + $0x7c0] sm:$0xff]  ;;  %299 = vst [vmem:[%s13150_s28 + $0x3d0] sm:$0xff] %v298_v61 }
  0x50   : >> { %v302_v63 = vld [vmem:[%s13154_s29 + $0x7e0] sm:$0xff]  ;;  %301 = vst [vmem:[%s13150_s28 + $0x3e0] sm:$0xff] %v300_v62 }
  0x51   : >> { %v304_v0 = vld [vmem:[%s13154_s29 + $0x800] sm:$0xff]  ;;  %303 = vst [vmem:[%s13150_s28 + $0x3f0] sm:$0xff] %v302_v63 }
  0x52   : >> { %v306_v1 = vld [vmem:[%s13154_s29 + $0x820] sm:$0xff]  ;;  %305 = vst [vmem:[%s13150_s28 + $0x400] sm:$0xff] %v304_v0 }
  0x53   : >> { %v308_v2 = vld [vmem:[%s13154_s29 + $0x840] sm:$0xff]  ;;  %307 = vst [vmem:[%s13150_s28 + $0x410] sm:$0xff] %v306_v1 }
  0x54   : >> { %v310_v3 = vld [vmem:[%s13154_s29 + $0x860] sm:$0xff]  ;;  %309 = vst [vmem:[%s13150_s28 + $0x420] sm:$0xff] %v308_v2 }
  0x55   : >> { %v312_v4 = vld [vmem:[%s13154_s29 + $0x880] sm:$0xff]  ;;  %311 = vst [vmem:[%s13150_s28 + $0x430] sm:$0xff] %v310_v3 }
  0x56   : >> { %v314_v5 = vld [vmem:[%s13154_s29 + $0x8a0] sm:$0xff]  ;;  %313 = vst [vmem:[%s13150_s28 + $0x440] sm:$0xff] %v312_v4 }
  0x57   : >> { %v316_v6 = vld [vmem:[%s13154_s29 + $0x8c0] sm:$0xff]  ;;  %315 = vst [vmem:[%s13150_s28 + $0x450] sm:$0xff] %v314_v5 }
  0x58   : >> { %v318_v7 = vld [vmem:[%s13154_s29 + $0x8e0] sm:$0xff]  ;;  %317 = vst [vmem:[%s13150_s28 + $0x460] sm:$0xff] %v316_v6 }
  0x59   : >> { %v320_v8 = vld [vmem:[%s13154_s29 + $0x900] sm:$0xff]  ;;  %319 = vst [vmem:[%s13150_s28 + $0x470] sm:$0xff] %v318_v7 }
  0x5a   : >> { %v322_v9 = vld [vmem:[%s13154_s29 + $0x920] sm:$0xff]  ;;  %321 = vst [vmem:[%s13150_s28 + $0x480] sm:$0xff] %v320_v8 }
  0x5b   : >> { %v324_v10 = vld [vmem:[%s13154_s29 + $0x940] sm:$0xff]  ;;  %323 = vst [vmem:[%s13150_s28 + $0x490] sm:$0xff] %v322_v9 }
  0x5c   : >> { %v326_v11 = vld [vmem:[%s13154_s29 + $0x960] sm:$0xff]  ;;  %325 = vst [vmem:[%s13150_s28 + $0x4a0] sm:$0xff] %v324_v10 }
  0x5d   : >> { %v328_v12 = vld [vmem:[%s13154_s29 + $0x980] sm:$0xff]  ;;  %327 = vst [vmem:[%s13150_s28 + $0x4b0] sm:$0xff] %v326_v11 }
  0x5e   : >> { %v330_v13 = vld [vmem:[%s13154_s29 + $0x9a0] sm:$0xff]  ;;  %329 = vst [vmem:[%s13150_s28 + $0x4c0] sm:$0xff] %v328_v12 }
  0x5f   : >> { %v332_v14 = vld [vmem:[%s13154_s29 + $0x9c0] sm:$0xff]  ;;  %331 = vst [vmem:[%s13150_s28 + $0x4d0] sm:$0xff] %v330_v13 }
  0x60   : >> { %v334_v15 = vld [vmem:[%s13154_s29 + $0x9e0] sm:$0xff]  ;;  %333 = vst [vmem:[%s13150_s28 + $0x4e0] sm:$0xff] %v332_v14 }
  0x61   : >> { %v336_v16 = vld [vmem:[%s13154_s29 + $0xa00] sm:$0xff]  ;;  %335 = vst [vmem:[%s13150_s28 + $0x4f0] sm:$0xff] %v334_v15 }
  0x62   : >> { %v338_v17 = vld [vmem:[%s13154_s29 + $0xa20] sm:$0xff]  ;;  %337 = vst [vmem:[%s13150_s28 + $0x500] sm:$0xff] %v336_v16 }
  0x63   : >> { %v340_v18 = vld [vmem:[%s13154_s29 + $0xa40] sm:$0xff]  ;;  %339 = vst [vmem:[%s13150_s28 + $0x510] sm:$0xff] %v338_v17 }
  0x64   : >> { %v342_v19 = vld [vmem:[%s13154_s29 + $0xa60] sm:$0xff]  ;;  %341 = vst [vmem:[%s13150_s28 + $0x520] sm:$0xff] %v340_v18 }
  0x65   : >> { %v344_v20 = vld [vmem:[%s13154_s29 + $0xa80] sm:$0xff]  ;;  %343 = vst [vmem:[%s13150_s28 + $0x530] sm:$0xff] %v342_v19 }
  0x66   : >> { %v346_v21 = vld [vmem:[%s13154_s29 + $0xaa0] sm:$0xff]  ;;  %345 = vst [vmem:[%s13150_s28 + $0x540] sm:$0xff] %v344_v20 }
  0x67   : >> { %v348_v22 = vld [vmem:[%s13154_s29 + $0xac0] sm:$0xff]  ;;  %347 = vst [vmem:[%s13150_s28 + $0x550] sm:$0xff] %v346_v21 }
  0x68   : >> { %v350_v23 = vld [vmem:[%s13154_s29 + $0xae0] sm:$0xff]  ;;  %349 = vst [vmem:[%s13150_s28 + $0x560] sm:$0xff] %v348_v22 }
  0x69   : >> { %v352_v24 = vld [vmem:[%s13154_s29 + $0xb00] sm:$0xff]  ;;  %351 = vst [vmem:[%s13150_s28 + $0x570] sm:$0xff] %v350_v23 }
  0x6a   : >> { %v354_v25 = vld [vmem:[%s13154_s29 + $0xb20] sm:$0xff]  ;;  %353 = vst [vmem:[%s13150_s28 + $0x580] sm:$0xff] %v352_v24 }
  0x6b   : >> { %v356_v26 = vld [vmem:[%s13154_s29 + $0xb40] sm:$0xff]  ;;  %355 = vst [vmem:[%s13150_s28 + $0x590] sm:$0xff] %v354_v25 }
  0x6c   : >> { %v358_v27 = vld [vmem:[%s13154_s29 + $0xb60] sm:$0xff]  ;;  %357 = vst [vmem:[%s13150_s28 + $0x5a0] sm:$0xff] %v356_v26 }
  0x6d   : >> { %v360_v28 = vld [vmem:[%s13154_s29 + $0xb80] sm:$0xff]  ;;  %359 = vst [vmem:[%s13150_s28 + $0x5b0] sm:$0xff] %v358_v27 }
  0x6e   : >> { %v362_v29 = vld [vmem:[%s13154_s29 + $0xba0] sm:$0xff]  ;;  %361 = vst [vmem:[%s13150_s28 + $0x5c0] sm:$0xff] %v360_v28 }
  0x6f   : >> { %v364_v30 = vld [vmem:[%s13154_s29 + $0xbc0] sm:$0xff]  ;;  %363 = vst [vmem:[%s13150_s28 + $0x5d0] sm:$0xff] %v362_v29 }
  0x70   : >> { %v366_v31 = vld [vmem:[%s13154_s29 + $0xbe0] sm:$0xff]  ;;  %365 = vst [vmem:[%s13150_s28 + $0x5e0] sm:$0xff] %v364_v30 }
  0x71   : >> { %v368_v32 = vld [vmem:[%s13154_s29 + $0xc00] sm:$0xff]  ;;  %367 = vst [vmem:[%s13150_s28 + $0x5f0] sm:$0xff] %v366_v31 }
  0x72   : >> { %v370_v33 = vld [vmem:[%s13154_s29 + $0xc20] sm:$0xff]  ;;  %369 = vst [vmem:[%s13150_s28 + $0x600] sm:$0xff] %v368_v32 }
  0x73   : >> { %v372_v34 = vld [vmem:[%s13154_s29 + $0xc40] sm:$0xff]  ;;  %371 = vst [vmem:[%s13150_s28 + $0x610] sm:$0xff] %v370_v33 }
  0x74   : >> { %v374_v35 = vld [vmem:[%s13154_s29 + $0xc60] sm:$0xff]  ;;  %373 = vst [vmem:[%s13150_s28 + $0x620] sm:$0xff] %v372_v34 }
  0x75   : >> { %v376_v36 = vld [vmem:[%s13154_s29 + $0xc80] sm:$0xff]  ;;  %375 = vst [vmem:[%s13150_s28 + $0x630] sm:$0xff] %v374_v35 }
  0x76   : >> { %v378_v37 = vld [vmem:[%s13154_s29 + $0xca0] sm:$0xff]  ;;  %377 = vst [vmem:[%s13150_s28 + $0x640] sm:$0xff] %v376_v36 }
  0x77   : >> { %v380_v38 = vld [vmem:[%s13154_s29 + $0xcc0] sm:$0xff]  ;;  %379 = vst [vmem:[%s13150_s28 + $0x650] sm:$0xff] %v378_v37 }
  0x78   : >> { %v382_v39 = vld [vmem:[%s13154_s29 + $0xce0] sm:$0xff]  ;;  %381 = vst [vmem:[%s13150_s28 + $0x660] sm:$0xff] %v380_v38 }
  0x79   : >> { %v384_v40 = vld [vmem:[%s13154_s29 + $0xd00] sm:$0xff]  ;;  %383 = vst [vmem:[%s13150_s28 + $0x670] sm:$0xff] %v382_v39 }
  0x7a   : >> { %v386_v41 = vld [vmem:[%s13154_s29 + $0xd20] sm:$0xff]  ;;  %385 = vst [vmem:[%s13150_s28 + $0x680] sm:$0xff] %v384_v40 }
  0x7b   : >> { %v388_v42 = vld [vmem:[%s13154_s29 + $0xd40] sm:$0xff]  ;;  %387 = vst [vmem:[%s13150_s28 + $0x690] sm:$0xff] %v386_v41 }
  0x7c   : >> { %v390_v43 = vld [vmem:[%s13154_s29 + $0xd60] sm:$0xff]  ;;  %389 = vst [vmem:[%s13150_s28 + $0x6a0] sm:$0xff] %v388_v42 }
  0x7d   : >> { %v392_v44 = vld [vmem:[%s13154_s29 + $0xd80] sm:$0xff]  ;;  %391 = vst [vmem:[%s13150_s28 + $0x6b0] sm:$0xff] %v390_v43 }
  0x7e   : >> { %v394_v45 = vld [vmem:[%s13154_s29 + $0xda0] sm:$0xff]  ;;  %393 = vst [vmem:[%s13150_s28 + $0x6c0] sm:$0xff] %v392_v44 }
  0x7f   : >> { %v396_v46 = vld [vmem:[%s13154_s29 + $0xdc0] sm:$0xff]  ;;  %395 = vst [vmem:[%s13150_s28 + $0x6d0] sm:$0xff] %v394_v45 }
  0x80   : >> { %v398_v47 = vld [vmem:[%s13154_s29 + $0xde0] sm:$0xff]  ;;  %397 = vst [vmem:[%s13150_s28 + $0x6e0] sm:$0xff] %v396_v46 }
  0x81   : >> { %v400_v48 = vld [vmem:[%s13154_s29 + $0xe00] sm:$0xff]  ;;  %399 = vst [vmem:[%s13150_s28 + $0x6f0] sm:$0xff] %v398_v47 }
  0x82   : >> { %v402_v49 = vld [vmem:[%s13154_s29 + $0xe20] sm:$0xff]  ;;  %401 = vst [vmem:[%s13150_s28 + $0x700] sm:$0xff] %v400_v48 }
  0x83   : >> { %v404_v50 = vld [vmem:[%s13154_s29 + $0xe40] sm:$0xff]  ;;  %403 = vst [vmem:[%s13150_s28 + $0x710] sm:$0xff] %v402_v49 }
  0x84   : >> { %v406_v51 = vld [vmem:[%s13154_s29 + $0xe60] sm:$0xff]  ;;  %405 = vst [vmem:[%s13150_s28 + $0x720] sm:$0xff] %v404_v50 }
  0x85   : >> { %v408_v52 = vld [vmem:[%s13154_s29 + $0xe80] sm:$0xff]  ;;  %407 = vst [vmem:[%s13150_s28 + $0x730] sm:$0xff] %v406_v51 }
  0x86   : >> { %v410_v53 = vld [vmem:[%s13154_s29 + $0xea0] sm:$0xff]  ;;  %409 = vst [vmem:[%s13150_s28 + $0x740] sm:$0xff] %v408_v52 }
  0x87   : >> { %v412_v54 = vld [vmem:[%s13154_s29 + $0xec0] sm:$0xff]  ;;  %411 = vst [vmem:[%s13150_s28 + $0x750] sm:$0xff] %v410_v53 }
  0x88   : >> { %v414_v55 = vld [vmem:[%s13154_s29 + $0xee0] sm:$0xff]  ;;  %413 = vst [vmem:[%s13150_s28 + $0x760] sm:$0xff] %v412_v54 }
  0x89   : >> { %v416_v56 = vld [vmem:[%s13154_s29 + $0xf00] sm:$0xff]  ;;  %415 = vst [vmem:[%s13150_s28 + $0x770] sm:$0xff] %v414_v55 }
  0x8a   : >> { %v418_v57 = vld [vmem:[%s13154_s29 + $0xf20] sm:$0xff]  ;;  %417 = vst [vmem:[%s13150_s28 + $0x780] sm:$0xff] %v416_v56 }
  0x8b   : >> { %v420_v58 = vld [vmem:[%s13154_s29 + $0xf40] sm:$0xff]  ;;  %419 = vst [vmem:[%s13150_s28 + $0x790] sm:$0xff] %v418_v57 }
  0x8c   : >> { %v422_v59 = vld [vmem:[%s13154_s29 + $0xf60] sm:$0xff]  ;;  %421 = vst [vmem:[%s13150_s28 + $0x7a0] sm:$0xff] %v420_v58 }
  0x8d   : >> { %v424_v60 = vld [vmem:[%s13154_s29 + $0xf80] sm:$0xff]  ;;  %423 = vst [vmem:[%s13150_s28 + $0x7b0] sm:$0xff] %v422_v59 }
  0x8e   : >> { %v426_v61 = vld [vmem:[%s13154_s29 + $0xfa0] sm:$0xff]  ;;  %425 = vst [vmem:[%s13150_s28 + $0x7c0] sm:$0xff] %v424_v60 }
  0x8f   : >> { %v428_v62 = vld [vmem:[%s13154_s29 + $0xfc0] sm:$0xff]  ;;  %427 = vst [vmem:[%s13150_s28 + $0x7d0] sm:$0xff] %v426_v61 }
  0x90   : >> { %v430_v63 = vld [vmem:[%s13154_s29 + $0xfe0] sm:$0xff]  ;;  %429 = vst [vmem:[%s13150_s28 + $0x7e0] sm:$0xff] %v428_v62 }
  0x91   : >> { %v432_v0 = vld [vmem:[%s13154_s29 + $0x1000] sm:$0xff]  ;;  %431 = vst [vmem:[%s13150_s28 + $0x7f0] sm:$0xff] %v430_v63 }
  0x92   : >> { %v434_v1 = vld [vmem:[%s13154_s29 + $0x1020] sm:$0xff]  ;;  %433 = vst [vmem:[%s13150_s28 + $0x800] sm:$0xff] %v432_v0 }
  0x93   : >> { %v436_v2 = vld [vmem:[%s13154_s29 + $0x1040] sm:$0xff]  ;;  %435 = vst [vmem:[%s13150_s28 + $0x810] sm:$0xff] %v434_v1 }
  0x94   : >> { %v438_v3 = vld [vmem:[%s13154_s29 + $0x1060] sm:$0xff]  ;;  %437 = vst [vmem:[%s13150_s28 + $0x820] sm:$0xff] %v436_v2 }
  0x95   : >> { %v440_v4 = vld [vmem:[%s13154_s29 + $0x1080] sm:$0xff]  ;;  %439 = vst [vmem:[%s13150_s28 + $0x830] sm:$0xff] %v438_v3 }
  0x96   : >> { %v442_v5 = vld [vmem:[%s13154_s29 + $0x10a0] sm:$0xff]  ;;  %441 = vst [vmem:[%s13150_s28 + $0x840] sm:$0xff] %v440_v4 }
  0x97   : >> { %v444_v6 = vld [vmem:[%s13154_s29 + $0x10c0] sm:$0xff]  ;;  %443 = vst [vmem:[%s13150_s28 + $0x850] sm:$0xff] %v442_v5 }
  0x98   : >> { %v446_v7 = vld [vmem:[%s13154_s29 + $0x10e0] sm:$0xff]  ;;  %445 = vst [vmem:[%s13150_s28 + $0x860] sm:$0xff] %v444_v6 }
  0x99   : >> { %v448_v8 = vld [vmem:[%s13154_s29 + $0x1100] sm:$0xff]  ;;  %447 = vst [vmem:[%s13150_s28 + $0x870] sm:$0xff] %v446_v7 }
  0x9a   : >> { %v450_v9 = vld [vmem:[%s13154_s29 + $0x1120] sm:$0xff]  ;;  %449 = vst [vmem:[%s13150_s28 + $0x880] sm:$0xff] %v448_v8 }
  0x9b   : >> { %v452_v10 = vld [vmem:[%s13154_s29 + $0x1140] sm:$0xff]  ;;  %451 = vst [vmem:[%s13150_s28 + $0x890] sm:$0xff] %v450_v9 }
  0x9c   : >> { %v454_v11 = vld [vmem:[%s13154_s29 + $0x1160] sm:$0xff]  ;;  %453 = vst [vmem:[%s13150_s28 + $0x8a0] sm:$0xff] %v452_v10 }
  0x9d   : >> { %v456_v12 = vld [vmem:[%s13154_s29 + $0x1180] sm:$0xff]  ;;  %455 = vst [vmem:[%s13150_s28 + $0x8b0] sm:$0xff] %v454_v11 }
  0x9e   : >> { %v458_v13 = vld [vmem:[%s13154_s29 + $0x11a0] sm:$0xff]  ;;  %457 = vst [vmem:[%s13150_s28 + $0x8c0] sm:$0xff] %v456_v12 }
  0x9f   : >> { %v460_v14 = vld [vmem:[%s13154_s29 + $0x11c0] sm:$0xff]  ;;  %459 = vst [vmem:[%s13150_s28 + $0x8d0] sm:$0xff] %v458_v13 }
  0xa0   : >> { %v462_v15 = vld [vmem:[%s13154_s29 + $0x11e0] sm:$0xff]  ;;  %461 = vst [vmem:[%s13150_s28 + $0x8e0] sm:$0xff] %v460_v14 }
  0xa1   : >> { %v464_v16 = vld [vmem:[%s13154_s29 + $0x1200] sm:$0xff]  ;;  %463 = vst [vmem:[%s13150_s28 + $0x8f0] sm:$0xff] %v462_v15 }
  0xa2   : >> { %v466_v17 = vld [vmem:[%s13154_s29 + $0x1220] sm:$0xff]  ;;  %465 = vst [vmem:[%s13150_s28 + $0x900] sm:$0xff] %v464_v16 }
  0xa3   : >> { %v468_v18 = vld [vmem:[%s13154_s29 + $0x1240] sm:$0xff]  ;;  %467 = vst [vmem:[%s13150_s28 + $0x910] sm:$0xff] %v466_v17 }
  0xa4   : >> { %v470_v19 = vld [vmem:[%s13154_s29 + $0x1260] sm:$0xff]  ;;  %469 = vst [vmem:[%s13150_s28 + $0x920] sm:$0xff] %v468_v18 }
  0xa5   : >> { %v472_v20 = vld [vmem:[%s13154_s29 + $0x1280] sm:$0xff]  ;;  %471 = vst [vmem:[%s13150_s28 + $0x930] sm:$0xff] %v470_v19 }
  0xa6   : >> { %v474_v21 = vld [vmem:[%s13154_s29 + $0x12a0] sm:$0xff]  ;;  %473 = vst [vmem:[%s13150_s28 + $0x940] sm:$0xff] %v472_v20 }
  0xa7   : >> { %v476_v22 = vld [vmem:[%s13154_s29 + $0x12c0] sm:$0xff]  ;;  %475 = vst [vmem:[%s13150_s28 + $0x950] sm:$0xff] %v474_v21 }
  0xa8   : >> { %v478_v23 = vld [vmem:[%s13154_s29 + $0x12e0] sm:$0xff]  ;;  %477 = vst [vmem:[%s13150_s28 + $0x960] sm:$0xff] %v476_v22 }
  0xa9   : >> { %v480_v24 = vld [vmem:[%s13154_s29 + $0x1300] sm:$0xff]  ;;  %479 = vst [vmem:[%s13150_s28 + $0x970] sm:$0xff] %v478_v23 }
  0xaa   : >> { %v482_v25 = vld [vmem:[%s13154_s29 + $0x1320] sm:$0xff]  ;;  %481 = vst [vmem:[%s13150_s28 + $0x980] sm:$0xff] %v480_v24 }
  0xab   : >> { %v484_v26 = vld [vmem:[%s13154_s29 + $0x1340] sm:$0xff]  ;;  %483 = vst [vmem:[%s13150_s28 + $0x990] sm:$0xff] %v482_v25 }
  0xac   : >> { %v486_v27 = vld [vmem:[%s13154_s29 + $0x1360] sm:$0xff]  ;;  %485 = vst [vmem:[%s13150_s28 + $0x9a0] sm:$0xff] %v484_v26 }
  0xad   : >> { %v488_v28 = vld [vmem:[%s13154_s29 + $0x1380] sm:$0xff]  ;;  %487 = vst [vmem:[%s13150_s28 + $0x9b0] sm:$0xff] %v486_v27 }
  0xae   : >> { %v490_v29 = vld [vmem:[%s13154_s29 + $0x13a0] sm:$0xff]  ;;  %489 = vst [vmem:[%s13150_s28 + $0x9c0] sm:$0xff] %v488_v28 }
  0xaf   : >> { %v492_v30 = vld [vmem:[%s13154_s29 + $0x13c0] sm:$0xff]  ;;  %491 = vst [vmem:[%s13150_s28 + $0x9d0] sm:$0xff] %v490_v29 }
  0xb0   : >> { %v494_v31 = vld [vmem:[%s13154_s29 + $0x13e0] sm:$0xff]  ;;  %493 = vst [vmem:[%s13150_s28 + $0x9e0] sm:$0xff] %v492_v30 }
  0xb1   : >> { %v496_v32 = vld [vmem:[%s13154_s29 + $0x1400] sm:$0xff]  ;;  %495 = vst [vmem:[%s13150_s28 + $0x9f0] sm:$0xff] %v494_v31 }
  0xb2   : >> { %v498_v33 = vld [vmem:[%s13154_s29 + $0x1420] sm:$0xff]  ;;  %497 = vst [vmem:[%s13150_s28 + $0xa00] sm:$0xff] %v496_v32 }
  0xb3   : >> { %v500_v34 = vld [vmem:[%s13154_s29 + $0x1440] sm:$0xff]  ;;  %499 = vst [vmem:[%s13150_s28 + $0xa10] sm:$0xff] %v498_v33 }
  0xb4   : >> { %v502_v35 = vld [vmem:[%s13154_s29 + $0x1460] sm:$0xff]  ;;  %501 = vst [vmem:[%s13150_s28 + $0xa20] sm:$0xff] %v500_v34 }
  0xb5   : >> { %v504_v36 = vld [vmem:[%s13154_s29 + $0x1480] sm:$0xff]  ;;  %503 = vst [vmem:[%s13150_s28 + $0xa30] sm:$0xff] %v502_v35 }
  0xb6   : >> { %v506_v37 = vld [vmem:[%s13154_s29 + $0x14a0] sm:$0xff]  ;;  %505 = vst [vmem:[%s13150_s28 + $0xa40] sm:$0xff] %v504_v36 }
  0xb7   : >> { %v508_v38 = vld [vmem:[%s13154_s29 + $0x14c0] sm:$0xff]  ;;  %507 = vst [vmem:[%s13150_s28 + $0xa50] sm:$0xff] %v506_v37 }
  0xb8   : >> { %v510_v39 = vld [vmem:[%s13154_s29 + $0x14e0] sm:$0xff]  ;;  %509 = vst [vmem:[%s13150_s28 + $0xa60] sm:$0xff] %v508_v38 }
  0xb9   : >> { %v512_v40 = vld [vmem:[%s13154_s29 + $0x1500] sm:$0xff]  ;;  %511 = vst [vmem:[%s13150_s28 + $0xa70] sm:$0xff] %v510_v39 }
  0xba   : >> { %v514_v41 = vld [vmem:[%s13154_s29 + $0x1520] sm:$0xff]  ;;  %513 = vst [vmem:[%s13150_s28 + $0xa80] sm:$0xff] %v512_v40 }
  0xbb   : >> { %v516_v42 = vld [vmem:[%s13154_s29 + $0x1540] sm:$0xff]  ;;  %515 = vst [vmem:[%s13150_s28 + $0xa90] sm:$0xff] %v514_v41 }
  0xbc   : >> { %v518_v43 = vld [vmem:[%s13154_s29 + $0x1560] sm:$0xff]  ;;  %517 = vst [vmem:[%s13150_s28 + $0xaa0] sm:$0xff] %v516_v42 }
  0xbd   : >> { %v520_v44 = vld [vmem:[%s13154_s29 + $0x1580] sm:$0xff]  ;;  %519 = vst [vmem:[%s13150_s28 + $0xab0] sm:$0xff] %v518_v43 }
  0xbe   : >> { %v522_v45 = vld [vmem:[%s13154_s29 + $0x15a0] sm:$0xff]  ;;  %521 = vst [vmem:[%s13150_s28 + $0xac0] sm:$0xff] %v520_v44 }
  0xbf   : >> { %v524_v46 = vld [vmem:[%s13154_s29 + $0x15c0] sm:$0xff]  ;;  %523 = vst [vmem:[%s13150_s28 + $0xad0] sm:$0xff] %v522_v45 }
  0xc0   : >> { %v526_v47 = vld [vmem:[%s13154_s29 + $0x15e0] sm:$0xff]  ;;  %525 = vst [vmem:[%s13150_s28 + $0xae0] sm:$0xff] %v524_v46 }
  0xc1   : >> { %v528_v48 = vld [vmem:[%s13154_s29 + $0x1600] sm:$0xff]  ;;  %527 = vst [vmem:[%s13150_s28 + $0xaf0] sm:$0xff] %v526_v47 }
  0xc2   : >> { %v530_v49 = vld [vmem:[%s13154_s29 + $0x1620] sm:$0xff]  ;;  %529 = vst [vmem:[%s13150_s28 + $0xb00] sm:$0xff] %v528_v48 }
  0xc3   : >> { %v532_v50 = vld [vmem:[%s13154_s29 + $0x1640] sm:$0xff]  ;;  %531 = vst [vmem:[%s13150_s28 + $0xb10] sm:$0xff] %v530_v49 }
  0xc4   : >> { %v534_v51 = vld [vmem:[%s13154_s29 + $0x1660] sm:$0xff]  ;;  %533 = vst [vmem:[%s13150_s28 + $0xb20] sm:$0xff] %v532_v50 }
  0xc5   : >> { %v536_v52 = vld [vmem:[%s13154_s29 + $0x1680] sm:$0xff]  ;;  %535 = vst [vmem:[%s13150_s28 + $0xb30] sm:$0xff] %v534_v51 }
  0xc6   : >> { %v538_v53 = vld [vmem:[%s13154_s29 + $0x16a0] sm:$0xff]  ;;  %537 = vst [vmem:[%s13150_s28 + $0xb40] sm:$0xff] %v536_v52 }
  0xc7   : >> { %v540_v54 = vld [vmem:[%s13154_s29 + $0x16c0] sm:$0xff]  ;;  %539 = vst [vmem:[%s13150_s28 + $0xb50] sm:$0xff] %v538_v53 }
  0xc8   : >> { %v542_v55 = vld [vmem:[%s13154_s29 + $0x16e0] sm:$0xff]  ;;  %541 = vst [vmem:[%s13150_s28 + $0xb60] sm:$0xff] %v540_v54 }
  0xc9   : >> { %v544_v56 = vld [vmem:[%s13154_s29 + $0x1700] sm:$0xff]  ;;  %543 = vst [vmem:[%s13150_s28 + $0xb70] sm:$0xff] %v542_v55 }
  0xca   : >> { %v546_v57 = vld [vmem:[%s13154_s29 + $0x1720] sm:$0xff]  ;;  %545 = vst [vmem:[%s13150_s28 + $0xb80] sm:$0xff] %v544_v56 }
  0xcb   : >> { %v548_v58 = vld [vmem:[%s13154_s29 + $0x1740] sm:$0xff]  ;;  %547 = vst [vmem:[%s13150_s28 + $0xb90] sm:$0xff] %v546_v57 }
  0xcc   : >> { %v550_v59 = vld [vmem:[%s13154_s29 + $0x1760] sm:$0xff]  ;;  %549 = vst [vmem:[%s13150_s28 + $0xba0] sm:$0xff] %v548_v58 }
  0xcd   : >> { %v552_v60 = vld [vmem:[%s13154_s29 + $0x1780] sm:$0xff]  ;;  %551 = vst [vmem:[%s13150_s28 + $0xbb0] sm:$0xff] %v550_v59 }
  0xce   : >> { %v554_v61 = vld [vmem:[%s13154_s29 + $0x17a0] sm:$0xff]  ;;  %553 = vst [vmem:[%s13150_s28 + $0xbc0] sm:$0xff] %v552_v60 }
  0xcf   : >> { %v556_v62 = vld [vmem:[%s13154_s29 + $0x17c0] sm:$0xff]  ;;  %555 = vst [vmem:[%s13150_s28 + $0xbd0] sm:$0xff] %v554_v61 }
  0xd0   : >> { %v558_v63 = vld [vmem:[%s13154_s29 + $0x17e0] sm:$0xff]  ;;  %557 = vst [vmem:[%s13150_s28 + $0xbe0] sm:$0xff] %v556_v62 }
  0xd1   : >> { %v560_v0 = vld [vmem:[%s13154_s29 + $0x1800] sm:$0xff]  ;;  %559 = vst [vmem:[%s13150_s28 + $0xbf0] sm:$0xff] %v558_v63 }
  0xd2   : >> { %v562_v1 = vld [vmem:[%s13154_s29 + $0x1820] sm:$0xff]  ;;  %561 = vst [vmem:[%s13150_s28 + $0xc00] sm:$0xff] %v560_v0 }
  0xd3   : >> { %v564_v2 = vld [vmem:[%s13154_s29 + $0x1840] sm:$0xff]  ;;  %563 = vst [vmem:[%s13150_s28 + $0xc10] sm:$0xff] %v562_v1 }
  0xd4   : >> { %v566_v3 = vld [vmem:[%s13154_s29 + $0x1860] sm:$0xff]  ;;  %565 = vst [vmem:[%s13150_s28 + $0xc20] sm:$0xff] %v564_v2 }
  0xd5   : >> { %v568_v4 = vld [vmem:[%s13154_s29 + $0x1880] sm:$0xff]  ;;  %567 = vst [vmem:[%s13150_s28 + $0xc30] sm:$0xff] %v566_v3 }
  0xd6   : >> { %v570_v5 = vld [vmem:[%s13154_s29 + $0x18a0] sm:$0xff]  ;;  %569 = vst [vmem:[%s13150_s28 + $0xc40] sm:$0xff] %v568_v4 }
  0xd7   : >> { %v572_v6 = vld [vmem:[%s13154_s29 + $0x18c0] sm:$0xff]  ;;  %571 = vst [vmem:[%s13150_s28 + $0xc50] sm:$0xff] %v570_v5 }
  0xd8   : >> { %v574_v7 = vld [vmem:[%s13154_s29 + $0x18e0] sm:$0xff]  ;;  %573 = vst [vmem:[%s13150_s28 + $0xc60] sm:$0xff] %v572_v6 }
  0xd9   : >> { %v576_v8 = vld [vmem:[%s13154_s29 + $0x1900] sm:$0xff]  ;;  %575 = vst [vmem:[%s13150_s28 + $0xc70] sm:$0xff] %v574_v7 }
  0xda   : >> { %v578_v9 = vld [vmem:[%s13154_s29 + $0x1920] sm:$0xff]  ;;  %577 = vst [vmem:[%s13150_s28 + $0xc80] sm:$0xff] %v576_v8 }
  0xdb   : >> { %v580_v10 = vld [vmem:[%s13154_s29 + $0x1940] sm:$0xff]  ;;  %579 = vst [vmem:[%s13150_s28 + $0xc90] sm:$0xff] %v578_v9 }
  0xdc   : >> { %v582_v11 = vld [vmem:[%s13154_s29 + $0x1960] sm:$0xff]  ;;  %581 = vst [vmem:[%s13150_s28 + $0xca0] sm:$0xff] %v580_v10 }
  0xdd   : >> { %v584_v12 = vld [vmem:[%s13154_s29 + $0x1980] sm:$0xff]  ;;  %583 = vst [vmem:[%s13150_s28 + $0xcb0] sm:$0xff] %v582_v11 }
  0xde   : >> { %v586_v13 = vld [vmem:[%s13154_s29 + $0x19a0] sm:$0xff]  ;;  %585 = vst [vmem:[%s13150_s28 + $0xcc0] sm:$0xff] %v584_v12 }
  0xdf   : >> { %v588_v14 = vld [vmem:[%s13154_s29 + $0x19c0] sm:$0xff]  ;;  %587 = vst [vmem:[%s13150_s28 + $0xcd0] sm:$0xff] %v586_v13 }
  0xe0   : >> { %v590_v15 = vld [vmem:[%s13154_s29 + $0x19e0] sm:$0xff]  ;;  %589 = vst [vmem:[%s13150_s28 + $0xce0] sm:$0xff] %v588_v14 }
  0xe1   : >> { %v592_v16 = vld [vmem:[%s13154_s29 + $0x1a00] sm:$0xff]  ;;  %591 = vst [vmem:[%s13150_s28 + $0xcf0] sm:$0xff] %v590_v15 }
  0xe2   : >> { %v594_v17 = vld [vmem:[%s13154_s29 + $0x1a20] sm:$0xff]  ;;  %593 = vst [vmem:[%s13150_s28 + $0xd00] sm:$0xff] %v592_v16 }
  0xe3   : >> { %v596_v18 = vld [vmem:[%s13154_s29 + $0x1a40] sm:$0xff]  ;;  %595 = vst [vmem:[%s13150_s28 + $0xd10] sm:$0xff] %v594_v17 }
  0xe4   : >> { %v598_v19 = vld [vmem:[%s13154_s29 + $0x1a60] sm:$0xff]  ;;  %597 = vst [vmem:[%s13150_s28 + $0xd20] sm:$0xff] %v596_v18 }
  0xe5   : >> { %v600_v20 = vld [vmem:[%s13154_s29 + $0x1a80] sm:$0xff]  ;;  %599 = vst [vmem:[%s13150_s28 + $0xd30] sm:$0xff] %v598_v19 }
  0xe6   : >> { %v602_v21 = vld [vmem:[%s13154_s29 + $0x1aa0] sm:$0xff]  ;;  %601 = vst [vmem:[%s13150_s28 + $0xd40] sm:$0xff] %v600_v20 }
  0xe7   : >> { %v604_v22 = vld [vmem:[%s13154_s29 + $0x1ac0] sm:$0xff]  ;;  %603 = vst [vmem:[%s13150_s28 + $0xd50] sm:$0xff] %v602_v21 }
  0xe8   : >> { %v606_v23 = vld [vmem:[%s13154_s29 + $0x1ae0] sm:$0xff]  ;;  %605 = vst [vmem:[%s13150_s28 + $0xd60] sm:$0xff] %v604_v22 }
  0xe9   : >> { %v608_v24 = vld [vmem:[%s13154_s29 + $0x1b00] sm:$0xff]  ;;  %607 = vst [vmem:[%s13150_s28 + $0xd70] sm:$0xff] %v606_v23 }
  0xea   : >> { %v610_v25 = vld [vmem:[%s13154_s29 + $0x1b20] sm:$0xff]  ;;  %609 = vst [vmem:[%s13150_s28 + $0xd80] sm:$0xff] %v608_v24 }
  0xeb   : >> { %v612_v26 = vld [vmem:[%s13154_s29 + $0x1b40] sm:$0xff]  ;;  %611 = vst [vmem:[%s13150_s28 + $0xd90] sm:$0xff] %v610_v25 }
  0xec   : >> { %v614_v27 = vld [vmem:[%s13154_s29 + $0x1b60] sm:$0xff]  ;;  %613 = vst [vmem:[%s13150_s28 + $0xda0] sm:$0xff] %v612_v26 }
  0xed   : >> { %v616_v28 = vld [vmem:[%s13154_s29 + $0x1b80] sm:$0xff]  ;;  %615 = vst [vmem:[%s13150_s28 + $0xdb0] sm:$0xff] %v614_v27 }
  0xee   : >> { %v618_v29 = vld [vmem:[%s13154_s29 + $0x1ba0] sm:$0xff]  ;;  %617 = vst [vmem:[%s13150_s28 + $0xdc0] sm:$0xff] %v616_v28 }
  0xef   : >> { %v620_v30 = vld [vmem:[%s13154_s29 + $0x1bc0] sm:$0xff]  ;;  %619 = vst [vmem:[%s13150_s28 + $0xdd0] sm:$0xff] %v618_v29 }
  0xf0   : >> { %v622_v31 = vld [vmem:[%s13154_s29 + $0x1be0] sm:$0xff]  ;;  %621 = vst [vmem:[%s13150_s28 + $0xde0] sm:$0xff] %v620_v30 }
  0xf1   : >> { %v624_v32 = vld [vmem:[%s13154_s29 + $0x1c00] sm:$0xff]  ;;  %623 = vst [vmem:[%s13150_s28 + $0xdf0] sm:$0xff] %v622_v31 }
  0xf2   : >> { %v626_v33 = vld [vmem:[%s13154_s29 + $0x1c20] sm:$0xff]  ;;  %625 = vst [vmem:[%s13150_s28 + $0xe00] sm:$0xff] %v624_v32 }
  0xf3   : >> { %v628_v34 = vld [vmem:[%s13154_s29 + $0x1c40] sm:$0xff]  ;;  %627 = vst [vmem:[%s13150_s28 + $0xe10] sm:$0xff] %v626_v33 }
  0xf4   : >> { %v630_v35 = vld [vmem:[%s13154_s29 + $0x1c60] sm:$0xff]  ;;  %629 = vst [vmem:[%s13150_s28 + $0xe20] sm:$0xff] %v628_v34 }
  0xf5   : >> { %v632_v36 = vld [vmem:[%s13154_s29 + $0x1c80] sm:$0xff]  ;;  %631 = vst [vmem:[%s13150_s28 + $0xe30] sm:$0xff] %v630_v35 }
  0xf6   : >> { %v634_v37 = vld [vmem:[%s13154_s29 + $0x1ca0] sm:$0xff]  ;;  %633 = vst [vmem:[%s13150_s28 + $0xe40] sm:$0xff] %v632_v36 }
  0xf7   : >> { %v636_v38 = vld [vmem:[%s13154_s29 + $0x1cc0] sm:$0xff]  ;;  %635 = vst [vmem:[%s13150_s28 + $0xe50] sm:$0xff] %v634_v37 }
  0xf8   : >> { %v638_v39 = vld [vmem:[%s13154_s29 + $0x1ce0] sm:$0xff]  ;;  %637 = vst [vmem:[%s13150_s28 + $0xe60] sm:$0xff] %v636_v38 }
  0xf9   : >> { %v640_v40 = vld [vmem:[%s13154_s29 + $0x1d00] sm:$0xff]  ;;  %639 = vst [vmem:[%s13150_s28 + $0xe70] sm:$0xff] %v638_v39 }
  0xfa   : >> { %v642_v41 = vld [vmem:[%s13154_s29 + $0x1d20] sm:$0xff]  ;;  %641 = vst [vmem:[%s13150_s28 + $0xe80] sm:$0xff] %v640_v40 }
  0xfb   : >> { %v644_v42 = vld [vmem:[%s13154_s29 + $0x1d40] sm:$0xff]  ;;  %643 = vst [vmem:[%s13150_s28 + $0xe90] sm:$0xff] %v642_v41 }
  0xfc   : >> { %v646_v43 = vld [vmem:[%s13154_s29 + $0x1d60] sm:$0xff]  ;;  %645 = vst [vmem:[%s13150_s28 + $0xea0] sm:$0xff] %v644_v42 }
  0xfd   : >> { %v648_v44 = vld [vmem:[%s13154_s29 + $0x1d80] sm:$0xff]  ;;  %647 = vst [vmem:[%s13150_s28 + $0xeb0] sm:$0xff] %v646_v43 }
  0xfe   : >> { %v650_v45 = vld [vmem:[%s13154_s29 + $0x1da0] sm:$0xff]  ;;  %649 = vst [vmem:[%s13150_s28 + $0xec0] sm:$0xff] %v648_v44 }
  0xff   : >> { %v652_v46 = vld [vmem:[%s13154_s29 + $0x1dc0] sm:$0xff]  ;;  %651 = vst [vmem:[%s13150_s28 + $0xed0] sm:$0xff] %v650_v45 }
 0x100   : >> { %v654_v47 = vld [vmem:[%s13154_s29 + $0x1de0] sm:$0xff]  ;;  %653 = vst [vmem:[%s13150_s28 + $0xee0] sm:$0xff] %v652_v46 }
 0x101   : >> { %v656_v48 = vld [vmem:[%s13154_s29 + $0x1e00] sm:$0xff]  ;;  %655 = vst [vmem:[%s13150_s28 + $0xef0] sm:$0xff] %v654_v47 }
 0x102   : >> { %v658_v49 = vld [vmem:[%s13154_s29 + $0x1e20] sm:$0xff]  ;;  %657 = vst [vmem:[%s13150_s28 + $0xf00] sm:$0xff] %v656_v48 }
 0x103   : >> { %v660_v50 = vld [vmem:[%s13154_s29 + $0x1e40] sm:$0xff]  ;;  %659 = vst [vmem:[%s13150_s28 + $0xf10] sm:$0xff] %v658_v49 }
 0x104   : >> { %v662_v51 = vld [vmem:[%s13154_s29 + $0x1e60] sm:$0xff]  ;;  %661 = vst [vmem:[%s13150_s28 + $0xf20] sm:$0xff] %v660_v50 }
 0x105   : >> { %v664_v52 = vld [vmem:[%s13154_s29 + $0x1e80] sm:$0xff]  ;;  %663 = vst [vmem:[%s13150_s28 + $0xf30] sm:$0xff] %v662_v51 }
 0x106   : >> { %v666_v53 = vld [vmem:[%s13154_s29 + $0x1ea0] sm:$0xff]  ;;  %665 = vst [vmem:[%s13150_s28 + $0xf40] sm:$0xff] %v664_v52 }
 0x107   : >> { %v668_v54 = vld [vmem:[%s13154_s29 + $0x1ec0] sm:$0xff]  ;;  %667 = vst [vmem:[%s13150_s28 + $0xf50] sm:$0xff] %v666_v53 }
 0x108   : >> { %v670_v55 = vld [vmem:[%s13154_s29 + $0x1ee0] sm:$0xff]  ;;  %669 = vst [vmem:[%s13150_s28 + $0xf60] sm:$0xff] %v668_v54 }
 0x109   : >> { %v672_v56 = vld [vmem:[%s13154_s29 + $0x1f00] sm:$0xff]  ;;  %671 = vst [vmem:[%s13150_s28 + $0xf70] sm:$0xff] %v670_v55 }
 0x10a   : >> { %v674_v57 = vld [vmem:[%s13154_s29 + $0x1f20] sm:$0xff]  ;;  %673 = vst [vmem:[%s13150_s28 + $0xf80] sm:$0xff] %v672_v56 }
 0x10b   : >> { %v676_v58 = vld [vmem:[%s13154_s29 + $0x1f40] sm:$0xff]  ;;  %675 = vst [vmem:[%s13150_s28 + $0xf90] sm:$0xff] %v674_v57 }
 0x10c   : >> { %v678_v59 = vld [vmem:[%s13154_s29 + $0x1f60] sm:$0xff]  ;;  %677 = vst [vmem:[%s13150_s28 + $0xfa0] sm:$0xff] %v676_v58 }
 0x10d   : >> { %v680_v60 = vld [vmem:[%s13154_s29 + $0x1f80] sm:$0xff]  ;;  %679 = vst [vmem:[%s13150_s28 + $0xfb0] sm:$0xff] %v678_v59 }
 0x10e   : >> { %v682_v61 = vld [vmem:[%s13154_s29 + $0x1fa0] sm:$0xff]  ;;  %681 = vst [vmem:[%s13150_s28 + $0xfc0] sm:$0xff] %v680_v60 }
 0x10f   : >> { %v684_v62 = vld [vmem:[%s13154_s29 + $0x1fc0] sm:$0xff]  ;;  %683 = vst [vmem:[%s13150_s28 + $0xfd0] sm:$0xff] %v682_v61 }
 0x110   : >> { %v686_v63 = vld [vmem:[%s13154_s29 + $0x1fe0] sm:$0xff]  ;;  %685 = vst [vmem:[%s13150_s28 + $0xfe0] sm:$0xff] %v684_v62 }
 0x111   : >> { %v688_v0 = vld [vmem:[%s13154_s29 + $0x2000] sm:$0xff]  ;;  %687 = vst [vmem:[%s13150_s28 + $0xff0] sm:$0xff] %v686_v63 }
 0x112   : >> { %v690_v1 = vld [vmem:[%s13154_s29 + $0x2020] sm:$0xff]  ;;  %689 = vst [vmem:[%s13150_s28 + $0x1000] sm:$0xff] %v688_v0 }
 0x113   : >> { %v692_v2 = vld [vmem:[%s13154_s29 + $0x2040] sm:$0xff]  ;;  %691 = vst [vmem:[%s13150_s28 + $0x1010] sm:$0xff] %v690_v1 }
 0x114   : >> { %v694_v3 = vld [vmem:[%s13154_s29 + $0x2060] sm:$0xff]  ;;  %693 = vst [vmem:[%s13150_s28 + $0x1020] sm:$0xff] %v692_v2 }
 0x115   : >> { %v696_v4 = vld [vmem:[%s13154_s29 + $0x2080] sm:$0xff]  ;;  %695 = vst [vmem:[%s13150_s28 + $0x1030] sm:$0xff] %v694_v3 }
 0x116   : >> { %v698_v5 = vld [vmem:[%s13154_s29 + $0x20a0] sm:$0xff]  ;;  %697 = vst [vmem:[%s13150_s28 + $0x1040] sm:$0xff] %v696_v4 }
 0x117   : >> { %v700_v6 = vld [vmem:[%s13154_s29 + $0x20c0] sm:$0xff]  ;;  %699 = vst [vmem:[%s13150_s28 + $0x1050] sm:$0xff] %v698_v5 }
 0x118   : >> { %v702_v7 = vld [vmem:[%s13154_s29 + $0x20e0] sm:$0xff]  ;;  %701 = vst [vmem:[%s13150_s28 + $0x1060] sm:$0xff] %v700_v6 }
 0x119   : >> { %v704_v8 = vld [vmem:[%s13154_s29 + $0x2100] sm:$0xff]  ;;  %703 = vst [vmem:[%s13150_s28 + $0x1070] sm:$0xff] %v702_v7 }
 0x11a   : >> { %v706_v9 = vld [vmem:[%s13154_s29 + $0x2120] sm:$0xff]  ;;  %705 = vst [vmem:[%s13150_s28 + $0x1080] sm:$0xff] %v704_v8 }
 0x11b   : >> { %v708_v10 = vld [vmem:[%s13154_s29 + $0x2140] sm:$0xff]  ;;  %707 = vst [vmem:[%s13150_s28 + $0x1090] sm:$0xff] %v706_v9 }
 0x11c   : >> { %v710_v11 = vld [vmem:[%s13154_s29 + $0x2160] sm:$0xff]  ;;  %709 = vst [vmem:[%s13150_s28 + $0x10a0] sm:$0xff] %v708_v10 }
 0x11d   : >> { %v712_v12 = vld [vmem:[%s13154_s29 + $0x2180] sm:$0xff]  ;;  %711 = vst [vmem:[%s13150_s28 + $0x10b0] sm:$0xff] %v710_v11 }
 0x11e   : >> { %v714_v13 = vld [vmem:[%s13154_s29 + $0x21a0] sm:$0xff]  ;;  %713 = vst [vmem:[%s13150_s28 + $0x10c0] sm:$0xff] %v712_v12 }
 0x11f   : >> { %v716_v14 = vld [vmem:[%s13154_s29 + $0x21c0] sm:$0xff]  ;;  %715 = vst [vmem:[%s13150_s28 + $0x10d0] sm:$0xff] %v714_v13 }
 0x120   : >> { %v718_v15 = vld [vmem:[%s13154_s29 + $0x21e0] sm:$0xff]  ;;  %717 = vst [vmem:[%s13150_s28 + $0x10e0] sm:$0xff] %v716_v14 }
 0x121   : >> { %v720_v16 = vld [vmem:[%s13154_s29 + $0x2200] sm:$0xff]  ;;  %719 = vst [vmem:[%s13150_s28 + $0x10f0] sm:$0xff] %v718_v15 }
 0x122   : >> { %v722_v17 = vld [vmem:[%s13154_s29 + $0x2220] sm:$0xff]  ;;  %721 = vst [vmem:[%s13150_s28 + $0x1100] sm:$0xff] %v720_v16 }
 0x123   : >> { %v724_v18 = vld [vmem:[%s13154_s29 + $0x2240] sm:$0xff]  ;;  %723 = vst [vmem:[%s13150_s28 + $0x1110] sm:$0xff] %v722_v17 }
 0x124   : >> { %v726_v19 = vld [vmem:[%s13154_s29 + $0x2260] sm:$0xff]  ;;  %725 = vst [vmem:[%s13150_s28 + $0x1120] sm:$0xff] %v724_v18 }
 0x125   : >> { %v728_v20 = vld [vmem:[%s13154_s29 + $0x2280] sm:$0xff]  ;;  %727 = vst [vmem:[%s13150_s28 + $0x1130] sm:$0xff] %v726_v19 }
 0x126   : >> { %v730_v21 = vld [vmem:[%s13154_s29 + $0x22a0] sm:$0xff]  ;;  %729 = vst [vmem:[%s13150_s28 + $0x1140] sm:$0xff] %v728_v20 }
 0x127   : >> { %v732_v22 = vld [vmem:[%s13154_s29 + $0x22c0] sm:$0xff]  ;;  %731 = vst [vmem:[%s13150_s28 + $0x1150] sm:$0xff] %v730_v21 }
 0x128   : >> { %v734_v23 = vld [vmem:[%s13154_s29 + $0x22e0] sm:$0xff]  ;;  %733 = vst [vmem:[%s13150_s28 + $0x1160] sm:$0xff] %v732_v22 }
 0x129   : >> { %v736_v24 = vld [vmem:[%s13154_s29 + $0x2300] sm:$0xff]  ;;  %735 = vst [vmem:[%s13150_s28 + $0x1170] sm:$0xff] %v734_v23 }
 0x12a   : >> { %v738_v25 = vld [vmem:[%s13154_s29 + $0x2320] sm:$0xff]  ;;  %737 = vst [vmem:[%s13150_s28 + $0x1180] sm:$0xff] %v736_v24 }
 0x12b   : >> { %v740_v26 = vld [vmem:[%s13154_s29 + $0x2340] sm:$0xff]  ;;  %739 = vst [vmem:[%s13150_s28 + $0x1190] sm:$0xff] %v738_v25 }
 0x12c   : >> { %v742_v27 = vld [vmem:[%s13154_s29 + $0x2360] sm:$0xff]  ;;  %741 = vst [vmem:[%s13150_s28 + $0x11a0] sm:$0xff] %v740_v26 }
 0x12d   : >> { %v744_v28 = vld [vmem:[%s13154_s29 + $0x2380] sm:$0xff]  ;;  %743 = vst [vmem:[%s13150_s28 + $0x11b0] sm:$0xff] %v742_v27 }
 0x12e   : >> { %v746_v29 = vld [vmem:[%s13154_s29 + $0x23a0] sm:$0xff]  ;;  %745 = vst [vmem:[%s13150_s28 + $0x11c0] sm:$0xff] %v744_v28 }
 0x12f   : >> { %v748_v30 = vld [vmem:[%s13154_s29 + $0x23c0] sm:$0xff]  ;;  %747 = vst [vmem:[%s13150_s28 + $0x11d0] sm:$0xff] %v746_v29 }
 0x130   : >> { %v750_v31 = vld [vmem:[%s13154_s29 + $0x23e0] sm:$0xff]  ;;  %749 = vst [vmem:[%s13150_s28 + $0x11e0] sm:$0xff] %v748_v30 }
 0x131   : >> { %v752_v32 = vld [vmem:[%s13154_s29 + $0x2400] sm:$0xff]  ;;  %751 = vst [vmem:[%s13150_s28 + $0x11f0] sm:$0xff] %v750_v31 }
 0x132   : >> { %v754_v33 = vld [vmem:[%s13154_s29 + $0x2420] sm:$0xff]  ;;  %753 = vst [vmem:[%s13150_s28 + $0x1200] sm:$0xff] %v752_v32 }
 0x133   : >> { %v756_v34 = vld [vmem:[%s13154_s29 + $0x2440] sm:$0xff]  ;;  %755 = vst [vmem:[%s13150_s28 + $0x1210] sm:$0xff] %v754_v33 }
 0x134   : >> { %v758_v35 = vld [vmem:[%s13154_s29 + $0x2460] sm:$0xff]  ;;  %757 = vst [vmem:[%s13150_s28 + $0x1220] sm:$0xff] %v756_v34 }
 0x135   : >> { %v760_v36 = vld [vmem:[%s13154_s29 + $0x2480] sm:$0xff]  ;;  %759 = vst [vmem:[%s13150_s28 + $0x1230] sm:$0xff] %v758_v35 }
 0x136   : >> { %v762_v37 = vld [vmem:[%s13154_s29 + $0x24a0] sm:$0xff]  ;;  %761 = vst [vmem:[%s13150_s28 + $0x1240] sm:$0xff] %v760_v36 }
 0x137   : >> { %v764_v38 = vld [vmem:[%s13154_s29 + $0x24c0] sm:$0xff]  ;;  %763 = vst [vmem:[%s13150_s28 + $0x1250] sm:$0xff] %v762_v37 }
 0x138   : >> { %v766_v39 = vld [vmem:[%s13154_s29 + $0x24e0] sm:$0xff]  ;;  %765 = vst [vmem:[%s13150_s28 + $0x1260] sm:$0xff] %v764_v38 }
 0x139   : >> { %v768_v40 = vld [vmem:[%s13154_s29 + $0x2500] sm:$0xff]  ;;  %767 = vst [vmem:[%s13150_s28 + $0x1270] sm:$0xff] %v766_v39 }
 0x13a   : >> { %v770_v41 = vld [vmem:[%s13154_s29 + $0x2520] sm:$0xff]  ;;  %769 = vst [vmem:[%s13150_s28 + $0x1280] sm:$0xff] %v768_v40 }
 0x13b   : >> { %v772_v42 = vld [vmem:[%s13154_s29 + $0x2540] sm:$0xff]  ;;  %771 = vst [vmem:[%s13150_s28 + $0x1290] sm:$0xff] %v770_v41 }
 0x13c   : >> { %v774_v43 = vld [vmem:[%s13154_s29 + $0x2560] sm:$0xff]  ;;  %773 = vst [vmem:[%s13150_s28 + $0x12a0] sm:$0xff] %v772_v42 }
 0x13d   : >> { %v776_v44 = vld [vmem:[%s13154_s29 + $0x2580] sm:$0xff]  ;;  %775 = vst [vmem:[%s13150_s28 + $0x12b0] sm:$0xff] %v774_v43 }
 0x13e   : >> { %v778_v45 = vld [vmem:[%s13154_s29 + $0x25a0] sm:$0xff]  ;;  %777 = vst [vmem:[%s13150_s28 + $0x12c0] sm:$0xff] %v776_v44 }
 0x13f   : >> { %v780_v46 = vld [vmem:[%s13154_s29 + $0x25c0] sm:$0xff]  ;;  %779 = vst [vmem:[%s13150_s28 + $0x12d0] sm:$0xff] %v778_v45 }
 0x140   : >> { %v782_v47 = vld [vmem:[%s13154_s29 + $0x25e0] sm:$0xff]  ;;  %781 = vst [vmem:[%s13150_s28 + $0x12e0] sm:$0xff] %v780_v46 }
 0x141   : >> { %v784_v48 = vld [vmem:[%s13154_s29 + $0x2600] sm:$0xff]  ;;  %783 = vst [vmem:[%s13150_s28 + $0x12f0] sm:$0xff] %v782_v47 }
 0x142   : >> { %v786_v49 = vld [vmem:[%s13154_s29 + $0x2620] sm:$0xff]  ;;  %785 = vst [vmem:[%s13150_s28 + $0x1300] sm:$0xff] %v784_v48 }
 0x143   : >> { %v788_v50 = vld [vmem:[%s13154_s29 + $0x2640] sm:$0xff]  ;;  %787 = vst [vmem:[%s13150_s28 + $0x1310] sm:$0xff] %v786_v49 }
 0x144   : >> { %v790_v51 = vld [vmem:[%s13154_s29 + $0x2660] sm:$0xff]  ;;  %789 = vst [vmem:[%s13150_s28 + $0x1320] sm:$0xff] %v788_v50 }
 0x145   : >> { %v792_v52 = vld [vmem:[%s13154_s29 + $0x2680] sm:$0xff]  ;;  %791 = vst [vmem:[%s13150_s28 + $0x1330] sm:$0xff] %v790_v51 }
 0x146   : >> { %v794_v53 = vld [vmem:[%s13154_s29 + $0x26a0] sm:$0xff]  ;;  %793 = vst [vmem:[%s13150_s28 + $0x1340] sm:$0xff] %v792_v52 }
 0x147   : >> { %v796_v54 = vld [vmem:[%s13154_s29 + $0x26c0] sm:$0xff]  ;;  %795 = vst [vmem:[%s13150_s28 + $0x1350] sm:$0xff] %v794_v53 }
 0x148   : >> { %v798_v55 = vld [vmem:[%s13154_s29 + $0x26e0] sm:$0xff]  ;;  %797 = vst [vmem:[%s13150_s28 + $0x1360] sm:$0xff] %v796_v54 }
 0x149   : >> { %v800_v56 = vld [vmem:[%s13154_s29 + $0x2700] sm:$0xff]  ;;  %799 = vst [vmem:[%s13150_s28 + $0x1370] sm:$0xff] %v798_v55 }
 0x14a   : >> { %v802_v57 = vld [vmem:[%s13154_s29 + $0x2720] sm:$0xff]  ;;  %801 = vst [vmem:[%s13150_s28 + $0x1380] sm:$0xff] %v800_v56 }
 0x14b   : >> { %v804_v58 = vld [vmem:[%s13154_s29 + $0x2740] sm:$0xff]  ;;  %803 = vst [vmem:[%s13150_s28 + $0x1390] sm:$0xff] %v802_v57 }
 0x14c   : >> { %v806_v59 = vld [vmem:[%s13154_s29 + $0x2760] sm:$0xff]  ;;  %805 = vst [vmem:[%s13150_s28 + $0x13a0] sm:$0xff] %v804_v58 }
 0x14d   : >> { %v808_v60 = vld [vmem:[%s13154_s29 + $0x2780] sm:$0xff]  ;;  %807 = vst [vmem:[%s13150_s28 + $0x13b0] sm:$0xff] %v806_v59 }
 0x14e   : >> { %v810_v61 = vld [vmem:[%s13154_s29 + $0x27a0] sm:$0xff]  ;;  %809 = vst [vmem:[%s13150_s28 + $0x13c0] sm:$0xff] %v808_v60 }
 0x14f   : >> { %v812_v62 = vld [vmem:[%s13154_s29 + $0x27c0] sm:$0xff]  ;;  %811 = vst [vmem:[%s13150_s28 + $0x13d0] sm:$0xff] %v810_v61 }
 0x150   : >> { %v814_v63 = vld [vmem:[%s13154_s29 + $0x27e0] sm:$0xff]  ;;  %813 = vst [vmem:[%s13150_s28 + $0x13e0] sm:$0xff] %v812_v62 }
 0x151   : >> { %v816_v0 = vld [vmem:[%s13154_s29 + $0x2800] sm:$0xff]  ;;  %815 = vst [vmem:[%s13150_s28 + $0x13f0] sm:$0xff] %v814_v63 }
 0x152   : >> { %v818_v1 = vld [vmem:[%s13154_s29 + $0x2820] sm:$0xff]  ;;  %817 = vst [vmem:[%s13150_s28 + $0x1400] sm:$0xff] %v816_v0 }
 0x153   : >> { %v820_v2 = vld [vmem:[%s13154_s29 + $0x2840] sm:$0xff]  ;;  %819 = vst [vmem:[%s13150_s28 + $0x1410] sm:$0xff] %v818_v1 }
 0x154   : >> { %v822_v3 = vld [vmem:[%s13154_s29 + $0x2860] sm:$0xff]  ;;  %821 = vst [vmem:[%s13150_s28 + $0x1420] sm:$0xff] %v820_v2 }
 0x155   : >> { %v824_v4 = vld [vmem:[%s13154_s29 + $0x2880] sm:$0xff]  ;;  %823 = vst [vmem:[%s13150_s28 + $0x1430] sm:$0xff] %v822_v3 }
 0x156   : >> { %v826_v5 = vld [vmem:[%s13154_s29 + $0x28a0] sm:$0xff]  ;;  %825 = vst [vmem:[%s13150_s28 + $0x1440] sm:$0xff] %v824_v4 }
 0x157   : >> { %v828_v6 = vld [vmem:[%s13154_s29 + $0x28c0] sm:$0xff]  ;;  %827 = vst [vmem:[%s13150_s28 + $0x1450] sm:$0xff] %v826_v5 }
 0x158   : >> { %v830_v7 = vld [vmem:[%s13154_s29 + $0x28e0] sm:$0xff]  ;;  %829 = vst [vmem:[%s13150_s28 + $0x1460] sm:$0xff] %v828_v6 }
 0x159   : >> { %v832_v8 = vld [vmem:[%s13154_s29 + $0x2900] sm:$0xff]  ;;  %831 = vst [vmem:[%s13150_s28 + $0x1470] sm:$0xff] %v830_v7 }
 0x15a   : >> { %v834_v9 = vld [vmem:[%s13154_s29 + $0x2920] sm:$0xff]  ;;  %833 = vst [vmem:[%s13150_s28 + $0x1480] sm:$0xff] %v832_v8 }
 0x15b   : >> { %v836_v10 = vld [vmem:[%s13154_s29 + $0x2940] sm:$0xff]  ;;  %835 = vst [vmem:[%s13150_s28 + $0x1490] sm:$0xff] %v834_v9 }
 0x15c   : >> { %v838_v11 = vld [vmem:[%s13154_s29 + $0x2960] sm:$0xff]  ;;  %837 = vst [vmem:[%s13150_s28 + $0x14a0] sm:$0xff] %v836_v10 }
 0x15d   : >> { %v840_v12 = vld [vmem:[%s13154_s29 + $0x2980] sm:$0xff]  ;;  %839 = vst [vmem:[%s13150_s28 + $0x14b0] sm:$0xff] %v838_v11 }
 0x15e   : >> { %v842_v13 = vld [vmem:[%s13154_s29 + $0x29a0] sm:$0xff]  ;;  %841 = vst [vmem:[%s13150_s28 + $0x14c0] sm:$0xff] %v840_v12 }
 0x15f   : >> { %v844_v14 = vld [vmem:[%s13154_s29 + $0x29c0] sm:$0xff]  ;;  %843 = vst [vmem:[%s13150_s28 + $0x14d0] sm:$0xff] %v842_v13 }
 0x160   : >> { %v846_v15 = vld [vmem:[%s13154_s29 + $0x29e0] sm:$0xff]  ;;  %845 = vst [vmem:[%s13150_s28 + $0x14e0] sm:$0xff] %v844_v14 }
 0x161   : >> { %v848_v16 = vld [vmem:[%s13154_s29 + $0x2a00] sm:$0xff]  ;;  %847 = vst [vmem:[%s13150_s28 + $0x14f0] sm:$0xff] %v846_v15 }
 0x162   : >> { %v850_v17 = vld [vmem:[%s13154_s29 + $0x2a20] sm:$0xff]  ;;  %849 = vst [vmem:[%s13150_s28 + $0x1500] sm:$0xff] %v848_v16 }
 0x163   : >> { %v852_v18 = vld [vmem:[%s13154_s29 + $0x2a40] sm:$0xff]  ;;  %851 = vst [vmem:[%s13150_s28 + $0x1510] sm:$0xff] %v850_v17 }
 0x164   : >> { %v854_v19 = vld [vmem:[%s13154_s29 + $0x2a60] sm:$0xff]  ;;  %853 = vst [vmem:[%s13150_s28 + $0x1520] sm:$0xff] %v852_v18 }
 0x165   : >> { %v856_v20 = vld [vmem:[%s13154_s29 + $0x2a80] sm:$0xff]  ;;  %855 = vst [vmem:[%s13150_s28 + $0x1530] sm:$0xff] %v854_v19 }
 0x166   : >> { %v858_v21 = vld [vmem:[%s13154_s29 + $0x2aa0] sm:$0xff]  ;;  %857 = vst [vmem:[%s13150_s28 + $0x1540] sm:$0xff] %v856_v20 }
 0x167   : >> { %v860_v22 = vld [vmem:[%s13154_s29 + $0x2ac0] sm:$0xff]  ;;  %859 = vst [vmem:[%s13150_s28 + $0x1550] sm:$0xff] %v858_v21 }
 0x168   : >> { %v862_v23 = vld [vmem:[%s13154_s29 + $0x2ae0] sm:$0xff]  ;;  %861 = vst [vmem:[%s13150_s28 + $0x1560] sm:$0xff] %v860_v22 }
 0x169   : >> { %v864_v24 = vld [vmem:[%s13154_s29 + $0x2b00] sm:$0xff]  ;;  %863 = vst [vmem:[%s13150_s28 + $0x1570] sm:$0xff] %v862_v23 }
 0x16a   : >> { %v866_v25 = vld [vmem:[%s13154_s29 + $0x2b20] sm:$0xff]  ;;  %865 = vst [vmem:[%s13150_s28 + $0x1580] sm:$0xff] %v864_v24 }
 0x16b   : >> { %v868_v26 = vld [vmem:[%s13154_s29 + $0x2b40] sm:$0xff]  ;;  %867 = vst [vmem:[%s13150_s28 + $0x1590] sm:$0xff] %v866_v25 }
 0x16c   : >> { %v870_v27 = vld [vmem:[%s13154_s29 + $0x2b60] sm:$0xff]  ;;  %869 = vst [vmem:[%s13150_s28 + $0x15a0] sm:$0xff] %v868_v26 }
 0x16d   : >> { %v872_v28 = vld [vmem:[%s13154_s29 + $0x2b80] sm:$0xff]  ;;  %871 = vst [vmem:[%s13150_s28 + $0x15b0] sm:$0xff] %v870_v27 }
 0x16e   : >> { %v874_v29 = vld [vmem:[%s13154_s29 + $0x2ba0] sm:$0xff]  ;;  %873 = vst [vmem:[%s13150_s28 + $0x15c0] sm:$0xff] %v872_v28 }
 0x16f   : >> { %v876_v30 = vld [vmem:[%s13154_s29 + $0x2bc0] sm:$0xff]  ;;  %875 = vst [vmem:[%s13150_s28 + $0x15d0] sm:$0xff] %v874_v29 }
 0x170   : >> { %v878_v31 = vld [vmem:[%s13154_s29 + $0x2be0] sm:$0xff]  ;;  %877 = vst [vmem:[%s13150_s28 + $0x15e0] sm:$0xff] %v876_v30 }
 0x171   : >> { %v880_v32 = vld [vmem:[%s13154_s29 + $0x2c00] sm:$0xff]  ;;  %879 = vst [vmem:[%s13150_s28 + $0x15f0] sm:$0xff] %v878_v31 }
 0x172   : >> { %v882_v33 = vld [vmem:[%s13154_s29 + $0x2c20] sm:$0xff]  ;;  %881 = vst [vmem:[%s13150_s28 + $0x1600] sm:$0xff] %v880_v32 }
 0x173   : >> { %v884_v34 = vld [vmem:[%s13154_s29 + $0x2c40] sm:$0xff]  ;;  %883 = vst [vmem:[%s13150_s28 + $0x1610] sm:$0xff] %v882_v33 }
 0x174   : >> { %v886_v35 = vld [vmem:[%s13154_s29 + $0x2c60] sm:$0xff]  ;;  %885 = vst [vmem:[%s13150_s28 + $0x1620] sm:$0xff] %v884_v34 }
 0x175   : >> { %v888_v36 = vld [vmem:[%s13154_s29 + $0x2c80] sm:$0xff]  ;;  %887 = vst [vmem:[%s13150_s28 + $0x1630] sm:$0xff] %v886_v35 }
 0x176   : >> { %v890_v37 = vld [vmem:[%s13154_s29 + $0x2ca0] sm:$0xff]  ;;  %889 = vst [vmem:[%s13150_s28 + $0x1640] sm:$0xff] %v888_v36 }
 0x177   : >> { %v892_v38 = vld [vmem:[%s13154_s29 + $0x2cc0] sm:$0xff]  ;;  %891 = vst [vmem:[%s13150_s28 + $0x1650] sm:$0xff] %v890_v37 }
 0x178   : >> { %v894_v39 = vld [vmem:[%s13154_s29 + $0x2ce0] sm:$0xff]  ;;  %893 = vst [vmem:[%s13150_s28 + $0x1660] sm:$0xff] %v892_v38 }
 0x179   : >> { %v896_v40 = vld [vmem:[%s13154_s29 + $0x2d00] sm:$0xff]  ;;  %895 = vst [vmem:[%s13150_s28 + $0x1670] sm:$0xff] %v894_v39 }
 0x17a   : >> { %v898_v41 = vld [vmem:[%s13154_s29 + $0x2d20] sm:$0xff]  ;;  %897 = vst [vmem:[%s13150_s28 + $0x1680] sm:$0xff] %v896_v40 }
 0x17b   : >> { %v900_v42 = vld [vmem:[%s13154_s29 + $0x2d40] sm:$0xff]  ;;  %899 = vst [vmem:[%s13150_s28 + $0x1690] sm:$0xff] %v898_v41 }
 0x17c   : >> { %v902_v43 = vld [vmem:[%s13154_s29 + $0x2d60] sm:$0xff]  ;;  %901 = vst [vmem:[%s13150_s28 + $0x16a0] sm:$0xff] %v900_v42 }
 0x17d   : >> { %v904_v44 = vld [vmem:[%s13154_s29 + $0x2d80] sm:$0xff]  ;;  %903 = vst [vmem:[%s13150_s28 + $0x16b0] sm:$0xff] %v902_v43 }
 0x17e   : >> { %v906_v45 = vld [vmem:[%s13154_s29 + $0x2da0] sm:$0xff]  ;;  %905 = vst [vmem:[%s13150_s28 + $0x16c0] sm:$0xff] %v904_v44 }
 0x17f   : >> { %v908_v46 = vld [vmem:[%s13154_s29 + $0x2dc0] sm:$0xff]  ;;  %907 = vst [vmem:[%s13150_s28 + $0x16d0] sm:$0xff] %v906_v45 }
 0x180   : >> { %v910_v47 = vld [vmem:[%s13154_s29 + $0x2de0] sm:$0xff]  ;;  %909 = vst [vmem:[%s13150_s28 + $0x16e0] sm:$0xff] %v908_v46 }
 0x181   : >> { %v912_v48 = vld [vmem:[%s13154_s29 + $0x2e00] sm:$0xff]  ;;  %911 = vst [vmem:[%s13150_s28 + $0x16f0] sm:$0xff] %v910_v47 }
 0x182   : >> { %v914_v49 = vld [vmem:[%s13154_s29 + $0x2e20] sm:$0xff]  ;;  %913 = vst [vmem:[%s13150_s28 + $0x1700] sm:$0xff] %v912_v48 }
 0x183   : >> { %v916_v50 = vld [vmem:[%s13154_s29 + $0x2e40] sm:$0xff]  ;;  %915 = vst [vmem:[%s13150_s28 + $0x1710] sm:$0xff] %v914_v49 }
 0x184   : >> { %v918_v51 = vld [vmem:[%s13154_s29 + $0x2e60] sm:$0xff]  ;;  %917 = vst [vmem:[%s13150_s28 + $0x1720] sm:$0xff] %v916_v50 }
 0x185   : >> { %v920_v52 = vld [vmem:[%s13154_s29 + $0x2e80] sm:$0xff]  ;;  %919 = vst [vmem:[%s13150_s28 + $0x1730] sm:$0xff] %v918_v51 }
 0x186   : >> { %v922_v53 = vld [vmem:[%s13154_s29 + $0x2ea0] sm:$0xff]  ;;  %921 = vst [vmem:[%s13150_s28 + $0x1740] sm:$0xff] %v920_v52 }
 0x187   : >> { %v924_v54 = vld [vmem:[%s13154_s29 + $0x2ec0] sm:$0xff]  ;;  %923 = vst [vmem:[%s13150_s28 + $0x1750] sm:$0xff] %v922_v53 }
 0x188   : >> { %v926_v55 = vld [vmem:[%s13154_s29 + $0x2ee0] sm:$0xff]  ;;  %925 = vst [vmem:[%s13150_s28 + $0x1760] sm:$0xff] %v924_v54 }
 0x189   : >> { %v928_v56 = vld [vmem:[%s13154_s29 + $0x2f00] sm:$0xff]  ;;  %927 = vst [vmem:[%s13150_s28 + $0x1770] sm:$0xff] %v926_v55 }
 0x18a   : >> { %v930_v57 = vld [vmem:[%s13154_s29 + $0x2f20] sm:$0xff]  ;;  %929 = vst [vmem:[%s13150_s28 + $0x1780] sm:$0xff] %v928_v56 }
 0x18b   : >> { %v932_v58 = vld [vmem:[%s13154_s29 + $0x2f40] sm:$0xff]  ;;  %931 = vst [vmem:[%s13150_s28 + $0x1790] sm:$0xff] %v930_v57 }
 0x18c   : >> { %v934_v59 = vld [vmem:[%s13154_s29 + $0x2f60] sm:$0xff]  ;;  %933 = vst [vmem:[%s13150_s28 + $0x17a0] sm:$0xff] %v932_v58 }
 0x18d   : >> { %v936_v60 = vld [vmem:[%s13154_s29 + $0x2f80] sm:$0xff]  ;;  %935 = vst [vmem:[%s13150_s28 + $0x17b0] sm:$0xff] %v934_v59 }
 0x18e   : >> { %v938_v61 = vld [vmem:[%s13154_s29 + $0x2fa0] sm:$0xff]  ;;  %937 = vst [vmem:[%s13150_s28 + $0x17c0] sm:$0xff] %v936_v60 }
 0x18f   : >> { %v940_v62 = vld [vmem:[%s13154_s29 + $0x2fc0] sm:$0xff]  ;;  %939 = vst [vmem:[%s13150_s28 + $0x17d0] sm:$0xff] %v938_v61 }
 0x190   : >> { %v942_v63 = vld [vmem:[%s13154_s29 + $0x2fe0] sm:$0xff]  ;;  %941 = vst [vmem:[%s13150_s28 + $0x17e0] sm:$0xff] %v940_v62 }
 0x191   : >> { %v944_v0 = vld [vmem:[%s13154_s29 + $0x3000] sm:$0xff]  ;;  %943 = vst [vmem:[%s13150_s28 + $0x17f0] sm:$0xff] %v942_v63 }
 0x192   : >> { %v946_v1 = vld [vmem:[%s13154_s29 + $0x3020] sm:$0xff]  ;;  %945 = vst [vmem:[%s13150_s28 + $0x1800] sm:$0xff] %v944_v0 }
 0x193   : >> { %v948_v2 = vld [vmem:[%s13154_s29 + $0x3040] sm:$0xff]  ;;  %947 = vst [vmem:[%s13150_s28 + $0x1810] sm:$0xff] %v946_v1 }
 0x194   : >> { %v950_v3 = vld [vmem:[%s13154_s29 + $0x3060] sm:$0xff]  ;;  %949 = vst [vmem:[%s13150_s28 + $0x1820] sm:$0xff] %v948_v2 }
 0x195   : >> { %v952_v4 = vld [vmem:[%s13154_s29 + $0x3080] sm:$0xff]  ;;  %951 = vst [vmem:[%s13150_s28 + $0x1830] sm:$0xff] %v950_v3 }
 0x196   : >> { %v954_v5 = vld [vmem:[%s13154_s29 + $0x30a0] sm:$0xff]  ;;  %953 = vst [vmem:[%s13150_s28 + $0x1840] sm:$0xff] %v952_v4 }
 0x197   : >> { %v956_v6 = vld [vmem:[%s13154_s29 + $0x30c0] sm:$0xff]  ;;  %955 = vst [vmem:[%s13150_s28 + $0x1850] sm:$0xff] %v954_v5 }
 0x198   : >> { %v958_v7 = vld [vmem:[%s13154_s29 + $0x30e0] sm:$0xff]  ;;  %957 = vst [vmem:[%s13150_s28 + $0x1860] sm:$0xff] %v956_v6 }
 0x199   : >> { %v960_v8 = vld [vmem:[%s13154_s29 + $0x3100] sm:$0xff]  ;;  %959 = vst [vmem:[%s13150_s28 + $0x1870] sm:$0xff] %v958_v7 }
 0x19a   : >> { %v962_v9 = vld [vmem:[%s13154_s29 + $0x3120] sm:$0xff]  ;;  %961 = vst [vmem:[%s13150_s28 + $0x1880] sm:$0xff] %v960_v8 }
 0x19b   : >> { %v964_v10 = vld [vmem:[%s13154_s29 + $0x3140] sm:$0xff]  ;;  %963 = vst [vmem:[%s13150_s28 + $0x1890] sm:$0xff] %v962_v9 }
 0x19c   : >> { %v966_v11 = vld [vmem:[%s13154_s29 + $0x3160] sm:$0xff]  ;;  %965 = vst [vmem:[%s13150_s28 + $0x18a0] sm:$0xff] %v964_v10 }
 0x19d   : >> { %v968_v12 = vld [vmem:[%s13154_s29 + $0x3180] sm:$0xff]  ;;  %967 = vst [vmem:[%s13150_s28 + $0x18b0] sm:$0xff] %v966_v11  ;;  %171 = sbr.rel (!%p169_p7) target bundleno = 17 (0x11), region = 112 }
 0x19e   : >> { %v970_v13 = vld [vmem:[%s13154_s29 + $0x31a0] sm:$0xff]  ;;  %969 = vst [vmem:[%s13150_s28 + $0x18c0] sm:$0xff] %v968_v12 }
 0x19f   : >> { %v972_v14 = vld [vmem:[%s13154_s29 + $0x31c0] sm:$0xff]  ;;  %971 = vst [vmem:[%s13150_s28 + $0x18d0] sm:$0xff] %v970_v13 }
 0x1a0   : >> { %v974_v15 = vld [vmem:[%s13154_s29 + $0x31e0] sm:$0xff]  ;;  %973 = vst [vmem:[%s13150_s28 + $0x18e0] sm:$0xff] %v972_v14  ;;  %s15952_s29 = smov %s13807_s7 }
 0x1a1   : >> { %975 = vst [vmem:[%s13150_s28 + $0x18f0] sm:$0xff] %v974_v15  ;;  %s15951_s28 = smov %s13811_s8 }
 0x1a2 PF: > { %p9006_p8 = scmp.ge.s32.totalorder %s13146_s16, 1  ;;  %p2623_p9 = scmp.lt.s32.totalorder %s13146_s16, 3 }
 0x1a4   : > { %p2624_p10 = pnand %p9006_p8, %p2623_p9 }
 0x1a5   : > { %s2630_s9 = sand.u32 (!%p2624_p10), 1, %s13130_s12   ;;  %s9007_s24 = sshll.u32 (!%p2624_p10), %s13138_s14, 2 }
 0x1a6   : > { %2627 = sbr.rel (%p2624_p10) target bundleno = 1380 (0x564), region = 65  ;;  %p14498_p11 = scmp.lt.s32.totalorder (!%p2624_p10), %s9007_s24, 7 }
 0x1a7   : > { %s13013_s10 = smul.u32 (!%p2624_p10), 6400, %s2630_s9 }
 0x1a9   : > { %s14081_s11 = scalar_lea.vmem (!%p2624_p10), [#allocation2], %s13013_s10 }
 0x1ab   : > { %v9123_v16 = vld [vmem:[%s14081_s11 + $0xe0] sm:$0xf]  ;;  %v12242_v17 = vld [vmem:[%s14081_s11 + $0xec] sm:$0xf0]  ;;  %s15964_s24 = smov (!%p14498_p11, %s9007_s24), 7  ;;  %vm8862_vm0 = vcmask 1040384  }
 0x1ac   : > { %v9251_v18 = vld [vmem:[%s14081_s11 + $0x1e0] sm:$0xf]  ;;  %v9124_v19 = vor.u32 %v12242_v17, %v9123_v16  ;;  %v12274_v20 = vld [vmem:[%s14081_s11 + $0x1ec] sm:$0xf0]  ;;  %s14529_s27 = scalar_lea.vmem %s15947_s2, %s15964_s24  ;;  %vm8866_vm1 = vcmask 1042434   ;;  %vm8870_vm2 = vcmask 1041408   ;;  %s2681_s5 = scalar_lea.vmem %s15948_s3, %s15964_s24 }
 0x1ad   : > { %v9379_v21 = vld [vmem:[%s14081_s11 + $0x2e0] sm:$0xf]  ;;  %v12306_v22 = vld [vmem:[%s14081_s11 + $0x2ec] sm:$0xf0]  ;;  %v9252_v23 = vor.u32 %v12274_v20, %v9251_v18 }
 0x1ae   : > { %v9380_v24 = vor.u32 %v12306_v22, %v9379_v21  ;;  %v9507_v25 = vld [vmem:[%s14081_s11 + $0x3e0] sm:$0xf]  ;;  %v12338_v26 = vld [vmem:[%s14081_s11 + $0x3ec] sm:$0xf0]  ;;  %7555 = vmatpush.bf16.msra.mxu0 %v9124_v19 }
 0x1af   : > { %v9107_v27 = vld [vmem:[%s14081_s11 + $0xc0] sm:$0xf]  ;;  %v9508_v28 = vor.u32 %v12338_v26, %v9507_v25  ;;  %v12238_v29 = vld [vmem:[%s14081_s11 + $0xcc] sm:$0xf0]  ;;  %7568 = vmatpush.bf16.msra.mxu1 %v9252_v23 }
 0x1b0   : > { %v9235_v30 = vld [vmem:[%s14081_s11 + $0x1c0] sm:$0xf]  ;;  %v12270_v31 = vld [vmem:[%s14081_s11 + $0x1cc] sm:$0xf0]  ;;  %7581 = vmatpush.bf16.msra.mxu2 %v9380_v24  ;;  %v9108_v32 = vor.u32 %v12238_v29, %v9107_v27 }
 0x1b1   : > { %v9236_v33 = vor.u32 %v12270_v31, %v9235_v30  ;;  %v9363_v34 = vld [vmem:[%s14081_s11 + $0x2c0] sm:$0xf]  ;;  %v12302_v35 = vld [vmem:[%s14081_s11 + $0x2cc] sm:$0xf0]  ;;  %7594 = vmatpush.bf16.msra.mxu3 %v9508_v28 }
 0x1b2   : > { %v9491_v36 = vld [vmem:[%s14081_s11 + $0x3c0] sm:$0xf]  ;;  %v9364_v37 = vor.u32 %v12302_v35, %v9363_v34  ;;  %v12334_v38 = vld [vmem:[%s14081_s11 + $0x3cc] sm:$0xf0]  ;;  %7556 = vmatpush.bf16.msra.mxu0 %v9108_v32 }
 0x1b3   : > { %v9091_v39 = vld [vmem:[%s14081_s11 + $0xa0] sm:$0xf]  ;;  %v12234_v40 = vld [vmem:[%s14081_s11 + $0xac] sm:$0xf0]  ;;  %v9492_v41 = vor.u32 %v12334_v38, %v9491_v36  ;;  %7569 = vmatpush.bf16.msra.mxu1 %v9236_v33 }
 0x1b4   : > { %v9219_v42 = vld [vmem:[%s14081_s11 + $0x1a0] sm:$0xf]  ;;  %v12266_v43 = vld [vmem:[%s14081_s11 + $0x1ac] sm:$0xf0]  ;;  %v9092_v45 = vor.u32 %v12234_v40, %v9091_v39  ;;  %7582 = vmatpush.bf16.msra.mxu2 %v9364_v37 }
 0x1b5   : > { %v9347_v44 = vld [vmem:[%s14081_s11 + $0x2a0] sm:$0xf]  ;;  %v12298_v46 = vld [vmem:[%s14081_s11 + $0x2ac] sm:$0xf0]  ;;  %v9220_v49 = vor.u32 %v12266_v43, %v9219_v42  ;;  %7595 = vmatpush.bf16.msra.mxu3 %v9492_v41 }
 0x1b6   : > { %v9475_v47 = vld [vmem:[%s14081_s11 + $0x3a0] sm:$0xf]  ;;  %v12330_v48 = vld [vmem:[%s14081_s11 + $0x3ac] sm:$0xf0]  ;;  %v9348_v50 = vor.u32 %v12298_v46, %v9347_v44  ;;  %7557 = vmatpush.bf16.msra.mxu0 %v9092_v45 }
 0x1b7   : > { %v9075_v51 = vld [vmem:[%s14081_s11 + $0x80] sm:$0xf]  ;;  %v12230_v52 = vld [vmem:[%s14081_s11 + $0x8c] sm:$0xf0]  ;;  %v9476_v54 = vor.u32 %v12330_v48, %v9475_v47  ;;  %7570 = vmatpush.bf16.msra.mxu1 %v9220_v49 }
 0x1b8   : > { %v9203_v53 = vld [vmem:[%s14081_s11 + $0x180] sm:$0xf]  ;;  %v12262_v55 = vld [vmem:[%s14081_s11 + $0x18c] sm:$0xf0]  ;;  %v9076_v60 = vor.u32 %v12230_v52, %v9075_v51  ;;  %7583 = vmatpush.bf16.msra.mxu2 %v9348_v50 }
 0x1b9   : > { %v9331_v56 = vld [vmem:[%s14081_s11 + $0x280] sm:$0xf]  ;;  %v12294_v57 = vld [vmem:[%s14081_s11 + $0x28c] sm:$0xf0]  ;;  %v9204_v61 = vor.u32 %v12262_v55, %v9203_v53  ;;  %7596 = vmatpush.bf16.msra.mxu3 %v9476_v54 }
 0x1ba   : > { %v9459_v58 = vld [vmem:[%s14081_s11 + $0x380] sm:$0xf]  ;;  %v12326_v59 = vld [vmem:[%s14081_s11 + $0x38c] sm:$0xf0]  ;;  %v9332_v62 = vor.u32 %v12294_v57, %v9331_v56  ;;  %7558 = vmatpush.bf16.msra.mxu0 %v9076_v60 }
 0x1bb   : > { %v9059_v63 = vld [vmem:[%s14081_s11 + $0x60] sm:$0xf]  ;;  %v12226_v0 = vld [vmem:[%s14081_s11 + $0x6c] sm:$0xf0]  ;;  %v9460_v2 = vor.u32 %v12326_v59, %v9459_v58  ;;  %7571 = vmatpush.bf16.msra.mxu1 %v9204_v61 }
 0x1bc   : > { %v9187_v1 = vld [vmem:[%s14081_s11 + $0x160] sm:$0xf]  ;;  %v12258_v3 = vld [vmem:[%s14081_s11 + $0x16c] sm:$0xf0]  ;;  %v9060_v8 = vor.u32 %v12226_v0, %v9059_v63  ;;  %7584 = vmatpush.bf16.msra.mxu2 %v9332_v62 }
 0x1bd   : > { %v9315_v4 = vld [vmem:[%s14081_s11 + $0x260] sm:$0xf]  ;;  %v12290_v5 = vld [vmem:[%s14081_s11 + $0x26c] sm:$0xf0]  ;;  %v9188_v9 = vor.u32 %v12258_v3, %v9187_v1  ;;  %7597 = vmatpush.bf16.msra.mxu3 %v9460_v2 }
 0x1be   : > { %v9443_v6 = vld [vmem:[%s14081_s11 + $0x360] sm:$0xf]  ;;  %v12322_v7 = vld [vmem:[%s14081_s11 + $0x36c] sm:$0xf0]  ;;  %v9316_v10 = vor.u32 %v12290_v5, %v9315_v4  ;;  %7559 = vmatpush.bf16.msra.mxu0 %v9060_v8 }
 0x1bf   : > { %v9043_v11 = vld [vmem:[%s14081_s11 + $0x40] sm:$0xf]  ;;  %v12222_v12 = vld [vmem:[%s14081_s11 + $0x4c] sm:$0xf0]  ;;  %v9444_v14 = vor.u32 %v12322_v7, %v9443_v6  ;;  %7572 = vmatpush.bf16.msra.mxu1 %v9188_v9 }
 0x1c0   : > { %v9171_v13 = vld [vmem:[%s14081_s11 + $0x140] sm:$0xf]  ;;  %v12254_v15 = vld [vmem:[%s14081_s11 + $0x14c] sm:$0xf0]  ;;  %v9044_v20 = vor.u32 %v12222_v12, %v9043_v11  ;;  %7585 = vmatpush.bf16.msra.mxu2 %v9316_v10 }
 0x1c1   : > { %v9299_v16 = vld [vmem:[%s14081_s11 + $0x240] sm:$0xf]  ;;  %v12286_v17 = vld [vmem:[%s14081_s11 + $0x24c] sm:$0xf0]  ;;  %v9172_v21 = vor.u32 %v12254_v15, %v9171_v13  ;;  %7598 = vmatpush.bf16.msra.mxu3 %v9444_v14 }
 0x1c2   : > { %v9427_v18 = vld [vmem:[%s14081_s11 + $0x340] sm:$0xf]  ;;  %v12318_v19 = vld [vmem:[%s14081_s11 + $0x34c] sm:$0xf0]  ;;  %v9300_v22 = vor.u32 %v12286_v17, %v9299_v16  ;;  %7560 = vmatpush.bf16.msra.mxu0 %v9044_v20 }
 0x1c3   : > { %v9027_v23 = vld [vmem:[%s14081_s11 + $0x20] sm:$0xf]  ;;  %v12218_v24 = vld [vmem:[%s14081_s11 + $0x2c] sm:$0xf0]  ;;  %v9428_v26 = vor.u32 %v12318_v19, %v9427_v18  ;;  %7573 = vmatpush.bf16.msra.mxu1 %v9172_v21  ;;  %v2683_v18 = vld [vmem:[%s15945_s0] sm:$0xff] }
 0x1c4   : > { %v9155_v25 = vld [vmem:[%s14081_s11 + $0x120] sm:$0xf]  ;;  %v12250_v27 = vld [vmem:[%s14081_s11 + $0x12c] sm:$0xf0]  ;;  %v9028_v32 = vor.u32 %v12218_v24, %v9027_v23  ;;  %7586 = vmatpush.bf16.msra.mxu2 %v9300_v22  ;;  %3498 = vst [vmem:[#allocation1] ss:$9 sm:$0xff] %v2683_v18 }
 0x1c5   : > { %v9283_v28 = vld [vmem:[%s14081_s11 + $0x220] sm:$0xf]  ;;  %v12282_v29 = vld [vmem:[%s14081_s11 + $0x22c] sm:$0xf0]  ;;  %v9156_v35 = vor.u32 %v12250_v27, %v9155_v25  ;;  %7599 = vmatpush.bf16.msra.mxu3 %v9428_v26 }
 0x1c6   : > { %v9411_v30 = vld [vmem:[%s14081_s11 + $0x320] sm:$0xf]  ;;  %v12314_v31 = vld [vmem:[%s14081_s11 + $0x32c] sm:$0xf0]  ;;  %v9284_v36 = vor.u32 %v12282_v29, %v9283_v28  ;;  %7561 = vmatpush.bf16.msra.mxu0 %v9028_v32 }
 0x1c7   : > { %v9011_v33 = vld [vmem:[%s14081_s11] sm:$0xf]  ;;  %v12214_v34 = vld [vmem:[%s14081_s11 + $0xc] sm:$0xf0]  ;;  %v9412_v40 = vor.u32 %v12314_v31, %v9411_v30  ;;  %7574 = vmatpush.bf16.msra.mxu1 %v9156_v35 }
 0x1c8   : > { %v9139_v37 = vld [vmem:[%s14081_s11 + $0x100] sm:$0xf]  ;;  %v12246_v38 = vld [vmem:[%s14081_s11 + $0x10c] sm:$0xf0]  ;;  %v9012_v47 = vor.u32 %v12214_v34, %v9011_v33  ;;  %7587 = vmatpush.bf16.msra.mxu2 %v9284_v36 }
 0x1c9   : > { %v9267_v39 = vld [vmem:[%s14081_s11 + $0x200] sm:$0xf]  ;;  %v12278_v41 = vld [vmem:[%s14081_s11 + $0x20c] sm:$0xf0]  ;;  %v9140_v51 = vor.u32 %v12246_v38, %v9139_v37  ;;  %7600 = vmatpush.bf16.msra.mxu3 %v9412_v40 }
 0x1ca   : > { %v9395_v42 = vld [vmem:[%s14081_s11 + $0x300] sm:$0xf]  ;;  %v12310_v43 = vld [vmem:[%s14081_s11 + $0x30c] sm:$0xf0]  ;;  %v9268_v52 = vor.u32 %v12278_v41, %v9267_v39  ;;  %7562 = vmatpush.bf16.msra.mxu0 %v9012_v47 }
 0x1cb   : > { %v9635_v44 = vld [vmem:[%s14081_s11 + $0x4e0] sm:$0xf]  ;;  %v12370_v45 = vld [vmem:[%s14081_s11 + $0x4ec] sm:$0xf0]  ;;  %v9396_v55 = vor.u32 %v12310_v43, %v9395_v42  ;;  %7575 = vmatpush.bf16.msra.mxu1 %v9140_v51  ;;  %v14233_v18 = vld [vmem:[#allocation1 + $0x2d] sm:$0xff] }
 0x1cc   : > { %v9763_v46 = vld [vmem:[%s14081_s11 + $0x5e0] sm:$0xf]  ;;  %v12402_v48 = vld [vmem:[%s14081_s11 + $0x5ec] sm:$0xf0]  ;;  %v9636_v56 = vor.u32 %v12370_v45, %v9635_v44  ;;  %7588 = vmatpush.bf16.msra.mxu2 %v9268_v52  ;;  %v14193_v44 = vld [vmem:[#allocation1] sm:$0xff] }
 0x1cd   : > { %v9891_v49 = vld [vmem:[%s14081_s11 + $0x6e0] sm:$0xf]  ;;  %v12434_v50 = vld [vmem:[%s14081_s11 + $0x6ec] sm:$0xf0]  ;;  %v9764_v57 = vor.u32 %v12402_v48, %v9763_v46  ;;  %7601 = vmatpush.bf16.msra.mxu3 %v9396_v55  ;;  %7563 = vmatmul.bf16.vlgmr.msra.gmra.mxu0 %v14193_v44 }
 0x1ce   : > { %v10019_v53 = vld [vmem:[%s14081_s11 + $0x7e0] sm:$0xf]  ;;  %v12466_v54 = vld [vmem:[%s14081_s11 + $0x7ec] sm:$0xf0]  ;;  %v9892_v58 = vor.u32 %v12434_v50, %v9891_v49  ;;  %7607 = vmatpush.bf16.msrb.mxu0 %v9636_v56 }
 0x1cf   : > { %v9619_v59 = vld [vmem:[%s14081_s11 + $0x4c0] sm:$0xf]  ;;  %v12366_v60 = vld [vmem:[%s14081_s11 + $0x4cc] sm:$0xf0]  ;;  %v10020_v62 = vor.u32 %v12466_v54, %v10019_v53  ;;  %7620 = vmatpush.bf16.msrb.mxu1 %v9764_v57 }
 0x1d0   : > { %v9747_v61 = vld [vmem:[%s14081_s11 + $0x5c0] sm:$0xf]  ;;  %v12398_v63 = vld [vmem:[%s14081_s11 + $0x5cc] sm:$0xf0]  ;;  %v9620_v4 = vor.u32 %v12366_v60, %v9619_v59  ;;  %7633 = vmatpush.bf16.msrb.mxu2 %v9892_v58 }
 0x1d1   : > { %v9875_v0 = vld [vmem:[%s14081_s11 + $0x6c0] sm:$0xf]  ;;  %v12430_v1 = vld [vmem:[%s14081_s11 + $0x6cc] sm:$0xf0]  ;;  %v9748_v5 = vor.u32 %v12398_v63, %v9747_v61  ;;  %7646 = vmatpush.bf16.msrb.mxu3 %v10020_v62 }
 0x1d2   : > { %v10003_v2 = vld [vmem:[%s14081_s11 + $0x7c0] sm:$0xf]  ;;  %v12462_v3 = vld [vmem:[%s14081_s11 + $0x7cc] sm:$0xf0]  ;;  %v9876_v6 = vor.u32 %v12430_v1, %v9875_v0  ;;  %7608 = vmatpush.bf16.msrb.mxu0 %v9620_v4 }
 0x1d3   : > { %v9603_v7 = vld [vmem:[%s14081_s11 + $0x4a0] sm:$0xf]  ;;  %v12362_v8 = vld [vmem:[%s14081_s11 + $0x4ac] sm:$0xf0]  ;;  %v10004_v10 = vor.u32 %v12462_v3, %v10003_v2  ;;  %7621 = vmatpush.bf16.msrb.mxu1 %v9748_v5 }
 0x1d4   : > { %v9731_v9 = vld [vmem:[%s14081_s11 + $0x5a0] sm:$0xf]  ;;  %v12394_v11 = vld [vmem:[%s14081_s11 + $0x5ac] sm:$0xf0]  ;;  %v9604_v16 = vor.u32 %v12362_v8, %v9603_v7  ;;  %7634 = vmatpush.bf16.msrb.mxu2 %v9876_v6 }
 0x1d5   : > { %v9859_v12 = vld [vmem:[%s14081_s11 + $0x6a0] sm:$0xf]  ;;  %v12426_v13 = vld [vmem:[%s14081_s11 + $0x6ac] sm:$0xf0]  ;;  %v9732_v19 = vor.u32 %v12394_v11, %v9731_v9  ;;  %7647 = vmatpush.bf16.msrb.mxu3 %v10004_v10 }
 0x1d6   : > { %v9987_v14 = vld [vmem:[%s14081_s11 + $0x7a0] sm:$0xf]  ;;  %v12458_v15 = vld [vmem:[%s14081_s11 + $0x7ac] sm:$0xf0]  ;;  %v9860_v20 = vor.u32 %v12426_v13, %v9859_v12  ;;  %7609 = vmatpush.bf16.msrb.mxu0 %v9604_v16 }
 0x1d7   : > { %v9587_v17 = vld [vmem:[%s14081_s11 + $0x480] sm:$0xf]  ;;  %v12358_v21 = vld [vmem:[%s14081_s11 + $0x48c] sm:$0xf0]  ;;  %v9988_v23 = vor.u32 %v12458_v15, %v9987_v14  ;;  %7622 = vmatpush.bf16.msrb.mxu1 %v9732_v19 }
 0x1d8   : > { %v9715_v22 = vld [vmem:[%s14081_s11 + $0x580] sm:$0xf]  ;;  %v12390_v24 = vld [vmem:[%s14081_s11 + $0x58c] sm:$0xf0]  ;;  %v9588_v29 = vor.u32 %v12358_v21, %v9587_v17  ;;  %7635 = vmatpush.bf16.msrb.mxu2 %v9860_v20  ;;  %v14231_v17 = vld [vmem:[#allocation1 + $0x3f] sm:$0xff] }
 0x1d9   : > { %v9843_v25 = vld [vmem:[%s14081_s11 + $0x680] sm:$0xf]  ;;  %v12422_v26 = vld [vmem:[%s14081_s11 + $0x68c] sm:$0xf0]  ;;  %v9716_v30 = vor.u32 %v12390_v24, %v9715_v22  ;;  %7648 = vmatpush.bf16.msrb.mxu3 %v9988_v23 }
 0x1da   : > { %v9971_v27 = vld [vmem:[%s14081_s11 + $0x780] sm:$0xf]  ;;  %v12454_v28 = vld [vmem:[%s14081_s11 + $0x78c] sm:$0xf0]  ;;  %v9844_v31 = vor.u32 %v12422_v26, %v9843_v25  ;;  %7610 = vmatpush.bf16.msrb.mxu0 %v9588_v29 }
 0x1db   : > { %v9571_v32 = vld [vmem:[%s14081_s11 + $0x460] sm:$0xf]  ;;  %v12354_v33 = vld [vmem:[%s14081_s11 + $0x46c] sm:$0xf0]  ;;  %v9972_v35 = vor.u32 %v12454_v28, %v9971_v27  ;;  %7623 = vmatpush.bf16.msrb.mxu1 %v9716_v30 }
 0x1dc   : > { %v9699_v34 = vld [vmem:[%s14081_s11 + $0x560] sm:$0xf]  ;;  %v12386_v36 = vld [vmem:[%s14081_s11 + $0x56c] sm:$0xf0]  ;;  %v9572_v42 = vor.u32 %v12354_v33, %v9571_v32  ;;  %7636 = vmatpush.bf16.msrb.mxu2 %v9844_v31 }
 0x1dd   : > { %v9827_v37 = vld [vmem:[%s14081_s11 + $0x660] sm:$0xf]  ;;  %v12418_v38 = vld [vmem:[%s14081_s11 + $0x66c] sm:$0xf0]  ;;  %v9700_v46 = vor.u32 %v12386_v36, %v9699_v34  ;;  %7649 = vmatpush.bf16.msrb.mxu3 %v9972_v35 }
 0x1de   : > { %v9955_v39 = vld [vmem:[%s14081_s11 + $0x760] sm:$0xf]  ;;  %v12450_v40 = vld [vmem:[%s14081_s11 + $0x76c] sm:$0xf0]  ;;  %v9828_v47 = vor.u32 %v12418_v38, %v9827_v37  ;;  %7611 = vmatpush.bf16.msrb.mxu0 %v9572_v42 }
 0x1df   : > { %v9555_v41 = vld [vmem:[%s14081_s11 + $0x440] sm:$0xf]  ;;  %v14191_v43 = vld [vmem:[#allocation1 + $0x12] sm:$0xff]  ;;  %v14195_v45 = vld [vmem:[#allocation1 + $0x1b] sm:$0xff]  ;;  %v9956_v51 = vor.u32 %v12450_v40, %v9955_v39  ;;  %7624 = vmatpush.bf16.msrb.mxu1 %v9700_v46 }
 0x1e0   : > { %v12350_v48 = vld [vmem:[%s14081_s11 + $0x44c] sm:$0xf0]  ;;  %v9683_v49 = vld [vmem:[%s14081_s11 + $0x540] sm:$0xf]  ;;  %7589 = vmatmul.bf16.vlgmr.msra.gmra.mxu2 %v14191_v43  ;;  %7602 = vmatmul.bf16.vlgmr.msra.gmra.mxu3 %v14195_v45 }
 0x1e1   : > { %v14199_v50 = vld [vmem:[#allocation1 + $0x9] sm:$0xff]  ;;  %v12382_v52 = vld [vmem:[%s14081_s11 + $0x54c] sm:$0xf0]  ;;  %v9556_v57 = vor.u32 %v12350_v48, %v9555_v41  ;;  %7637 = vmatpush.bf16.msrb.mxu2 %v9828_v47  ;;  %7650 = vmatpush.bf16.msrb.mxu3 %v9956_v51 }
 0x1e2   : > { %v9811_v53 = vld [vmem:[%s14081_s11 + $0x640] sm:$0xf]  ;;  %v12414_v54 = vld [vmem:[%s14081_s11 + $0x64c] sm:$0xf0]  ;;  %7576 = vmatmul.bf16.vlgmr.msra.gmra.mxu1 %v14199_v50  ;;  %v9684_v59 = vor.u32 %v12382_v52, %v9683_v49 }
 0x1e3   : > { %v9939_v55 = vld [vmem:[%s14081_s11 + $0x740] sm:$0xf]  ;;  %v12446_v56 = vld [vmem:[%s14081_s11 + $0x74c] sm:$0xf0]  ;;  %v9812_v60 = vor.u32 %v12414_v54, %v9811_v53  ;;  %7612 = vmatpush.bf16.msrb.mxu0 %v9556_v57 }
 0x1e4   : > { %v9539_v58 = vld [vmem:[%s14081_s11 + $0x420] sm:$0xf]  ;;  %v12346_v61 = vld [vmem:[%s14081_s11 + $0x42c] sm:$0xf0]  ;;  %v9940_v0 = vor.u32 %v12446_v56, %v9939_v55  ;;  %7625 = vmatpush.bf16.msrb.mxu1 %v9684_v59 }
 0x1e5   : > { %v9667_v62 = vld [vmem:[%s14081_s11 + $0x520] sm:$0xf]  ;;  %v12378_v63 = vld [vmem:[%s14081_s11 + $0x52c] sm:$0xf0]  ;;  %v9540_v7 = vor.u32 %v12346_v61, %v9539_v58  ;;  %7638 = vmatpush.bf16.msrb.mxu2 %v9812_v60 }
 0x1e6   : > { %v9795_v1 = vld [vmem:[%s14081_s11 + $0x620] sm:$0xf]  ;;  %v12410_v2 = vld [vmem:[%s14081_s11 + $0x62c] sm:$0xf0]  ;;  %v9668_v14 = vor.u32 %v12378_v63, %v9667_v62  ;;  %7651 = vmatpush.bf16.msrb.mxu3 %v9940_v0 }
 0x1e7   : > { %v9923_v3 = vld [vmem:[%s14081_s11 + $0x720] sm:$0xf]  ;;  %v12442_v4 = vld [vmem:[%s14081_s11 + $0x72c] sm:$0xf0]  ;;  %v9796_v15 = vor.u32 %v12410_v2, %v9795_v1  ;;  %7613 = vmatpush.bf16.msrb.mxu0 %v9540_v7 }
 0x1e8   : > { %v9523_v5 = vld [vmem:[%s14081_s11 + $0x400] sm:$0xf]  ;;  %v12342_v6 = vld [vmem:[%s14081_s11 + $0x40c] sm:$0xf0]  ;;  %v9924_v19 = vor.u32 %v12442_v4, %v9923_v3  ;;  %7626 = vmatpush.bf16.msrb.mxu1 %v9668_v14 }
 0x1e9   : > { %v9651_v8 = vld [vmem:[%s14081_s11 + $0x500] sm:$0xf]  ;;  %v12374_v9 = vld [vmem:[%s14081_s11 + $0x50c] sm:$0xf0]  ;;  %v9524_v25 = vor.u32 %v12342_v6, %v9523_v5  ;;  %7639 = vmatpush.bf16.msrb.mxu2 %v9796_v15 }
 0x1ea   : > { %v9779_v10 = vld [vmem:[%s14081_s11 + $0x600] sm:$0xf]  ;;  %v12406_v11 = vld [vmem:[%s14081_s11 + $0x60c] sm:$0xf0]  ;;  %v9652_v29 = vor.u32 %v12374_v9, %v9651_v8  ;;  %7652 = vmatpush.bf16.msrb.mxu3 %v9924_v19 }
 0x1eb   : > { %v14224_v12 = vld [vmem:[#allocation1 + $0x36] sm:$0xff]  ;;  %v2684_v13 = vld [vmem:[%s15945_s0 + $0x8] sm:$0xff]  ;;  %v9780_v30 = vor.u32 %v12406_v11, %v9779_v10  ;;  %7614 = vmatpush.bf16.msrb.mxu0 %v9524_v25 }
 0x1ec   : > { %v14229_v16 = vld [vmem:[#allocation1 + $0x24] sm:$0xff]  ;;  %v12438_v21 = vld [vmem:[%s14081_s11 + $0x70c] sm:$0xf0]  ;;  %7627 = vmatpush.bf16.msrb.mxu1 %v9652_v29 }
 0x1ed   : > { %v9907_v20 = vld [vmem:[%s14081_s11 + $0x700] sm:$0xf]  ;;  %3508 = vst [vmem:[#allocation1] ss:$9 sm:$0xff] %v2684_v13  ;;  %v12498_v23 = vld [vmem:[%s14081_s11 + $0x8ec] sm:$0xf0]  ;;  %7640 = vmatpush.bf16.msrb.mxu2 %v9780_v30 }
 0x1ee   : > { %v10147_v22 = vld [vmem:[%s14081_s11 + $0x8e0] sm:$0xf]  ;;  %v12530_v26 = vld [vmem:[%s14081_s11 + $0x9ec] sm:$0xf0]  ;;  %v9908_v33 = vor.u32 %v12438_v21, %v9907_v20  ;;  %7615 = vmatmul.bf16.vlgmr.msrb.gmra.mxu0 %v14229_v16 }
 0x1ef   : > { %v10275_v24 = vld [vmem:[%s14081_s11 + $0x9e0] sm:$0xf]  ;;  %v12562_v28 = vld [vmem:[%s14081_s11 + $0xaec] sm:$0xf0]  ;;  %v10148_v34 = vor.u32 %v12498_v23, %v10147_v22 }
 0x1f0   : > { %v10403_v27 = vld [vmem:[%s14081_s11 + $0xae0] sm:$0xf]  ;;  %v12594_v32 = vld [vmem:[%s14081_s11 + $0xbec] sm:$0xf0]  ;;  %v10276_v35 = vor.u32 %v12530_v26, %v10275_v24  ;;  %7653 = vmatpush.bf16.msrb.mxu3 %v9908_v33  ;;  %7641 = vmatmul.bf16.vlgmr.msrb.gmra.mxu2 %v14224_v12 }
 0x1f1   : > { %v10531_v31 = vld [vmem:[%s14081_s11 + $0xbe0] sm:$0xf]  ;;  %v10404_v36 = vor.u32 %v12562_v28, %v10403_v27  ;;  %v12494_v38 = vld [vmem:[%s14081_s11 + $0x8cc] sm:$0xf0]  ;;  %7659 = vmatpush.bf16.msra.mxu0 %v10148_v34 }
 0x1f2   : > { %v10131_v37 = vld [vmem:[%s14081_s11 + $0x8c0] sm:$0xf]  ;;  %v10532_v40 = vor.u32 %v12594_v32, %v10531_v31  ;;  %v12526_v41 = vld [vmem:[%s14081_s11 + $0x9cc] sm:$0xf0]  ;;  %7672 = vmatpush.bf16.msra.mxu1 %v10276_v35 }
 0x1f3   : > { %v10259_v39 = vld [vmem:[%s14081_s11 + $0x9c0] sm:$0xf]  ;;  %v12558_v46 = vld [vmem:[%s14081_s11 + $0xacc] sm:$0xf0]  ;;  %v10132_v49 = vor.u32 %v12494_v38, %v10131_v37  ;;  %7685 = vmatpush.bf16.msra.mxu2 %v10404_v36  ;;  %7654 = vmatmul.bf16.vlgmr.msrb.gmra.mxu3 %v14231_v17 }
 0x1f4   : > { %v10387_v42 = vld [vmem:[%s14081_s11 + $0xac0] sm:$0xf]  ;;  %v12590_v48 = vld [vmem:[%s14081_s11 + $0xbcc] sm:$0xf0]  ;;  %v10260_v51 = vor.u32 %v12526_v41, %v10259_v39  ;;  %7698 = vmatpush.bf16.msra.mxu3 %v10532_v40  ;;  %7628 = vmatmul.bf16.vlgmr.msrb.gmra.mxu1 %v14233_v18 }
 0x1f5   : > { %v10515_v47 = vld [vmem:[%s14081_s11 + $0xbc0] sm:$0xf]  ;;  %v10388_v52 = vor.u32 %v12558_v46, %v10387_v42  ;;  %v12490_v54 = vld [vmem:[%s14081_s11 + $0x8ac] sm:$0xf0]  ;;  %7660 = vmatpush.bf16.msra.mxu0 %v10132_v49 }
 0x1f6   : > { %v10115_v53 = vld [vmem:[%s14081_s11 + $0x8a0] sm:$0xf]  ;;  %v10516_v56 = vor.u32 %v12590_v48, %v10515_v47  ;;  %v12522_v57 = vld [vmem:[%s14081_s11 + $0x9ac] sm:$0xf0]  ;;  %7673 = vmatpush.bf16.msra.mxu1 %v10260_v51 }
 0x1f7   : > { %v10243_v55 = vld [vmem:[%s14081_s11 + $0x9a0] sm:$0xf]  ;;  %v12554_v59 = vld [vmem:[%s14081_s11 + $0xaac] sm:$0xf0]  ;;  %v10116_v62 = vor.u32 %v12490_v54, %v10115_v53  ;;  %7686 = vmatpush.bf16.msra.mxu2 %v10388_v52 }
 0x1f8   : > { %v10371_v58 = vld [vmem:[%s14081_s11 + $0xaa0] sm:$0xf]  ;;  %v12586_v61 = vld [vmem:[%s14081_s11 + $0xbac] sm:$0xf0]  ;;  %v10244_v63 = vor.u32 %v12522_v57, %v10243_v55  ;;  %7699 = vmatpush.bf16.msra.mxu3 %v10516_v56 }
 0x1f9   : > { %v10499_v60 = vld [vmem:[%s14081_s11 + $0xba0] sm:$0xf]  ;;  %v10372_v0 = vor.u32 %v12554_v59, %v10371_v58  ;;  %v12486_v2 = vld [vmem:[%s14081_s11 + $0x88c] sm:$0xf0]  ;;  %7661 = vmatpush.bf16.msra.mxu0 %v10116_v62 }
 0x1fa   : > { %v10099_v1 = vld [vmem:[%s14081_s11 + $0x880] sm:$0xf]  ;;  %v10500_v4 = vor.u32 %v12586_v61, %v10499_v60  ;;  %v12518_v5 = vld [vmem:[%s14081_s11 + $0x98c] sm:$0xf0]  ;;  %7674 = vmatpush.bf16.msra.mxu1 %v10244_v63 }
 0x1fb   : > { %v10227_v3 = vld [vmem:[%s14081_s11 + $0x980] sm:$0xf]  ;;  %v12550_v7 = vld [vmem:[%s14081_s11 + $0xa8c] sm:$0xf0]  ;;  %v10100_v10 = vor.u32 %v12486_v2, %v10099_v1  ;;  %7687 = vmatpush.bf16.msra.mxu2 %v10372_v0 }
 0x1fc   : > { %v10355_v6 = vld [vmem:[%s14081_s11 + $0xa80] sm:$0xf]  ;;  %v12582_v9 = vld [vmem:[%s14081_s11 + $0xb8c] sm:$0xf0]  ;;  %v10228_v11 = vor.u32 %v12518_v5, %v10227_v3  ;;  %7700 = vmatpush.bf16.msra.mxu3 %v10500_v4 }
 0x1fd   : > { %v10483_v8 = vld [vmem:[%s14081_s11 + $0xb80] sm:$0xf]  ;;  %v10356_v13 = vor.u32 %v12550_v7, %v10355_v6  ;;  %v12482_v15 = vld [vmem:[%s14081_s11 + $0x86c] sm:$0xf0]  ;;  %7662 = vmatpush.bf16.msra.mxu0 %v10100_v10 }
 0x1fe   : > { %v10083_v14 = vld [vmem:[%s14081_s11 + $0x860] sm:$0xf]  ;;  %v10484_v20 = vor.u32 %v12582_v9, %v10483_v8  ;;  %v12514_v21 = vld [vmem:[%s14081_s11 + $0x96c] sm:$0xf0]  ;;  %7675 = vmatpush.bf16.msra.mxu1 %v10228_v11 }
 0x1ff   : > { %v10211_v19 = vld [vmem:[%s14081_s11 + $0x960] sm:$0xf]  ;;  %v12546_v23 = vld [vmem:[%s14081_s11 + $0xa6c] sm:$0xf0]  ;;  %v10084_v26 = vor.u32 %v12482_v15, %v10083_v14  ;;  %7688 = vmatpush.bf16.msra.mxu2 %v10356_v13 }
 0x200   : > { %v10339_v22 = vld [vmem:[%s14081_s11 + $0xa60] sm:$0xf]  ;;  %v12578_v25 = vld [vmem:[%s14081_s11 + $0xb6c] sm:$0xf0]  ;;  %v10212_v27 = vor.u32 %v12514_v21, %v10211_v19  ;;  %7701 = vmatpush.bf16.msra.mxu3 %v10484_v20 }
 0x201   : > { %v10467_v24 = vld [vmem:[%s14081_s11 + $0xb60] sm:$0xf]  ;;  %v10340_v28 = vor.u32 %v12546_v23, %v10339_v22  ;;  %v12478_v30 = vld [vmem:[%s14081_s11 + $0x84c] sm:$0xf0]  ;;  %7663 = vmatpush.bf16.msra.mxu0 %v10084_v26 }
 0x202   : > { %v10067_v29 = vld [vmem:[%s14081_s11 + $0x840] sm:$0xf]  ;;  %v10468_v32 = vor.u32 %v12578_v25, %v10467_v24  ;;  %v12510_v33 = vld [vmem:[%s14081_s11 + $0x94c] sm:$0xf0]  ;;  %7676 = vmatpush.bf16.msra.mxu1 %v10212_v27 }
 0x203   : > { %v10195_v31 = vld [vmem:[%s14081_s11 + $0x940] sm:$0xf]  ;;  %v12542_v35 = vld [vmem:[%s14081_s11 + $0xa4c] sm:$0xf0]  ;;  %v10068_v38 = vor.u32 %v12478_v30, %v10067_v29  ;;  %7689 = vmatpush.bf16.msra.mxu2 %v10340_v28  ;;  %v14319_v28 = vld [vmem:[#allocation1] sm:$0xff] }
 0x204   : > { %v10323_v34 = vld [vmem:[%s14081_s11 + $0xa40] sm:$0xf]  ;;  %v12574_v37 = vld [vmem:[%s14081_s11 + $0xb4c] sm:$0xf0]  ;;  %v10196_v39 = vor.u32 %v12510_v33, %v10195_v31  ;;  %7702 = vmatpush.bf16.msra.mxu3 %v10468_v32 }
 0x205   : > { %v10451_v36 = vld [vmem:[%s14081_s11 + $0xb40] sm:$0xf]  ;;  %v10324_v40 = vor.u32 %v12542_v35, %v10323_v34  ;;  %v12474_v42 = vld [vmem:[%s14081_s11 + $0x82c] sm:$0xf0]  ;;  %7664 = vmatpush.bf16.msra.mxu0 %v10068_v38 }
 0x206   : > { %v10051_v41 = vld [vmem:[%s14081_s11 + $0x820] sm:$0xf]  ;;  %v10452_v47 = vor.u32 %v12574_v37, %v10451_v36  ;;  %v12506_v48 = vld [vmem:[%s14081_s11 + $0x92c] sm:$0xf0]  ;;  %7677 = vmatpush.bf16.msra.mxu1 %v10196_v39 }
 0x207   : > { %v10179_v46 = vld [vmem:[%s14081_s11 + $0x920] sm:$0xf]  ;;  %v12538_v51 = vld [vmem:[%s14081_s11 + $0xa2c] sm:$0xf0]  ;;  %v10052_v54 = vor.u32 %v12474_v42, %v10051_v41  ;;  %7690 = vmatpush.bf16.msra.mxu2 %v10324_v40 }
 0x208   : > { %v10307_v49 = vld [vmem:[%s14081_s11 + $0xa20] sm:$0xf]  ;;  %v12570_v53 = vld [vmem:[%s14081_s11 + $0xb2c] sm:$0xf0]  ;;  %v10180_v57 = vor.u32 %v12506_v48, %v10179_v46  ;;  %7703 = vmatpush.bf16.msra.mxu3 %v10452_v47 }
 0x209   : > { %v10435_v52 = vld [vmem:[%s14081_s11 + $0xb20] sm:$0xf]  ;;  %v12470_v56 = vld [vmem:[%s14081_s11 + $0x80c] sm:$0xf0]  ;;  %v10308_v58 = vor.u32 %v12538_v51, %v10307_v49  ;;  %7665 = vmatpush.bf16.msra.mxu0 %v10052_v54 }
 0x20a   : > { %v10035_v55 = vld [vmem:[%s14081_s11 + $0x800] sm:$0xf]  ;;  %v12502_v60 = vld [vmem:[%s14081_s11 + $0x90c] sm:$0xf0]  ;;  %v10436_v62 = vor.u32 %v12570_v53, %v10435_v52  ;;  %7678 = vmatpush.bf16.msra.mxu1 %v10180_v57 }
 0x20b   : > { %v10163_v59 = vld [vmem:[%s14081_s11 + $0x900] sm:$0xf]  ;;  %v12534_v63 = vld [vmem:[%s14081_s11 + $0xa0c] sm:$0xf0]  ;;  %v10036_v5 = vor.u32 %v12470_v56, %v10035_v55  ;;  %7691 = vmatpush.bf16.msra.mxu2 %v10308_v58 }
 0x20c   : > { %v10291_v61 = vld [vmem:[%s14081_s11 + $0xa00] sm:$0xf]  ;;  %v12566_v1 = vld [vmem:[%s14081_s11 + $0xb0c] sm:$0xf0]  ;;  %v10164_v9 = vor.u32 %v12502_v60, %v10163_v59  ;;  %7704 = vmatpush.bf16.msra.mxu3 %v10436_v62 }
 0x20d   : > { %v10419_v0 = vld [vmem:[%s14081_s11 + $0xb00] sm:$0xf]  ;;  %v12626_v3 = vld [vmem:[%s14081_s11 + $0xcec] sm:$0xf0]  ;;  %v10292_v10 = vor.u32 %v12534_v63, %v10291_v61  ;;  %7666 = vmatpush.bf16.msra.mxu0 %v10036_v5 }
 0x20e   : > { %v10659_v2 = vld [vmem:[%s14081_s11 + $0xce0] sm:$0xf]  ;;  %v12658_v6 = vld [vmem:[%s14081_s11 + $0xdec] sm:$0xf0]  ;;  %v10420_v14 = vor.u32 %v12566_v1, %v10419_v0  ;;  %7679 = vmatpush.bf16.msra.mxu1 %v10164_v9 }
 0x20f   : > { %v10787_v4 = vld [vmem:[%s14081_s11 + $0xde0] sm:$0xf]  ;;  %v12690_v8 = vld [vmem:[%s14081_s11 + $0xeec] sm:$0xf0]  ;;  %v10660_v15 = vor.u32 %v12626_v3, %v10659_v2  ;;  %7692 = vmatpush.bf16.msra.mxu2 %v10292_v10 }
 0x210   : > { %v10915_v7 = vld [vmem:[%s14081_s11 + $0xee0] sm:$0xf]  ;;  %v12722_v13 = vld [vmem:[%s14081_s11 + $0xfec] sm:$0xf0]  ;;  %v10788_v19 = vor.u32 %v12658_v6, %v10787_v4  ;;  %7705 = vmatpush.bf16.msra.mxu3 %v10420_v14  ;;  %7667 = vmatmul.bf16.vlgmr.msra.gmra.mxu0 %v14319_v28 }
 0x211   : > { %v11043_v11 = vld [vmem:[%s14081_s11 + $0xfe0] sm:$0xf]  ;;  %v10916_v20 = vor.u32 %v12690_v8, %v10915_v7  ;;  %v12622_v22 = vld [vmem:[%s14081_s11 + $0xccc] sm:$0xf0]  ;;  %7711 = vmatpush.bf16.msrb.mxu0 %v10660_v15 }
 0x212   : > { %v10643_v21 = vld [vmem:[%s14081_s11 + $0xcc0] sm:$0xf]  ;;  %v11044_v24 = vor.u32 %v12722_v13, %v11043_v11  ;;  %v12654_v25 = vld [vmem:[%s14081_s11 + $0xdcc] sm:$0xf0]  ;;  %7724 = vmatpush.bf16.msrb.mxu1 %v10788_v19 }
 0x213   : > { %v10771_v23 = vld [vmem:[%s14081_s11 + $0xdc0] sm:$0xf]  ;;  %v12686_v27 = vld [vmem:[%s14081_s11 + $0xecc] sm:$0xf0]  ;;  %v10644_v34 = vor.u32 %v12622_v22, %v10643_v21  ;;  %7737 = vmatpush.bf16.msrb.mxu2 %v10916_v20 }
 0x214   : > { %v10899_v26 = vld [vmem:[%s14081_s11 + $0xec0] sm:$0xf]  ;;  %v12718_v30 = vld [vmem:[%s14081_s11 + $0xfcc] sm:$0xf0]  ;;  %v10772_v35 = vor.u32 %v12654_v25, %v10771_v23  ;;  %7750 = vmatpush.bf16.msrb.mxu3 %v11044_v24 }
 0x215   : > { %v11027_v29 = vld [vmem:[%s14081_s11 + $0xfc0] sm:$0xf]  ;;  %v14323_v31 = vld [vmem:[#allocation1 + $0x12] sm:$0xff]  ;;  %v14327_v33 = vld [vmem:[#allocation1 + $0x1b] sm:$0xff]  ;;  %v10900_v36 = vor.u32 %v12686_v27, %v10899_v26  ;;  %7712 = vmatpush.bf16.msrb.mxu0 %v10644_v34 }
 0x216   : > { %v14325_v32 = vld [vmem:[#allocation1 + $0x9] sm:$0xff]  ;;  %v12618_v38 = vld [vmem:[%s14081_s11 + $0xcac] sm:$0xf0]  ;;  %v11028_v40 = vor.u32 %v12718_v30, %v11027_v29  ;;  %7693 = vmatmul.bf16.vlgmr.msra.gmra.mxu2 %v14323_v31  ;;  %7706 = vmatmul.bf16.vlgmr.msra.gmra.mxu3 %v14327_v33 }
 0x217   : > { %v10627_v37 = vld [vmem:[%s14081_s11 + $0xca0] sm:$0xf]  ;;  %v12650_v41 = vld [vmem:[%s14081_s11 + $0xdac] sm:$0xf0]  ;;  %7680 = vmatmul.bf16.vlgmr.msra.gmra.mxu1 %v14325_v32  ;;  %7738 = vmatpush.bf16.msrb.mxu2 %v10900_v36 }
 0x218   : > { %v10755_v39 = vld [vmem:[%s14081_s11 + $0xda0] sm:$0xf]  ;;  %v12682_v46 = vld [vmem:[%s14081_s11 + $0xeac] sm:$0xf0]  ;;  %v10628_v49 = vor.u32 %v12618_v38, %v10627_v37  ;;  %7725 = vmatpush.bf16.msrb.mxu1 %v10772_v35  ;;  %7751 = vmatpush.bf16.msrb.mxu3 %v11028_v40 }
 0x219   : > { %v10883_v42 = vld [vmem:[%s14081_s11 + $0xea0] sm:$0xf]  ;;  %v12714_v48 = vld [vmem:[%s14081_s11 + $0xfac] sm:$0xf0]  ;;  %v10756_v51 = vor.u32 %v12650_v41, %v10755_v39 }
 0x21a   : > { %v11011_v47 = vld [vmem:[%s14081_s11 + $0xfa0] sm:$0xf]  ;;  %v10884_v52 = vor.u32 %v12682_v46, %v10883_v42  ;;  %v12614_v54 = vld [vmem:[%s14081_s11 + $0xc8c] sm:$0xf0]  ;;  %7713 = vmatpush.bf16.msrb.mxu0 %v10628_v49 }
 0x21b   : > { %v10611_v53 = vld [vmem:[%s14081_s11 + $0xc80] sm:$0xf]  ;;  %v11012_v56 = vor.u32 %v12714_v48, %v11011_v47  ;;  %v12646_v57 = vld [vmem:[%s14081_s11 + $0xd8c] sm:$0xf0] }
 0x21c   : > { %v10739_v55 = vld [vmem:[%s14081_s11 + $0xd80] sm:$0xf]  ;;  %v12678_v59 = vld [vmem:[%s14081_s11 + $0xe8c] sm:$0xf0]  ;;  %v10612_v62 = vor.u32 %v12614_v54, %v10611_v53  ;;  %7726 = vmatpush.bf16.msrb.mxu1 %v10756_v51  ;;  %7739 = vmatpush.bf16.msrb.mxu2 %v10884_v52 }
 0x21d   : > { %v10867_v58 = vld [vmem:[%s14081_s11 + $0xe80] sm:$0xf]  ;;  %v12710_v61 = vld [vmem:[%s14081_s11 + $0xf8c] sm:$0xf0]  ;;  %v10740_v63 = vor.u32 %v12646_v57, %v10739_v55  ;;  %7752 = vmatpush.bf16.msrb.mxu3 %v11012_v56 }
 0x21e   : > { %v10995_v60 = vld [vmem:[%s14081_s11 + $0xf80] sm:$0xf]  ;;  %v10868_v0 = vor.u32 %v12678_v59, %v10867_v58  ;;  %v12610_v2 = vld [vmem:[%s14081_s11 + $0xc6c] sm:$0xf0]  ;;  %7714 = vmatpush.bf16.msrb.mxu0 %v10612_v62 }
 0x21f   : > { %v10595_v1 = vld [vmem:[%s14081_s11 + $0xc60] sm:$0xf]  ;;  %v10996_v4 = vor.u32 %v12710_v61, %v10995_v60  ;;  %v12642_v5 = vld [vmem:[%s14081_s11 + $0xd6c] sm:$0xf0] }
 0x220   : > { %v10723_v3 = vld [vmem:[%s14081_s11 + $0xd60] sm:$0xf]  ;;  %v12674_v7 = vld [vmem:[%s14081_s11 + $0xe6c] sm:$0xf0]  ;;  %v10596_v10 = vor.u32 %v12610_v2, %v10595_v1  ;;  %7727 = vmatpush.bf16.msrb.mxu1 %v10740_v63  ;;  %7740 = vmatpush.bf16.msrb.mxu2 %v10868_v0  ;;  %v14389_v0 = vld [vmem:[#allocation1 + $0x2d] sm:$0xff] }
 0x221   : > { %v10851_v6 = vld [vmem:[%s14081_s11 + $0xe60] sm:$0xf]  ;;  %v12706_v9 = vld [vmem:[%s14081_s11 + $0xf6c] sm:$0xf0]  ;;  %v10724_v11 = vor.u32 %v12642_v5, %v10723_v3  ;;  %7753 = vmatpush.bf16.msrb.mxu3 %v10996_v4  ;;  %v14391_v1 = vld [vmem:[#allocation1 + $0x3f] sm:$0xff] }
 0x222   : > { %v10979_v8 = vld [vmem:[%s14081_s11 + $0xf60] sm:$0xf]  ;;  %v10852_v13 = vor.u32 %v12674_v7, %v10851_v6  ;;  %v12606_v15 = vld [vmem:[%s14081_s11 + $0xc4c] sm:$0xf0]  ;;  %7715 = vmatpush.bf16.msrb.mxu0 %v10596_v10  ;;  %v2685_v2 = vld [vmem:[%s15945_s0 + $0x10] sm:$0xff] }
 0x223   : > { %v10579_v14 = vld [vmem:[%s14081_s11 + $0xc40] sm:$0xf]  ;;  %v10980_v20 = vor.u32 %v12706_v9, %v10979_v8  ;;  %v12638_v21 = vld [vmem:[%s14081_s11 + $0xd4c] sm:$0xf0] }
 0x224   : > { %v10707_v19 = vld [vmem:[%s14081_s11 + $0xd40] sm:$0xf]  ;;  %v12670_v23 = vld [vmem:[%s14081_s11 + $0xe4c] sm:$0xf0]  ;;  %v10580_v26 = vor.u32 %v12606_v15, %v10579_v14  ;;  %7728 = vmatpush.bf16.msrb.mxu1 %v10724_v11  ;;  %7741 = vmatpush.bf16.msrb.mxu2 %v10852_v13 }
 0x225   : > { %v10835_v22 = vld [vmem:[%s14081_s11 + $0xe40] sm:$0xf]  ;;  %v12702_v25 = vld [vmem:[%s14081_s11 + $0xf4c] sm:$0xf0]  ;;  %v10708_v29 = vor.u32 %v12638_v21, %v10707_v19  ;;  %7754 = vmatpush.bf16.msrb.mxu3 %v10980_v20 }
 0x226   : > { %v10963_v24 = vld [vmem:[%s14081_s11 + $0xf40] sm:$0xf]  ;;  %v10836_v30 = vor.u32 %v12670_v23, %v10835_v22  ;;  %v12602_v34 = vld [vmem:[%s14081_s11 + $0xc2c] sm:$0xf0]  ;;  %7716 = vmatpush.bf16.msrb.mxu0 %v10580_v26 }
 0x227   : > { %v10563_v27 = vld [vmem:[%s14081_s11 + $0xc20] sm:$0xf]  ;;  %v12634_v36 = vld [vmem:[%s14081_s11 + $0xd2c] sm:$0xf0]  ;;  %v10964_v37 = vor.u32 %v12702_v25, %v10963_v24 }
 0x228   : > { %v10691_v35 = vld [vmem:[%s14081_s11 + $0xd20] sm:$0xf]  ;;  %v12666_v39 = vld [vmem:[%s14081_s11 + $0xe2c] sm:$0xf0]  ;;  %v10564_v47 = vor.u32 %v12602_v34, %v10563_v27  ;;  %7729 = vmatpush.bf16.msrb.mxu1 %v10708_v29  ;;  %7742 = vmatpush.bf16.msrb.mxu2 %v10836_v30 }
 0x229   : > { %v10819_v38 = vld [vmem:[%s14081_s11 + $0xe20] sm:$0xf]  ;;  %v12698_v41 = vld [vmem:[%s14081_s11 + $0xf2c] sm:$0xf0]  ;;  %v10692_v53 = vor.u32 %v12634_v36, %v10691_v35  ;;  %7755 = vmatpush.bf16.msrb.mxu3 %v10964_v37 }
 0x22a   : > { %v10947_v40 = vld [vmem:[%s14081_s11 + $0xf20] sm:$0xf]  ;;  %v12598_v46 = vld [vmem:[%s14081_s11 + $0xc0c] sm:$0xf0]  ;;  %v10820_v54 = vor.u32 %v12666_v39, %v10819_v38  ;;  %7717 = vmatpush.bf16.msrb.mxu0 %v10564_v47 }
 0x22b   : > { %v10547_v42 = vld [vmem:[%s14081_s11 + $0xc00] sm:$0xf]  ;;  %v12630_v49 = vld [vmem:[%s14081_s11 + $0xd0c] sm:$0xf0]  ;;  %v10948_v59 = vor.u32 %v12698_v41, %v10947_v40 }
 0x22c   : > { %v10675_v48 = vld [vmem:[%s14081_s11 + $0xd00] sm:$0xf]  ;;  %v12662_v52 = vld [vmem:[%s14081_s11 + $0xe0c] sm:$0xf0]  ;;  %v10548_v3 = vor.u32 %v12598_v46, %v10547_v42  ;;  %7730 = vmatpush.bf16.msrb.mxu1 %v10692_v53  ;;  %7743 = vmatpush.bf16.msrb.mxu2 %v10820_v54 }
 0x22d   : > { %v10803_v51 = vld [vmem:[%s14081_s11 + $0xe00] sm:$0xf]  ;;  %v12694_v56 = vld [vmem:[%s14081_s11 + $0xf0c] sm:$0xf0]  ;;  %v10676_v6 = vor.u32 %v12630_v49, %v10675_v48  ;;  %7756 = vmatpush.bf16.msrb.mxu3 %v10948_v59 }
 0x22e   : > { %v10931_v55 = vld [vmem:[%s14081_s11 + $0xf00] sm:$0xf]  ;;  %v12754_v58 = vld [vmem:[%s14081_s11 + $0x10ec] sm:$0xf0]  ;;  %v10804_v7 = vor.u32 %v12662_v52, %v10803_v51  ;;  %7718 = vmatpush.bf16.msrb.mxu0 %v10548_v3 }
 0x22f   : > { %v11171_v57 = vld [vmem:[%s14081_s11 + $0x10e0] sm:$0xf]  ;;  %v12786_v61 = vld [vmem:[%s14081_s11 + $0x11ec] sm:$0xf0]  ;;  %v10932_v10 = vor.u32 %v12694_v56, %v10931_v55 }
 0x230   : > { %v11299_v60 = vld [vmem:[%s14081_s11 + $0x11e0] sm:$0xf]  ;;  %v14387_v63 = vld [vmem:[#allocation1 + $0x36] sm:$0xff]  ;;  %v11172_v11 = vor.u32 %v12754_v58, %v11171_v57  ;;  %7731 = vmatpush.bf16.msrb.mxu1 %v10676_v6  ;;  %7744 = vmatpush.bf16.msrb.mxu2 %v10804_v7 }
 0x231   : > { %v14385_v62 = vld [vmem:[#allocation1 + $0x24] sm:$0xff]  ;;  %v12818_v5 = vld [vmem:[%s14081_s11 + $0x12ec] sm:$0xf0]  ;;  %v11300_v13 = vor.u32 %v12786_v61, %v11299_v60  ;;  %7757 = vmatpush.bf16.msrb.mxu3 %v10932_v10 }
 0x232   : > { %v11427_v4 = vld [vmem:[%s14081_s11 + $0x12e0] sm:$0xf]  ;;  %3518 = vst [vmem:[#allocation1] ss:$9 sm:$0xff] %v2685_v2  ;;  %v12850_v9 = vld [vmem:[%s14081_s11 + $0x13ec] sm:$0xf0]  ;;  %7763 = vmatpush.bf16.msra.mxu0 %v11172_v11 }
 0x233   : > { %v11555_v8 = vld [vmem:[%s14081_s11 + $0x13e0] sm:$0xf]  ;;  %v11428_v14 = vor.u32 %v12818_v5, %v11427_v4  ;;  %v12750_v19 = vld [vmem:[%s14081_s11 + $0x10cc] sm:$0xf0]  ;;  %7719 = vmatmul.bf16.vlgmr.msrb.gmra.mxu0 %v14385_v62  ;;  %7745 = vmatmul.bf16.vlgmr.msrb.gmra.mxu2 %v14387_v63 }
 0x234   : > { %v11155_v15 = vld [vmem:[%s14081_s11 + $0x10c0] sm:$0xf]  ;;  %v11556_v21 = vor.u32 %v12850_v9, %v11555_v8  ;;  %v12782_v22 = vld [vmem:[%s14081_s11 + $0x11cc] sm:$0xf0]  ;;  %7776 = vmatpush.bf16.msra.mxu1 %v11300_v13  ;;  %7758 = vmatmul.bf16.vlgmr.msrb.gmra.mxu3 %v14391_v1 }
 0x235   : > { %v11283_v20 = vld [vmem:[%s14081_s11 + $0x11c0] sm:$0xf]  ;;  %v12814_v24 = vld [vmem:[%s14081_s11 + $0x12cc] sm:$0xf0]  ;;  %v11156_v27 = vor.u32 %v12750_v19, %v11155_v15  ;;  %7789 = vmatpush.bf16.msra.mxu2 %v11428_v14  ;;  %7732 = vmatmul.bf16.vlgmr.msrb.gmra.mxu1 %v14389_v0 }
 0x236   : > { %v11411_v23 = vld [vmem:[%s14081_s11 + $0x12c0] sm:$0xf]  ;;  %v12846_v26 = vld [vmem:[%s14081_s11 + $0x13cc] sm:$0xf0]  ;;  %v11284_v29 = vor.u32 %v12782_v22, %v11283_v20  ;;  %7802 = vmatpush.bf16.msra.mxu3 %v11556_v21 }
 0x237   : > { %v11539_v25 = vld [vmem:[%s14081_s11 + $0x13c0] sm:$0xf]  ;;  %v11412_v30 = vor.u32 %v12814_v24, %v11411_v23  ;;  %v12746_v35 = vld [vmem:[%s14081_s11 + $0x10ac] sm:$0xf0]  ;;  %7764 = vmatpush.bf16.msra.mxu0 %v11156_v27 }
 0x238   : > { %v11139_v34 = vld [vmem:[%s14081_s11 + $0x10a0] sm:$0xf]  ;;  %v11540_v37 = vor.u32 %v12846_v26, %v11539_v25  ;;  %v12778_v38 = vld [vmem:[%s14081_s11 + $0x11ac] sm:$0xf0]  ;;  %7777 = vmatpush.bf16.msra.mxu1 %v11284_v29 }
 0x239   : > { %v11267_v36 = vld [vmem:[%s14081_s11 + $0x11a0] sm:$0xf]  ;;  %v12810_v40 = vld [vmem:[%s14081_s11 + $0x12ac] sm:$0xf0]  ;;  %v11140_v46 = vor.u32 %v12746_v35, %v11139_v34  ;;  %7790 = vmatpush.bf16.msra.mxu2 %v11412_v30 }
 0x23a   : > { %v11395_v39 = vld [vmem:[%s14081_s11 + $0x12a0] sm:$0xf]  ;;  %v12842_v42 = vld [vmem:[%s14081_s11 + $0x13ac] sm:$0xf0]  ;;  %v11268_v47 = vor.u32 %v12778_v38, %v11267_v36  ;;  %7803 = vmatpush.bf16.msra.mxu3 %v11540_v37 }
 0x23b   : > { %v11523_v41 = vld [vmem:[%s14081_s11 + $0x13a0] sm:$0xf]  ;;  %v11396_v48 = vor.u32 %v12810_v40, %v11395_v39  ;;  %v12742_v51 = vld [vmem:[%s14081_s11 + $0x108c] sm:$0xf0]  ;;  %7765 = vmatpush.bf16.msra.mxu0 %v11140_v46 }
 0x23c   : > { %v11123_v49 = vld [vmem:[%s14081_s11 + $0x1080] sm:$0xf]  ;;  %v11524_v53 = vor.u32 %v12842_v42, %v11523_v41  ;;  %v12774_v54 = vld [vmem:[%s14081_s11 + $0x118c] sm:$0xf0]  ;;  %7778 = vmatpush.bf16.msra.mxu1 %v11268_v47 }
 0x23d   : > { %v11251_v52 = vld [vmem:[%s14081_s11 + $0x1180] sm:$0xf]  ;;  %v12806_v56 = vld [vmem:[%s14081_s11 + $0x128c] sm:$0xf0]  ;;  %v11124_v59 = vor.u32 %v12742_v51, %v11123_v49  ;;  %7791 = vmatpush.bf16.msra.mxu2 %v11396_v48 }
 0x23e   : > { %v11379_v55 = vld [vmem:[%s14081_s11 + $0x1280] sm:$0xf]  ;;  %v12838_v58 = vld [vmem:[%s14081_s11 + $0x138c] sm:$0xf0]  ;;  %v11252_v60 = vor.u32 %v12774_v54, %v11251_v52  ;;  %7804 = vmatpush.bf16.msra.mxu3 %v11524_v53 }
 0x23f   : > { %v11507_v57 = vld [vmem:[%s14081_s11 + $0x1380] sm:$0xf]  ;;  %v11380_v61 = vor.u32 %v12806_v56, %v11379_v55  ;;  %v12738_v3 = vld [vmem:[%s14081_s11 + $0x106c] sm:$0xf0]  ;;  %7766 = vmatpush.bf16.msra.mxu0 %v11124_v59 }
 0x240   : > { %v11107_v2 = vld [vmem:[%s14081_s11 + $0x1060] sm:$0xf]  ;;  %v11508_v5 = vor.u32 %v12838_v58, %v11507_v57  ;;  %v12770_v6 = vld [vmem:[%s14081_s11 + $0x116c] sm:$0xf0]  ;;  %7779 = vmatpush.bf16.msra.mxu1 %v11252_v60 }
 0x241   : > { %v11235_v4 = vld [vmem:[%s14081_s11 + $0x1160] sm:$0xf]  ;;  %v12802_v8 = vld [vmem:[%s14081_s11 + $0x126c] sm:$0xf0]  ;;  %v11108_v11 = vor.u32 %v12738_v3, %v11107_v2  ;;  %7792 = vmatpush.bf16.msra.mxu2 %v11380_v61 }
 0x242   : > { %v11363_v7 = vld [vmem:[%s14081_s11 + $0x1260] sm:$0xf]  ;;  %v12834_v10 = vld [vmem:[%s14081_s11 + $0x136c] sm:$0xf0]  ;;  %v11236_v13 = vor.u32 %v12770_v6, %v11235_v4  ;;  %7805 = vmatpush.bf16.msra.mxu3 %v11508_v5 }
 0x243   : > { %v11491_v9 = vld [vmem:[%s14081_s11 + $0x1360] sm:$0xf]  ;;  %v11364_v14 = vor.u32 %v12802_v8, %v11363_v7  ;;  %v12734_v19 = vld [vmem:[%s14081_s11 + $0x104c] sm:$0xf0]  ;;  %7767 = vmatpush.bf16.msra.mxu0 %v11108_v11 }
 0x244   : > { %v11091_v15 = vld [vmem:[%s14081_s11 + $0x1040] sm:$0xf]  ;;  %v11492_v21 = vor.u32 %v12834_v10, %v11491_v9  ;;  %v12766_v22 = vld [vmem:[%s14081_s11 + $0x114c] sm:$0xf0]  ;;  %7780 = vmatpush.bf16.msra.mxu1 %v11236_v13 }
 0x245   : > { %v11219_v20 = vld [vmem:[%s14081_s11 + $0x1140] sm:$0xf]  ;;  %v12798_v24 = vld [vmem:[%s14081_s11 + $0x124c] sm:$0xf0]  ;;  %v11092_v27 = vor.u32 %v12734_v19, %v11091_v15  ;;  %7793 = vmatpush.bf16.msra.mxu2 %v11364_v14 }
 0x246   : > { %v11347_v23 = vld [vmem:[%s14081_s11 + $0x1240] sm:$0xf]  ;;  %v12830_v26 = vld [vmem:[%s14081_s11 + $0x134c] sm:$0xf0]  ;;  %v11220_v29 = vor.u32 %v12766_v22, %v11219_v20  ;;  %7806 = vmatpush.bf16.msra.mxu3 %v11492_v21 }
 0x247   : > { %v11475_v25 = vld [vmem:[%s14081_s11 + $0x1340] sm:$0xf]  ;;  %v11348_v30 = vor.u32 %v12798_v24, %v11347_v23  ;;  %v12730_v35 = vld [vmem:[%s14081_s11 + $0x102c] sm:$0xf0]  ;;  %7768 = vmatpush.bf16.msra.mxu0 %v11092_v27 }
 0x248   : > { %v11075_v34 = vld [vmem:[%s14081_s11 + $0x1020] sm:$0xf]  ;;  %v11476_v37 = vor.u32 %v12830_v26, %v11475_v25  ;;  %v12762_v38 = vld [vmem:[%s14081_s11 + $0x112c] sm:$0xf0]  ;;  %7781 = vmatpush.bf16.msra.mxu1 %v11220_v29  ;;  %v14474_v25 = vld [vmem:[#allocation1] sm:$0xff] }
 0x249   : > { %v11203_v36 = vld [vmem:[%s14081_s11 + $0x1120] sm:$0xf]  ;;  %v12794_v40 = vld [vmem:[%s14081_s11 + $0x122c] sm:$0xf0]  ;;  %v11076_v46 = vor.u32 %v12730_v35, %v11075_v34  ;;  %7794 = vmatpush.bf16.msra.mxu2 %v11348_v30 }
 0x24a   : > { %v11331_v39 = vld [vmem:[%s14081_s11 + $0x1220] sm:$0xf]  ;;  %v12826_v42 = vld [vmem:[%s14081_s11 + $0x132c] sm:$0xf0]  ;;  %v11204_v49 = vor.u32 %v12762_v38, %v11203_v36  ;;  %7807 = vmatpush.bf16.msra.mxu3 %v11476_v37 }
 0x24b   : > { %v11459_v41 = vld [vmem:[%s14081_s11 + $0x1320] sm:$0xf]  ;;  %v12726_v48 = vld [vmem:[%s14081_s11 + $0x100c] sm:$0xf0]  ;;  %v11332_v51 = vor.u32 %v12794_v40, %v11331_v39  ;;  %7769 = vmatpush.bf16.msra.mxu0 %v11076_v46 }
 0x24c   : > { %v11059_v47 = vld [vmem:[%s14081_s11 + $0x1000] sm:$0xf]  ;;  %v12758_v53 = vld [vmem:[%s14081_s11 + $0x110c] sm:$0xf0]  ;;  %v11460_v55 = vor.u32 %v12826_v42, %v11459_v41  ;;  %7782 = vmatpush.bf16.msra.mxu1 %v11204_v49 }
 0x24d   : > { %v11187_v52 = vld [vmem:[%s14081_s11 + $0x1100] sm:$0xf]  ;;  %v12790_v56 = vld [vmem:[%s14081_s11 + $0x120c] sm:$0xf0]  ;;  %v11060_v2 = vor.u32 %v12726_v48, %v11059_v47  ;;  %7795 = vmatpush.bf16.msra.mxu2 %v11332_v51 }
 0x24e   : > { %v11315_v54 = vld [vmem:[%s14081_s11 + $0x1200] sm:$0xf]  ;;  %v12822_v58 = vld [vmem:[%s14081_s11 + $0x130c] sm:$0xf0]  ;;  %v11188_v6 = vor.u32 %v12758_v53, %v11187_v52  ;;  %7808 = vmatpush.bf16.msra.mxu3 %v11460_v55 }
 0x24f   : > { %v11443_v57 = vld [vmem:[%s14081_s11 + $0x1300] sm:$0xf]  ;;  %v12882_v60 = vld [vmem:[%s14081_s11 + $0x14ec] sm:$0xf0]  ;;  %v11316_v7 = vor.u32 %v12790_v56, %v11315_v54  ;;  %7770 = vmatpush.bf16.msra.mxu0 %v11060_v2 }
 0x250   : > { %v11683_v59 = vld [vmem:[%s14081_s11 + $0x14e0] sm:$0xf]  ;;  %v12914_v3 = vld [vmem:[%s14081_s11 + $0x15ec] sm:$0xf0]  ;;  %v11444_v10 = vor.u32 %v12822_v58, %v11443_v57  ;;  %7783 = vmatpush.bf16.msra.mxu1 %v11188_v6 }
 0x251   : > { %v11811_v61 = vld [vmem:[%s14081_s11 + $0x15e0] sm:$0xf]  ;;  %v12946_v5 = vld [vmem:[%s14081_s11 + $0x16ec] sm:$0xf0]  ;;  %v11684_v11 = vor.u32 %v12882_v60, %v11683_v59  ;;  %7796 = vmatpush.bf16.msra.mxu2 %v11316_v7 }
 0x252   : > { %v11939_v4 = vld [vmem:[%s14081_s11 + $0x16e0] sm:$0xf]  ;;  %v12978_v9 = vld [vmem:[%s14081_s11 + $0x17ec] sm:$0xf0]  ;;  %v11812_v13 = vor.u32 %v12914_v3, %v11811_v61  ;;  %7809 = vmatpush.bf16.msra.mxu3 %v11444_v10  ;;  %7771 = vmatmul.bf16.vlgmr.msra.gmra.mxu0 %v14474_v25 }
 0x253   : > { %v12067_v8 = vld [vmem:[%s14081_s11 + $0x17e0] sm:$0xf]  ;;  %v11940_v14 = vor.u32 %v12946_v5, %v11939_v4  ;;  %v12878_v19 = vld [vmem:[%s14081_s11 + $0x14cc] sm:$0xf0]  ;;  %7815 = vmatpush.bf16.msrb.mxu0 %v11684_v11 }
 0x254   : > { %v11667_v15 = vld [vmem:[%s14081_s11 + $0x14c0] sm:$0xf]  ;;  %v12068_v21 = vor.u32 %v12978_v9, %v12067_v8  ;;  %v12910_v22 = vld [vmem:[%s14081_s11 + $0x15cc] sm:$0xf0]  ;;  %7828 = vmatpush.bf16.msrb.mxu1 %v11812_v13 }
 0x255   : > { %v11795_v20 = vld [vmem:[%s14081_s11 + $0x15c0] sm:$0xf]  ;;  %v12942_v24 = vld [vmem:[%s14081_s11 + $0x16cc] sm:$0xf0]  ;;  %v11668_v35 = vor.u32 %v12878_v19, %v11667_v15  ;;  %7841 = vmatpush.bf16.msrb.mxu2 %v11940_v14 }
 0x256   : > { %v11923_v23 = vld [vmem:[%s14081_s11 + $0x16c0] sm:$0xf]  ;;  %v12974_v27 = vld [vmem:[%s14081_s11 + $0x17cc] sm:$0xf0]  ;;  %v11796_v36 = vor.u32 %v12910_v22, %v11795_v20  ;;  %7854 = vmatpush.bf16.msrb.mxu3 %v12068_v21 }
 0x257   : > { %v12051_v26 = vld [vmem:[%s14081_s11 + $0x17c0] sm:$0xf]  ;;  %v14478_v29 = vld [vmem:[#allocation1 + $0x12] sm:$0xff]  ;;  %v14482_v34 = vld [vmem:[#allocation1 + $0x1b] sm:$0xff]  ;;  %v11924_v37 = vor.u32 %v12942_v24, %v11923_v23  ;;  %7816 = vmatpush.bf16.msrb.mxu0 %v11668_v35 }
 0x258   : > { %v14480_v30 = vld [vmem:[#allocation1 + $0x9] sm:$0xff]  ;;  %v12874_v39 = vld [vmem:[%s14081_s11 + $0x14ac] sm:$0xf0]  ;;  %v12052_v41 = vor.u32 %v12974_v27, %v12051_v26  ;;  %7797 = vmatmul.bf16.vlgmr.msra.gmra.mxu2 %v14478_v29  ;;  %7810 = vmatmul.bf16.vlgmr.msra.gmra.mxu3 %v14482_v34 }
 0x259   : > { %v11651_v38 = vld [vmem:[%s14081_s11 + $0x14a0] sm:$0xf]  ;;  %v12906_v42 = vld [vmem:[%s14081_s11 + $0x15ac] sm:$0xf0]  ;;  %7784 = vmatmul.bf16.vlgmr.msra.gmra.mxu1 %v14480_v30  ;;  %7842 = vmatpush.bf16.msrb.mxu2 %v11924_v37  ;;  %v3487_v37 = vld [vmem:[%s14529_s27] sm:$0xf] }
 0x25a   : > { %v11779_v40 = vld [vmem:[%s14081_s11 + $0x15a0] sm:$0xf]  ;;  %v12938_v47 = vld [vmem:[%s14081_s11 + $0x16ac] sm:$0xf0]  ;;  %v11652_v51 = vor.u32 %v12874_v39, %v11651_v38  ;;  %7829 = vmatpush.bf16.msrb.mxu1 %v11796_v36  ;;  %7855 = vmatpush.bf16.msrb.mxu3 %v12052_v41 }
 0x25b   : > { %v11907_v46 = vld [vmem:[%s14081_s11 + $0x16a0] sm:$0xf]  ;;  %v12970_v49 = vld [vmem:[%s14081_s11 + $0x17ac] sm:$0xf0]  ;;  %v11780_v52 = vor.u32 %v12906_v42, %v11779_v40 }
 0x25c   : > { %v12035_v48 = vld [vmem:[%s14081_s11 + $0x17a0] sm:$0xf]  ;;  %v11908_v53 = vor.u32 %v12938_v47, %v11907_v46  ;;  %v12870_v55 = vld [vmem:[%s14081_s11 + $0x148c] sm:$0xf0]  ;;  %7817 = vmatpush.bf16.msrb.mxu0 %v11652_v51  ;;  %v3489_v51 = vperm.slane %v3487_v37, 0 }
 0x25d   : > { %v11635_v54 = vld [vmem:[%s14081_s11 + $0x1480] sm:$0xf]  ;;  %v12036_v57 = vor.u32 %v12970_v49, %v12035_v48  ;;  %v12902_v58 = vld [vmem:[%s14081_s11 + $0x158c] sm:$0xf0] }
 0x25e   : > { %v11763_v56 = vld [vmem:[%s14081_s11 + $0x1580] sm:$0xf]  ;;  %v12934_v60 = vld [vmem:[%s14081_s11 + $0x168c] sm:$0xf0]  ;;  %v11636_v3 = vor.u32 %v12870_v55, %v11635_v54  ;;  %7830 = vmatpush.bf16.msrb.mxu1 %v11780_v52  ;;  %7843 = vmatpush.bf16.msrb.mxu2 %v11908_v53 }
 0x25f   : > { %v11891_v59 = vld [vmem:[%s14081_s11 + $0x1680] sm:$0xf]  ;;  %v12966_v2 = vld [vmem:[%s14081_s11 + $0x178c] sm:$0xf0]  ;;  %v11764_v4 = vor.u32 %v12902_v58, %v11763_v56  ;;  %7856 = vmatpush.bf16.msrb.mxu3 %v12036_v57 }
 0x260   : > { %v12019_v61 = vld [vmem:[%s14081_s11 + $0x1780] sm:$0xf]  ;;  %v11892_v5 = vor.u32 %v12934_v60, %v11891_v59  ;;  %v12866_v7 = vld [vmem:[%s14081_s11 + $0x146c] sm:$0xf0]  ;;  %7818 = vmatpush.bf16.msrb.mxu0 %v11636_v3 }
 0x261   : > { %v11619_v6 = vld [vmem:[%s14081_s11 + $0x1460] sm:$0xf]  ;;  %v12020_v9 = vor.u32 %v12966_v2, %v12019_v61  ;;  %v12898_v10 = vld [vmem:[%s14081_s11 + $0x156c] sm:$0xf0] }
 0x262   : > { %v11747_v8 = vld [vmem:[%s14081_s11 + $0x1560] sm:$0xf]  ;;  %v12930_v13 = vld [vmem:[%s14081_s11 + $0x166c] sm:$0xf0]  ;;  %v11620_v19 = vor.u32 %v12866_v7, %v11619_v6  ;;  %7831 = vmatpush.bf16.msrb.mxu1 %v11764_v4  ;;  %7844 = vmatpush.bf16.msrb.mxu2 %v11892_v5  ;;  %v7564_v4 = vpop.f32.mrf.mxu0 }
 0x263   : > { %v11875_v11 = vld [vmem:[%s14081_s11 + $0x1660] sm:$0xf]  ;;  %v12962_v15 = vld [vmem:[%s14081_s11 + $0x176c] sm:$0xf0]  ;;  %v11748_v21 = vor.u32 %v12898_v10, %v11747_v8  ;;  %7857 = vmatpush.bf16.msrb.mxu3 %v12020_v9 }
 0x264   : > { %v12003_v14 = vld [vmem:[%s14081_s11 + $0x1760] sm:$0xf]  ;;  %v11876_v22 = vor.u32 %v12930_v13, %v11875_v11  ;;  %v12862_v23 = vld [vmem:[%s14081_s11 + $0x144c] sm:$0xf0]  ;;  %7819 = vmatpush.bf16.msrb.mxu0 %v11620_v19  ;;  %v7565_v11 = vadd.f32 %v7564_v4, %v3489_v51  ;;  %v7577_v13 = vpop.f32.mrf.mxu1  ;;  %v9125_v19 = vld [vmem:[%s14081_s11 + $0xf0] sm:$0xf0] }
 0x265   : > { %v11603_v20 = vld [vmem:[%s14081_s11 + $0x1440] sm:$0xf]  ;;  %v12894_v26 = vld [vmem:[%s14081_s11 + $0x154c] sm:$0xf0]  ;;  %v12004_v27 = vor.u32 %v12962_v15, %v12003_v14  ;;  %v12240_v15 = vld [vmem:[%s14081_s11 + $0xe4] sm:$0xf] }
 0x266   : > { %v11731_v24 = vld [vmem:[%s14081_s11 + $0x1540] sm:$0xf]  ;;  %v12926_v36 = vld [vmem:[%s14081_s11 + $0x164c] sm:$0xf0]  ;;  %v11604_v40 = vor.u32 %v12862_v23, %v11603_v20  ;;  %7832 = vmatpush.bf16.msrb.mxu1 %v11748_v21  ;;  %7845 = vmatpush.bf16.msrb.mxu2 %v11876_v22  ;;  %v14564_v22 = vld [vmem:[#allocation1 + $0x2d] sm:$0xff] }
 0x267   : > { %v11859_v35 = vld [vmem:[%s14081_s11 + $0x1640] sm:$0xf]  ;;  %v12958_v39 = vld [vmem:[%s14081_s11 + $0x174c] sm:$0xf0]  ;;  %v11732_v46 = vor.u32 %v12894_v26, %v11731_v24  ;;  %7858 = vmatpush.bf16.msrb.mxu3 %v12004_v27  ;;  %v14566_v23 = vld [vmem:[#allocation1 + $0x3f] sm:$0xff]  ;;  %v7578_v24 = vadd.f32 %v7577_v13, %v7565_v11 }
 0x268   : > { %v11987_v38 = vld [vmem:[%s14081_s11 + $0x1740] sm:$0xf]  ;;  %v12858_v42 = vld [vmem:[%s14081_s11 + $0x142c] sm:$0xf0]  ;;  %v11860_v47 = vor.u32 %v12926_v36, %v11859_v35  ;;  %7820 = vmatpush.bf16.msrb.mxu0 %v11604_v40  ;;  %v12272_v35 = vld [vmem:[%s14081_s11 + $0x1e4] sm:$0xf] }
 0x269   : > { %v11587_v41 = vld [vmem:[%s14081_s11 + $0x1420] sm:$0xf]  ;;  %v12890_v49 = vld [vmem:[%s14081_s11 + $0x152c] sm:$0xf0]  ;;  %v11988_v52 = vor.u32 %v12958_v39, %v11987_v38  ;;  %v9253_v36 = vld [vmem:[%s14081_s11 + $0x1f0] sm:$0xf0] }
 0x26a   : > { %v11715_v48 = vld [vmem:[%s14081_s11 + $0x1520] sm:$0xf]  ;;  %v12922_v54 = vld [vmem:[%s14081_s11 + $0x162c] sm:$0xf0]  ;;  %v11588_v59 = vor.u32 %v12858_v42, %v11587_v41  ;;  %7833 = vmatpush.bf16.msrb.mxu1 %v11732_v46  ;;  %7846 = vmatpush.bf16.msrb.mxu2 %v11860_v47  ;;  %v12304_v39 = vld [vmem:[%s14081_s11 + $0x2e4] sm:$0xf]  ;;  %v7590_v41 = vpop.f32.mrf.mxu2  ;;  %v9256_v51 = vor.u32 %v12272_v35, %v9253_v36 }
 0x26b   : > { %v11843_v53 = vld [vmem:[%s14081_s11 + $0x1620] sm:$0xf]  ;;  %v12954_v56 = vld [vmem:[%s14081_s11 + $0x172c] sm:$0xf0]  ;;  %v11716_v5 = vor.u32 %v12890_v49, %v11715_v48  ;;  %7859 = vmatpush.bf16.msrb.mxu3 %v11988_v52  ;;  %v9381_v40 = vld [vmem:[%s14081_s11 + $0x2f0] sm:$0xf0]  ;;  %v7591_v47 = vadd.f32 %v7590_v41, %v7578_v24  ;;  %v7603_v48 = vpop.f32.mrf.mxu3  ;;  %v9128_v49 = vor.u32 %v12240_v15, %v9125_v19 }
 0x26c   : > { %v11971_v55 = vld [vmem:[%s14081_s11 + $0x1720] sm:$0xf]  ;;  %v12854_v58 = vld [vmem:[%s14081_s11 + $0x140c] sm:$0xf0]  ;;  %v11844_v6 = vor.u32 %v12922_v54, %v11843_v53  ;;  %7821 = vmatpush.bf16.msrb.mxu0 %v11588_v59  ;;  %v12236_v54 = vld [vmem:[%s14081_s11 + $0xc4] sm:$0xf] }
 0x26d   : > { %v11571_v57 = vld [vmem:[%s14081_s11 + $0x1400] sm:$0xf]  ;;  %v12886_v61 = vld [vmem:[%s14081_s11 + $0x150c] sm:$0xf0]  ;;  %v11972_v14 = vor.u32 %v12954_v56, %v11971_v55  ;;  %v9384_v55 = vor.u32 %v12304_v39, %v9381_v40  ;;  %v9109_v56 = vld [vmem:[%s14081_s11 + $0xd0] sm:$0xf0]  ;;  %v7604_v59 = vadd.f32 %v7603_v48, %v7591_v47 }
 0x26e   : > { %v11699_v60 = vld [vmem:[%s14081_s11 + $0x1500] sm:$0xf]  ;;  %v12918_v3 = vld [vmem:[%s14081_s11 + $0x160c] sm:$0xf0]  ;;  %v11572_v27 = vor.u32 %v12854_v58, %v11571_v57  ;;  %7834 = vmatpush.bf16.msrb.mxu1 %v11716_v5  ;;  %7847 = vmatpush.bf16.msrb.mxu2 %v11844_v6  ;;  %v12268_v57 = vld [vmem:[%s14081_s11 + $0x1c4] sm:$0xf]  ;;  %v9112_v5 = vor.u32 %v12236_v54, %v9109_v56 }
 0x26f   : > { %v11827_v2 = vld [vmem:[%s14081_s11 + $0x1600] sm:$0xf]  ;;  %v12950_v8 = vld [vmem:[%s14081_s11 + $0x170c] sm:$0xf0]  ;;  %v11700_v37 = vor.u32 %v12886_v61, %v11699_v60  ;;  %7860 = vmatpush.bf16.msrb.mxu3 %v11972_v14  ;;  %v9237_v58 = vld [vmem:[%s14081_s11 + $0x1d0] sm:$0xf0]  ;;  %v7566_v60 = vpop.f32.mrf.mxu0 }
 0x270   : > { %v11955_v7 = vld [vmem:[%s14081_s11 + $0x1700] sm:$0xf]  ;;  %v13010_v10 = vld [vmem:[%s14081_s11 + $0x18ec] sm:$0xf0]  ;;  %v11828_v38 = vor.u32 %v12918_v3, %v11827_v2  ;;  %7822 = vmatpush.bf16.msrb.mxu0 %v11572_v27  ;;  %v12300_v61 = vld [vmem:[%s14081_s11 + $0x2c4] sm:$0xf]  ;;  %v7579_v3 = vpop.f32.mrf.mxu1  ;;  %v9240_v6 = vor.u32 %v12268_v57, %v9237_v58 }
 0x271   : > { %v12195_v9 = vld [vmem:[%s14081_s11 + $0x18e0] sm:$0xf]  ;;  %v14562_v21 = vld [vmem:[#allocation1 + $0x36] sm:$0xff]  ;;  %v11956_v42 = vor.u32 %v12950_v8, %v11955_v7  ;;  %v12264_v13 = vld [vmem:[%s14081_s11 + $0x1a4] sm:$0xf] }
 0x272   : > { %v14560_v20 = vld [vmem:[#allocation1 + $0x24] sm:$0xff]  ;;  %v2686_v26 = vld [vmem:[%s15945_s0 + $0x18] sm:$0x1]  ;;  %v12196_v46 = vor.u32 %v13010_v10, %v12195_v9  ;;  %7835 = vmatpush.bf16.msrb.mxu1 %v11700_v37  ;;  %7848 = vmatpush.bf16.msrb.mxu2 %v11828_v38  ;;  %v9365_v2 = vld [vmem:[%s14081_s11 + $0x2d0] sm:$0xf0]  ;;  %v7592_v24 = vpop.f32.mrf.mxu2 }
 0x273   : > { %3528 = vst [vmem:[#allocation1] ss:$9 sm:$0xff] %v2686_v26  ;;  %v12179_v52 = vld [vmem:[%s14081_s11 + $0x18c0] sm:$0xf]  ;;  %v13006_v53 = vld [vmem:[%s14081_s11 + $0x18cc] sm:$0xf0]  ;;  %7861 = vmatpush.bf16.msrb.mxu3 %v11956_v42  ;;  %7823 = vmatmul.bf16.vlgmr.msrb.gmra.mxu0 %v14560_v20  ;;  %v9368_v10 = vor.u32 %v12300_v61, %v9365_v2  ;;  %v7605_v27 = vpop.f32.mrf.mxu3 }
 0x274   : > { %7867 = vmatpush.bf16.msra.mxu0 %v12196_v46  ;;  %v12180_v4 = vor.u32 %v13006_v53, %v12179_v52  ;;  %v12163_v7 = vld [vmem:[%s14081_s11 + $0x18a0] sm:$0xf]  ;;  %v13002_v8 = vld [vmem:[%s14081_s11 + $0x18ac] sm:$0xf0]  ;;  %v12232_v9 = vld [vmem:[%s14081_s11 + $0xa4] sm:$0xf] }
 0x275   : > { %v9093_v11 = vld [vmem:[%s14081_s11 + $0xb0] sm:$0xf0]  ;;  %7849 = vmatmul.bf16.vlgmr.msrb.gmra.mxu2 %v14562_v21  ;;  %7836 = vmatmul.bf16.vlgmr.msrb.gmra.mxu1 %v14564_v22  ;;  %v12296_v15 = vld [vmem:[%s14081_s11 + $0x2a4] sm:$0xf]  ;;  %v12164_v26 = vor.u32 %v13002_v8, %v12163_v7  ;;  %v12147_v37 = vld [vmem:[%s14081_s11 + $0x1880] sm:$0xf] }
 0x276   : > { %7880 = vmatpush.bf16.msra.mxu1 %v9128_v49  ;;  %7893 = vmatpush.bf16.msra.mxu2 %v9256_v51  ;;  %v9221_v14 = vld [vmem:[%s14081_s11 + $0x1b0] sm:$0xf0]  ;;  %v9096_v35 = vor.u32 %v12232_v9, %v9093_v11  ;;  %v12998_v38 = vld [vmem:[%s14081_s11 + $0x188c] sm:$0xf0]  ;;  %v12228_v39 = vld [vmem:[%s14081_s11 + $0x84] sm:$0xf] }
 0x277   : > { %7906 = vmatpush.bf16.msra.mxu3 %v9384_v55  ;;  %v9349_v19 = vld [vmem:[%s14081_s11 + $0x2b0] sm:$0xf0]  ;;  %v9224_v36 = vor.u32 %v12264_v13, %v9221_v14  ;;  %v12260_v42 = vld [vmem:[%s14081_s11 + $0x184] sm:$0xf]  ;;  %v12148_v49 = vor.u32 %v12998_v38, %v12147_v37  ;;  %v7616_v51 = vpop.f32.mrf.mxu0  ;;  %v12131_v54 = vld [vmem:[%s14081_s11 + $0x1860] sm:$0xf] }
 0x278   : > { %7862 = vmatmul.bf16.vlgmr.msrb.gmra.mxu3 %v14566_v23  ;;  %7868 = vmatpush.bf16.msra.mxu0 %v12180_v4  ;;  %v9352_v40 = vor.u32 %v12296_v15, %v9349_v19  ;;  %v9077_v41 = vld [vmem:[%s14081_s11 + $0x90] sm:$0xf0]  ;;  %v12292_v47 = vld [vmem:[%s14081_s11 + $0x284] sm:$0xf]  ;;  %v12994_v55 = vld [vmem:[%s14081_s11 + $0x186c] sm:$0xf0]  ;;  %v7617_v57 = vadd.f32 %v7616_v51, %v7604_v59  ;;  %v7629_v58 = vpop.f32.mrf.mxu1 }
 0x279   : > { %v9205_v46 = vld [vmem:[%s14081_s11 + $0x190] sm:$0xf0]  ;;  %v9080_v52 = vor.u32 %v12228_v39, %v9077_v41  ;;  %v12224_v56 = vld [vmem:[%s14081_s11 + $0x64] sm:$0xf]  ;;  %v12132_v7 = vor.u32 %v12994_v55, %v12131_v54  ;;  %v12115_v9 = vld [vmem:[%s14081_s11 + $0x1840] sm:$0xf] }
 0x27a   : > { %7881 = vmatpush.bf16.msra.mxu1 %v9112_v5  ;;  %7894 = vmatpush.bf16.msra.mxu2 %v9240_v6  ;;  %v9333_v48 = vld [vmem:[%s14081_s11 + $0x290] sm:$0xf0]  ;;  %v9208_v53 = vor.u32 %v12260_v42, %v9205_v46  ;;  %v12256_v2 = vld [vmem:[%s14081_s11 + $0x164] sm:$0xf]  ;;  %v7630_v6 = vadd.f32 %v7629_v58, %v7617_v57  ;;  %v7642_v13 = vpop.f32.mrf.mxu2  ;;  %v12099_v42 = vld [vmem:[%s14081_s11 + $0x1820] sm:$0xf] }
 0x27b   : > { %7907 = vmatpush.bf16.msra.mxu3 %v9368_v10  ;;  %v9336_v60 = vor.u32 %v12292_v47, %v9333_v48  ;;  %v9061_v61 = vld [vmem:[%s14081_s11 + $0x70] sm:$0xf0]  ;;  %v12288_v4 = vld [vmem:[%s14081_s11 + $0x264] sm:$0xf]  ;;  %v12990_v10 = vld [vmem:[%s14081_s11 + $0x184c] sm:$0xf0]  ;;  %v7655_v27 = vpop.f32.mrf.mxu3 }
 0x27c   : > { %7869 = vmatpush.bf16.msra.mxu0 %v12164_v26  ;;  %v9189_v3 = vld [vmem:[%s14081_s11 + $0x170] sm:$0xf0]  ;;  %v9064_v59 = vor.u32 %v12224_v56, %v9061_v61  ;;  %v12220_v11 = vld [vmem:[%s14081_s11 + $0x44] sm:$0xf]  ;;  %v7643_v26 = vadd.f32 %v7642_v13, %v7630_v6  ;;  %v12116_v37 = vor.u32 %v12990_v10, %v12115_v9  ;;  %v12986_v46 = vld [vmem:[%s14081_s11 + $0x182c] sm:$0xf0] }
 0x27d   : > { %v9317_v5 = vld [vmem:[%s14081_s11 + $0x270] sm:$0xf0]  ;;  %v9192_v8 = vor.u32 %v12256_v2, %v9189_v3  ;;  %v12252_v19 = vld [vmem:[%s14081_s11 + $0x144] sm:$0xf]  ;;  %v12100_v56 = vor.u32 %v12986_v46, %v12099_v42  ;;  %v12083_v57 = vld [vmem:[%s14081_s11 + $0x1800] sm:$0xf] }
 0x27e   : > { %7882 = vmatpush.bf16.msra.mxu1 %v9096_v35  ;;  %7895 = vmatpush.bf16.msra.mxu2 %v9224_v36  ;;  %v9320_v14 = vor.u32 %v12288_v4, %v9317_v5  ;;  %v9045_v15 = vld [vmem:[%s14081_s11 + $0x50] sm:$0xf0]  ;;  %v12284_v35 = vld [vmem:[%s14081_s11 + $0x244] sm:$0xf]  ;;  %v14619_v38 = vadd.f32 %v7655_v27, %v7643_v26  ;;  %v12982_v58 = vld [vmem:[%s14081_s11 + $0x180c] sm:$0xf0] }
 0x27f   : > { %7908 = vmatpush.bf16.msra.mxu3 %v9352_v40  ;;  %v9173_v24 = vld [vmem:[%s14081_s11 + $0x150] sm:$0xf0]  ;;  %v7618_v39 = vpop.f32.mrf.mxu0  ;;  %v9048_v40 = vor.u32 %v12220_v11, %v9045_v15  ;;  %v12216_v47 = vld [vmem:[%s14081_s11 + $0x24] sm:$0xf] }
 0x280   : > { %7870 = vmatpush.bf16.msra.mxu0 %v12148_v49  ;;  %v9301_v36 = vld [vmem:[%s14081_s11 + $0x250] sm:$0xf0]  ;;  %v9176_v41 = vor.u32 %v12252_v19, %v9173_v24  ;;  %v7631_v48 = vpop.f32.mrf.mxu1  ;;  %v12280_v54 = vld [vmem:[%s14081_s11 + $0x224] sm:$0xf] }
 0x281   : > { %v9304_v49 = vor.u32 %v12284_v35, %v9301_v36  ;;  %v9029_v51 = vld [vmem:[%s14081_s11 + $0x30] sm:$0xf0]  ;;  %v12212_v2 = vld [vmem:[%s14081_s11 + $0x4] sm:$0xf] }
 0x282   : > { %7883 = vmatpush.bf16.msra.mxu1 %v9080_v52  ;;  %7896 = vmatpush.bf16.msra.mxu2 %v9208_v53  ;;  %v12248_v52 = vld [vmem:[%s14081_s11 + $0x124] sm:$0xf]  ;;  %v9157_v53 = vld [vmem:[%s14081_s11 + $0x130] sm:$0xf0]  ;;  %v7644_v5 = vpop.f32.mrf.mxu2 }
 0x283   : > { %7909 = vmatpush.bf16.msra.mxu3 %v9336_v60  ;;  %v9285_v55 = vld [vmem:[%s14081_s11 + $0x230] sm:$0xf0]  ;;  %v9032_v60 = vor.u32 %v12216_v47, %v9029_v51  ;;  %v9160_v61 = vor.u32 %v12248_v52, %v9157_v53  ;;  %v12244_v4 = vld [vmem:[%s14081_s11 + $0x104] sm:$0xf]  ;;  %v7657_v9 = vpop.f32.mrf.mxu3  ;;  %v3529_v53 = vld [vmem:[#allocation1] sm:$0xff] }
 0x284   : > { %7871 = vmatpush.bf16.msra.mxu0 %v12132_v7  ;;  %v9013_v3 = vld [vmem:[%s14081_s11 + $0x10] sm:$0xf0]  ;;  %v9288_v6 = vor.u32 %v12280_v54, %v9285_v55  ;;  %v12336_v10 = vld [vmem:[%s14081_s11 + $0x3e4] sm:$0xf] }
 0x285   : > { %v9141_v7 = vld [vmem:[%s14081_s11 + $0x110] sm:$0xf0]  ;;  %v12368_v13 = vld [vmem:[%s14081_s11 + $0x4e4] sm:$0xf]  ;;  %v9016_v26 = vor.u32 %v12212_v2, %v9013_v3 }
 0x286   : > { %7884 = vmatpush.bf16.msra.mxu1 %v9064_v59  ;;  %7897 = vmatpush.bf16.msra.mxu2 %v9192_v8  ;;  %v12276_v59 = vld [vmem:[%s14081_s11 + $0x204] sm:$0xf]  ;;  %v9269_v8 = vld [vmem:[%s14081_s11 + $0x210] sm:$0xf0]  ;;  %v9144_v27 = vor.u32 %v12244_v4, %v9141_v7 }
 0x287   : > { %7910 = vmatpush.bf16.msra.mxu3 %v9320_v14  ;;  %v9509_v11 = vld [vmem:[%s14081_s11 + $0x3f0] sm:$0xf0]  ;;  %v12084_v14 = vor.u32 %v12982_v58, %v12083_v57  ;;  %v12400_v19 = vld [vmem:[%s14081_s11 + $0x5e4] sm:$0xf] }
 0x288   : > { %7872 = vmatpush.bf16.msra.mxu0 %v12116_v37  ;;  %v9637_v15 = vld [vmem:[%s14081_s11 + $0x4f0] sm:$0xf0]  ;;  %v12432_v35 = vld [vmem:[%s14081_s11 + $0x6e4] sm:$0xf]  ;;  %v9272_v37 = vor.u32 %v12276_v59, %v9269_v8  ;;  %v9512_v39 = vor.u32 %v12336_v10, %v9509_v11 }
 0x289   : > { %v9765_v24 = vld [vmem:[%s14081_s11 + $0x5f0] sm:$0xf0]  ;;  %v12332_v42 = vld [vmem:[%s14081_s11 + $0x3c4] sm:$0xf] }
 0x28a   : > { %7885 = vmatpush.bf16.msra.mxu1 %v9048_v40  ;;  %7898 = vmatpush.bf16.msra.mxu2 %v9176_v41  ;;  %v9893_v36 = vld [vmem:[%s14081_s11 + $0x6f0] sm:$0xf0]  ;;  %v9640_v40 = vor.u32 %v12368_v13, %v9637_v15  ;;  %v9768_v41 = vor.u32 %v12400_v19, %v9765_v24  ;;  %v12364_v47 = vld [vmem:[%s14081_s11 + $0x4c4] sm:$0xf] }
 0x28b   : > { %7911 = vmatpush.bf16.msra.mxu3 %v9304_v49  ;;  %v9493_v46 = vld [vmem:[%s14081_s11 + $0x3d0] sm:$0xf0]  ;;  %v9896_v48 = vor.u32 %v12432_v35, %v9893_v36  ;;  %v12396_v51 = vld [vmem:[%s14081_s11 + $0x5c4] sm:$0xf] }
 0x28c   : > { %7873 = vmatpush.bf16.msra.mxu0 %v12100_v56  ;;  %v9621_v49 = vld [vmem:[%s14081_s11 + $0x4d0] sm:$0xf0]  ;;  %v12428_v54 = vld [vmem:[%s14081_s11 + $0x6c4] sm:$0xf]  ;;  %v9496_v56 = vor.u32 %v12332_v42, %v9493_v46 }
 0x28d   : > { %v9749_v52 = vld [vmem:[%s14081_s11 + $0x5d0] sm:$0xf0]  ;;  %v9624_v57 = vor.u32 %v12364_v47, %v9621_v49  ;;  %v12360_v2 = vld [vmem:[%s14081_s11 + $0x4a4] sm:$0xf] }
 0x28e   : > { %7886 = vmatpush.bf16.msra.mxu1 %v9032_v60  ;;  %7899 = vmatpush.bf16.msra.mxu2 %v9160_v61  ;;  %v9877_v55 = vld [vmem:[%s14081_s11 + $0x6d0] sm:$0xf0]  ;;  %v9752_v58 = vor.u32 %v12396_v51, %v9749_v52  ;;  %v12328_v60 = vld [vmem:[%s14081_s11 + $0x3a4] sm:$0xf] }
 0x28f   : > { %7912 = vmatpush.bf16.msra.mxu3 %v9288_v6  ;;  %v9477_v61 = vld [vmem:[%s14081_s11 + $0x3b0] sm:$0xf0]  ;;  %v9880_v3 = vor.u32 %v12428_v54, %v9877_v55  ;;  %v12392_v5 = vld [vmem:[%s14081_s11 + $0x5a4] sm:$0xf] }
 0x290   : > { %7874 = vmatpush.bf16.msra.mxu0 %v12084_v14  ;;  %v9605_v4 = vld [vmem:[%s14081_s11 + $0x4b0] sm:$0xf0]  ;;  %v12424_v7 = vld [vmem:[%s14081_s11 + $0x6a4] sm:$0xf]  ;;  %v9480_v8 = vor.u32 %v12328_v60, %v9477_v61 }
 0x291   : > { %v9733_v6 = vld [vmem:[%s14081_s11 + $0x5b0] sm:$0xf0]  ;;  %v9608_v9 = vor.u32 %v12360_v2, %v9605_v4  ;;  %v12324_v11 = vld [vmem:[%s14081_s11 + $0x384] sm:$0xf] }
 0x292   : > { %7887 = vmatpush.bf16.msra.mxu1 %v9016_v26  ;;  %7900 = vmatpush.bf16.msra.mxu2 %v9144_v27  ;;  %v9861_v59 = vld [vmem:[%s14081_s11 + $0x6b0] sm:$0xf0]  ;;  %v9736_v10 = vor.u32 %v12392_v5, %v9733_v6  ;;  %v12356_v14 = vld [vmem:[%s14081_s11 + $0x484] sm:$0xf]  ;;  %v7668_v27 = vpop.f32.mrf.mxu0 }
 0x293   : > { %7913 = vmatpush.bf16.msra.mxu3 %v9272_v37  ;;  %7875 = vmatmul.bf16.vlgmr.msra.gmra.mxu0 %v3529_v53  ;;  %v9461_v13 = vld [vmem:[%s14081_s11 + $0x390] sm:$0xf0]  ;;  %v9864_v15 = vor.u32 %v12424_v7, %v9861_v59  ;;  %v12388_v24 = vld [vmem:[%s14081_s11 + $0x584] sm:$0xf]  ;;  %v7669_v37 = vadd.f32 %v7668_v27, %v14619_v38 }
 0x294   : > { %7919 = vmatpush.bf16.msrb.mxu0 %v9512_v39  ;;  %v9589_v19 = vld [vmem:[%s14081_s11 + $0x490] sm:$0xf0]  ;;  %v12420_v35 = vld [vmem:[%s14081_s11 + $0x684] sm:$0xf]  ;;  %v9464_v39 = vor.u32 %v12324_v11, %v9461_v13 }
 0x295   : > { %7901 = vmatmul.bf16.vlgmr.msra.gmra.mxu2 %v14199_v50  ;;  %7888 = vmatmul.bf16.vlgmr.msra.gmra.mxu1 %v14193_v44  ;;  %v9717_v26 = vld [vmem:[%s14081_s11 + $0x590] sm:$0xf0]  ;;  %v12320_v46 = vld [vmem:[%s14081_s11 + $0x364] sm:$0xf] }
 0x296   : > { %7932 = vmatpush.bf16.msrb.mxu1 %v9640_v40  ;;  %7945 = vmatpush.bf16.msrb.mxu2 %v9768_v41  ;;  %v9845_v36 = vld [vmem:[%s14081_s11 + $0x690] sm:$0xf0]  ;;  %v7681_v40 = vpop.f32.mrf.mxu1  ;;  %v9592_v41 = vor.u32 %v12356_v14, %v9589_v19  ;;  %v9720_v42 = vor.u32 %v12388_v24, %v9717_v26  ;;  %v12384_v53 = vld [vmem:[%s14081_s11 + $0x564] sm:$0xf] }
 0x297   : > { %7958 = vmatpush.bf16.msrb.mxu3 %v9896_v48  ;;  %v9445_v47 = vld [vmem:[%s14081_s11 + $0x370] sm:$0xf0]  ;;  %v12352_v48 = vld [vmem:[%s14081_s11 + $0x464] sm:$0xf]  ;;  %v9848_v49 = vor.u32 %v12420_v35, %v9845_v36  ;;  %v7682_v51 = vadd.f32 %v7681_v40, %v7669_v37 }
 0x298   : > { %7914 = vmatmul.bf16.vlgmr.msra.gmra.mxu3 %v14191_v43  ;;  %7920 = vmatpush.bf16.msrb.mxu0 %v9496_v56  ;;  %v9573_v52 = vld [vmem:[%s14081_s11 + $0x470] sm:$0xf0]  ;;  %v12416_v54 = vld [vmem:[%s14081_s11 + $0x664] sm:$0xf]  ;;  %v9448_v56 = vor.u32 %v12320_v46, %v9445_v47 }
 0x299   : > { %v9701_v38 = vld [vmem:[%s14081_s11 + $0x570] sm:$0xf0]  ;;  %v12316_v60 = vld [vmem:[%s14081_s11 + $0x344] sm:$0xf]  ;;  %v7694_v4 = vpop.f32.mrf.mxu2 }
 0x29a   : > { %7933 = vmatpush.bf16.msrb.mxu1 %v9624_v57  ;;  %7946 = vmatpush.bf16.msrb.mxu2 %v9752_v58  ;;  %v9829_v55 = vld [vmem:[%s14081_s11 + $0x670] sm:$0xf0]  ;;  %v9576_v57 = vor.u32 %v12352_v48, %v9573_v52  ;;  %v9704_v58 = vor.u32 %v12384_v53, %v9701_v38  ;;  %v12348_v2 = vld [vmem:[%s14081_s11 + $0x444] sm:$0xf]  ;;  %v7695_v59 = vadd.f32 %v7694_v4, %v7682_v51  ;;  %v7670_v11 = vpop.f32.mrf.mxu0 }
 0x29b   : > { %7959 = vmatpush.bf16.msrb.mxu3 %v9880_v3  ;;  %v9429_v61 = vld [vmem:[%s14081_s11 + $0x350] sm:$0xf0]  ;;  %v9832_v3 = vor.u32 %v12416_v54, %v9829_v55  ;;  %v12380_v6 = vld [vmem:[%s14081_s11 + $0x544] sm:$0xf] }
 0x29c   : > { %7921 = vmatpush.bf16.msrb.mxu0 %v9480_v8  ;;  %v9557_v5 = vld [vmem:[%s14081_s11 + $0x450] sm:$0xf0]  ;;  %v7707_v8 = vpop.f32.mrf.mxu3  ;;  %v9432_v13 = vor.u32 %v12316_v60, %v9429_v61  ;;  %v12312_v26 = vld [vmem:[%s14081_s11 + $0x324] sm:$0xf] }
 0x29d   : > { %v9685_v7 = vld [vmem:[%s14081_s11 + $0x550] sm:$0xf0]  ;;  %v9560_v19 = vor.u32 %v12348_v2, %v9557_v5  ;;  %v12344_v35 = vld [vmem:[%s14081_s11 + $0x424] sm:$0xf] }
 0x29e   : > { %7934 = vmatpush.bf16.msrb.mxu1 %v9608_v9  ;;  %7947 = vmatpush.bf16.msrb.mxu2 %v9736_v10  ;;  %v12412_v9 = vld [vmem:[%s14081_s11 + $0x644] sm:$0xf]  ;;  %v9813_v10 = vld [vmem:[%s14081_s11 + $0x650] sm:$0xf0]  ;;  %v7683_v14 = vpop.f32.mrf.mxu1  ;;  %v9688_v24 = vor.u32 %v12380_v6, %v9685_v7 }
 0x29f   : > { %7960 = vmatpush.bf16.msrb.mxu3 %v9864_v15  ;;  %v14689_v15 = vadd.f32 %v7707_v8, %v7695_v59  ;;  %v9413_v27 = vld [vmem:[%s14081_s11 + $0x330] sm:$0xf0]  ;;  %v9816_v36 = vor.u32 %v12412_v9, %v9813_v10  ;;  %v12308_v47 = vld [vmem:[%s14081_s11 + $0x304] sm:$0xf] }
 0x2a0   : > { %7922 = vmatpush.bf16.msrb.mxu0 %v9464_v39  ;;  %v9541_v37 = vld [vmem:[%s14081_s11 + $0x430] sm:$0xf0]  ;;  %v12376_v39 = vld [vmem:[%s14081_s11 + $0x524] sm:$0xf]  ;;  %v9416_v46 = vor.u32 %v12312_v26, %v9413_v27 }
 0x2a1   : > { %v9669_v40 = vld [vmem:[%s14081_s11 + $0x530] sm:$0xf0]  ;;  %v12340_v52 = vld [vmem:[%s14081_s11 + $0x404] sm:$0xf] }
 0x2a2   : > { %7935 = vmatpush.bf16.msrb.mxu1 %v9592_v41  ;;  %7948 = vmatpush.bf16.msrb.mxu2 %v9720_v42  ;;  %v12408_v41 = vld [vmem:[%s14081_s11 + $0x624] sm:$0xf]  ;;  %v9797_v42 = vld [vmem:[%s14081_s11 + $0x630] sm:$0xf0]  ;;  %v9672_v51 = vor.u32 %v12376_v39, %v9669_v40 }
 0x2a3   : > { %7961 = vmatpush.bf16.msrb.mxu3 %v9848_v49  ;;  %v9397_v48 = vld [vmem:[%s14081_s11 + $0x310] sm:$0xf0]  ;;  %v9544_v49 = vor.u32 %v12344_v35, %v9541_v37  ;;  %v12372_v38 = vld [vmem:[%s14081_s11 + $0x504] sm:$0xf]  ;;  %v9800_v54 = vor.u32 %v12408_v41, %v9797_v42 }
 0x2a4   : > { %7923 = vmatpush.bf16.msrb.mxu0 %v9448_v56  ;;  %v9525_v53 = vld [vmem:[%s14081_s11 + $0x410] sm:$0xf0]  ;;  %v12404_v56 = vld [vmem:[%s14081_s11 + $0x604] sm:$0xf]  ;;  %v9400_v4 = vor.u32 %v12308_v47, %v9397_v48 }
 0x2a5   : > { %v9653_v55 = vld [vmem:[%s14081_s11 + $0x510] sm:$0xf0]  ;;  %v12464_v60 = vld [vmem:[%s14081_s11 + $0x7e4] sm:$0xf]  ;;  %v9528_v59 = vor.u32 %v12340_v52, %v9525_v53 }
 0x2a6   : > { %7936 = vmatpush.bf16.msrb.mxu1 %v9576_v57  ;;  %7949 = vmatpush.bf16.msrb.mxu2 %v9704_v58  ;;  %v9781_v57 = vld [vmem:[%s14081_s11 + $0x610] sm:$0xf0]  ;;  %v7696_v58 = vpop.f32.mrf.mxu2  ;;  %v12496_v2 = vld [vmem:[%s14081_s11 + $0x8e4] sm:$0xf]  ;;  %v9656_v8 = vor.u32 %v12372_v38, %v9653_v55 }
 0x2a7   : > { %7962 = vmatpush.bf16.msrb.mxu3 %v9832_v3  ;;  %v10021_v61 = vld [vmem:[%s14081_s11 + $0x7f0] sm:$0xf0]  ;;  %v7709_v3 = vpop.f32.mrf.mxu3  ;;  %v12528_v6 = vld [vmem:[%s14081_s11 + $0x9e4] sm:$0xf]  ;;  %v9784_v11 = vor.u32 %v12404_v56, %v9781_v57 }
 0x2a8   : > { %7924 = vmatpush.bf16.msrb.mxu0 %v9432_v13  ;;  %v10149_v5 = vld [vmem:[%s14081_s11 + $0x8f0] sm:$0xf0]  ;;  %v12560_v9 = vld [vmem:[%s14081_s11 + $0xae4] sm:$0xf]  ;;  %v10024_v13 = vor.u32 %v12464_v60, %v10021_v61 }
 0x2a9   : > { %v10277_v7 = vld [vmem:[%s14081_s11 + $0x9f0] sm:$0xf0]  ;;  %v10152_v14 = vor.u32 %v12496_v2, %v10149_v5  ;;  %v12492_v27 = vld [vmem:[%s14081_s11 + $0x8c4] sm:$0xf] }
 0x2aa   : > { %7937 = vmatpush.bf16.msrb.mxu1 %v9560_v19  ;;  %7950 = vmatpush.bf16.msrb.mxu2 %v9688_v24  ;;  %v10405_v10 = vld [vmem:[%s14081_s11 + $0xaf0] sm:$0xf0]  ;;  %v10280_v19 = vor.u32 %v12528_v6, %v10277_v7  ;;  %v12460_v24 = vld [vmem:[%s14081_s11 + $0x7c4] sm:$0xf] }
 0x2ab   : > { %7963 = vmatpush.bf16.msrb.mxu3 %v9816_v36  ;;  %v10005_v26 = vld [vmem:[%s14081_s11 + $0x7d0] sm:$0xf0]  ;;  %v10408_v35 = vor.u32 %v12560_v9, %v10405_v10  ;;  %v12524_v37 = vld [vmem:[%s14081_s11 + $0x9c4] sm:$0xf] }
 0x2ac   : > { %7925 = vmatpush.bf16.msrb.mxu0 %v9416_v46  ;;  %v10133_v36 = vld [vmem:[%s14081_s11 + $0x8d0] sm:$0xf0]  ;;  %v12556_v40 = vld [vmem:[%s14081_s11 + $0xac4] sm:$0xf]  ;;  %v10008_v42 = vor.u32 %v12460_v24, %v10005_v26 }
 0x2ad   : > { %v10261_v39 = vld [vmem:[%s14081_s11 + $0x9d0] sm:$0xf0]  ;;  %v10136_v46 = vor.u32 %v12492_v27, %v10133_v36  ;;  %v12456_v48 = vld [vmem:[%s14081_s11 + $0x7a4] sm:$0xf] }
 0x2ae   : > { %7938 = vmatpush.bf16.msrb.mxu1 %v9544_v49  ;;  %7951 = vmatpush.bf16.msrb.mxu2 %v9672_v51  ;;  %v10389_v41 = vld [vmem:[%s14081_s11 + $0xad0] sm:$0xf0]  ;;  %v10264_v47 = vor.u32 %v12524_v37, %v10261_v39  ;;  %v12488_v51 = vld [vmem:[%s14081_s11 + $0x8a4] sm:$0xf] }
 0x2af   : > { %7964 = vmatpush.bf16.msrb.mxu3 %v9800_v54  ;;  %v9989_v49 = vld [vmem:[%s14081_s11 + $0x7b0] sm:$0xf0]  ;;  %v10392_v52 = vor.u32 %v12556_v40, %v10389_v41  ;;  %v12520_v38 = vld [vmem:[%s14081_s11 + $0x9a4] sm:$0xf] }
 0x2b0   : > { %7926 = vmatpush.bf16.msrb.mxu0 %v9400_v4  ;;  %v10117_v53 = vld [vmem:[%s14081_s11 + $0x8b0] sm:$0xf0]  ;;  %v12552_v55 = vld [vmem:[%s14081_s11 + $0xaa4] sm:$0xf]  ;;  %v9992_v57 = vor.u32 %v12456_v48, %v9989_v49 }
 0x2b1   : > { %v10245_v54 = vld [vmem:[%s14081_s11 + $0x9b0] sm:$0xf0]  ;;  %v10120_v58 = vor.u32 %v12488_v51, %v10117_v53  ;;  %v12452_v61 = vld [vmem:[%s14081_s11 + $0x784] sm:$0xf] }
 0x2b2   : > { %7939 = vmatpush.bf16.msrb.mxu1 %v9528_v59  ;;  %7952 = vmatpush.bf16.msrb.mxu2 %v9656_v8  ;;  %v10373_v56 = vld [vmem:[%s14081_s11 + $0xab0] sm:$0xf0]  ;;  %v10248_v60 = vor.u32 %v12520_v38, %v10245_v54  ;;  %v12484_v3 = vld [vmem:[%s14081_s11 + $0x884] sm:$0xf]  ;;  %v7720_v59 = vpop.f32.mrf.mxu0 }
 0x2b3   : > { %7965 = vmatpush.bf16.msrb.mxu3 %v9784_v11  ;;  %7927 = vmatmul.bf16.vlgmr.msrb.gmra.mxu0 %v14195_v45  ;;  %v9973_v2 = vld [vmem:[%s14081_s11 + $0x790] sm:$0xf0]  ;;  %v10376_v4 = vor.u32 %v12552_v55, %v10373_v56  ;;  %v12516_v6 = vld [vmem:[%s14081_s11 + $0x984] sm:$0xf]  ;;  %v7721_v10 = vadd.f32 %v7720_v59, %v14689_v15 }
 0x2b4   : > { %7971 = vmatpush.bf16.msra.mxu0 %v10024_v13  ;;  %v10101_v5 = vld [vmem:[%s14081_s11 + $0x890] sm:$0xf0]  ;;  %v12548_v8 = vld [vmem:[%s14081_s11 + $0xa84] sm:$0xf]  ;;  %v9976_v11 = vor.u32 %v12452_v61, %v9973_v2  ;;  %v7733_v13 = vpop.f32.mrf.mxu1 }
 0x2b5   : > { %7953 = vmatmul.bf16.vlgmr.msrb.gmra.mxu2 %v14233_v18  ;;  %7940 = vmatmul.bf16.vlgmr.msrb.gmra.mxu1 %v14229_v16  ;;  %v10229_v7 = vld [vmem:[%s14081_s11 + $0x990] sm:$0xf0]  ;;  %v12448_v24 = vld [vmem:[%s14081_s11 + $0x764] sm:$0xf]  ;;  %v7734_v36 = vadd.f32 %v7733_v13, %v7721_v10 }
 0x2b6   : > { %7984 = vmatpush.bf16.msra.mxu1 %v10152_v14  ;;  %7997 = vmatpush.bf16.msra.mxu2 %v10280_v19  ;;  %v10357_v9 = vld [vmem:[%s14081_s11 + $0xa90] sm:$0xf0]  ;;  %v10104_v14 = vor.u32 %v12484_v3, %v10101_v5  ;;  %v10232_v19 = vor.u32 %v12516_v6, %v10229_v7  ;;  %v12480_v27 = vld [vmem:[%s14081_s11 + $0x864] sm:$0xf]  ;;  %v7746_v53 = vpop.f32.mrf.mxu2 }
 0x2b7   : > { %8010 = vmatpush.bf16.msra.mxu3 %v10408_v35  ;;  %v9957_v26 = vld [vmem:[%s14081_s11 + $0x770] sm:$0xf0]  ;;  %v10360_v35 = vor.u32 %v12548_v8, %v10357_v9  ;;  %v12512_v39 = vld [vmem:[%s14081_s11 + $0x964] sm:$0xf]  ;;  %v7747_v56 = vadd.f32 %v7746_v53, %v7734_v36 }
 0x2b8   : > { %7966 = vmatmul.bf16.vlgmr.msrb.gmra.mxu3 %v14224_v12  ;;  %7972 = vmatpush.bf16.msra.mxu0 %v10008_v42  ;;  %v10085_v37 = vld [vmem:[%s14081_s11 + $0x870] sm:$0xf0]  ;;  %v12544_v40 = vld [vmem:[%s14081_s11 + $0xa64] sm:$0xf]  ;;  %v9960_v42 = vor.u32 %v12448_v24, %v9957_v26 }
 0x2b9   : > { %v10213_v15 = vld [vmem:[%s14081_s11 + $0x970] sm:$0xf0]  ;;  %v12444_v48 = vld [vmem:[%s14081_s11 + $0x744] sm:$0xf] }
 0x2ba   : > { %7985 = vmatpush.bf16.msra.mxu1 %v10136_v46  ;;  %7998 = vmatpush.bf16.msra.mxu2 %v10264_v47  ;;  %v10341_v41 = vld [vmem:[%s14081_s11 + $0xa70] sm:$0xf0]  ;;  %v10088_v46 = vor.u32 %v12480_v27, %v10085_v37  ;;  %v10216_v47 = vor.u32 %v12512_v39, %v10213_v15  ;;  %v12476_v51 = vld [vmem:[%s14081_s11 + $0x844] sm:$0xf]  ;;  %v7722_v61 = vpop.f32.mrf.mxu0 }
 0x2bb   : > { %8011 = vmatpush.bf16.msra.mxu3 %v10392_v52  ;;  %v9941_v49 = vld [vmem:[%s14081_s11 + $0x750] sm:$0xf0]  ;;  %v10344_v52 = vor.u32 %v12544_v40, %v10341_v41  ;;  %v12508_v54 = vld [vmem:[%s14081_s11 + $0x944] sm:$0xf] }
 0x2bc   : > { %7973 = vmatpush.bf16.msra.mxu0 %v9992_v57  ;;  %v10069_v38 = vld [vmem:[%s14081_s11 + $0x850] sm:$0xf0]  ;;  %v7759_v57 = vpop.f32.mrf.mxu3  ;;  %v9944_v2 = vor.u32 %v12444_v48, %v9941_v49  ;;  %v7735_v3 = vpop.f32.mrf.mxu1  ;;  %v12440_v7 = vld [vmem:[%s14081_s11 + $0x724] sm:$0xf] }
 0x2bd   : > { %v10197_v55 = vld [vmem:[%s14081_s11 + $0x950] sm:$0xf0]  ;;  %v10072_v5 = vor.u32 %v12476_v51, %v10069_v38  ;;  %v12472_v8 = vld [vmem:[%s14081_s11 + $0x824] sm:$0xf] }
 0x2be   : > { %7986 = vmatpush.bf16.msra.mxu1 %v10120_v58  ;;  %7999 = vmatpush.bf16.msra.mxu2 %v10248_v60  ;;  %v12540_v58 = vld [vmem:[%s14081_s11 + $0xa44] sm:$0xf]  ;;  %v10325_v60 = vld [vmem:[%s14081_s11 + $0xa50] sm:$0xf0]  ;;  %v10200_v6 = vor.u32 %v12508_v54, %v10197_v55 }
 0x2bf   : > { %8012 = vmatpush.bf16.msra.mxu3 %v10376_v4  ;;  %v14760_v4 = vadd.f32 %v7759_v57, %v7747_v56  ;;  %v9925_v59 = vld [vmem:[%s14081_s11 + $0x730] sm:$0xf0]  ;;  %v10328_v9 = vor.u32 %v12540_v58, %v10325_v60  ;;  %v12436_v26 = vld [vmem:[%s14081_s11 + $0x704] sm:$0xf] }
 0x2c0   : > { %7974 = vmatpush.bf16.msra.mxu0 %v9976_v11  ;;  %v10053_v10 = vld [vmem:[%s14081_s11 + $0x830] sm:$0xf0]  ;;  %v12504_v11 = vld [vmem:[%s14081_s11 + $0x924] sm:$0xf]  ;;  %v9928_v24 = vor.u32 %v12440_v7, %v9925_v59 }
 0x2c1   : > { %v10181_v13 = vld [vmem:[%s14081_s11 + $0x930] sm:$0xf0]  ;;  %v12468_v37 = vld [vmem:[%s14081_s11 + $0x804] sm:$0xf] }
 0x2c2   : > { %7987 = vmatpush.bf16.msra.mxu1 %v10104_v14  ;;  %8000 = vmatpush.bf16.msra.mxu2 %v10232_v19  ;;  %v12536_v14 = vld [vmem:[%s14081_s11 + $0xa24] sm:$0xf]  ;;  %v10309_v19 = vld [vmem:[%s14081_s11 + $0xa30] sm:$0xf0]  ;;  %v10184_v36 = vor.u32 %v12504_v11, %v10181_v13 }
 0x2c3   : > { %8013 = vmatpush.bf16.msra.mxu3 %v10360_v35  ;;  %v9909_v27 = vld [vmem:[%s14081_s11 + $0x710] sm:$0xf0]  ;;  %v10056_v35 = vor.u32 %v12472_v8, %v10053_v10  ;;  %v12500_v15 = vld [vmem:[%s14081_s11 + $0x904] sm:$0xf]  ;;  %v10312_v40 = vor.u32 %v12536_v14, %v10309_v19 }
 0x2c4   : > { %7975 = vmatpush.bf16.msra.mxu0 %v9960_v42  ;;  %v10037_v39 = vld [vmem:[%s14081_s11 + $0x810] sm:$0xf0]  ;;  %v12532_v42 = vld [vmem:[%s14081_s11 + $0xa04] sm:$0xf]  ;;  %v9912_v53 = vor.u32 %v12436_v26, %v9909_v27 }
 0x2c5   : > { %v10165_v41 = vld [vmem:[%s14081_s11 + $0x910] sm:$0xf0]  ;;  %v12592_v48 = vld [vmem:[%s14081_s11 + $0xbe4] sm:$0xf]  ;;  %v10040_v56 = vor.u32 %v12468_v37, %v10037_v39 }
 0x2c6   : > { %7988 = vmatpush.bf16.msra.mxu1 %v10088_v46  ;;  %8001 = vmatpush.bf16.msra.mxu2 %v10216_v47  ;;  %v10293_v46 = vld [vmem:[%s14081_s11 + $0xa10] sm:$0xf0]  ;;  %v7748_v47 = vpop.f32.mrf.mxu2  ;;  %v12624_v51 = vld [vmem:[%s14081_s11 + $0xce4] sm:$0xf]  ;;  %v10168_v57 = vor.u32 %v12500_v15, %v10165_v41 }
 0x2c7   : > { %8014 = vmatpush.bf16.msra.mxu3 %v10344_v52  ;;  %v10533_v49 = vld [vmem:[%s14081_s11 + $0xbf0] sm:$0xf0]  ;;  %v7761_v52 = vpop.f32.mrf.mxu3  ;;  %v12656_v54 = vld [vmem:[%s14081_s11 + $0xde4] sm:$0xf]  ;;  %v10296_v61 = vor.u32 %v12532_v42, %v10293_v46 }
 0x2c8   : > { %7976 = vmatpush.bf16.msra.mxu0 %v9944_v2  ;;  %v10661_v38 = vld [vmem:[%s14081_s11 + $0xcf0] sm:$0xf0]  ;;  %v12688_v58 = vld [vmem:[%s14081_s11 + $0xee4] sm:$0xf]  ;;  %v10536_v2 = vor.u32 %v12592_v48, %v10533_v49 }
 0x2c9   : > { %v10789_v55 = vld [vmem:[%s14081_s11 + $0xdf0] sm:$0xf0]  ;;  %v10664_v3 = vor.u32 %v12624_v51, %v10661_v38  ;;  %v12620_v59 = vld [vmem:[%s14081_s11 + $0xcc4] sm:$0xf] }
 0x2ca   : > { %7989 = vmatpush.bf16.msra.mxu1 %v10072_v5  ;;  %8002 = vmatpush.bf16.msra.mxu2 %v10200_v6  ;;  %v10917_v60 = vld [vmem:[%s14081_s11 + $0xef0] sm:$0xf0]  ;;  %v10792_v5 = vor.u32 %v12656_v54, %v10789_v55  ;;  %v12588_v6 = vld [vmem:[%s14081_s11 + $0xbc4] sm:$0xf] }
 0x2cb   : > { %8015 = vmatpush.bf16.msra.mxu3 %v10328_v9  ;;  %v10517_v7 = vld [vmem:[%s14081_s11 + $0xbd0] sm:$0xf0]  ;;  %v10920_v8 = vor.u32 %v12688_v58, %v10917_v60  ;;  %v12652_v10 = vld [vmem:[%s14081_s11 + $0xdc4] sm:$0xf] }
 0x2cc   : > { %7977 = vmatpush.bf16.msra.mxu0 %v9928_v24  ;;  %v10645_v9 = vld [vmem:[%s14081_s11 + $0xcd0] sm:$0xf0]  ;;  %v12684_v13 = vld [vmem:[%s14081_s11 + $0xec4] sm:$0xf]  ;;  %v10520_v19 = vor.u32 %v12588_v6, %v10517_v7 }
 0x2cd   : > { %v10773_v11 = vld [vmem:[%s14081_s11 + $0xdd0] sm:$0xf0]  ;;  %v10648_v24 = vor.u32 %v12620_v59, %v10645_v9  ;;  %v12584_v27 = vld [vmem:[%s14081_s11 + $0xba4] sm:$0xf] }
 0x2ce   : > { %7990 = vmatpush.bf16.msra.mxu1 %v10056_v35  ;;  %8003 = vmatpush.bf16.msra.mxu2 %v10184_v36  ;;  %v10901_v14 = vld [vmem:[%s14081_s11 + $0xed0] sm:$0xf0]  ;;  %v10776_v26 = vor.u32 %v12652_v10, %v10773_v11  ;;  %v12616_v36 = vld [vmem:[%s14081_s11 + $0xca4] sm:$0xf] }
 0x2cf   : > { %8016 = vmatpush.bf16.msra.mxu3 %v10312_v40  ;;  %v10501_v35 = vld [vmem:[%s14081_s11 + $0xbb0] sm:$0xf0]  ;;  %v10904_v37 = vor.u32 %v12684_v13, %v10901_v14  ;;  %v12648_v15 = vld [vmem:[%s14081_s11 + $0xda4] sm:$0xf] }
 0x2d0   : > { %7978 = vmatpush.bf16.msra.mxu0 %v9912_v53  ;;  %v10629_v39 = vld [vmem:[%s14081_s11 + $0xcb0] sm:$0xf0]  ;;  %v12680_v41 = vld [vmem:[%s14081_s11 + $0xea4] sm:$0xf]  ;;  %v10504_v46 = vor.u32 %v12584_v27, %v10501_v35 }
 0x2d1   : > { %v10757_v40 = vld [vmem:[%s14081_s11 + $0xdb0] sm:$0xf0]  ;;  %v10632_v47 = vor.u32 %v12616_v36, %v10629_v39  ;;  %v12580_v49 = vld [vmem:[%s14081_s11 + $0xb84] sm:$0xf] }
 0x2d2   : > { %7991 = vmatpush.bf16.msra.mxu1 %v10040_v56  ;;  %8004 = vmatpush.bf16.msra.mxu2 %v10168_v57  ;;  %v10885_v42 = vld [vmem:[%s14081_s11 + $0xeb0] sm:$0xf0]  ;;  %v10760_v48 = vor.u32 %v12648_v15, %v10757_v40  ;;  %v12612_v52 = vld [vmem:[%s14081_s11 + $0xc84] sm:$0xf]  ;;  %v7772_v56 = vpop.f32.mrf.mxu0 }
 0x2d3   : > { %8017 = vmatpush.bf16.msra.mxu3 %v10296_v61  ;;  %7979 = vmatmul.bf16.vlgmr.msra.gmra.mxu0 %v14231_v17  ;;  %v10485_v51 = vld [vmem:[%s14081_s11 + $0xb90] sm:$0xf0]  ;;  %v10888_v53 = vor.u32 %v12680_v41, %v10885_v42  ;;  %v12644_v54 = vld [vmem:[%s14081_s11 + $0xd84] sm:$0xf]  ;;  %v7773_v60 = vadd.f32 %v7772_v56, %v14760_v4 }
 0x2d4   : > { %8023 = vmatpush.bf16.msrb.mxu0 %v10536_v2  ;;  %v10613_v38 = vld [vmem:[%s14081_s11 + $0xc90] sm:$0xf0]  ;;  %v12676_v57 = vld [vmem:[%s14081_s11 + $0xe84] sm:$0xf]  ;;  %v10488_v61 = vor.u32 %v12580_v49, %v10485_v51 }
 0x2d5   : > { %8005 = vmatmul.bf16.vlgmr.msra.gmra.mxu2 %v14325_v32  ;;  %7992 = vmatmul.bf16.vlgmr.msra.gmra.mxu1 %v14319_v28  ;;  %v10741_v55 = vld [vmem:[%s14081_s11 + $0xd90] sm:$0xf0]  ;;  %v12576_v6 = vld [vmem:[%s14081_s11 + $0xb64] sm:$0xf] }
 0x2d6   : > { %8036 = vmatpush.bf16.msrb.mxu1 %v10664_v3  ;;  %8049 = vmatpush.bf16.msrb.mxu2 %v10792_v5  ;;  %v10869_v58 = vld [vmem:[%s14081_s11 + $0xe90] sm:$0xf0]  ;;  %v7785_v2 = vpop.f32.mrf.mxu1  ;;  %v10616_v3 = vor.u32 %v12612_v52, %v10613_v38  ;;  %v10744_v5 = vor.u32 %v12644_v54, %v10741_v55  ;;  %v12608_v59 = vld [vmem:[%s14081_s11 + $0xc64] sm:$0xf] }
 0x2d7   : > { %8062 = vmatpush.bf16.msrb.mxu3 %v10920_v8  ;;  %v10469_v7 = vld [vmem:[%s14081_s11 + $0xb70] sm:$0xf0]  ;;  %v10872_v8 = vor.u32 %v12676_v57, %v10869_v58  ;;  %v7786_v9 = vadd.f32 %v7785_v2, %v7773_v60  ;;  %v12640_v11 = vld [vmem:[%s14081_s11 + $0xd64] sm:$0xf] }
 0x2d8   : > { %8018 = vmatmul.bf16.vlgmr.msra.gmra.mxu3 %v14323_v31  ;;  %8024 = vmatpush.bf16.msrb.mxu0 %v10520_v19  ;;  %v10597_v10 = vld [vmem:[%s14081_s11 + $0xc70] sm:$0xf0]  ;;  %v12672_v13 = vld [vmem:[%s14081_s11 + $0xe64] sm:$0xf]  ;;  %v10472_v19 = vor.u32 %v12576_v6, %v10469_v7 }
 0x2d9   : > { %v10725_v4 = vld [vmem:[%s14081_s11 + $0xd70] sm:$0xf0]  ;;  %v12572_v27 = vld [vmem:[%s14081_s11 + $0xb44] sm:$0xf] }
 0x2da   : > { %8037 = vmatpush.bf16.msrb.mxu1 %v10648_v24  ;;  %8050 = vmatpush.bf16.msrb.mxu2 %v10776_v26  ;;  %v10853_v14 = vld [vmem:[%s14081_s11 + $0xe70] sm:$0xf0]  ;;  %v10600_v24 = vor.u32 %v12608_v59, %v10597_v10  ;;  %v10728_v26 = vor.u32 %v12640_v11, %v10725_v4  ;;  %v12604_v36 = vld [vmem:[%s14081_s11 + $0xc44] sm:$0xf]  ;;  %v7774_v49 = vpop.f32.mrf.mxu0 }
 0x2db   : > { %8063 = vmatpush.bf16.msrb.mxu3 %v10904_v37  ;;  %v10453_v35 = vld [vmem:[%s14081_s11 + $0xb50] sm:$0xf0]  ;;  %v10856_v37 = vor.u32 %v12672_v13, %v10853_v14  ;;  %v7798_v39 = vpop.f32.mrf.mxu2  ;;  %v12636_v40 = vld [vmem:[%s14081_s11 + $0xd44] sm:$0xf] }
 0x2dc   : > { %8025 = vmatpush.bf16.msrb.mxu0 %v10504_v46  ;;  %v10581_v15 = vld [vmem:[%s14081_s11 + $0xc50] sm:$0xf0]  ;;  %v7799_v42 = vadd.f32 %v7798_v39, %v7786_v9  ;;  %v7811_v46 = vpop.f32.mrf.mxu3  ;;  %v10456_v51 = vor.u32 %v12572_v27, %v10453_v35  ;;  %v12568_v55 = vld [vmem:[%s14081_s11 + $0xb24] sm:$0xf] }
 0x2dd   : > { %v10709_v41 = vld [vmem:[%s14081_s11 + $0xd50] sm:$0xf0]  ;;  %v10584_v38 = vor.u32 %v12604_v36, %v10581_v15  ;;  %v12600_v57 = vld [vmem:[%s14081_s11 + $0xc24] sm:$0xf] }
 0x2de   : > { %8038 = vmatpush.bf16.msrb.mxu1 %v10632_v47  ;;  %8051 = vmatpush.bf16.msrb.mxu2 %v10760_v48  ;;  %v12668_v47 = vld [vmem:[%s14081_s11 + $0xe44] sm:$0xf]  ;;  %v10837_v48 = vld [vmem:[%s14081_s11 + $0xe50] sm:$0xf0]  ;;  %v7787_v52 = vpop.f32.mrf.mxu1  ;;  %v10712_v54 = vor.u32 %v12636_v40, %v10709_v41 }
 0x2df   : > { %8064 = vmatpush.bf16.msrb.mxu3 %v10888_v53  ;;  %v14831_v53 = vadd.f32 %v7811_v46, %v7799_v42  ;;  %v10437_v56 = vld [vmem:[%s14081_s11 + $0xb30] sm:$0xf0]  ;;  %v10840_v58 = vor.u32 %v12668_v47, %v10837_v48  ;;  %v12564_v7 = vld [vmem:[%s14081_s11 + $0xb04] sm:$0xf] }
 0x2e0   : > { %8026 = vmatpush.bf16.msrb.mxu0 %v10488_v61  ;;  %v10565_v60 = vld [vmem:[%s14081_s11 + $0xc30] sm:$0xf0]  ;;  %v12632_v61 = vld [vmem:[%s14081_s11 + $0xd24] sm:$0xf]  ;;  %v10440_v6 = vor.u32 %v12568_v55, %v10437_v56 }
 0x2e1   : > { %v10693_v2 = vld [vmem:[%s14081_s11 + $0xd30] sm:$0xf0]  ;;  %v12596_v10 = vld [vmem:[%s14081_s11 + $0xc04] sm:$0xf] }
 0x2e2   : > { %8039 = vmatpush.bf16.msrb.mxu1 %v10616_v3  ;;  %8052 = vmatpush.bf16.msrb.mxu2 %v10744_v5  ;;  %v12664_v3 = vld [vmem:[%s14081_s11 + $0xe24] sm:$0xf]  ;;  %v10821_v5 = vld [vmem:[%s14081_s11 + $0xe30] sm:$0xf0]  ;;  %v10696_v9 = vor.u32 %v12632_v61, %v10693_v2 }
 0x2e3   : > { %8065 = vmatpush.bf16.msrb.mxu3 %v10872_v8  ;;  %v10421_v59 = vld [vmem:[%s14081_s11 + $0xb10] sm:$0xf0]  ;;  %v10568_v8 = vor.u32 %v12600_v57, %v10565_v60  ;;  %v12628_v4 = vld [vmem:[%s14081_s11 + $0xd04] sm:$0xf]  ;;  %v10824_v13 = vor.u32 %v12664_v3, %v10821_v5 }
 0x2e4   : > { %8027 = vmatpush.bf16.msrb.mxu0 %v10472_v19  ;;  %v10549_v11 = vld [vmem:[%s14081_s11 + $0xc10] sm:$0xf0]  ;;  %v12660_v19 = vld [vmem:[%s14081_s11 + $0xe04] sm:$0xf]  ;;  %v10424_v39 = vor.u32 %v12564_v7, %v10421_v59 }
 0x2e5   : > { %v10677_v14 = vld [vmem:[%s14081_s11 + $0xd10] sm:$0xf0]  ;;  %v12720_v27 = vld [vmem:[%s14081_s11 + $0xfe4] sm:$0xf]  ;;  %v10552_v42 = vor.u32 %v12596_v10, %v10549_v11 }
 0x2e6   : > { %8040 = vmatpush.bf16.msrb.mxu1 %v10600_v24  ;;  %8053 = vmatpush.bf16.msrb.mxu2 %v10728_v26  ;;  %v10805_v24 = vld [vmem:[%s14081_s11 + $0xe10] sm:$0xf0]  ;;  %v7800_v26 = vpop.f32.mrf.mxu2  ;;  %v12752_v36 = vld [vmem:[%s14081_s11 + $0x10e4] sm:$0xf]  ;;  %v10680_v46 = vor.u32 %v12628_v4, %v10677_v14 }
 0x2e7   : > { %8066 = vmatpush.bf16.msrb.mxu3 %v10856_v37  ;;  %v11045_v35 = vld [vmem:[%s14081_s11 + $0xff0] sm:$0xf0]  ;;  %v7813_v37 = vpop.f32.mrf.mxu3  ;;  %v12784_v40 = vld [vmem:[%s14081_s11 + $0x11e4] sm:$0xf]  ;;  %v10808_v49 = vor.u32 %v12660_v19, %v10805_v24 }
 0x2e8   : > { %8028 = vmatpush.bf16.msrb.mxu0 %v10456_v51  ;;  %v11173_v15 = vld [vmem:[%s14081_s11 + $0x10f0] sm:$0xf0]  ;;  %v12816_v47 = vld [vmem:[%s14081_s11 + $0x12e4] sm:$0xf]  ;;  %v11048_v51 = vor.u32 %v12720_v27, %v11045_v35 }
 0x2e9   : > { %v11301_v41 = vld [vmem:[%s14081_s11 + $0x11f0] sm:$0xf0]  ;;  %v11176_v52 = vor.u32 %v12752_v36, %v11173_v15  ;;  %v12748_v56 = vld [vmem:[%s14081_s11 + $0x10c4] sm:$0xf] }
 0x2ea   : > { %8041 = vmatpush.bf16.msrb.mxu1 %v10584_v38  ;;  %8054 = vmatpush.bf16.msrb.mxu2 %v10712_v54  ;;  %v11429_v48 = vld [vmem:[%s14081_s11 + $0x12f0] sm:$0xf0]  ;;  %v11304_v38 = vor.u32 %v12784_v40, %v11301_v41  ;;  %v12716_v54 = vld [vmem:[%s14081_s11 + $0xfc4] sm:$0xf] }
 0x2eb   : > { %8067 = vmatpush.bf16.msrb.mxu3 %v10840_v58  ;;  %v11029_v55 = vld [vmem:[%s14081_s11 + $0xfd0] sm:$0xf0]  ;;  %v11432_v57 = vor.u32 %v12816_v47, %v11429_v48  ;;  %v12780_v60 = vld [vmem:[%s14081_s11 + $0x11c4] sm:$0xf] }
 0x2ec   : > { %8029 = vmatpush.bf16.msrb.mxu0 %v10440_v6  ;;  %v11157_v58 = vld [vmem:[%s14081_s11 + $0x10d0] sm:$0xf0]  ;;  %v12812_v2 = vld [vmem:[%s14081_s11 + $0x12c4] sm:$0xf]  ;;  %v11032_v5 = vor.u32 %v12716_v54, %v11029_v55 }
 0x2ed   : > { %v11285_v61 = vld [vmem:[%s14081_s11 + $0x11d0] sm:$0xf0]  ;;  %v11160_v6 = vor.u32 %v12748_v56, %v11157_v58  ;;  %v12712_v59 = vld [vmem:[%s14081_s11 + $0xfa4] sm:$0xf] }
 0x2ee   : > { %8042 = vmatpush.bf16.msrb.mxu1 %v10568_v8  ;;  %8055 = vmatpush.bf16.msrb.mxu2 %v10696_v9  ;;  %v11413_v3 = vld [vmem:[%s14081_s11 + $0x12d0] sm:$0xf0]  ;;  %v11288_v7 = vor.u32 %v12780_v60, %v11285_v61  ;;  %v12744_v9 = vld [vmem:[%s14081_s11 + $0x10a4] sm:$0xf] }
 0x2ef   : > { %8068 = vmatpush.bf16.msrb.mxu3 %v10824_v13  ;;  %v11013_v8 = vld [vmem:[%s14081_s11 + $0xfb0] sm:$0xf0]  ;;  %v11416_v10 = vor.u32 %v12812_v2, %v11413_v3  ;;  %v12776_v4 = vld [vmem:[%s14081_s11 + $0x11a4] sm:$0xf] }
 0x2f0   : > { %8030 = vmatpush.bf16.msrb.mxu0 %v10424_v39  ;;  %v11141_v11 = vld [vmem:[%s14081_s11 + $0x10b0] sm:$0xf0]  ;;  %v12808_v14 = vld [vmem:[%s14081_s11 + $0x12a4] sm:$0xf]  ;;  %v11016_v24 = vor.u32 %v12712_v59, %v11013_v8 }
 0x2f1   : > { %v11269_v13 = vld [vmem:[%s14081_s11 + $0x11b0] sm:$0xf0]  ;;  %v11144_v26 = vor.u32 %v12744_v9, %v11141_v11  ;;  %v12708_v35 = vld [vmem:[%s14081_s11 + $0xf84] sm:$0xf] }
 0x2f2   : > { %8043 = vmatpush.bf16.msrb.mxu1 %v10552_v42  ;;  %8056 = vmatpush.bf16.msrb.mxu2 %v10680_v46  ;;  %v11397_v19 = vld [vmem:[%s14081_s11 + $0x12b0] sm:$0xf0]  ;;  %v11272_v27 = vor.u32 %v12776_v4, %v11269_v13  ;;  %v12740_v37 = vld [vmem:[%s14081_s11 + $0x1084] sm:$0xf]  ;;  %v7824_v42 = vpop.f32.mrf.mxu0 }
 0x2f3   : > { %8069 = vmatpush.bf16.msrb.mxu3 %v10808_v49  ;;  %8031 = vmatmul.bf16.vlgmr.msrb.gmra.mxu0 %v14327_v33  ;;  %v10997_v36 = vld [vmem:[%s14081_s11 + $0xf90] sm:$0xf0]  ;;  %v11400_v39 = vor.u32 %v12808_v14, %v11397_v19  ;;  %v12772_v40 = vld [vmem:[%s14081_s11 + $0x1184] sm:$0xf]  ;;  %v7825_v48 = vadd.f32 %v7824_v42, %v14831_v53 }
 0x2f4   : > { %8075 = vmatpush.bf16.msra.mxu0 %v11048_v51  ;;  %v11125_v15 = vld [vmem:[%s14081_s11 + $0x1090] sm:$0xf0]  ;;  %v12804_v46 = vld [vmem:[%s14081_s11 + $0x1284] sm:$0xf]  ;;  %v11000_v49 = vor.u32 %v12708_v35, %v10997_v36  ;;  %v7837_v51 = vpop.f32.mrf.mxu1 }
 0x2f5   : > { %8057 = vmatmul.bf16.vlgmr.msrb.gmra.mxu2 %v14389_v0  ;;  %8044 = vmatmul.bf16.vlgmr.msrb.gmra.mxu1 %v14385_v62  ;;  %v11253_v41 = vld [vmem:[%s14081_s11 + $0x1190] sm:$0xf0]  ;;  %v12704_v54 = vld [vmem:[%s14081_s11 + $0xf64] sm:$0xf]  ;;  %v7838_v58 = vadd.f32 %v7837_v51, %v7825_v48 }
 0x2f6   : > { %8088 = vmatpush.bf16.msra.mxu1 %v11176_v52  ;;  %8101 = vmatpush.bf16.msra.mxu2 %v11304_v38  ;;  %v11381_v47 = vld [vmem:[%s14081_s11 + $0x1290] sm:$0xf0]  ;;  %v11128_v52 = vor.u32 %v12740_v37, %v11125_v15  ;;  %v11256_v38 = vor.u32 %v12772_v40, %v11253_v41  ;;  %v12736_v56 = vld [vmem:[%s14081_s11 + $0x1064] sm:$0xf] }
 0x2f7   : > { %8114 = vmatpush.bf16.msra.mxu3 %v11432_v57  ;;  %v10981_v55 = vld [vmem:[%s14081_s11 + $0xf70] sm:$0xf0]  ;;  %v11384_v57 = vor.u32 %v12804_v46, %v11381_v47  ;;  %v12768_v61 = vld [vmem:[%s14081_s11 + $0x1164] sm:$0xf] }
 0x2f8   : > { %8070 = vmatmul.bf16.vlgmr.msrb.gmra.mxu3 %v14387_v63  ;;  %8076 = vmatpush.bf16.msra.mxu0 %v11032_v5  ;;  %v11109_v60 = vld [vmem:[%s14081_s11 + $0x1070] sm:$0xf0]  ;;  %v12800_v2 = vld [vmem:[%s14081_s11 + $0x1264] sm:$0xf]  ;;  %v10984_v5 = vor.u32 %v12704_v54, %v10981_v55  ;;  %v7850_v11 = vpop.f32.mrf.mxu2 }
 0x2f9   : > { %v11237_v53 = vld [vmem:[%s14081_s11 + $0x1170] sm:$0xf0]  ;;  %v12700_v59 = vld [vmem:[%s14081_s11 + $0xf44] sm:$0xf]  ;;  %v7851_v19 = vadd.f32 %v7850_v11, %v7838_v58 }
 0x2fa   : > { %8089 = vmatpush.bf16.msra.mxu1 %v11160_v6  ;;  %8102 = vmatpush.bf16.msra.mxu2 %v11288_v7  ;;  %v11365_v3 = vld [vmem:[%s14081_s11 + $0x1270] sm:$0xf0]  ;;  %v11112_v6 = vor.u32 %v12736_v56, %v11109_v60  ;;  %v11240_v7 = vor.u32 %v12768_v61, %v11237_v53  ;;  %v12732_v9 = vld [vmem:[%s14081_s11 + $0x1044] sm:$0xf]  ;;  %v7826_v35 = vpop.f32.mrf.mxu0 }
 0x2fb   : > { %8115 = vmatpush.bf16.msra.mxu3 %v11416_v10  ;;  %v10965_v8 = vld [vmem:[%s14081_s11 + $0xf50] sm:$0xf0]  ;;  %v11368_v10 = vor.u32 %v12800_v2, %v11365_v3  ;;  %v12764_v13 = vld [vmem:[%s14081_s11 + $0x1144] sm:$0xf] }
 0x2fc   : > { %8077 = vmatpush.bf16.msra.mxu0 %v11016_v24  ;;  %v11093_v4 = vld [vmem:[%s14081_s11 + $0x1050] sm:$0xf0]  ;;  %v7863_v24 = vpop.f32.mrf.mxu3  ;;  %v10968_v36 = vor.u32 %v12700_v59, %v10965_v8  ;;  %v7839_v37 = vpop.f32.mrf.mxu1  ;;  %v12696_v41 = vld [vmem:[%s14081_s11 + $0xf24] sm:$0xf] }
 0x2fd   : > { %v11221_v14 = vld [vmem:[%s14081_s11 + $0x1150] sm:$0xf0]  ;;  %v11096_v15 = vor.u32 %v12732_v9, %v11093_v4  ;;  %v12728_v46 = vld [vmem:[%s14081_s11 + $0x1024] sm:$0xf] }
 0x2fe   : > { %8090 = vmatpush.bf16.msra.mxu1 %v11144_v26  ;;  %8103 = vmatpush.bf16.msra.mxu2 %v11272_v27  ;;  %v12796_v26 = vld [vmem:[%s14081_s11 + $0x1244] sm:$0xf]  ;;  %v11349_v27 = vld [vmem:[%s14081_s11 + $0x1250] sm:$0xf0]  ;;  %v11224_v40 = vor.u32 %v12764_v13, %v11221_v14 }
 0x2ff   : > { %8116 = vmatpush.bf16.msra.mxu3 %v11400_v39  ;;  %v14902_v39 = vadd.f32 %v7863_v24, %v7851_v19  ;;  %v10949_v42 = vld [vmem:[%s14081_s11 + $0xf30] sm:$0xf0]  ;;  %v11352_v47 = vor.u32 %v12796_v26, %v11349_v27  ;;  %v12692_v55 = vld [vmem:[%s14081_s11 + $0xf04] sm:$0xf] }
 0x300   : > { %8078 = vmatpush.bf16.msra.mxu0 %v11000_v49  ;;  %v11077_v48 = vld [vmem:[%s14081_s11 + $0x1030] sm:$0xf0]  ;;  %v12760_v49 = vld [vmem:[%s14081_s11 + $0x1124] sm:$0xf]  ;;  %v10952_v54 = vor.u32 %v12696_v41, %v10949_v42 }
 0x301   : > { %v11205_v51 = vld [vmem:[%s14081_s11 + $0x1130] sm:$0xf0]  ;;  %v12724_v60 = vld [vmem:[%s14081_s11 + $0x1004] sm:$0xf] }
 0x302   : > { %8091 = vmatpush.bf16.msra.mxu1 %v11128_v52  ;;  %8104 = vmatpush.bf16.msra.mxu2 %v11256_v38  ;;  %v12792_v52 = vld [vmem:[%s14081_s11 + $0x1224] sm:$0xf]  ;;  %v11333_v38 = vld [vmem:[%s14081_s11 + $0x1230] sm:$0xf0]  ;;  %v11208_v58 = vor.u32 %v12760_v49, %v11205_v51 }
 0x303   : > { %8117 = vmatpush.bf16.msra.mxu3 %v11384_v57  ;;  %v10933_v56 = vld [vmem:[%s14081_s11 + $0xf10] sm:$0xf0]  ;;  %v11080_v57 = vor.u32 %v12728_v46, %v11077_v48  ;;  %v12756_v53 = vld [vmem:[%s14081_s11 + $0x1104] sm:$0xf]  ;;  %v11336_v2 = vor.u32 %v12792_v52, %v11333_v38 }
 0x304   : > { %8079 = vmatpush.bf16.msra.mxu0 %v10984_v5  ;;  %v11061_v61 = vld [vmem:[%s14081_s11 + $0x1010] sm:$0xf0]  ;;  %v12788_v5 = vld [vmem:[%s14081_s11 + $0x1204] sm:$0xf]  ;;  %v10936_v11 = vor.u32 %v12692_v55, %v10933_v56 }
 0x305   : > { %v11189_v3 = vld [vmem:[%s14081_s11 + $0x1110] sm:$0xf0]  ;;  %v12848_v59 = vld [vmem:[%s14081_s11 + $0x13e4] sm:$0xf]  ;;  %v11064_v19 = vor.u32 %v12724_v60, %v11061_v61 }
 0x306   : > { %8092 = vmatpush.bf16.msra.mxu1 %v11112_v6  ;;  %8105 = vmatpush.bf16.msra.mxu2 %v11240_v7  ;;  %v11317_v6 = vld [vmem:[%s14081_s11 + $0x1210] sm:$0xf0]  ;;  %v7852_v7 = vpop.f32.mrf.mxu2  ;;  %v12880_v9 = vld [vmem:[%s14081_s11 + $0x14e4] sm:$0xf]  ;;  %v11192_v24 = vor.u32 %v12756_v53, %v11189_v3 }
 0x307   : > { %8118 = vmatpush.bf16.msra.mxu3 %v11368_v10  ;;  %v11557_v8 = vld [vmem:[%s14081_s11 + $0x13f0] sm:$0xf0]  ;;  %v7865_v10 = vpop.f32.mrf.mxu3  ;;  %v12912_v13 = vld [vmem:[%s14081_s11 + $0x15e4] sm:$0xf]  ;;  %v11320_v35 = vor.u32 %v12788_v5, %v11317_v6 }
 0x308   : > { %8080 = vmatpush.bf16.msra.mxu0 %v10968_v36  ;;  %v11685_v4 = vld [vmem:[%s14081_s11 + $0x14f0] sm:$0xf0]  ;;  %v12944_v26 = vld [vmem:[%s14081_s11 + $0x16e4] sm:$0xf]  ;;  %v11560_v36 = vor.u32 %v12848_v59, %v11557_v8 }
 0x309   : > { %v11813_v14 = vld [vmem:[%s14081_s11 + $0x15f0] sm:$0xf0]  ;;  %v11688_v37 = vor.u32 %v12880_v9, %v11685_v4  ;;  %v12876_v42 = vld [vmem:[%s14081_s11 + $0x14c4] sm:$0xf] }
 0x30a   : > { %8093 = vmatpush.bf16.msra.mxu1 %v11096_v15  ;;  %8106 = vmatpush.bf16.msra.mxu2 %v11224_v40  ;;  %v11941_v27 = vld [vmem:[%s14081_s11 + $0x16f0] sm:$0xf0]  ;;  %v11816_v15 = vor.u32 %v12912_v13, %v11813_v14  ;;  %v12844_v40 = vld [vmem:[%s14081_s11 + $0x13c4] sm:$0xf] }
 0x30b   : > { %8119 = vmatpush.bf16.msra.mxu3 %v11352_v47  ;;  %v11541_v41 = vld [vmem:[%s14081_s11 + $0x13d0] sm:$0xf0]  ;;  %v11944_v46 = vor.u32 %v12944_v26, %v11941_v27  ;;  %v12908_v48 = vld [vmem:[%s14081_s11 + $0x15c4] sm:$0xf]  ;;  %v13086_v27 = vld [vmem:[%s14529_s27] sm:$0xf] }
 0x30c   : > { %8081 = vmatpush.bf16.msra.mxu0 %v10952_v54  ;;  %v11669_v47 = vld [vmem:[%s14081_s11 + $0x14d0] sm:$0xf0]  ;;  %v12940_v51 = vld [vmem:[%s14081_s11 + $0x16c4] sm:$0xf]  ;;  %v11544_v38 = vor.u32 %v12844_v40, %v11541_v41 }
 0x30d   : > { %v11797_v49 = vld [vmem:[%s14081_s11 + $0x15d0] sm:$0xf0]  ;;  %v11672_v54 = vor.u32 %v12876_v42, %v11669_v47  ;;  %v12840_v56 = vld [vmem:[%s14081_s11 + $0x13a4] sm:$0xf] }
 0x30e   : > { %8094 = vmatpush.bf16.msra.mxu1 %v11080_v57  ;;  %8107 = vmatpush.bf16.msra.mxu2 %v11208_v58  ;;  %v11925_v52 = vld [vmem:[%s14081_s11 + $0x16d0] sm:$0xf0]  ;;  %v11800_v55 = vor.u32 %v12908_v48, %v11797_v49  ;;  %v12872_v58 = vld [vmem:[%s14081_s11 + $0x14a4] sm:$0xf] }
 0x30f   : > { %8120 = vmatpush.bf16.msra.mxu3 %v11336_v2  ;;  %v11525_v57 = vld [vmem:[%s14081_s11 + $0x13b0] sm:$0xf0]  ;;  %v11928_v60 = vor.u32 %v12940_v51, %v11925_v52  ;;  %v12904_v53 = vld [vmem:[%s14081_s11 + $0x15a4] sm:$0xf] }
 0x310   : > { %8082 = vmatpush.bf16.msra.mxu0 %v10936_v11  ;;  %v11653_v61 = vld [vmem:[%s14081_s11 + $0x14b0] sm:$0xf0]  ;;  %v12936_v3 = vld [vmem:[%s14081_s11 + $0x16a4] sm:$0xf]  ;;  %v11528_v6 = vor.u32 %v12840_v56, %v11525_v57 }
 0x311   : > { %v11781_v2 = vld [vmem:[%s14081_s11 + $0x15b0] sm:$0xf0]  ;;  %v11656_v7 = vor.u32 %v12872_v58, %v11653_v61  ;;  %v12836_v8 = vld [vmem:[%s14081_s11 + $0x1384] sm:$0xf] }
 0x312   : > { %8095 = vmatpush.bf16.msra.mxu1 %v11064_v19  ;;  %8108 = vmatpush.bf16.msra.mxu2 %v11192_v24  ;;  %v11909_v5 = vld [vmem:[%s14081_s11 + $0x16b0] sm:$0xf0]  ;;  %v11784_v59 = vor.u32 %v12904_v53, %v11781_v2  ;;  %v12868_v10 = vld [vmem:[%s14081_s11 + $0x1484] sm:$0xf]  ;;  %v7876_v19 = vpop.f32.mrf.mxu0  ;;  %v7889_v47 = vpop.f32.mrf.mxu1 }
 0x313   : > { %8121 = vmatpush.bf16.msra.mxu3 %v11320_v35  ;;  %8083 = vmatmul.bf16.vlgmr.msra.gmra.mxu0 %v14391_v1  ;;  %v11509_v9 = vld [vmem:[%s14081_s11 + $0x1390] sm:$0xf0]  ;;  %v11912_v11 = vor.u32 %v12936_v3, %v11909_v5  ;;  %v12900_v13 = vld [vmem:[%s14081_s11 + $0x1584] sm:$0xf]  ;;  %v3490_v35 = vperm.slane %v13086_v27, 1 }
 0x314   : > { %8127 = vmatpush.bf16.msrb.mxu0 %v11560_v36  ;;  %v11637_v4 = vld [vmem:[%s14081_s11 + $0x1490] sm:$0xf0]  ;;  %v12932_v24 = vld [vmem:[%s14081_s11 + $0x1684] sm:$0xf]  ;;  %v14958_v36 = vadd.f32 %v7876_v19, %v14902_v39 }
 0x315   : > { %8109 = vmatmul.bf16.vlgmr.msra.gmra.mxu2 %v14480_v30  ;;  %8096 = vmatmul.bf16.vlgmr.msra.gmra.mxu1 %v14474_v25  ;;  %v11765_v14 = vld [vmem:[%s14081_s11 + $0x1590] sm:$0xf0]  ;;  %v12832_v41 = vld [vmem:[%s14081_s11 + $0x1364] sm:$0xf] }
 0x316   : > { %8140 = vmatpush.bf16.msrb.mxu1 %v11688_v37  ;;  %8153 = vmatpush.bf16.msrb.mxu2 %v11816_v15  ;;  %v11893_v26 = vld [vmem:[%s14081_s11 + $0x1690] sm:$0xf0]  ;;  %v11512_v37 = vor.u32 %v12836_v8, %v11509_v9  ;;  %v11640_v15 = vor.u32 %v12868_v10, %v11637_v4  ;;  %v11768_v40 = vor.u32 %v12900_v13, %v11765_v14  ;;  %v12896_v51 = vld [vmem:[%s14081_s11 + $0x1564] sm:$0xf] }
 0x317   : > { %8166 = vmatpush.bf16.msrb.mxu3 %v11944_v46  ;;  %v11493_v42 = vld [vmem:[%s14081_s11 + $0x1370] sm:$0xf0]  ;;  %v12864_v46 = vld [vmem:[%s14081_s11 + $0x1464] sm:$0xf]  ;;  %v11896_v48 = vor.u32 %v12932_v24, %v11893_v26 }
 0x318   : > { %8122 = vmatmul.bf16.vlgmr.msra.gmra.mxu3 %v14478_v29  ;;  %8128 = vmatpush.bf16.msrb.mxu0 %v11544_v38  ;;  %v11621_v49 = vld [vmem:[%s14081_s11 + $0x1470] sm:$0xf0]  ;;  %v12928_v52 = vld [vmem:[%s14081_s11 + $0x1664] sm:$0xf] }
 0x319   : > { %v11749_v39 = vld [vmem:[%s14081_s11 + $0x1570] sm:$0xf0]  ;;  %v11624_v56 = vor.u32 %v12864_v46, %v11621_v49  ;;  %v12828_v58 = vld [vmem:[%s14081_s11 + $0x1344] sm:$0xf] }
 0x31a   : > { %8141 = vmatpush.bf16.msrb.mxu1 %v11672_v54  ;;  %8154 = vmatpush.bf16.msrb.mxu2 %v11800_v55  ;;  %v11877_v38 = vld [vmem:[%s14081_s11 + $0x1670] sm:$0xf0]  ;;  %v7890_v54 = vadd.f32 %v7889_v47, %v3490_v35  ;;  %v11496_v55 = vor.u32 %v12832_v41, %v11493_v42  ;;  %v11752_v57 = vor.u32 %v12896_v51, %v11749_v39  ;;  %v12860_v61 = vld [vmem:[%s14081_s11 + $0x1444] sm:$0xf]  ;;  %v7878_v10 = vpop.f32.mrf.mxu0  ;;  %v7891_v27 = vpop.f32.mrf.mxu1 }
 0x31b   : > { %8167 = vmatpush.bf16.msrb.mxu3 %v11928_v60  ;;  %v11477_v60 = vld [vmem:[%s14081_s11 + $0x1350] sm:$0xf0]  ;;  %v11880_v53 = vor.u32 %v12928_v52, %v11877_v38  ;;  %v12892_v3 = vld [vmem:[%s14081_s11 + $0x1544] sm:$0xf]  ;;  %v12275_v10 = vld [vmem:[%s14081_s11 + $0x1f4] sm:$0xf0] }
 0x31c   : > { %8129 = vmatpush.bf16.msrb.mxu0 %v11528_v6  ;;  %v11605_v2 = vld [vmem:[%s14081_s11 + $0x1450] sm:$0xf0]  ;;  %v7902_v6 = vpop.f32.mrf.mxu2  ;;  %v12824_v14 = vld [vmem:[%s14081_s11 + $0x1324] sm:$0xf] }
 0x31d   : > { %v11733_v5 = vld [vmem:[%s14081_s11 + $0x1550] sm:$0xf0]  ;;  %v7903_v9 = vadd.f32 %v7902_v6, %v7890_v54  ;;  %v11608_v4 = vor.u32 %v12860_v61, %v11605_v2  ;;  %v12856_v24 = vld [vmem:[%s14081_s11 + $0x1424] sm:$0xf]  ;;  %v9131_v6 = vld [vmem:[%s14081_s11 + $0xe8] sm:$0xf] }
 0x31e   : > { %8142 = vmatpush.bf16.msrb.mxu1 %v11656_v7  ;;  %8155 = vmatpush.bf16.msrb.mxu2 %v11784_v59  ;;  %v7915_v7 = vpop.f32.mrf.mxu3  ;;  %v12924_v59 = vld [vmem:[%s14081_s11 + $0x1644] sm:$0xf]  ;;  %v11861_v8 = vld [vmem:[%s14081_s11 + $0x1650] sm:$0xf0]  ;;  %v11736_v13 = vor.u32 %v12892_v3, %v11733_v5 }
 0x31f   : > { %8168 = vmatpush.bf16.msrb.mxu3 %v11912_v11  ;;  %v11480_v11 = vor.u32 %v12828_v58, %v11477_v60  ;;  %v11461_v19 = vld [vmem:[%s14081_s11 + $0x1330] sm:$0xf0]  ;;  %v14979_v26 = vadd.f32 %v7915_v7, %v7903_v9  ;;  %v11864_v35 = vor.u32 %v12924_v59, %v11861_v8  ;;  %v12920_v41 = vld [vmem:[%s14081_s11 + $0x1624] sm:$0xf]  ;;  %v12243_v7 = vld [vmem:[%s14081_s11 + $0xf4] sm:$0xf0] }
 0x320   : > { %8130 = vmatpush.bf16.msrb.mxu0 %v11512_v37  ;;  %v11589_v37 = vld [vmem:[%s14081_s11 + $0x1430] sm:$0xf0]  ;;  %v11464_v46 = vor.u32 %v12824_v14, %v11461_v19  ;;  %v12820_v47 = vld [vmem:[%s14081_s11 + $0x1304] sm:$0xf]  ;;  %v9259_v9 = vld [vmem:[%s14081_s11 + $0x1e8] sm:$0xf]  ;;  %v9132_v14 = vor.u32 %v12243_v7, %v9131_v6 }
 0x321   : > { %v11845_v42 = vld [vmem:[%s14081_s11 + $0x1630] sm:$0xf0]  ;;  %v11592_v49 = vor.u32 %v12856_v24, %v11589_v37  ;;  %v12852_v39 = vld [vmem:[%s14081_s11 + $0x1404] sm:$0xf]  ;;  %v9083_v7 = vld [vmem:[%s14081_s11 + $0x88] sm:$0xf] }
 0x322   : > { %8143 = vmatpush.bf16.msrb.mxu1 %v11640_v15  ;;  %8156 = vmatpush.bf16.msrb.mxu2 %v11768_v40  ;;  %v12888_v15 = vld [vmem:[%s14081_s11 + $0x1524] sm:$0xf]  ;;  %v11717_v40 = vld [vmem:[%s14081_s11 + $0x1530] sm:$0xf0]  ;;  %v11848_v54 = vor.u32 %v12920_v41, %v11845_v42  ;;  %v9243_v41 = vld [vmem:[%s14081_s11 + $0x1c8] sm:$0xf] }
 0x323   : > { %8169 = vmatpush.bf16.msrb.mxu3 %v11896_v48  ;;  %v11445_v48 = vld [vmem:[%s14081_s11 + $0x1310] sm:$0xf0]  ;;  %v11720_v51 = vor.u32 %v12888_v15, %v11717_v40  ;;  %v12884_v38 = vld [vmem:[%s14081_s11 + $0x1504] sm:$0xf]  ;;  %v9115_v15 = vld [vmem:[%s14081_s11 + $0xc8] sm:$0xf] }
 0x324   : > { %8131 = vmatpush.bf16.msrb.mxu0 %v11496_v55  ;;  %v11573_v52 = vld [vmem:[%s14081_s11 + $0x1410] sm:$0xf0]  ;;  %v7904_v58 = vpop.f32.mrf.mxu2  ;;  %v12976_v61 = vld [vmem:[%s14081_s11 + $0x17e4] sm:$0xf]  ;;  %v11448_v3 = vor.u32 %v12820_v47, %v11445_v48  ;;  %v12239_v40 = vld [vmem:[%s14081_s11 + $0xd4] sm:$0xf0] }
 0x325   : > { %v11701_v55 = vld [vmem:[%s14081_s11 + $0x1510] sm:$0xf0]  ;;  %v13008_v2 = vld [vmem:[%s14081_s11 + $0x18e4] sm:$0xf]  ;;  %v11576_v59 = vor.u32 %v12852_v39, %v11573_v52  ;;  %v12271_v42 = vld [vmem:[%s14081_s11 + $0x1d4] sm:$0xf0]  ;;  %v9116_v48 = vor.u32 %v12239_v40, %v9115_v15 }
 0x326   : > { %8144 = vmatpush.bf16.msrb.mxu1 %v11624_v56  ;;  %8157 = vmatpush.bf16.msrb.mxu2 %v11752_v57  ;;  %v12916_v56 = vld [vmem:[%s14081_s11 + $0x1604] sm:$0xf]  ;;  %v11829_v57 = vld [vmem:[%s14081_s11 + $0x1610] sm:$0xf0]  ;;  %v7917_v60 = vpop.f32.mrf.mxu3  ;;  %v11704_v8 = vor.u32 %v12884_v38, %v11701_v55  ;;  %v9244_v52 = vor.u32 %v12271_v42, %v9243_v41  ;;  %v12235_v55 = vld [vmem:[%s14081_s11 + $0xb4] sm:$0xf0] }
 0x327   : > { %8170 = vmatpush.bf16.msrb.mxu3 %v11880_v53  ;;  %v12069_v53 = vld [vmem:[%s14081_s11 + $0x17f0] sm:$0xf0]  ;;  %v12972_v19 = vld [vmem:[%s14081_s11 + $0x17c4] sm:$0xf]  ;;  %v9067_v40 = vld [vmem:[%s14081_s11 + $0x68] sm:$0xf] }
 0x328   : > { %8132 = vmatpush.bf16.msrb.mxu0 %v11480_v11  ;;  %v12197_v5 = vld [vmem:[%s14081_s11 + $0x18f0] sm:$0xf0]  ;;  %v11832_v11 = vor.u32 %v12916_v56, %v11829_v57  ;;  %v13004_v27 = vld [vmem:[%s14081_s11 + $0x18c4] sm:$0xf]  ;;  %v9227_v56 = vld [vmem:[%s14081_s11 + $0x1a8] sm:$0xf] }
 0x329   : > { %v12053_v24 = vld [vmem:[%s14081_s11 + $0x17d0] sm:$0xf0]  ;;  %v13000_v39 = vld [vmem:[%s14081_s11 + $0x18a4] sm:$0xf]  ;;  %v12267_v57 = vld [vmem:[%s14081_s11 + $0x1b4] sm:$0xf0] }
 0x32a   : > { %8145 = vmatpush.bf16.msrb.mxu1 %v11608_v4  ;;  %8158 = vmatpush.bf16.msrb.mxu2 %v11736_v13  ;;  %v12072_v4 = vor.u32 %v12976_v61, %v12069_v53  ;;  %v12200_v13 = vor.u32 %v13008_v2, %v12197_v5  ;;  %v12181_v37 = vld [vmem:[%s14081_s11 + $0x18d0] sm:$0xf0]  ;;  %v12964_v53 = vld [vmem:[%s14081_s11 + $0x1784] sm:$0xf]  ;;  %v9228_v5 = vor.u32 %v12267_v57, %v9227_v56  ;;  %v12227_v41 = vld [vmem:[%s14081_s11 + $0x74] sm:$0xf0] }
 0x32b   : > { %8171 = vmatpush.bf16.msrb.mxu3 %v11864_v35  ;;  %v9260_v35 = vor.u32 %v12275_v10, %v9259_v9  ;;  %v12184_v47 = vor.u32 %v13004_v27, %v12181_v37  ;;  %v12165_v38 = vld [vmem:[%s14081_s11 + $0x18b0] sm:$0xf0]  ;;  %v12263_v9 = vld [vmem:[%s14081_s11 + $0x194] sm:$0xf0]  ;;  %v9195_v42 = vld [vmem:[%s14081_s11 + $0x168] sm:$0xf] }
 0x32c   : > { %8133 = vmatpush.bf16.msrb.mxu0 %v11464_v46  ;;  %v12056_v46 = vor.u32 %v12972_v19, %v12053_v24  ;;  %v12168_v60 = vor.u32 %v13000_v39, %v12165_v38  ;;  %v12021_v2 = vld [vmem:[%s14081_s11 + $0x1790] sm:$0xf0]  ;;  %v12992_v24 = vld [vmem:[%s14081_s11 + $0x1864] sm:$0xf]  ;;  %v9051_v56 = vld [vmem:[%s14081_s11 + $0x48] sm:$0xf] }
 0x32d   : > { %v12149_v6 = vld [vmem:[%s14081_s11 + $0x1890] sm:$0xf0]  ;;  %v12024_v10 = vor.u32 %v12964_v53, %v12021_v2  ;;  %v12223_v57 = vld [vmem:[%s14081_s11 + $0x54] sm:$0xf0] }
 0x32e   : > { %8146 = vmatpush.bf16.msrb.mxu1 %v11592_v49  ;;  %8159 = vmatpush.bf16.msrb.mxu2 %v11720_v51  ;;  %v12968_v49 = vld [vmem:[%s14081_s11 + $0x17a4] sm:$0xf]  ;;  %v12037_v51 = vld [vmem:[%s14081_s11 + $0x17b0] sm:$0xf0]  ;;  %v12255_v53 = vld [vmem:[%s14081_s11 + $0x154] sm:$0xf0] }
 0x32f   : > { %8172 = vmatpush.bf16.msrb.mxu3 %v11848_v54  ;;  %v9099_v54 = vld [vmem:[%s14081_s11 + $0xa8] sm:$0xf]  ;;  %v12040_v58 = vor.u32 %v12968_v49, %v12037_v51  ;;  %v12005_v19 = vld [vmem:[%s14081_s11 + $0x1770] sm:$0xf0]  ;;  %v9068_v49 = vor.u32 %v12227_v41, %v9067_v40  ;;  %v12956_v51 = vld [vmem:[%s14081_s11 + $0x1744] sm:$0xf] }
 0x330   : > { %8134 = vmatpush.bf16.msrb.mxu0 %v11448_v3  ;;  %v9100_v61 = vor.u32 %v12235_v55, %v9099_v54  ;;  %v12996_v3 = vld [vmem:[%s14081_s11 + $0x1884] sm:$0xf]  ;;  %v12133_v15 = vld [vmem:[%s14081_s11 + $0x1870] sm:$0xf0] }
 0x331   : > { %v11989_v39 = vld [vmem:[%s14081_s11 + $0x1750] sm:$0xf0]  ;;  %v12980_v41 = vld [vmem:[%s14081_s11 + $0x1804] sm:$0xf] }
 0x332   : > { %8147 = vmatpush.bf16.msrb.mxu1 %v11576_v59  ;;  %8160 = vmatpush.bf16.msrb.mxu2 %v11704_v8  ;;  %v12231_v59 = vld [vmem:[%s14081_s11 + $0x94] sm:$0xf0]  ;;  %v9211_v8 = vld [vmem:[%s14081_s11 + $0x188] sm:$0xf]  ;;  %v12117_v55 = vld [vmem:[%s14081_s11 + $0x1850] sm:$0xf0]  ;;  %v11992_v2 = vor.u32 %v12956_v51, %v11989_v39 }
 0x333   : > { %8173 = vmatpush.bf16.msrb.mxu3 %v11832_v11  ;;  %8135 = vmatmul.bf16.vlgmr.msrb.gmra.mxu0 %v14482_v34  ;;  %v7928_v11 = vpop.f32.mrf.mxu0  ;;  %v9212_v37 = vor.u32 %v12263_v9, %v9211_v8  ;;  %v11973_v8 = vld [vmem:[%s14081_s11 + $0x1730] sm:$0xf0]  ;;  %v12984_v9 = vld [vmem:[%s14081_s11 + $0x1824] sm:$0xf]  ;;  %v12247_v51 = vld [vmem:[%s14081_s11 + $0x114] sm:$0xf0] }
 0x334   : > { %8179 = vmatpush.bf16.msra.mxu0 %v12072_v4  ;;  %v12152_v4 = vor.u32 %v12996_v3, %v12149_v6  ;;  %v7929_v27 = vadd.f32 %v7928_v11, %v14979_v26  ;;  %v12136_v26 = vor.u32 %v12992_v24, %v12133_v15  ;;  %v12251_v24 = vld [vmem:[%s14081_s11 + $0x134] sm:$0xf0] }
 0x335   : > { %8161 = vmatmul.bf16.vlgmr.msrb.gmra.mxu2 %v14564_v22  ;;  %8148 = vmatmul.bf16.vlgmr.msrb.gmra.mxu1 %v14560_v20 }
 0x336   : > { %8192 = vmatpush.bf16.msra.mxu1 %v12200_v13  ;;  %8205 = vmatpush.bf16.msra.mxu2 %v9132_v14  ;;  %v9084_v13 = vor.u32 %v12231_v59, %v9083_v7  ;;  %v12960_v14 = vld [vmem:[%s14081_s11 + $0x1764] sm:$0xf]  ;;  %v9052_v7 = vor.u32 %v12223_v57, %v9051_v56  ;;  %v12339_v56 = vld [vmem:[%s14081_s11 + $0x3f4] sm:$0xf0]  ;;  %v9643_v57 = vld [vmem:[%s14081_s11 + $0x4e8] sm:$0xf] }
 0x337   : > { %8218 = vmatpush.bf16.msra.mxu3 %v9260_v35  ;;  %v7941_v35 = vpop.f32.mrf.mxu1  ;;  %v12952_v59 = vld [vmem:[%s14081_s11 + $0x1724] sm:$0xf] }
 0x338   : > { %8174 = vmatmul.bf16.vlgmr.msrb.gmra.mxu3 %v14562_v21  ;;  %8180 = vmatpush.bf16.msra.mxu0 %v12056_v46  ;;  %v12259_v46 = vld [vmem:[%s14081_s11 + $0x174] sm:$0xf0]  ;;  %v7954_v38 = vpop.f32.mrf.mxu2 }
 0x339   : > { %v9196_v54 = vor.u32 %v12259_v46, %v9195_v42  ;;  %v12085_v42 = vld [vmem:[%s14081_s11 + $0x1810] sm:$0xf0]  ;;  %v9019_v46 = vld [vmem:[%s14081_s11 + $0x8] sm:$0xf] }
 0x33a   : > { %8193 = vmatpush.bf16.msra.mxu1 %v12184_v47  ;;  %8206 = vmatpush.bf16.msra.mxu2 %v9116_v48  ;;  %v7942_v47 = vadd.f32 %v7941_v35, %v7929_v27  ;;  %v12008_v48 = vor.u32 %v12960_v14, %v12005_v19  ;;  %v12219_v14 = vld [vmem:[%s14081_s11 + $0x34] sm:$0xf0]  ;;  %v9163_v19 = vld [vmem:[%s14081_s11 + $0x128] sm:$0xf]  ;;  %v11976_v27 = vor.u32 %v12952_v59, %v11973_v8  ;;  %v12948_v35 = vld [vmem:[%s14081_s11 + $0x1704] sm:$0xf] }
 0x33b   : > { %8219 = vmatpush.bf16.msra.mxu3 %v9244_v52  ;;  %v12988_v52 = vld [vmem:[%s14081_s11 + $0x1844] sm:$0xf]  ;;  %v9371_v8 = vld [vmem:[%s14081_s11 + $0x2c8] sm:$0xf] }
 0x33c   : > { %8181 = vmatpush.bf16.msra.mxu0 %v12040_v58  ;;  %v7955_v58 = vadd.f32 %v7954_v38, %v7942_v47  ;;  %v12120_v6 = vor.u32 %v12988_v52, %v12117_v55  ;;  %v9387_v52 = vld [vmem:[%s14081_s11 + $0x2e8] sm:$0xf]  ;;  %v12307_v38 = vld [vmem:[%s14081_s11 + $0x2f4] sm:$0xf0] }
 0x33e   : > { %8194 = vmatpush.bf16.msra.mxu1 %v12168_v60  ;;  %8207 = vmatpush.bf16.msra.mxu2 %v9100_v61  ;;  %v7967_v60 = vpop.f32.mrf.mxu3  ;;  %v9179_v61 = vld [vmem:[%s14081_s11 + $0x148] sm:$0xf] }
 0x33f   : > { %8220 = vmatpush.bf16.msra.mxu3 %v9228_v5  ;;  %v15047_v3 = vadd.f32 %v7967_v60, %v7955_v58  ;;  %v7930_v5 = vpop.f32.mrf.mxu0  ;;  %v9180_v11 = vor.u32 %v12255_v53, %v9179_v61  ;;  %v12371_v58 = vld [vmem:[%s14081_s11 + $0x4f4] sm:$0xf0]  ;;  %v12088_v60 = vor.u32 %v12980_v41, %v12085_v42  ;;  %v9771_v53 = vld [vmem:[%s14081_s11 + $0x5e8] sm:$0xf] }
 0x340   : > { %8182 = vmatpush.bf16.msra.mxu0 %v12024_v10  ;;  %v7943_v10 = vpop.f32.mrf.mxu1  ;;  %v7956_v47 = vpop.f32.mrf.mxu2  ;;  %v9644_v59 = vor.u32 %v12371_v58, %v9643_v57  ;;  %v9483_v41 = vld [vmem:[%s14081_s11 + $0x3a8] sm:$0xf]  ;;  %v12327_v58 = vld [vmem:[%s14081_s11 + $0x394] sm:$0xf0] }
 0x341   : > { %v9499_v10 = vld [vmem:[%s14081_s11 + $0x3c8] sm:$0xf] }
 0x342   : > { %8195 = vmatpush.bf16.msra.mxu1 %v12152_v4  ;;  %8208 = vmatpush.bf16.msra.mxu2 %v9084_v13  ;;  %v12101_v4 = vld [vmem:[%s14081_s11 + $0x1830] sm:$0xf0]  ;;  %v9035_v13 = vld [vmem:[%s14081_s11 + $0x28] sm:$0xf] }
 0x343   : > { %8221 = vmatpush.bf16.msra.mxu3 %v9212_v37  ;;  %v11957_v37 = vld [vmem:[%s14081_s11 + $0x1710] sm:$0xf0]  ;;  %v12104_v15 = vor.u32 %v12984_v9, %v12101_v4  ;;  %v9036_v40 = vor.u32 %v12219_v14, %v9035_v13  ;;  %v12303_v9 = vld [vmem:[%s14081_s11 + $0x2d4] sm:$0xf0]  ;;  %v9627_v13 = vld [vmem:[%s14081_s11 + $0x4c8] sm:$0xf] }
 0x344   : > { %8183 = vmatpush.bf16.msra.mxu0 %v12008_v48  ;;  %v9164_v48 = vor.u32 %v12251_v24, %v9163_v19  ;;  %v11960_v55 = vor.u32 %v12948_v35, %v11957_v37  ;;  %v12335_v4 = vld [vmem:[%s14081_s11 + $0x3d4] sm:$0xf0]  ;;  %v9755_v19 = vld [vmem:[%s14081_s11 + $0x5c8] sm:$0xf] }
 0x345   : > { %v12367_v14 = vld [vmem:[%s14081_s11 + $0x4d4] sm:$0xf0]  ;;  %v9500_v35 = vor.u32 %v12335_v4, %v9499_v10  ;;  %v9611_v47 = vld [vmem:[%s14081_s11 + $0x4a8] sm:$0xf] }
 0x346   : > { %8196 = vmatpush.bf16.msra.mxu1 %v12136_v26  ;;  %8209 = vmatpush.bf16.msra.mxu2 %v9068_v49  ;;  %v12215_v26 = vld [vmem:[%s14081_s11 + $0x14] sm:$0xf0]  ;;  %v9147_v49 = vld [vmem:[%s14081_s11 + $0x108] sm:$0xf]  ;;  %v7969_v39 = vpop.f32.mrf.mxu3  ;;  %v9628_v37 = vor.u32 %v12367_v14, %v9627_v13 }
 0x347   : > { %8222 = vmatpush.bf16.msra.mxu3 %v9196_v54  ;;  %v9515_v54 = vld [vmem:[%s14081_s11 + $0x3e8] sm:$0xf]  ;;  %v9020_v61 = vor.u32 %v12215_v26, %v9019_v46  ;;  %v9148_v5 = vor.u32 %v12247_v51, %v9147_v49  ;;  %v12399_v24 = vld [vmem:[%s14081_s11 + $0x5d4] sm:$0xf0] }
 0x348   : > { %8184 = vmatpush.bf16.msra.mxu0 %v11992_v2  ;;  %v12403_v2 = vld [vmem:[%s14081_s11 + $0x5f4] sm:$0xf0]  ;;  %v9756_v42 = vor.u32 %v12399_v24, %v9755_v19  ;;  %v9739_v49 = vld [vmem:[%s14081_s11 + $0x5a8] sm:$0xf] }
 0x349   : > { %v12331_v46 = vld [vmem:[%s14081_s11 + $0x3b4] sm:$0xf0]  ;;  %v9323_v10 = vld [vmem:[%s14081_s11 + $0x268] sm:$0xf] }
 0x34a   : > { %8197 = vmatpush.bf16.msra.mxu1 %v12120_v6  ;;  %8210 = vmatpush.bf16.msra.mxu2 %v9052_v7  ;;  %v9388_v6 = vor.u32 %v12307_v38, %v9387_v52  ;;  %v9516_v7 = vor.u32 %v12339_v56, %v9515_v54  ;;  %v13087_v26 = vld [vmem:[#allocation1] sm:$0xff]  ;;  %v9484_v52 = vor.u32 %v12331_v46, %v9483_v41  ;;  %v9339_v54 = vld [vmem:[%s14081_s11 + $0x288] sm:$0xf] }
 0x34b   : > { %8223 = vmatpush.bf16.msra.mxu3 %v9180_v11  ;;  %v9772_v11 = vor.u32 %v12403_v2, %v9771_v53  ;;  %v12395_v51 = vld [vmem:[%s14081_s11 + $0x5b4] sm:$0xf0]  ;;  %v9467_v56 = vld [vmem:[%s14081_s11 + $0x388] sm:$0xf] }
 0x34c   : > { %8185 = vmatpush.bf16.msra.mxu0 %v11976_v27  ;;  %v9372_v27 = vor.u32 %v12303_v9, %v9371_v8  ;;  %v9740_v57 = vor.u32 %v12395_v51, %v9739_v49  ;;  %v9723_v2 = vld [vmem:[%s14081_s11 + $0x588] sm:$0xf]  ;;  %v9468_v8 = vor.u32 %v12327_v58, %v9467_v56  ;;  %v12323_v19 = vld [vmem:[%s14081_s11 + $0x374] sm:$0xf0] }
 0x34d   : > { %v9451_v4 = vld [vmem:[%s14081_s11 + $0x368] sm:$0xf]  ;;  %v12351_v51 = vld [vmem:[%s14081_s11 + $0x454] sm:$0xf0] }
 0x34e   : > { %8198 = vmatpush.bf16.msra.mxu1 %v12104_v15  ;;  %8211 = vmatpush.bf16.msra.mxu2 %v9036_v40  ;;  %v9355_v15 = vld [vmem:[%s14081_s11 + $0x2a8] sm:$0xf]  ;;  %v12299_v40 = vld [vmem:[%s14081_s11 + $0x2b4] sm:$0xf0] }
 0x34f   : > { %8224 = vmatpush.bf16.msra.mxu3 %v9164_v48  ;;  %v12363_v48 = vld [vmem:[%s14081_s11 + $0x4b4] sm:$0xf0]  ;;  %v9356_v39 = vor.u32 %v12299_v40, %v9355_v15  ;;  %v9579_v24 = vld [vmem:[%s14081_s11 + $0x468] sm:$0xf]  ;;  %v9452_v15 = vor.u32 %v12323_v19, %v9451_v4 }
 0x350   : > { %8186 = vmatpush.bf16.msra.mxu0 %v11960_v55  ;;  %v9612_v38 = vor.u32 %v12363_v48, %v9611_v47  ;;  %v12295_v55 = vld [vmem:[%s14081_s11 + $0x294] sm:$0xf0]  ;;  %v7980_v53 = vpop.f32.mrf.mxu0  ;;  %v9307_v41 = vld [vmem:[%s14081_s11 + $0x248] sm:$0xf] }
 0x351   : > { %v9435_v46 = vld [vmem:[%s14081_s11 + $0x348] sm:$0xf] }
 0x352   : > { %8199 = vmatpush.bf16.msra.mxu1 %v12088_v60  ;;  %8212 = vmatpush.bf16.msra.mxu2 %v9020_v61  ;;  %v9595_v60 = vld [vmem:[%s14081_s11 + $0x488] sm:$0xf]  ;;  %v12359_v61 = vld [vmem:[%s14081_s11 + $0x494] sm:$0xf0] }
 0x353   : > { %8225 = vmatpush.bf16.msra.mxu3 %v9148_v5  ;;  %8187 = vmatmul.bf16.vlgmr.msra.gmra.mxu0 %v14566_v23  ;;  %v12391_v5 = vld [vmem:[%s14081_s11 + $0x594] sm:$0xf0]  ;;  %v9596_v9 = vor.u32 %v12359_v61, %v9595_v60  ;;  %v9563_v49 = vld [vmem:[%s14081_s11 + $0x448] sm:$0xf] }
 0x354   : > { %8231 = vmatpush.bf16.msrb.mxu0 %v9388_v6  ;;  %v7981_v6 = vadd.f32 %v7980_v53, %v15047_v3  ;;  %v9724_v13 = vor.u32 %v12391_v5, %v9723_v2  ;;  %v12355_v3 = vld [vmem:[%s14081_s11 + $0x474] sm:$0xf0]  ;;  %v9564_v61 = vor.u32 %v12351_v51, %v9563_v49  ;;  %v9291_v53 = vld [vmem:[%s14081_s11 + $0x228] sm:$0xf] }
 0x355   : > { %8200 = vmatmul.bf16.vlgmr.msra.gmra.mxu1 %v13087_v26  ;;  %8213 = vmatmul.bf16.vlgmr.msra.gmra.mxu2 %v14193_v44  ;;  %v9580_v40 = vor.u32 %v12355_v3, %v9579_v24  ;;  %v12319_v26 = vld [vmem:[%s14081_s11 + $0x354] sm:$0xf0]  ;;  %v9419_v5 = vld [vmem:[%s14081_s11 + $0x328] sm:$0xf] }
 0x356   : > { %8244 = vmatpush.bf16.msrb.mxu1 %v9516_v7  ;;  %8257 = vmatpush.bf16.msrb.mxu2 %v9644_v59  ;;  %v9340_v7 = vor.u32 %v12295_v55, %v9339_v54  ;;  %v7993_v59 = vpop.f32.mrf.mxu1  ;;  %v12383_v54 = vld [vmem:[%s14081_s11 + $0x554] sm:$0xf0]  ;;  %v9436_v60 = vor.u32 %v12319_v26, %v9435_v46  ;;  %v9275_v4 = vld [vmem:[%s14081_s11 + $0x208] sm:$0xf] }
 0x357   : > { %8270 = vmatpush.bf16.msrb.mxu3 %v9772_v11  ;;  %v12291_v11 = vld [vmem:[%s14081_s11 + $0x274] sm:$0xf0]  ;;  %v7994_v14 = vadd.f32 %v7993_v59, %v7981_v6  ;;  %v9547_v59 = vld [vmem:[%s14081_s11 + $0x428] sm:$0xf] }
 0x358   : > { %8232 = vmatpush.bf16.msrb.mxu0 %v9372_v27  ;;  %8226 = vmatmul.bf16.vlgmr.msra.gmra.mxu3 %v14199_v50  ;;  %v9707_v27 = vld [vmem:[%s14081_s11 + $0x568] sm:$0xf]  ;;  %v8006_v48 = vpop.f32.mrf.mxu2  ;;  %v7982_v55 = vpop.f32.mrf.mxu0  ;;  %v12283_v2 = vld [vmem:[%s14081_s11 + $0x234] sm:$0xf0] }
 0x359   : > { %v9403_v24 = vld [vmem:[%s14081_s11 + $0x308] sm:$0xf]  ;;  %v12311_v3 = vld [vmem:[%s14081_s11 + $0x314] sm:$0xf0] }
 0x35a   : > { %8245 = vmatpush.bf16.msrb.mxu1 %v9500_v35  ;;  %8258 = vmatpush.bf16.msrb.mxu2 %v9628_v37  ;;  %v12387_v35 = vld [vmem:[%s14081_s11 + $0x574] sm:$0xf0]  ;;  %v9324_v37 = vor.u32 %v12291_v11, %v9323_v10  ;;  %v9292_v11 = vor.u32 %v12283_v2, %v9291_v53  ;;  %v10155_v51 = vld [vmem:[%s14081_s11 + $0x8e8] sm:$0xf] }
 0x35b   : > { %8271 = vmatpush.bf16.msrb.mxu3 %v9756_v42  ;;  %v12287_v42 = vld [vmem:[%s14081_s11 + $0x254] sm:$0xf0]  ;;  %v9708_v47 = vor.u32 %v12387_v35, %v9707_v27  ;;  %v9531_v27 = vld [vmem:[%s14081_s11 + $0x408] sm:$0xf] }
 0x35c   : > { %8233 = vmatpush.bf16.msrb.mxu0 %v9356_v39  ;;  %v8007_v39 = vadd.f32 %v8006_v48, %v7994_v14  ;;  %v9308_v56 = vor.u32 %v12287_v42, %v9307_v41  ;;  %v12379_v10 = vld [vmem:[%s14081_s11 + $0x534] sm:$0xf0]  ;;  %v9899_v42 = vld [vmem:[%s14081_s11 + $0x6e8] sm:$0xf] }
 0x35d   : > { %v12435_v46 = vld [vmem:[%s14081_s11 + $0x6f4] sm:$0xf0]  ;;  %v9883_v53 = vld [vmem:[%s14081_s11 + $0x6c8] sm:$0xf] }
 0x35e   : > { %8246 = vmatpush.bf16.msrb.mxu1 %v9484_v52  ;;  %8259 = vmatpush.bf16.msrb.mxu2 %v9612_v38  ;;  %v8019_v52 = vpop.f32.mrf.mxu3  ;;  %v9691_v38 = vld [vmem:[%s14081_s11 + $0x548] sm:$0xf]  ;;  %v12467_v49 = vld [vmem:[%s14081_s11 + $0x7f4] sm:$0xf0] }
 0x35f   : > { %8272 = vmatpush.bf16.msrb.mxu3 %v9740_v57  ;;  %v7995_v57 = vpop.f32.mrf.mxu1  ;;  %v15117_v58 = vadd.f32 %v8019_v52, %v8007_v39  ;;  %v9692_v6 = vor.u32 %v12383_v54, %v9691_v38  ;;  %v12499_v39 = vld [vmem:[%s14081_s11 + $0x8f4] sm:$0xf0]  ;;  %v9404_v52 = vor.u32 %v12311_v3, %v9403_v24  ;;  %v10283_v54 = vld [vmem:[%s14081_s11 + $0x9e8] sm:$0xf] }
 0x360   : > { %8234 = vmatpush.bf16.msrb.mxu0 %v9340_v7  ;;  %v12315_v7 = vld [vmem:[%s14081_s11 + $0x334] sm:$0xf0]  ;;  %v8008_v41 = vpop.f32.mrf.mxu2  ;;  %v9900_v57 = vor.u32 %v12435_v46, %v9899_v42  ;;  %v9995_v24 = vld [vmem:[%s14081_s11 + $0x7a8] sm:$0xf] }
 0x361   : > { %v9420_v14 = vor.u32 %v12315_v7, %v9419_v5  ;;  %v12531_v55 = vld [vmem:[%s14081_s11 + $0x9f4] sm:$0xf0]  ;;  %v10011_v5 = vld [vmem:[%s14081_s11 + $0x7c8] sm:$0xf] }
 0x362   : > { %8247 = vmatpush.bf16.msrb.mxu1 %v9468_v8  ;;  %8260 = vmatpush.bf16.msrb.mxu2 %v9596_v9  ;;  %v12347_v8 = vld [vmem:[%s14081_s11 + $0x434] sm:$0xf0]  ;;  %v9675_v9 = vld [vmem:[%s14081_s11 + $0x528] sm:$0xf] }
 0x363   : > { %8273 = vmatpush.bf16.msrb.mxu3 %v9724_v13  ;;  %v12279_v13 = vld [vmem:[%s14081_s11 + $0x214] sm:$0xf0]  ;;  %v9548_v19 = vor.u32 %v12347_v8, %v9547_v59  ;;  %v9676_v35 = vor.u32 %v12379_v10, %v9675_v9  ;;  %v10139_v59 = vld [vmem:[%s14081_s11 + $0x8c8] sm:$0xf] }
 0x364   : > { %8235 = vmatpush.bf16.msrb.mxu0 %v9324_v37  ;;  %v12343_v37 = vld [vmem:[%s14081_s11 + $0x414] sm:$0xf0]  ;;  %v9276_v26 = vor.u32 %v12279_v13, %v9275_v4  ;;  %v10267_v9 = vld [vmem:[%s14081_s11 + $0x9c8] sm:$0xf] }
 0x365   : > { %v9532_v38 = vor.u32 %v12343_v37, %v9531_v27  ;;  %v12431_v2 = vld [vmem:[%s14081_s11 + $0x6d4] sm:$0xf0] }
 0x366   : > { %8248 = vmatpush.bf16.msrb.mxu1 %v9452_v15  ;;  %8261 = vmatpush.bf16.msrb.mxu2 %v9580_v40  ;;  %v9659_v15 = vld [vmem:[%s14081_s11 + $0x508] sm:$0xf]  ;;  %v12375_v40 = vld [vmem:[%s14081_s11 + $0x514] sm:$0xf0]  ;;  %v8021_v48 = vpop.f32.mrf.mxu3 }
 0x367   : > { %8274 = vmatpush.bf16.msrb.mxu3 %v9708_v47  ;;  %v10027_v47 = vld [vmem:[%s14081_s11 + $0x7e8] sm:$0xf]  ;;  %v12463_v7 = vld [vmem:[%s14081_s11 + $0x7d4] sm:$0xf0] }
 0x368   : > { %8236 = vmatpush.bf16.msrb.mxu0 %v9308_v56  ;;  %v9660_v56 = vor.u32 %v12375_v40, %v9659_v15  ;;  %v12495_v8 = vld [vmem:[%s14081_s11 + $0x8d4] sm:$0xf0]  ;;  %v10012_v4 = vor.u32 %v12463_v7, %v10011_v5  ;;  %v10251_v15 = vld [vmem:[%s14081_s11 + $0x9a8] sm:$0xf] }
 0x369   : > { %v12527_v10 = vld [vmem:[%s14081_s11 + $0x9d4] sm:$0xf0]  ;;  %v10140_v13 = vor.u32 %v12495_v8, %v10139_v59 }
 0x36a   : > { %8249 = vmatpush.bf16.msrb.mxu1 %v9436_v60  ;;  %8262 = vmatpush.bf16.msrb.mxu2 %v9564_v61  ;;  %v10028_v60 = vor.u32 %v12467_v49, %v10027_v47  ;;  %v10156_v61 = vor.u32 %v12499_v39, %v10155_v51  ;;  %v10268_v3 = vor.u32 %v12527_v10, %v10267_v9  ;;  %v12459_v27 = vld [vmem:[%s14081_s11 + $0x7b4] sm:$0xf0]  ;;  %v9851_v47 = vld [vmem:[%s14081_s11 + $0x688] sm:$0xf] }
 0x36b   : > { %8275 = vmatpush.bf16.msrb.mxu3 %v9692_v6  ;;  %v10284_v6 = vor.u32 %v12531_v55, %v10283_v54  ;;  %v12491_v37 = vld [vmem:[%s14081_s11 + $0x8b4] sm:$0xf0]  ;;  %v9996_v42 = vor.u32 %v12459_v27, %v9995_v24  ;;  %v10107_v39 = vld [vmem:[%s14081_s11 + $0x888] sm:$0xf] }
 0x36c   : > { %8237 = vmatpush.bf16.msrb.mxu0 %v9292_v11  ;;  %v9884_v11 = vor.u32 %v12431_v2, %v9883_v53  ;;  %v12523_v40 = vld [vmem:[%s14081_s11 + $0x9b4] sm:$0xf0]  ;;  %v10235_v54 = vld [vmem:[%s14081_s11 + $0x988] sm:$0xf] }
 0x36d   : > { %v12423_v48 = vld [vmem:[%s14081_s11 + $0x694] sm:$0xf0]  ;;  %v10252_v49 = vor.u32 %v12523_v40, %v10251_v15  ;;  %v9835_v2 = vld [vmem:[%s14081_s11 + $0x668] sm:$0xf] }
 0x36e   : > { %8250 = vmatpush.bf16.msrb.mxu1 %v9420_v14  ;;  %8263 = vmatpush.bf16.msrb.mxu2 %v9548_v19  ;;  %v9867_v14 = vld [vmem:[%s14081_s11 + $0x6a8] sm:$0xf]  ;;  %v12427_v19 = vld [vmem:[%s14081_s11 + $0x6b4] sm:$0xf0] }
 0x36f   : > { %8276 = vmatpush.bf16.msrb.mxu3 %v9676_v35  ;;  %v10123_v35 = vld [vmem:[%s14081_s11 + $0x8a8] sm:$0xf]  ;;  %v9868_v41 = vor.u32 %v12427_v19, %v9867_v14  ;;  %v12455_v51 = vld [vmem:[%s14081_s11 + $0x794] sm:$0xf0] }
 0x370   : > { %8238 = vmatpush.bf16.msrb.mxu0 %v9276_v26  ;;  %v10124_v46 = vor.u32 %v12491_v37, %v10123_v35  ;;  %v9979_v26 = vld [vmem:[%s14081_s11 + $0x788] sm:$0xf]  ;;  %v12519_v55 = vld [vmem:[%s14081_s11 + $0x994] sm:$0xf0] }
 0x371   : > { %v12419_v5 = vld [vmem:[%s14081_s11 + $0x674] sm:$0xf0]  ;;  %v10236_v7 = vor.u32 %v12519_v55, %v10235_v54  ;;  %v10091_v9 = vld [vmem:[%s14081_s11 + $0x868] sm:$0xf] }
 0x372   : > { %8251 = vmatpush.bf16.msrb.mxu1 %v9404_v52  ;;  %8264 = vmatpush.bf16.msrb.mxu2 %v9532_v38  ;;  %v12487_v52 = vld [vmem:[%s14081_s11 + $0x894] sm:$0xf0]  ;;  %v8032_v38 = vpop.f32.mrf.mxu0  ;;  %v10219_v10 = vld [vmem:[%s14081_s11 + $0x968] sm:$0xf] }
 0x373   : > { %8277 = vmatpush.bf16.msrb.mxu3 %v9660_v56  ;;  %8239 = vmatmul.bf16.vlgmr.msrb.gmra.mxu0 %v14191_v43  ;;  %v8033_v56 = vadd.f32 %v8032_v38, %v15117_v58  ;;  %v10108_v53 = vor.u32 %v12487_v52, %v10107_v39  ;;  %v12451_v8 = vld [vmem:[%s14081_s11 + $0x774] sm:$0xf0]  ;;  %v9819_v19 = vld [vmem:[%s14081_s11 + $0x648] sm:$0xf] }
 0x374   : > { %8283 = vmatpush.bf16.msra.mxu0 %v9900_v57  ;;  %v9852_v57 = vor.u32 %v12423_v48, %v9851_v47  ;;  %v12483_v58 = vld [vmem:[%s14081_s11 + $0x874] sm:$0xf0]  ;;  %v10075_v15 = vld [vmem:[%s14081_s11 + $0x848] sm:$0xf] }
 0x375   : > { %8265 = vmatmul.bf16.vlgmr.msrb.gmra.mxu2 %v14229_v16  ;;  %8252 = vmatmul.bf16.vlgmr.msrb.gmra.mxu1 %v14195_v45  ;;  %v10092_v14 = vor.u32 %v12483_v58, %v10091_v9  ;;  %v12415_v24 = vld [vmem:[%s14081_s11 + $0x654] sm:$0xf0]  ;;  %v9803_v38 = vld [vmem:[%s14081_s11 + $0x628] sm:$0xf] }
 0x376   : > { %8296 = vmatpush.bf16.msra.mxu1 %v10028_v60  ;;  %8309 = vmatpush.bf16.msra.mxu2 %v10156_v61  ;;  %v8045_v60 = vpop.f32.mrf.mxu1  ;;  %v9980_v61 = vor.u32 %v12455_v51, %v9979_v26  ;;  %v12447_v37 = vld [vmem:[%s14081_s11 + $0x754] sm:$0xf0]  ;;  %v9820_v26 = vor.u32 %v12415_v24, %v9819_v19  ;;  %v9931_v55 = vld [vmem:[%s14081_s11 + $0x728] sm:$0xf] }
 0x377   : > { %8322 = vmatpush.bf16.msra.mxu3 %v10284_v6  ;;  %v9963_v6 = vld [vmem:[%s14081_s11 + $0x768] sm:$0xf]  ;;  %v8046_v59 = vadd.f32 %v8045_v60, %v8033_v56  ;;  %v12479_v40 = vld [vmem:[%s14081_s11 + $0x854] sm:$0xf0] }
 0x378   : > { %8278 = vmatmul.bf16.vlgmr.msrb.gmra.mxu3 %v14233_v18  ;;  %8284 = vmatpush.bf16.msra.mxu0 %v9884_v11  ;;  %v12515_v11 = vld [vmem:[%s14081_s11 + $0x974] sm:$0xf0]  ;;  %v8058_v35 = vpop.f32.mrf.mxu2  ;;  %v10076_v52 = vor.u32 %v12479_v40, %v10075_v15  ;;  %v10059_v60 = vld [vmem:[%s14081_s11 + $0x828] sm:$0xf] }
 0x379   : > { %v10220_v27 = vor.u32 %v12515_v11, %v10219_v10  ;;  %v12511_v47 = vld [vmem:[%s14081_s11 + $0x954] sm:$0xf0]  ;;  %v9915_v9 = vld [vmem:[%s14081_s11 + $0x708] sm:$0xf] }
 0x37a   : > { %8297 = vmatpush.bf16.msra.mxu1 %v10012_v4  ;;  %8310 = vmatpush.bf16.msra.mxu2 %v10140_v13  ;;  %v9836_v4 = vor.u32 %v12419_v5, %v9835_v2  ;;  %v9964_v13 = vor.u32 %v12451_v8, %v9963_v6  ;;  %v8034_v48 = vpop.f32.mrf.mxu0  ;;  %v12411_v54 = vld [vmem:[%s14081_s11 + $0x634] sm:$0xf0]  ;;  %v9787_v6 = vld [vmem:[%s14081_s11 + $0x608] sm:$0xf] }
 0x37b   : > { %8323 = vmatpush.bf16.msra.mxu3 %v10268_v3  ;;  %v9947_v3 = vld [vmem:[%s14081_s11 + $0x748] sm:$0xf]  ;;  %v12507_v2 = vld [vmem:[%s14081_s11 + $0x934] sm:$0xf0]  ;;  %v9804_v5 = vor.u32 %v12411_v54, %v9803_v38 }
 0x37c   : > { %8285 = vmatpush.bf16.msra.mxu0 %v9868_v41  ;;  %v8059_v41 = vadd.f32 %v8058_v35, %v8046_v59  ;;  %v9948_v39 = vor.u32 %v12447_v37, %v9947_v3  ;;  %v12439_v58 = vld [vmem:[%s14081_s11 + $0x714] sm:$0xf0]  ;;  %v10043_v10 = vld [vmem:[%s14081_s11 + $0x808] sm:$0xf] }
 0x37d   : > { %v10411_v24 = vld [vmem:[%s14081_s11 + $0xae8] sm:$0xf]  ;;  %v12563_v3 = vld [vmem:[%s14081_s11 + $0xaf4] sm:$0xf0] }
 0x37e   : > { %8298 = vmatpush.bf16.msra.mxu1 %v9996_v42  ;;  %8311 = vmatpush.bf16.msra.mxu2 %v10124_v46  ;;  %v8071_v42 = vpop.f32.mrf.mxu3  ;;  %v10203_v46 = vld [vmem:[%s14081_s11 + $0x948] sm:$0xf]  ;;  %v12595_v15 = vld [vmem:[%s14081_s11 + $0xbf4] sm:$0xf0] }
 0x37f   : > { %8324 = vmatpush.bf16.msra.mxu3 %v10252_v49  ;;  %v8047_v49 = vpop.f32.mrf.mxu1  ;;  %v15188_v51 = vadd.f32 %v8071_v42, %v8059_v41  ;;  %v10204_v56 = vor.u32 %v12511_v47, %v10203_v46  ;;  %v10667_v40 = vld [vmem:[%s14081_s11 + $0xce8] sm:$0xf]  ;;  %v12627_v41 = vld [vmem:[%s14081_s11 + $0xcf4] sm:$0xf0]  ;;  %v9916_v42 = vor.u32 %v12439_v58, %v9915_v9 }
 0x380   : > { %8286 = vmatpush.bf16.msra.mxu0 %v9852_v57  ;;  %v12443_v57 = vld [vmem:[%s14081_s11 + $0x734] sm:$0xf0]  ;;  %v8060_v19 = vpop.f32.mrf.mxu2  ;;  %v10795_v47 = vld [vmem:[%s14081_s11 + $0xde8] sm:$0xf]  ;;  %v10412_v49 = vor.u32 %v12563_v3, %v10411_v24 }
 0x381   : > { %v9932_v59 = vor.u32 %v12443_v57, %v9931_v55  ;;  %v12659_v48 = vld [vmem:[%s14081_s11 + $0xdf4] sm:$0xf0]  ;;  %v10395_v38 = vld [vmem:[%s14081_s11 + $0xac8] sm:$0xf] }
 0x382   : > { %8299 = vmatpush.bf16.msra.mxu1 %v9980_v61  ;;  %8312 = vmatpush.bf16.msra.mxu2 %v10108_v53  ;;  %v12475_v61 = vld [vmem:[%s14081_s11 + $0x834] sm:$0xf0]  ;;  %v10187_v53 = vld [vmem:[%s14081_s11 + $0x928] sm:$0xf] }
 0x383   : > { %8325 = vmatpush.bf16.msra.mxu3 %v10236_v7  ;;  %v12407_v7 = vld [vmem:[%s14081_s11 + $0x614] sm:$0xf0]  ;;  %v10060_v8 = vor.u32 %v12475_v61, %v10059_v60  ;;  %v10188_v11 = vor.u32 %v12507_v2, %v10187_v53  ;;  %v10523_v55 = vld [vmem:[%s14081_s11 + $0xbc8] sm:$0xf] }
 0x384   : > { %8287 = vmatpush.bf16.msra.mxu0 %v9836_v4  ;;  %v12471_v4 = vld [vmem:[%s14081_s11 + $0x814] sm:$0xf0]  ;;  %v9788_v37 = vor.u32 %v12407_v7, %v9787_v6  ;;  %v10651_v60 = vld [vmem:[%s14081_s11 + $0xcc8] sm:$0xf] }
 0x385   : > { %v10044_v46 = vor.u32 %v12471_v4, %v10043_v10  ;;  %v12559_v54 = vld [vmem:[%s14081_s11 + $0xad4] sm:$0xf0]  ;;  %v10779_v53 = vld [vmem:[%s14081_s11 + $0xdc8] sm:$0xf] }
 0x386   : > { %8300 = vmatpush.bf16.msra.mxu1 %v9964_v13  ;;  %8313 = vmatpush.bf16.msra.mxu2 %v10092_v14  ;;  %v10171_v13 = vld [vmem:[%s14081_s11 + $0x908] sm:$0xf]  ;;  %v12503_v14 = vld [vmem:[%s14081_s11 + $0x914] sm:$0xf0]  ;;  %v8073_v35 = vpop.f32.mrf.mxu3 }
 0x387   : > { %8326 = vmatpush.bf16.msra.mxu3 %v10220_v27  ;;  %v10539_v27 = vld [vmem:[%s14081_s11 + $0xbe8] sm:$0xf]  ;;  %v12591_v57 = vld [vmem:[%s14081_s11 + $0xbd4] sm:$0xf0] }
 0x388   : > { %8288 = vmatpush.bf16.msra.mxu0 %v9820_v26  ;;  %v10172_v26 = vor.u32 %v12503_v14, %v10171_v13  ;;  %v12623_v61 = vld [vmem:[%s14081_s11 + $0xcd4] sm:$0xf0]  ;;  %v10524_v6 = vor.u32 %v12591_v57, %v10523_v55  ;;  %v10507_v9 = vld [vmem:[%s14081_s11 + $0xba8] sm:$0xf] }
 0x389   : > { %v12655_v2 = vld [vmem:[%s14081_s11 + $0xdd4] sm:$0xf0]  ;;  %v10652_v7 = vor.u32 %v12623_v61, %v10651_v60  ;;  %v10763_v13 = vld [vmem:[%s14081_s11 + $0xda8] sm:$0xf] }
 0x38a   : > { %8301 = vmatpush.bf16.msra.mxu1 %v9948_v39  ;;  %8314 = vmatpush.bf16.msra.mxu2 %v10076_v52  ;;  %v10540_v39 = vor.u32 %v12595_v15, %v10539_v27  ;;  %v10668_v52 = vor.u32 %v12627_v41, %v10667_v40  ;;  %v10780_v58 = vor.u32 %v12655_v2, %v10779_v53  ;;  %v12587_v10 = vld [vmem:[%s14081_s11 + $0xbb4] sm:$0xf0]  ;;  %v10363_v27 = vld [vmem:[%s14081_s11 + $0xa88] sm:$0xf] }
 0x38b   : > { %8327 = vmatpush.bf16.msra.mxu3 %v10204_v56  ;;  %v10796_v56 = vor.u32 %v12659_v48, %v10795_v47  ;;  %v12619_v4 = vld [vmem:[%s14081_s11 + $0xcb4] sm:$0xf0]  ;;  %v10508_v24 = vor.u32 %v12587_v10, %v10507_v9  ;;  %v10619_v41 = vld [vmem:[%s14081_s11 + $0xc88] sm:$0xf] }
 0x38c   : > { %8289 = vmatpush.bf16.msra.mxu0 %v9804_v5  ;;  %v10396_v5 = vor.u32 %v12559_v54, %v10395_v38  ;;  %v12651_v14 = vld [vmem:[%s14081_s11 + $0xdb4] sm:$0xf0]  ;;  %v10747_v47 = vld [vmem:[%s14081_s11 + $0xd88] sm:$0xf] }
 0x38d   : > { %v12551_v35 = vld [vmem:[%s14081_s11 + $0xa94] sm:$0xf0]  ;;  %v10764_v15 = vor.u32 %v12651_v14, %v10763_v13  ;;  %v10347_v54 = vld [vmem:[%s14081_s11 + $0xa68] sm:$0xf] }
 0x38e   : > { %8302 = vmatpush.bf16.msra.mxu1 %v9932_v59  ;;  %8315 = vmatpush.bf16.msra.mxu2 %v10060_v8  ;;  %v10379_v59 = vld [vmem:[%s14081_s11 + $0xaa8] sm:$0xf]  ;;  %v12555_v8 = vld [vmem:[%s14081_s11 + $0xab4] sm:$0xf0] }
 0x38f   : > { %8328 = vmatpush.bf16.msra.mxu3 %v10188_v11  ;;  %v10635_v11 = vld [vmem:[%s14081_s11 + $0xca8] sm:$0xf]  ;;  %v10380_v19 = vor.u32 %v12555_v8, %v10379_v59  ;;  %v12583_v40 = vld [vmem:[%s14081_s11 + $0xb94] sm:$0xf0] }
 0x390   : > { %8290 = vmatpush.bf16.msra.mxu0 %v9788_v37  ;;  %v10636_v3 = vor.u32 %v12619_v4, %v10635_v11  ;;  %v10491_v37 = vld [vmem:[%s14081_s11 + $0xb88] sm:$0xf]  ;;  %v12647_v48 = vld [vmem:[%s14081_s11 + $0xd94] sm:$0xf0] }
 0x391   : > { %v12547_v55 = vld [vmem:[%s14081_s11 + $0xa74] sm:$0xf0]  ;;  %v10748_v57 = vor.u32 %v12647_v48, %v10747_v47  ;;  %v10603_v53 = vld [vmem:[%s14081_s11 + $0xc68] sm:$0xf] }
 0x392   : > { %8303 = vmatpush.bf16.msra.mxu1 %v9916_v42  ;;  %8316 = vmatpush.bf16.msra.mxu2 %v10044_v46  ;;  %v12615_v42 = vld [vmem:[%s14081_s11 + $0xc94] sm:$0xf0]  ;;  %v8084_v46 = vpop.f32.mrf.mxu0  ;;  %v10731_v2 = vld [vmem:[%s14081_s11 + $0xd68] sm:$0xf] }
 0x393   : > { %8329 = vmatpush.bf16.msra.mxu3 %v10172_v26  ;;  %8291 = vmatmul.bf16.vlgmr.msra.gmra.mxu0 %v14224_v12  ;;  %v8085_v26 = vadd.f32 %v8084_v46, %v15188_v51  ;;  %v10620_v38 = vor.u32 %v12615_v42, %v10619_v41  ;;  %v12579_v61 = vld [vmem:[%s14081_s11 + $0xb74] sm:$0xf0]  ;;  %v10331_v8 = vld [vmem:[%s14081_s11 + $0xa48] sm:$0xf] }
 0x394   : > { %8335 = vmatpush.bf16.msrb.mxu0 %v10412_v49  ;;  %v10364_v49 = vor.u32 %v12551_v35, %v10363_v27  ;;  %v12611_v51 = vld [vmem:[%s14081_s11 + $0xc74] sm:$0xf0]  ;;  %v10587_v13 = vld [vmem:[%s14081_s11 + $0xc48] sm:$0xf] }
 0x395   : > { %8317 = vmatmul.bf16.vlgmr.msra.gmra.mxu2 %v14319_v28  ;;  %8304 = vmatmul.bf16.vlgmr.msra.gmra.mxu1 %v14231_v17  ;;  %v10604_v59 = vor.u32 %v12611_v51, %v10603_v53  ;;  %v12543_v9 = vld [vmem:[%s14081_s11 + $0xa54] sm:$0xf0]  ;;  %v10315_v46 = vld [vmem:[%s14081_s11 + $0xa28] sm:$0xf] }
 0x396   : > { %8348 = vmatpush.bf16.msrb.mxu1 %v10540_v39  ;;  %8361 = vmatpush.bf16.msrb.mxu2 %v10668_v52  ;;  %v8097_v39 = vpop.f32.mrf.mxu1  ;;  %v10492_v52 = vor.u32 %v12583_v40, %v10491_v37  ;;  %v12575_v4 = vld [vmem:[%s14081_s11 + $0xb54] sm:$0xf0]  ;;  %v10332_v37 = vor.u32 %v12543_v9, %v10331_v8  ;;  %v10443_v48 = vld [vmem:[%s14081_s11 + $0xb28] sm:$0xf] }
 0x397   : > { %8374 = vmatpush.bf16.msrb.mxu3 %v10796_v56  ;;  %v10475_v56 = vld [vmem:[%s14081_s11 + $0xb68] sm:$0xf]  ;;  %v8098_v60 = vadd.f32 %v8097_v39, %v8085_v26  ;;  %v12607_v14 = vld [vmem:[%s14081_s11 + $0xc54] sm:$0xf0] }
 0x398   : > { %8330 = vmatmul.bf16.vlgmr.msra.gmra.mxu3 %v14325_v32  ;;  %8336 = vmatpush.bf16.msrb.mxu0 %v10396_v5  ;;  %v12643_v5 = vld [vmem:[%s14081_s11 + $0xd74] sm:$0xf0]  ;;  %v8110_v11 = vpop.f32.mrf.mxu2  ;;  %v10588_v42 = vor.u32 %v12607_v14, %v10587_v13  ;;  %v10571_v39 = vld [vmem:[%s14081_s11 + $0xc28] sm:$0xf] }
 0x399   : > { %v10732_v10 = vor.u32 %v12643_v5, %v10731_v2  ;;  %v12639_v27 = vld [vmem:[%s14081_s11 + $0xd54] sm:$0xf0]  ;;  %v10427_v53 = vld [vmem:[%s14081_s11 + $0xb08] sm:$0xf] }
 0x39a   : > { %8349 = vmatpush.bf16.msrb.mxu1 %v10524_v6  ;;  %8362 = vmatpush.bf16.msrb.mxu2 %v10652_v7  ;;  %v10348_v6 = vor.u32 %v12547_v55, %v10347_v54  ;;  %v10476_v7 = vor.u32 %v12579_v61, %v10475_v56  ;;  %v8086_v35 = vpop.f32.mrf.mxu0  ;;  %v12539_v47 = vld [vmem:[%s14081_s11 + $0xa34] sm:$0xf0]  ;;  %v10299_v56 = vld [vmem:[%s14081_s11 + $0xa08] sm:$0xf] }
 0x39b   : > { %8375 = vmatpush.bf16.msrb.mxu3 %v10780_v58  ;;  %v10459_v58 = vld [vmem:[%s14081_s11 + $0xb48] sm:$0xf]  ;;  %v12635_v54 = vld [vmem:[%s14081_s11 + $0xd34] sm:$0xf0]  ;;  %v10316_v55 = vor.u32 %v12539_v47, %v10315_v46 }
 0x39c   : > { %8337 = vmatpush.bf16.msrb.mxu0 %v10380_v19  ;;  %v8111_v19 = vadd.f32 %v8110_v11, %v8098_v60  ;;  %v10460_v41 = vor.u32 %v12575_v4, %v10459_v58  ;;  %v12567_v51 = vld [vmem:[%s14081_s11 + $0xb14] sm:$0xf0]  ;;  %v10555_v2 = vld [vmem:[%s14081_s11 + $0xc08] sm:$0xf] }
 0x39d   : > { %v10923_v9 = vld [vmem:[%s14081_s11 + $0xee8] sm:$0xf]  ;;  %v12691_v58 = vld [vmem:[%s14081_s11 + $0xef4] sm:$0xf0] }
 0x39e   : > { %8350 = vmatpush.bf16.msrb.mxu1 %v10508_v24  ;;  %8363 = vmatpush.bf16.msrb.mxu2 %v10636_v3  ;;  %v8123_v24 = vpop.f32.mrf.mxu3  ;;  %v10715_v3 = vld [vmem:[%s14081_s11 + $0xd48] sm:$0xf]  ;;  %v12723_v13 = vld [vmem:[%s14081_s11 + $0xff4] sm:$0xf0] }
 0x39f   : > { %8376 = vmatpush.bf16.msrb.mxu3 %v10764_v15  ;;  %v8099_v15 = vpop.f32.mrf.mxu1  ;;  %v15259_v40 = vadd.f32 %v8123_v24, %v8111_v19  ;;  %v10716_v26 = vor.u32 %v12639_v27, %v10715_v3  ;;  %v11179_v14 = vld [vmem:[%s14081_s11 + $0x10e8] sm:$0xf]  ;;  %v12755_v19 = vld [vmem:[%s14081_s11 + $0x10f4] sm:$0xf0]  ;;  %v10428_v24 = vor.u32 %v12567_v51, %v10427_v53 }
 0x3a0   : > { %8338 = vmatpush.bf16.msrb.mxu0 %v10364_v49  ;;  %v12571_v49 = vld [vmem:[%s14081_s11 + $0xb34] sm:$0xf0]  ;;  %v8112_v8 = vpop.f32.mrf.mxu2  ;;  %v11307_v27 = vld [vmem:[%s14081_s11 + $0x11e8] sm:$0xf]  ;;  %v10924_v15 = vor.u32 %v12691_v58, %v10923_v9 }
 0x3a1   : > { %v10444_v60 = vor.u32 %v12571_v49, %v10443_v48  ;;  %v12787_v35 = vld [vmem:[%s14081_s11 + $0x11f4] sm:$0xf0]  ;;  %v10907_v46 = vld [vmem:[%s14081_s11 + $0xec8] sm:$0xf] }
 0x3a2   : > { %8351 = vmatpush.bf16.msrb.mxu1 %v10492_v52  ;;  %8364 = vmatpush.bf16.msrb.mxu2 %v10620_v38  ;;  %v12603_v52 = vld [vmem:[%s14081_s11 + $0xc34] sm:$0xf0]  ;;  %v10699_v38 = vld [vmem:[%s14081_s11 + $0xd28] sm:$0xf] }
 0x3a3   : > { %8377 = vmatpush.bf16.msrb.mxu3 %v10748_v57  ;;  %v12535_v57 = vld [vmem:[%s14081_s11 + $0xa14] sm:$0xf0]  ;;  %v10572_v61 = vor.u32 %v12603_v52, %v10571_v39  ;;  %v10700_v5 = vor.u32 %v12635_v54, %v10699_v38  ;;  %v11035_v48 = vld [vmem:[%s14081_s11 + $0xfc8] sm:$0xf] }
 0x3a4   : > { %8339 = vmatpush.bf16.msrb.mxu0 %v10348_v6  ;;  %v12599_v6 = vld [vmem:[%s14081_s11 + $0xc14] sm:$0xf0]  ;;  %v10300_v4 = vor.u32 %v12535_v57, %v10299_v56  ;;  %v11163_v39 = vld [vmem:[%s14081_s11 + $0x10c8] sm:$0xf] }
 0x3a5   : > { %v10556_v3 = vor.u32 %v12599_v6, %v10555_v2  ;;  %v12687_v47 = vld [vmem:[%s14081_s11 + $0xed4] sm:$0xf0]  ;;  %v11291_v38 = vld [vmem:[%s14081_s11 + $0x11c8] sm:$0xf] }
 0x3a6   : > { %8352 = vmatpush.bf16.msrb.mxu1 %v10476_v7  ;;  %8365 = vmatpush.bf16.msrb.mxu2 %v10604_v59  ;;  %v10683_v7 = vld [vmem:[%s14081_s11 + $0xd08] sm:$0xf]  ;;  %v12631_v59 = vld [vmem:[%s14081_s11 + $0xd14] sm:$0xf0]  ;;  %v8125_v11 = vpop.f32.mrf.mxu3 }
 0x3a7   : > { %8378 = vmatpush.bf16.msrb.mxu3 %v10732_v10  ;;  %v11051_v10 = vld [vmem:[%s14081_s11 + $0xfe8] sm:$0xf]  ;;  %v12719_v49 = vld [vmem:[%s14081_s11 + $0xfd4] sm:$0xf0] }
 0x3a8   : > { %8340 = vmatpush.bf16.msrb.mxu0 %v10332_v37  ;;  %v10684_v37 = vor.u32 %v12631_v59, %v10683_v7  ;;  %v12751_v52 = vld [vmem:[%s14081_s11 + $0x10d4] sm:$0xf0]  ;;  %v11036_v56 = vor.u32 %v12719_v49, %v11035_v48  ;;  %v11019_v53 = vld [vmem:[%s14081_s11 + $0xfa8] sm:$0xf] }
 0x3a9   : > { %v12783_v54 = vld [vmem:[%s14081_s11 + $0x11d4] sm:$0xf0]  ;;  %v11164_v57 = vor.u32 %v12751_v52, %v11163_v39  ;;  %v11275_v7 = vld [vmem:[%s14081_s11 + $0x11a8] sm:$0xf] }
 0x3aa   : > { %8353 = vmatpush.bf16.msrb.mxu1 %v10460_v41  ;;  %8366 = vmatpush.bf16.msrb.mxu2 %v10588_v42  ;;  %v11052_v41 = vor.u32 %v12723_v13, %v11051_v10  ;;  %v11180_v42 = vor.u32 %v12755_v19, %v11179_v14  ;;  %v11292_v51 = vor.u32 %v12783_v54, %v11291_v38  ;;  %v12715_v2 = vld [vmem:[%s14081_s11 + $0xfb4] sm:$0xf0]  ;;  %v10875_v10 = vld [vmem:[%s14081_s11 + $0xe88] sm:$0xf] }
 0x3ab   : > { %8379 = vmatpush.bf16.msrb.mxu3 %v10716_v26  ;;  %v11308_v26 = vor.u32 %v12787_v35, %v11307_v27  ;;  %v12747_v6 = vld [vmem:[%s14081_s11 + $0x10b4] sm:$0xf0]  ;;  %v11020_v9 = vor.u32 %v12715_v2, %v11019_v53  ;;  %v11131_v19 = vld [vmem:[%s14081_s11 + $0x1088] sm:$0xf] }
 0x3ac   : > { %8341 = vmatpush.bf16.msrb.mxu0 %v10316_v55  ;;  %v10908_v55 = vor.u32 %v12687_v47, %v10907_v46  ;;  %v12779_v59 = vld [vmem:[%s14081_s11 + $0x11b4] sm:$0xf0]  ;;  %v11259_v27 = vld [vmem:[%s14081_s11 + $0x1188] sm:$0xf] }
 0x3ad   : > { %v12679_v11 = vld [vmem:[%s14081_s11 + $0xe94] sm:$0xf0]  ;;  %v11276_v13 = vor.u32 %v12779_v59, %v11275_v7  ;;  %v10859_v47 = vld [vmem:[%s14081_s11 + $0xe68] sm:$0xf] }
 0x3ae   : > { %8354 = vmatpush.bf16.msrb.mxu1 %v10444_v60  ;;  %8367 = vmatpush.bf16.msrb.mxu2 %v10572_v61  ;;  %v10891_v60 = vld [vmem:[%s14081_s11 + $0xea8] sm:$0xf]  ;;  %v12683_v61 = vld [vmem:[%s14081_s11 + $0xeb4] sm:$0xf0] }
 0x3af   : > { %8380 = vmatpush.bf16.msrb.mxu3 %v10700_v5  ;;  %v11147_v5 = vld [vmem:[%s14081_s11 + $0x10a8] sm:$0xf]  ;;  %v10892_v8 = vor.u32 %v12683_v61, %v10891_v60  ;;  %v12711_v14 = vld [vmem:[%s14081_s11 + $0xf94] sm:$0xf0] }
 0x3b0   : > { %8342 = vmatpush.bf16.msrb.mxu0 %v10300_v4  ;;  %v11148_v58 = vor.u32 %v12747_v6, %v11147_v5  ;;  %v11003_v4 = vld [vmem:[%s14081_s11 + $0xf88] sm:$0xf]  ;;  %v12775_v35 = vld [vmem:[%s14081_s11 + $0x1194] sm:$0xf0] }
 0x3b1   : > { %v12675_v48 = vld [vmem:[%s14081_s11 + $0xe74] sm:$0xf0]  ;;  %v11260_v49 = vor.u32 %v12775_v35, %v11259_v27  ;;  %v11115_v38 = vld [vmem:[%s14081_s11 + $0x1068] sm:$0xf] }
 0x3b2   : > { %8355 = vmatpush.bf16.msrb.mxu1 %v10428_v24  ;;  %8368 = vmatpush.bf16.msrb.mxu2 %v10556_v3  ;;  %v12743_v24 = vld [vmem:[%s14081_s11 + $0x1094] sm:$0xf0]  ;;  %v8136_v3 = vpop.f32.mrf.mxu0  ;;  %v11243_v54 = vld [vmem:[%s14081_s11 + $0x1168] sm:$0xf] }
 0x3b3   : > { %8381 = vmatpush.bf16.msrb.mxu3 %v10684_v37  ;;  %8343 = vmatmul.bf16.vlgmr.msrb.gmra.mxu0 %v14323_v31  ;;  %v8137_v37 = vadd.f32 %v8136_v3, %v15259_v40  ;;  %v11132_v46 = vor.u32 %v12743_v24, %v11131_v19  ;;  %v12707_v52 = vld [vmem:[%s14081_s11 + $0xf74] sm:$0xf0]  ;;  %v10843_v61 = vld [vmem:[%s14081_s11 + $0xe48] sm:$0xf] }
 0x3b4   : > { %8387 = vmatpush.bf16.msra.mxu0 %v10924_v15  ;;  %v10876_v15 = vor.u32 %v12679_v11, %v10875_v10  ;;  %v12739_v40 = vld [vmem:[%s14081_s11 + $0x1074] sm:$0xf0]  ;;  %v11099_v7 = vld [vmem:[%s14081_s11 + $0x1048] sm:$0xf] }
 0x3b5   : > { %8369 = vmatmul.bf16.vlgmr.msrb.gmra.mxu2 %v14385_v62  ;;  %8356 = vmatmul.bf16.vlgmr.msrb.gmra.mxu1 %v14327_v33  ;;  %v11116_v60 = vor.u32 %v12739_v40, %v11115_v38  ;;  %v12671_v53 = vld [vmem:[%s14081_s11 + $0xe54] sm:$0xf0]  ;;  %v10827_v3 = vld [vmem:[%s14081_s11 + $0xe28] sm:$0xf] }
 0x3b6   : > { %8400 = vmatpush.bf16.msra.mxu1 %v11052_v41  ;;  %8413 = vmatpush.bf16.msra.mxu2 %v11180_v42  ;;  %v8149_v41 = vpop.f32.mrf.mxu1  ;;  %v11004_v42 = vor.u32 %v12711_v14, %v11003_v4  ;;  %v12703_v6 = vld [vmem:[%s14081_s11 + $0xf54] sm:$0xf0]  ;;  %v10844_v4 = vor.u32 %v12671_v53, %v10843_v61  ;;  %v10955_v35 = vld [vmem:[%s14081_s11 + $0xf28] sm:$0xf] }
 0x3b7   : > { %8426 = vmatpush.bf16.msra.mxu3 %v11308_v26  ;;  %v10987_v26 = vld [vmem:[%s14081_s11 + $0xf68] sm:$0xf]  ;;  %v8150_v39 = vadd.f32 %v8149_v41, %v8137_v37  ;;  %v12735_v59 = vld [vmem:[%s14081_s11 + $0x1054] sm:$0xf0] }
 0x3b8   : > { %8382 = vmatmul.bf16.vlgmr.msrb.gmra.mxu3 %v14389_v0  ;;  %8388 = vmatpush.bf16.msra.mxu0 %v10908_v55  ;;  %v12771_v55 = vld [vmem:[%s14081_s11 + $0x1174] sm:$0xf0]  ;;  %v8162_v5 = vpop.f32.mrf.mxu2  ;;  %v11100_v24 = vor.u32 %v12735_v59, %v11099_v7  ;;  %v11083_v41 = vld [vmem:[%s14081_s11 + $0x1028] sm:$0xf] }
 0x3b9   : > { %v11244_v2 = vor.u32 %v12771_v55, %v11243_v54  ;;  %v12767_v10 = vld [vmem:[%s14081_s11 + $0x1154] sm:$0xf0]  ;;  %v10939_v38 = vld [vmem:[%s14081_s11 + $0xf08] sm:$0xf] }
 0x3ba   : > { %8401 = vmatpush.bf16.msra.mxu1 %v11036_v56  ;;  %8414 = vmatpush.bf16.msra.mxu2 %v11164_v57  ;;  %v10860_v56 = vor.u32 %v12675_v48, %v10859_v47  ;;  %v10988_v57 = vor.u32 %v12707_v52, %v10987_v26  ;;  %v8138_v11 = vpop.f32.mrf.mxu0  ;;  %v12667_v27 = vld [vmem:[%s14081_s11 + $0xe34] sm:$0xf0]  ;;  %v10811_v26 = vld [vmem:[%s14081_s11 + $0xe08] sm:$0xf] }
 0x3bb   : > { %8427 = vmatpush.bf16.msra.mxu3 %v11292_v51  ;;  %v10971_v51 = vld [vmem:[%s14081_s11 + $0xf48] sm:$0xf]  ;;  %v12763_v47 = vld [vmem:[%s14081_s11 + $0x1134] sm:$0xf0]  ;;  %v10828_v48 = vor.u32 %v12667_v27, %v10827_v3 }
 0x3bc   : > { %8389 = vmatpush.bf16.msra.mxu0 %v10892_v8  ;;  %v8163_v8 = vadd.f32 %v8162_v5, %v8150_v39  ;;  %v10972_v19 = vor.u32 %v12703_v6, %v10971_v51  ;;  %v12695_v40 = vld [vmem:[%s14081_s11 + $0xf14] sm:$0xf0]  ;;  %v11067_v54 = vld [vmem:[%s14081_s11 + $0x1008] sm:$0xf] }
 0x3bd   : > { %v11435_v53 = vld [vmem:[%s14081_s11 + $0x12e8] sm:$0xf]  ;;  %v12819_v51 = vld [vmem:[%s14081_s11 + $0x12f4] sm:$0xf0] }
 0x3be   : > { %8402 = vmatpush.bf16.msra.mxu1 %v11020_v9  ;;  %8415 = vmatpush.bf16.msra.mxu2 %v11148_v58  ;;  %v8175_v9 = vpop.f32.mrf.mxu3  ;;  %v11227_v58 = vld [vmem:[%s14081_s11 + $0x1148] sm:$0xf]  ;;  %v12851_v7 = vld [vmem:[%s14081_s11 + $0x13f4] sm:$0xf0] }
 0x3bf   : > { %8428 = vmatpush.bf16.msra.mxu3 %v11276_v13  ;;  %v8151_v13 = vpop.f32.mrf.mxu1  ;;  %v15330_v14 = vadd.f32 %v8175_v9, %v8163_v8  ;;  %v11228_v37 = vor.u32 %v12767_v10, %v11227_v58  ;;  %v11691_v59 = vld [vmem:[%s14081_s11 + $0x14e8] sm:$0xf]  ;;  %v12883_v8 = vld [vmem:[%s14081_s11 + $0x14f4] sm:$0xf0]  ;;  %v10940_v9 = vor.u32 %v12695_v40, %v10939_v38 }
 0x3c0   : > { %8390 = vmatpush.bf16.msra.mxu0 %v10876_v15  ;;  %v12699_v15 = vld [vmem:[%s14081_s11 + $0xf34] sm:$0xf0]  ;;  %v8164_v61 = vpop.f32.mrf.mxu2  ;;  %v11819_v10 = vld [vmem:[%s14081_s11 + $0x15e8] sm:$0xf]  ;;  %v11436_v13 = vor.u32 %v12819_v51, %v11435_v53 }
 0x3c1   : > { %v10956_v39 = vor.u32 %v12699_v15, %v10955_v35  ;;  %v12915_v11 = vld [vmem:[%s14081_s11 + $0x15f4] sm:$0xf0]  ;;  %v11419_v3 = vld [vmem:[%s14081_s11 + $0x12c8] sm:$0xf] }
 0x3c2   : > { %8403 = vmatpush.bf16.msra.mxu1 %v11004_v42  ;;  %8416 = vmatpush.bf16.msra.mxu2 %v11132_v46  ;;  %v12731_v42 = vld [vmem:[%s14081_s11 + $0x1034] sm:$0xf0]  ;;  %v11211_v46 = vld [vmem:[%s14081_s11 + $0x1128] sm:$0xf] }
 0x3c3   : > { %8429 = vmatpush.bf16.msra.mxu3 %v11260_v49  ;;  %v12663_v49 = vld [vmem:[%s14081_s11 + $0xe14] sm:$0xf0]  ;;  %v11084_v52 = vor.u32 %v12731_v42, %v11083_v41  ;;  %v11212_v55 = vor.u32 %v12763_v47, %v11211_v46  ;;  %v11547_v35 = vld [vmem:[%s14081_s11 + $0x13c8] sm:$0xf] }
 0x3c4   : > { %8391 = vmatpush.bf16.msra.mxu0 %v10860_v56  ;;  %v12727_v56 = vld [vmem:[%s14081_s11 + $0x1014] sm:$0xf0]  ;;  %v10812_v6 = vor.u32 %v12663_v49, %v10811_v26  ;;  %v11675_v41 = vld [vmem:[%s14081_s11 + $0x14c8] sm:$0xf] }
 0x3c5   : > { %v11068_v58 = vor.u32 %v12727_v56, %v11067_v54  ;;  %v12815_v27 = vld [vmem:[%s14081_s11 + $0x12d4] sm:$0xf0]  ;;  %v11803_v46 = vld [vmem:[%s14081_s11 + $0x15c8] sm:$0xf] }
 0x3c6   : > { %8404 = vmatpush.bf16.msra.mxu1 %v10988_v57  ;;  %8417 = vmatpush.bf16.msra.mxu2 %v11116_v60  ;;  %v11195_v57 = vld [vmem:[%s14081_s11 + $0x1108] sm:$0xf]  ;;  %v12759_v60 = vld [vmem:[%s14081_s11 + $0x1114] sm:$0xf0]  ;;  %v8177_v5 = vpop.f32.mrf.mxu3 }
 0x3c7   : > { %8430 = vmatpush.bf16.msra.mxu3 %v11244_v2  ;;  %v11563_v2 = vld [vmem:[%s14081_s11 + $0x13e8] sm:$0xf]  ;;  %v12847_v15 = vld [vmem:[%s14081_s11 + $0x13d4] sm:$0xf0] }
 0x3c8   : > { %8392 = vmatpush.bf16.msra.mxu0 %v10844_v4  ;;  %v11196_v4 = vor.u32 %v12759_v60, %v11195_v57  ;;  %v12879_v42 = vld [vmem:[%s14081_s11 + $0x14d4] sm:$0xf0]  ;;  %v11548_v26 = vor.u32 %v12847_v15, %v11547_v35  ;;  %v11531_v38 = vld [vmem:[%s14081_s11 + $0x13a8] sm:$0xf] }
 0x3c9   : > { %v12911_v47 = vld [vmem:[%s14081_s11 + $0x15d4] sm:$0xf0]  ;;  %v11676_v49 = vor.u32 %v12879_v42, %v11675_v41  ;;  %v11787_v57 = vld [vmem:[%s14081_s11 + $0x15a8] sm:$0xf] }
 0x3ca   : > { %8405 = vmatpush.bf16.msra.mxu1 %v10972_v19  ;;  %8418 = vmatpush.bf16.msra.mxu2 %v11100_v24  ;;  %v11564_v19 = vor.u32 %v12851_v7, %v11563_v2  ;;  %v11692_v24 = vor.u32 %v12883_v8, %v11691_v59  ;;  %v11804_v40 = vor.u32 %v12911_v47, %v11803_v46  ;;  %v12843_v54 = vld [vmem:[%s14081_s11 + $0x13b4] sm:$0xf0]  ;;  %v11387_v2 = vld [vmem:[%s14081_s11 + $0x1288] sm:$0xf] }
 0x3cb   : > { %8431 = vmatpush.bf16.msra.mxu3 %v11228_v37  ;;  %v11820_v37 = vor.u32 %v12915_v11, %v11819_v10  ;;  %v12875_v56 = vld [vmem:[%s14081_s11 + $0x14b4] sm:$0xf0]  ;;  %v11532_v53 = vor.u32 %v12843_v54, %v11531_v38  ;;  %v11643_v8 = vld [vmem:[%s14081_s11 + $0x1488] sm:$0xf] }
 0x3cc   : > { %8393 = vmatpush.bf16.msra.mxu0 %v10828_v48  ;;  %v11420_v48 = vor.u32 %v12815_v27, %v11419_v3  ;;  %v12907_v60 = vld [vmem:[%s14081_s11 + $0x15b4] sm:$0xf0]  ;;  %v11771_v10 = vld [vmem:[%s14081_s11 + $0x1588] sm:$0xf] }
 0x3cd   : > { %v12807_v5 = vld [vmem:[%s14081_s11 + $0x1294] sm:$0xf0]  ;;  %v11788_v7 = vor.u32 %v12907_v60, %v11787_v57  ;;  %v11371_v27 = vld [vmem:[%s14081_s11 + $0x1268] sm:$0xf] }
 0x3ce   : > { %8406 = vmatpush.bf16.msra.mxu1 %v10956_v39  ;;  %8419 = vmatpush.bf16.msra.mxu2 %v11084_v52  ;;  %v11403_v39 = vld [vmem:[%s14081_s11 + $0x12a8] sm:$0xf]  ;;  %v12811_v52 = vld [vmem:[%s14081_s11 + $0x12b4] sm:$0xf0] }
 0x3cf   : > { %8432 = vmatpush.bf16.msra.mxu3 %v11212_v55  ;;  %v11659_v55 = vld [vmem:[%s14081_s11 + $0x14a8] sm:$0xf]  ;;  %v11404_v61 = vor.u32 %v12811_v52, %v11403_v39  ;;  %v12839_v59 = vld [vmem:[%s14081_s11 + $0x1394] sm:$0xf0] }
 0x3d0   : > { %8394 = vmatpush.bf16.msra.mxu0 %v10812_v6  ;;  %v11660_v51 = vor.u32 %v12875_v56, %v11659_v55  ;;  %v11515_v6 = vld [vmem:[%s14081_s11 + $0x1388] sm:$0xf]  ;;  %v12903_v11 = vld [vmem:[%s14081_s11 + $0x1594] sm:$0xf0] }
 0x3d1   : > { %v12803_v35 = vld [vmem:[%s14081_s11 + $0x1274] sm:$0xf0]  ;;  %v11772_v15 = vor.u32 %v12903_v11, %v11771_v10  ;;  %v11755_v47 = vld [vmem:[%s14081_s11 + $0x1568] sm:$0xf] }
 0x3d2   : > { %8407 = vmatpush.bf16.msra.mxu1 %v10940_v9  ;;  %8420 = vmatpush.bf16.msra.mxu2 %v11068_v58  ;;  %v12871_v9 = vld [vmem:[%s14081_s11 + $0x1494] sm:$0xf0]  ;;  %v8188_v58 = vpop.f32.mrf.mxu0  ;;  %v11372_v52 = vor.u32 %v12803_v35, %v11371_v27  ;;  %v11355_v54 = vld [vmem:[%s14081_s11 + $0x1248] sm:$0xf] }
 0x3d3   : > { %8433 = vmatpush.bf16.msra.mxu3 %v11196_v4  ;;  %8395 = vmatmul.bf16.vlgmr.msra.gmra.mxu0 %v14387_v63  ;;  %v8189_v4 = vadd.f32 %v8188_v58, %v15330_v14  ;;  %v11644_v3 = vor.u32 %v12871_v9, %v11643_v8  ;;  %v12835_v42 = vld [vmem:[%s14081_s11 + $0x1374] sm:$0xf0]  ;;  %v11627_v14 = vld [vmem:[%s14081_s11 + $0x1468] sm:$0xf] }
 0x3d4   : > { %8439 = vmatpush.bf16.msrb.mxu0 %v11436_v13  ;;  %v11388_v13 = vor.u32 %v12807_v5, %v11387_v2  ;;  %v12867_v46 = vld [vmem:[%s14081_s11 + $0x1474] sm:$0xf0]  ;;  %v11483_v56 = vld [vmem:[%s14081_s11 + $0x1348] sm:$0xf] }
 0x3d5   : > { %8421 = vmatmul.bf16.vlgmr.msra.gmra.mxu2 %v14474_v25  ;;  %8408 = vmatmul.bf16.vlgmr.msra.gmra.mxu1 %v14391_v1  ;;  %v12799_v55 = vld [vmem:[%s14081_s11 + $0x1254] sm:$0xf0]  ;;  %v11339_v10 = vld [vmem:[%s14081_s11 + $0x1228] sm:$0xf] }
 0x3d6   : > { %8452 = vmatpush.bf16.msrb.mxu1 %v11564_v19  ;;  %8465 = vmatpush.bf16.msrb.mxu2 %v11692_v24  ;;  %v8201_v19 = vpop.f32.mrf.mxu1  ;;  %v11516_v24 = vor.u32 %v12839_v59, %v11515_v6  ;;  %v12831_v60 = vld [vmem:[%s14081_s11 + $0x1354] sm:$0xf0]  ;;  %v11356_v59 = vor.u32 %v12799_v55, %v11355_v54  ;;  %v11723_v35 = vld [vmem:[%s14081_s11 + $0x1528] sm:$0xf] }
 0x3d7   : > { %8478 = vmatpush.bf16.msrb.mxu3 %v11820_v37  ;;  %v11499_v37 = vld [vmem:[%s14081_s11 + $0x1368] sm:$0xf]  ;;  %v8202_v41 = vadd.f32 %v8201_v19, %v8189_v4  ;;  %v12895_v2 = vld [vmem:[%s14081_s11 + $0x1554] sm:$0xf0]  ;;  %v11484_v9 = vor.u32 %v12831_v60, %v11483_v56 }
 0x3d8   : > { %8434 = vmatmul.bf16.vlgmr.msra.gmra.mxu3 %v14480_v30  ;;  %8440 = vmatpush.bf16.msrb.mxu0 %v11420_v48  ;;  %v12899_v48 = vld [vmem:[%s14081_s11 + $0x1574] sm:$0xf0]  ;;  %v11500_v38 = vor.u32 %v12835_v42, %v11499_v37  ;;  %v11467_v4 = vld [vmem:[%s14081_s11 + $0x1328] sm:$0xf] }
 0x3d9   : > { %v15395_v39 = vpack.c.bf16 %v8202_v41, %v14958_v36  ;;  %v11756_v57 = vor.u32 %v12899_v48, %v11755_v47  ;;  %v11739_v36 = vld [vmem:[%s14081_s11 + $0x1548] sm:$0xf]  ;;  %v12795_v11 = vld [vmem:[%s14081_s11 + $0x1234] sm:$0xf0] }
 0x3da   : > { %8453 = vmatpush.bf16.msrb.mxu1 %v11548_v26  ;;  %8466 = vmatpush.bf16.msrb.mxu2 %v11676_v49  ;;  %v13088_v26 = vld [vmem:[%s14529_s27] sm:$0xf]  ;;  %v11740_v19 = vor.u32 %v12895_v2, %v11739_v36  ;;  %v11323_v41 = vld [vmem:[%s14081_s11 + $0x1208] sm:$0xf] }
 0x3db   : > { %8479 = vmatpush.bf16.msrb.mxu3 %v11804_v40  ;;  %v3491_v49 = vperm.slane %v13088_v26, 2  ;;  %v11628_v40 = vor.u32 %v12867_v46, %v11627_v14  ;;  %v8227_v6 = vpop.f32.mrf.mxu3  ;;  %v12859_v27 = vld [vmem:[%s14081_s11 + $0x1434] sm:$0xf0]  ;;  %v11451_v47 = vld [vmem:[%s14081_s11 + $0x1308] sm:$0xf] }
 0x3dc   : > { %8441 = vmatpush.bf16.msrb.mxu0 %v11404_v61  ;;  %v11611_v61 = vld [vmem:[%s14081_s11 + $0x1448] sm:$0xf]  ;;  %v12891_v37 = vld [vmem:[%s14081_s11 + $0x1534] sm:$0xf0] }
 0x3dd   : > { %v12791_v42 = vld [vmem:[%s14081_s11 + $0x1214] sm:$0xf0]  ;;  %v11579_v26 = vld [vmem:[%s14081_s11 + $0x1408] sm:$0xf] }
 0x3de   : > { %8454 = vmatpush.bf16.msrb.mxu1 %v11532_v53  ;;  %8467 = vmatpush.bf16.msrb.mxu2 %v11660_v51  ;;  %v12863_v53 = vld [vmem:[%s14081_s11 + $0x1454] sm:$0xf0]  ;;  %v8214_v51 = vpop.f32.mrf.mxu2  ;;  %v8203_v8 = vpop.f32.mrf.mxu1  ;;  %v11947_v55 = vld [vmem:[%s14081_s11 + $0x16e8] sm:$0xf] }
 0x3df   : > { %8480 = vmatpush.bf16.msrb.mxu3 %v11788_v7  ;;  %v8215_v5 = vadd.f32 %v8214_v51, %v3491_v49  ;;  %v8190_v7 = vpop.f32.mrf.mxu0  ;;  %v11612_v58 = vor.u32 %v12863_v53, %v11611_v61  ;;  %v12823_v48 = vld [vmem:[%s14081_s11 + $0x1314] sm:$0xf0]  ;;  %v11724_v49 = vor.u32 %v12891_v37, %v11723_v35  ;;  %v11324_v61 = vor.u32 %v12791_v42, %v11323_v41  ;;  %v12203_v51 = vld [vmem:[%s14081_s11 + $0x18e8] sm:$0xf]  ;;  %v12237_v35 = vld [vmem:[%s14081_s11 + $0xcc] sm:$0xf] }
 0x3e0   : > { %8442 = vmatpush.bf16.msrb.mxu0 %v11388_v13  ;;  %v12947_v56 = vld [vmem:[%s14081_s11 + $0x16f4] sm:$0xf0]  ;;  %v11452_v2 = vor.u32 %v12823_v48, %v11451_v47  ;;  %v9133_v7 = vld [vmem:[%s14081_s11 + $0xf8] sm:$0xf0]  ;;  %v12043_v47 = vld [vmem:[%s14081_s11 + $0x17a8] sm:$0xf] }
 0x3e1   : > { %v15408_v13 = vadd.f32 %v8227_v6, %v8215_v5  ;;  %v12979_v53 = vld [vmem:[%s14081_s11 + $0x17f4] sm:$0xf0]  ;;  %v12241_v6 = vld [vmem:[%s14081_s11 + $0xec] sm:$0xf]  ;;  %v11948_v8 = vor.u32 %v12947_v56, %v11947_v55  ;;  %v9117_v37 = vld [vmem:[%s14081_s11 + $0xd8] sm:$0xf0] }
 0x3e2   : > { %8455 = vmatpush.bf16.msrb.mxu1 %v11516_v24  ;;  %8468 = vmatpush.bf16.msrb.mxu2 %v11644_v3  ;;  %v12827_v24 = vld [vmem:[%s14081_s11 + $0x1334] sm:$0xf0]  ;;  %v11595_v3 = vld [vmem:[%s14081_s11 + $0x1428] sm:$0xf]  ;;  %v9120_v48 = vor.u32 %v12237_v35, %v9117_v37  ;;  %v12225_v37 = vld [vmem:[%s14081_s11 + $0x6c] sm:$0xf] }
 0x3e3   : > { %8481 = vmatpush.bf16.msrb.mxu3 %v11772_v15  ;;  %v11340_v15 = vor.u32 %v12795_v11, %v11339_v10  ;;  %v11468_v14 = vor.u32 %v12827_v24, %v11467_v4  ;;  %v11596_v46 = vor.u32 %v12859_v27, %v11595_v3  ;;  %v8229_v60 = vpop.f32.mrf.mxu3  ;;  %v13011_v36 = vld [vmem:[%s14081_s11 + $0x18f4] sm:$0xf0]  ;;  %v11931_v10 = vld [vmem:[%s14081_s11 + $0x16c8] sm:$0xf] }
 0x3e4   : > { %8443 = vmatpush.bf16.msrb.mxu0 %v11372_v52  ;;  %v12855_v52 = vld [vmem:[%s14081_s11 + $0x1414] sm:$0xf0]  ;;  %v12059_v4 = vld [vmem:[%s14081_s11 + $0x17c8] sm:$0xf] }
 0x3e5   : > { %v11580_v5 = vor.u32 %v12855_v52, %v11579_v26  ;;  %v12943_v11 = vld [vmem:[%s14081_s11 + $0x16d4] sm:$0xf0]  ;;  %v12187_v3 = vld [vmem:[%s14081_s11 + $0x18c8] sm:$0xf] }
 0x3e6   : > { %8456 = vmatpush.bf16.msrb.mxu1 %v11500_v38  ;;  %8469 = vmatpush.bf16.msrb.mxu2 %v11628_v40  ;;  %v11707_v38 = vld [vmem:[%s14081_s11 + $0x1508] sm:$0xf]  ;;  %v12887_v40 = vld [vmem:[%s14081_s11 + $0x1514] sm:$0xf0]  ;;  %v8216_v54 = vpop.f32.mrf.mxu2 }
 0x3e7   : > { %8482 = vmatpush.bf16.msrb.mxu3 %v11756_v57  ;;  %v12075_v57 = vld [vmem:[%s14081_s11 + $0x17e8] sm:$0xf]  ;;  %v12975_v24 = vld [vmem:[%s14081_s11 + $0x17d4] sm:$0xf0] }
 0x3e8   : > { %8444 = vmatpush.bf16.msrb.mxu0 %v11356_v59  ;;  %v11708_v59 = vor.u32 %v12887_v40, %v11707_v38  ;;  %v13007_v27 = vld [vmem:[%s14081_s11 + $0x18d4] sm:$0xf0]  ;;  %v12060_v41 = vor.u32 %v12975_v24, %v12059_v4  ;;  %v12233_v38 = vld [vmem:[%s14081_s11 + $0xac] sm:$0xf]  ;;  %v9101_v40 = vld [vmem:[%s14081_s11 + $0xb8] sm:$0xf0] }
 0x3e9   : > { %v12188_v42 = vor.u32 %v13007_v27, %v12187_v3  ;;  %v12971_v26 = vld [vmem:[%s14081_s11 + $0x17b4] sm:$0xf0]  ;;  %v12139_v27 = vld [vmem:[%s14081_s11 + $0x1868] sm:$0xf] }
 0x3ea   : > { %8457 = vmatpush.bf16.msrb.mxu1 %v11484_v9  ;;  %8470 = vmatpush.bf16.msrb.mxu2 %v11612_v58  ;;  %v12076_v9 = vor.u32 %v12979_v53, %v12075_v57  ;;  %v12204_v58 = vor.u32 %v13011_v36, %v12203_v51  ;;  %v13003_v52 = vld [vmem:[%s14081_s11 + $0x18b4] sm:$0xf0]  ;;  %v12044_v55 = vor.u32 %v12971_v26, %v12043_v47  ;;  %v11899_v57 = vld [vmem:[%s14081_s11 + $0x1688] sm:$0xf] }
 0x3eb   : > { %8483 = vmatpush.bf16.msrb.mxu3 %v11740_v19  ;;  %v9136_v19 = vor.u32 %v12241_v6, %v9133_v7  ;;  %v12935_v60 = vld [vmem:[%s14081_s11 + $0x1694] sm:$0xf0]  ;;  %v9104_v53 = vor.u32 %v12233_v38, %v9101_v40  ;;  %v12155_v36 = vld [vmem:[%s14081_s11 + $0x1888] sm:$0xf]  ;;  %v9085_v6 = vld [vmem:[%s14081_s11 + $0x98] sm:$0xf0] }
 0x3ec   : > { %8445 = vmatpush.bf16.msrb.mxu0 %v11340_v15  ;;  %v11932_v15 = vor.u32 %v12943_v11, %v11931_v10  ;;  %v12967_v51 = vld [vmem:[%s14081_s11 + $0x1794] sm:$0xf0]  ;;  %v11900_v7 = vor.u32 %v12935_v60, %v11899_v57  ;;  %v12011_v11 = vld [vmem:[%s14081_s11 + $0x1768] sm:$0xf]  ;;  %v9053_v57 = vld [vmem:[%s14081_s11 + $0x58] sm:$0xf0] }
 0x3ed   : > { %v12931_v10 = vld [vmem:[%s14081_s11 + $0x1674] sm:$0xf0]  ;;  %v12123_v38 = vld [vmem:[%s14081_s11 + $0x1848] sm:$0xf] }
 0x3ee   : > { %8458 = vmatpush.bf16.msrb.mxu1 %v11468_v14  ;;  %8471 = vmatpush.bf16.msrb.mxu2 %v11596_v46  ;;  %v11915_v14 = vld [vmem:[%s14081_s11 + $0x16a8] sm:$0xf]  ;;  %v12939_v46 = vld [vmem:[%s14081_s11 + $0x16b4] sm:$0xf0] }
 0x3ef   : > { %8484 = vmatpush.bf16.msrb.mxu3 %v11724_v49  ;;  %v12171_v49 = vld [vmem:[%s14081_s11 + $0x18a8] sm:$0xf]  ;;  %v11916_v54 = vor.u32 %v12939_v46, %v11915_v14  ;;  %v12963_v3 = vld [vmem:[%s14081_s11 + $0x1774] sm:$0xf0] }
 0x3f0   : > { %8446 = vmatpush.bf16.msrb.mxu0 %v11324_v61  ;;  %v12172_v56 = vor.u32 %v13003_v52, %v12171_v49  ;;  %v12027_v61 = vld [vmem:[%s14081_s11 + $0x1788] sm:$0xf]  ;;  %v12995_v35 = vld [vmem:[%s14081_s11 + $0x1874] sm:$0xf0] }
 0x3f1   : > { %v12140_v14 = vor.u32 %v12995_v35, %v12139_v27  ;;  %v11867_v46 = vld [vmem:[%s14081_s11 + $0x1648] sm:$0xf]  ;;  %v12927_v47 = vld [vmem:[%s14081_s11 + $0x1654] sm:$0xf0] }
 0x3f2   : > { %8459 = vmatpush.bf16.msrb.mxu1 %v11452_v2  ;;  %8472 = vmatpush.bf16.msrb.mxu2 %v11580_v5  ;;  %v12999_v2 = vld [vmem:[%s14081_s11 + $0x1894] sm:$0xf0]  ;;  %v12229_v5 = vld [vmem:[%s14081_s11 + $0x8c] sm:$0xf]  ;;  %v11868_v60 = vor.u32 %v12927_v47, %v11867_v46  ;;  %v11963_v35 = vld [vmem:[%s14081_s11 + $0x1708] sm:$0xf] }
 0x3f3   : > { %8485 = vmatpush.bf16.msrb.mxu3 %v11708_v59  ;;  %8447 = vmatmul.bf16.vlgmr.msrb.gmra.mxu0 %v14478_v29  ;;  %v8240_v59 = vpop.f32.mrf.mxu0  ;;  %v9088_v24 = vor.u32 %v12229_v5, %v9085_v6  ;;  %v12959_v52 = vld [vmem:[%s14081_s11 + $0x1754] sm:$0xf0]  ;;  %v11979_v6 = vld [vmem:[%s14081_s11 + $0x1728] sm:$0xf]  ;;  %v9021_v46 = vld [vmem:[%s14081_s11 + $0x18] sm:$0xf0] }
 0x3f4   : > { %8491 = vmatpush.bf16.msra.mxu0 %v11948_v8  ;;  %v12028_v8 = vor.u32 %v12967_v51, %v12027_v61  ;;  %v8241_v4 = vadd.f32 %v8240_v59, %v15408_v13  ;;  %v12012_v13 = vor.u32 %v12963_v3, %v12011_v11  ;;  %v12991_v40 = vld [vmem:[%s14081_s11 + $0x1854] sm:$0xf0]  ;;  %v9037_v11 = vld [vmem:[%s14081_s11 + $0x38] sm:$0xf0] }
 0x3f5   : > { %8473 = vmatmul.bf16.vlgmr.msrb.gmra.mxu2 %v14560_v20  ;;  %8460 = vmatmul.bf16.vlgmr.msrb.gmra.mxu1 %v14482_v34  ;;  %v12923_v5 = vld [vmem:[%s14081_s11 + $0x1634] sm:$0xf0] }
 0x3f6   : > { %8504 = vmatpush.bf16.msra.mxu1 %v12076_v9  ;;  %8517 = vmatpush.bf16.msra.mxu2 %v12204_v58  ;;  %v12156_v9 = vor.u32 %v12999_v2, %v12155_v36  ;;  %v11883_v58 = vld [vmem:[%s14081_s11 + $0x1668] sm:$0xf]  ;;  %v12124_v36 = vor.u32 %v12991_v40, %v12123_v38  ;;  %v9389_v38 = vld [vmem:[%s14081_s11 + $0x2f8] sm:$0xf0]  ;;  %v12337_v40 = vld [vmem:[%s14081_s11 + $0x3ec] sm:$0xf] }
 0x3f7   : > { %8530 = vmatpush.bf16.msra.mxu3 %v9136_v19  ;;  %v8253_v19 = vpop.f32.mrf.mxu1  ;;  %v11851_v2 = vld [vmem:[%s14081_s11 + $0x1628] sm:$0xf] }
 0x3f8   : > { %8486 = vmatmul.bf16.vlgmr.msrb.gmra.mxu3 %v14564_v22  ;;  %8492 = vmatpush.bf16.msra.mxu0 %v11932_v15  ;;  %v9069_v15 = vld [vmem:[%s14081_s11 + $0x78] sm:$0xf0]  ;;  %v8266_v26 = vpop.f32.mrf.mxu2 }
 0x3f9   : > { %v9072_v49 = vor.u32 %v12225_v37, %v9069_v15  ;;  %v12951_v37 = vld [vmem:[%s14081_s11 + $0x1714] sm:$0xf0]  ;;  %v12091_v15 = vld [vmem:[%s14081_s11 + $0x1808] sm:$0xf] }
 0x3fa   : > { %8505 = vmatpush.bf16.msra.mxu1 %v12060_v41  ;;  %8518 = vmatpush.bf16.msra.mxu2 %v12188_v42  ;;  %v8254_v41 = vadd.f32 %v8253_v19, %v8241_v4  ;;  %v11884_v42 = vor.u32 %v12931_v10, %v11883_v58  ;;  %v12987_v58 = vld [vmem:[%s14081_s11 + $0x1834] sm:$0xf0]  ;;  %v12217_v10 = vld [vmem:[%s14081_s11 + $0x2c] sm:$0xf]  ;;  %v11852_v4 = vor.u32 %v12923_v5, %v11851_v2  ;;  %v11835_v19 = vld [vmem:[%s14081_s11 + $0x1608] sm:$0xf] }
 0x3fb   : > { %8531 = vmatpush.bf16.msra.mxu3 %v9120_v48  ;;  %v11995_v48 = vld [vmem:[%s14081_s11 + $0x1748] sm:$0xf]  ;;  %v12269_v5 = vld [vmem:[%s14081_s11 + $0x1cc] sm:$0xf] }
 0x3fc   : > { %8493 = vmatpush.bf16.msra.mxu0 %v11916_v54  ;;  %v8267_v54 = vadd.f32 %v8266_v26, %v8254_v41  ;;  %v11996_v51 = vor.u32 %v12959_v52, %v11995_v48  ;;  %v12273_v48 = vld [vmem:[%s14081_s11 + $0x1ec] sm:$0xf]  ;;  %v9261_v26 = vld [vmem:[%s14081_s11 + $0x1f8] sm:$0xf0] }
 0x3fe   : > { %8506 = vmatpush.bf16.msra.mxu1 %v12044_v55  ;;  %8519 = vmatpush.bf16.msra.mxu2 %v12172_v56  ;;  %v8279_v55 = vpop.f32.mrf.mxu3  ;;  %v12221_v56 = vld [vmem:[%s14081_s11 + $0x4c] sm:$0xf] }
 0x3ff   : > { %8532 = vmatpush.bf16.msra.mxu3 %v9104_v53  ;;  %v15476_v61 = vadd.f32 %v8279_v55, %v8267_v54  ;;  %v8242_v53 = vpop.f32.mrf.mxu0  ;;  %v9056_v59 = vor.u32 %v12221_v56, %v9053_v57  ;;  %v9517_v54 = vld [vmem:[%s14081_s11 + $0x3f8] sm:$0xf0]  ;;  %v11964_v55 = vor.u32 %v12951_v37, %v11963_v35  ;;  %v12369_v57 = vld [vmem:[%s14081_s11 + $0x4ec] sm:$0xf] }
 0x400   : > { %8494 = vmatpush.bf16.msra.mxu0 %v11900_v7  ;;  %v8255_v7 = vpop.f32.mrf.mxu1  ;;  %v8268_v41 = vpop.f32.mrf.mxu2  ;;  %v9520_v2 = vor.u32 %v12337_v40, %v9517_v54  ;;  %v12297_v35 = vld [vmem:[%s14081_s11 + $0x2ac] sm:$0xf]  ;;  %v9341_v54 = vld [vmem:[%s14081_s11 + $0x298] sm:$0xf0] }
 0x401   : > { %v12301_v7 = vld [vmem:[%s14081_s11 + $0x2cc] sm:$0xf] }
 0x402   : > { %8507 = vmatpush.bf16.msra.mxu1 %v12028_v8  ;;  %8520 = vmatpush.bf16.msra.mxu2 %v12156_v9  ;;  %v12955_v8 = vld [vmem:[%s14081_s11 + $0x1734] sm:$0xf0]  ;;  %v12107_v9 = vld [vmem:[%s14081_s11 + $0x1828] sm:$0xf]  ;;  %v12329_v41 = vld [vmem:[%s14081_s11 + $0x3ac] sm:$0xf] }
 0x403   : > { %8533 = vmatpush.bf16.msra.mxu3 %v9088_v24  ;;  %v12919_v24 = vld [vmem:[%s14081_s11 + $0x1614] sm:$0xf0]  ;;  %v11980_v3 = vor.u32 %v12955_v8, %v11979_v6  ;;  %v12108_v27 = vor.u32 %v12987_v58, %v12107_v9  ;;  %v9245_v6 = vld [vmem:[%s14081_s11 + $0x1d8] sm:$0xf0]  ;;  %v12333_v9 = vld [vmem:[%s14081_s11 + $0x3cc] sm:$0xf] }
 0x404   : > { %8495 = vmatpush.bf16.msra.mxu0 %v11884_v42  ;;  %v9040_v42 = vor.u32 %v12217_v10, %v9037_v11  ;;  %v11836_v52 = vor.u32 %v12919_v24, %v11835_v19  ;;  %v9373_v8 = vld [vmem:[%s14081_s11 + $0x2d8] sm:$0xf0]  ;;  %v12365_v10 = vld [vmem:[%s14081_s11 + $0x4cc] sm:$0xf] }
 0x405   : > { %v9501_v58 = vld [vmem:[%s14081_s11 + $0x3d8] sm:$0xf0]  ;;  %v9376_v19 = vor.u32 %v12301_v7, %v9373_v8 }
 0x406   : > { %8508 = vmatpush.bf16.msra.mxu1 %v12012_v13  ;;  %8521 = vmatpush.bf16.msra.mxu2 %v12140_v14  ;;  %v12983_v13 = vld [vmem:[%s14081_s11 + $0x1814] sm:$0xf0]  ;;  %v12213_v14 = vld [vmem:[%s14081_s11 + $0xc] sm:$0xf]  ;;  %v8281_v47 = vpop.f32.mrf.mxu3  ;;  %v9629_v11 = vld [vmem:[%s14081_s11 + $0x4d8] sm:$0xf0]  ;;  %v9504_v24 = vor.u32 %v12333_v9, %v9501_v58 }
 0x407   : > { %8534 = vmatpush.bf16.msra.mxu3 %v9072_v49  ;;  %v12305_v49 = vld [vmem:[%s14081_s11 + $0x2ec] sm:$0xf]  ;;  %v12092_v56 = vor.u32 %v12983_v13, %v12091_v15  ;;  %v9024_v53 = vor.u32 %v12213_v14, %v9021_v46  ;;  %v9632_v37 = vor.u32 %v12365_v10, %v9629_v11  ;;  %v9357_v15 = vld [vmem:[%s14081_s11 + $0x2b8] sm:$0xf0] }
 0x408   : > { %8496 = vmatpush.bf16.msra.mxu0 %v11868_v60  ;;  %v9645_v60 = vld [vmem:[%s14081_s11 + $0x4f8] sm:$0xf0]  ;;  %v12361_v14 = vld [vmem:[%s14081_s11 + $0x4ac] sm:$0xf] }
 0x409   : > { %v13089_v13 = vld [vmem:[#allocation1] sm:$0xff]  ;;  %v12321_v10 = vld [vmem:[%s14081_s11 + $0x36c] sm:$0xf] }
 0x40a   : > { %8509 = vmatpush.bf16.msra.mxu1 %v11996_v51  ;;  %8522 = vmatpush.bf16.msra.mxu2 %v12124_v36  ;;  %v9264_v51 = vor.u32 %v12273_v48, %v9261_v26  ;;  %v9392_v36 = vor.u32 %v12305_v49, %v9389_v38  ;;  %v9613_v46 = vld [vmem:[%s14081_s11 + $0x4b8] sm:$0xf0]  ;;  %v9360_v48 = vor.u32 %v12297_v35, %v9357_v15  ;;  %v12261_v49 = vld [vmem:[%s14081_s11 + $0x18c] sm:$0xf] }
 0x40b   : > { %8535 = vmatpush.bf16.msra.mxu3 %v9056_v59  ;;  %v9648_v59 = vor.u32 %v12369_v57, %v9645_v60  ;;  %v12293_v38 = vld [vmem:[%s14081_s11 + $0x28c] sm:$0xf]  ;;  %v9616_v40 = vor.u32 %v12361_v14, %v9613_v46  ;;  %v9197_v7 = vld [vmem:[%s14081_s11 + $0x178] sm:$0xf0] }
 0x40c   : > { %8497 = vmatpush.bf16.msra.mxu0 %v11852_v4  ;;  %v9248_v4 = vor.u32 %v12269_v5, %v9245_v6  ;;  %v12357_v60 = vld [vmem:[%s14081_s11 + $0x48c] sm:$0xf]  ;;  %v9325_v58 = vld [vmem:[%s14081_s11 + $0x278] sm:$0xf0] }
 0x40d   : > { %v12257_v6 = vld [vmem:[%s14081_s11 + $0x16c] sm:$0xf]  ;;  %v9181_v35 = vld [vmem:[%s14081_s11 + $0x158] sm:$0xf0] }
 0x40e   : > { %8510 = vmatpush.bf16.msra.mxu1 %v11980_v3  ;;  %8523 = vmatpush.bf16.msra.mxu2 %v12108_v27  ;;  %v12265_v3 = vld [vmem:[%s14081_s11 + $0x1ac] sm:$0xf]  ;;  %v9229_v27 = vld [vmem:[%s14081_s11 + $0x1b8] sm:$0xf0] }
 0x40f   : > { %8536 = vmatpush.bf16.msra.mxu3 %v9040_v42  ;;  %v9485_v42 = vld [vmem:[%s14081_s11 + $0x3b8] sm:$0xf0]  ;;  %v9232_v47 = vor.u32 %v12265_v3, %v9229_v27  ;;  %v12353_v11 = vld [vmem:[%s14081_s11 + $0x46c] sm:$0xf] }
 0x410   : > { %8498 = vmatpush.bf16.msra.mxu0 %v11836_v52  ;;  %v9488_v26 = vor.u32 %v12329_v41, %v9485_v42  ;;  %v9213_v52 = vld [vmem:[%s14081_s11 + $0x198] sm:$0xf0]  ;;  %v8292_v57 = vpop.f32.mrf.mxu0  ;;  %v12253_v27 = vld [vmem:[%s14081_s11 + $0x14c] sm:$0xf] }
 0x411   : > { %v9309_v42 = vld [vmem:[%s14081_s11 + $0x258] sm:$0xf0] }
 0x412   : > { %8511 = vmatpush.bf16.msra.mxu1 %v11964_v55  ;;  %8524 = vmatpush.bf16.msra.mxu2 %v12092_v56  ;;  %v12325_v55 = vld [vmem:[%s14081_s11 + $0x38c] sm:$0xf]  ;;  %v9469_v56 = vld [vmem:[%s14081_s11 + $0x398] sm:$0xf0] }
 0x413   : > { %8537 = vmatpush.bf16.msra.mxu3 %v9024_v53  ;;  %8499 = vmatmul.bf16.vlgmr.msra.gmra.mxu0 %v14562_v21  ;;  %v9597_v53 = vld [vmem:[%s14081_s11 + $0x498] sm:$0xf0]  ;;  %v9472_v5 = vor.u32 %v12325_v55, %v9469_v56  ;;  %v12249_v56 = vld [vmem:[%s14081_s11 + $0x12c] sm:$0xf] }
 0x414   : > { %8543 = vmatpush.bf16.msrb.mxu0 %v9264_v51  ;;  %v9216_v51 = vor.u32 %v12261_v49, %v9213_v52  ;;  %v9600_v8 = vor.u32 %v12357_v60, %v9597_v53  ;;  %v9437_v14 = vld [vmem:[%s14081_s11 + $0x358] sm:$0xf0]  ;;  %v9184_v52 = vor.u32 %v12253_v27, %v9181_v35  ;;  %v12281_v60 = vld [vmem:[%s14081_s11 + $0x22c] sm:$0xf] }
 0x415   : > { %8525 = vmatmul.bf16.vlgmr.msra.gmra.mxu2 %v13089_v13  ;;  %8512 = vmatmul.bf16.vlgmr.msra.gmra.mxu1 %v14566_v23  ;;  %v12317_v13 = vld [vmem:[%s14081_s11 + $0x34c] sm:$0xf]  ;;  %v9773_v35 = vld [vmem:[%s14081_s11 + $0x5f8] sm:$0xf0] }
 0x416   : > { %8556 = vmatpush.bf16.msrb.mxu1 %v9392_v36  ;;  %8569 = vmatpush.bf16.msrb.mxu2 %v9520_v2  ;;  %v8305_v36 = vpop.f32.mrf.mxu1  ;;  %v9344_v2 = vor.u32 %v12293_v38, %v9341_v54  ;;  %v9440_v55 = vor.u32 %v12317_v13, %v9437_v14  ;;  %v12401_v27 = vld [vmem:[%s14081_s11 + $0x5ec] sm:$0xf]  ;;  %v10029_v14 = vld [vmem:[%s14081_s11 + $0x7f8] sm:$0xf0] }
 0x417   : > { %8582 = vmatpush.bf16.msrb.mxu3 %v9648_v59  ;;  %v12289_v59 = vld [vmem:[%s14081_s11 + $0x26c] sm:$0xf] }
 0x418   : > { %8544 = vmatpush.bf16.msrb.mxu0 %v9248_v4  ;;  %8538 = vmatmul.bf16.vlgmr.msra.gmra.mxu3 %v14193_v44  ;;  %v8293_v44 = vadd.f32 %v8292_v57, %v15476_v61  ;;  %v9453_v61 = vld [vmem:[%s14081_s11 + $0x378] sm:$0xf0]  ;;  %v8318_v41 = vpop.f32.mrf.mxu2  ;;  %v8294_v49 = vpop.f32.mrf.mxu0  ;;  %v12465_v13 = vld [vmem:[%s14081_s11 + $0x7ec] sm:$0xf] }
 0x419   : > { %v9581_v4 = vld [vmem:[%s14081_s11 + $0x478] sm:$0xf0]  ;;  %v9456_v3 = vor.u32 %v12321_v10, %v9453_v61  ;;  %v12309_v61 = vld [vmem:[%s14081_s11 + $0x30c] sm:$0xf] }
 0x41a   : > { %8557 = vmatpush.bf16.msrb.mxu1 %v9376_v19  ;;  %8570 = vmatpush.bf16.msrb.mxu2 %v9504_v24  ;;  %v8306_v9 = vadd.f32 %v8305_v36, %v8293_v44  ;;  %v9200_v19 = vor.u32 %v12257_v6, %v9197_v7  ;;  %v9328_v24 = vor.u32 %v12289_v59, %v9325_v58  ;;  %v9165_v57 = vld [vmem:[%s14081_s11 + $0x138] sm:$0xf0]  ;;  %v12245_v7 = vld [vmem:[%s14081_s11 + $0x10c] sm:$0xf] }
 0x41b   : > { %8583 = vmatpush.bf16.msrb.mxu3 %v9632_v37  ;;  %v12285_v37 = vld [vmem:[%s14081_s11 + $0x24c] sm:$0xf]  ;;  %v9584_v15 = vor.u32 %v12353_v11, %v9581_v4  ;;  %v9293_v44 = vld [vmem:[%s14081_s11 + $0x238] sm:$0xf0]  ;;  %v9168_v6 = vor.u32 %v12249_v56, %v9165_v57 }
 0x41c   : > { %8545 = vmatpush.bf16.msrb.mxu0 %v9232_v47  ;;  %v8319_v46 = vadd.f32 %v8318_v41, %v8306_v9  ;;  %v8331_v47 = vpop.f32.mrf.mxu3  ;;  %v9312_v54 = vor.u32 %v12285_v37, %v9309_v42  ;;  %v9421_v36 = vld [vmem:[%s14081_s11 + $0x338] sm:$0xf0]  ;;  %v12277_v58 = vld [vmem:[%s14081_s11 + $0x20c] sm:$0xf] }
 0x41d   : > { %v9149_v59 = vld [vmem:[%s14081_s11 + $0x118] sm:$0xf0]  ;;  %v12433_v37 = vld [vmem:[%s14081_s11 + $0x6ec] sm:$0xf] }
 0x41e   : > { %8558 = vmatpush.bf16.msrb.mxu1 %v9360_v48  ;;  %8571 = vmatpush.bf16.msrb.mxu2 %v9488_v26  ;;  %v12349_v48 = vld [vmem:[%s14081_s11 + $0x44c] sm:$0xf]  ;;  %v9565_v26 = vld [vmem:[%s14081_s11 + $0x458] sm:$0xf0]  ;;  %v8307_v38 = vpop.f32.mrf.mxu1  ;;  %v9152_v41 = vor.u32 %v12245_v7, %v9149_v59 }
 0x41f   : > { %8584 = vmatpush.bf16.msrb.mxu3 %v9616_v40  ;;  %v15546_v40 = vadd.f32 %v8331_v47, %v8319_v46  ;;  %v9568_v53 = vor.u32 %v12349_v48, %v9565_v26  ;;  %v9277_v10 = vld [vmem:[%s14081_s11 + $0x218] sm:$0xf0]  ;;  %v12497_v48 = vld [vmem:[%s14081_s11 + $0x8ec] sm:$0xf] }
 0x420   : > { %8546 = vmatpush.bf16.msrb.mxu0 %v9216_v51  ;;  %v12313_v51 = vld [vmem:[%s14081_s11 + $0x32c] sm:$0xf]  ;;  %v9405_v4 = vld [vmem:[%s14081_s11 + $0x318] sm:$0xf0]  ;;  %v9280_v46 = vor.u32 %v12277_v58, %v9277_v10 }
 0x421   : > { %v9424_v9 = vor.u32 %v12313_v51, %v9421_v36  ;;  %v9901_v42 = vld [vmem:[%s14081_s11 + $0x6f8] sm:$0xf0]  ;;  %v9408_v47 = vor.u32 %v12309_v61, %v9405_v4  ;;  %v12429_v57 = vld [vmem:[%s14081_s11 + $0x6cc] sm:$0xf] }
 0x422   : > { %8559 = vmatpush.bf16.msrb.mxu1 %v9344_v2  ;;  %8572 = vmatpush.bf16.msrb.mxu2 %v9472_v5  ;;  %v12345_v2 = vld [vmem:[%s14081_s11 + $0x42c] sm:$0xf]  ;;  %v9549_v5 = vld [vmem:[%s14081_s11 + $0x438] sm:$0xf0]  ;;  %v9904_v38 = vor.u32 %v12433_v37, %v9901_v42 }
 0x423   : > { %8585 = vmatpush.bf16.msrb.mxu3 %v9600_v8  ;;  %v9296_v8 = vor.u32 %v12281_v60, %v9293_v44  ;;  %v9552_v11 = vor.u32 %v12345_v2, %v9549_v5  ;;  %v10157_v26 = vld [vmem:[%s14081_s11 + $0x8f8] sm:$0xf0]  ;;  %v12461_v44 = vld [vmem:[%s14081_s11 + $0x7cc] sm:$0xf] }
 0x424   : > { %8547 = vmatpush.bf16.msrb.mxu0 %v9200_v19  ;;  %v12341_v19 = vld [vmem:[%s14081_s11 + $0x40c] sm:$0xf]  ;;  %v9757_v56 = vld [vmem:[%s14081_s11 + $0x5d8] sm:$0xf0]  ;;  %v10160_v60 = vor.u32 %v12497_v48, %v10157_v26 }
 0x425   : > { %v10013_v51 = vld [vmem:[%s14081_s11 + $0x7d8] sm:$0xf0]  ;;  %v12493_v36 = vld [vmem:[%s14081_s11 + $0x8cc] sm:$0xf] }
 0x426   : > { %8560 = vmatpush.bf16.msrb.mxu1 %v9328_v24  ;;  %8573 = vmatpush.bf16.msrb.mxu2 %v9456_v3  ;;  %v9533_v24 = vld [vmem:[%s14081_s11 + $0x418] sm:$0xf0]  ;;  %v8320_v3 = vpop.f32.mrf.mxu2  ;;  %v10016_v7 = vor.u32 %v12461_v44, %v10013_v51  ;;  %v12393_v59 = vld [vmem:[%s14081_s11 + $0x5ac] sm:$0xf] }
 0x427   : > { %8586 = vmatpush.bf16.msrb.mxu3 %v9584_v15  ;;  %v8333_v15 = vpop.f32.mrf.mxu3  ;;  %v9536_v49 = vor.u32 %v12341_v19, %v9533_v24  ;;  %v10141_v2 = vld [vmem:[%s14081_s11 + $0x8d8] sm:$0xf0]  ;;  %v12457_v61 = vld [vmem:[%s14081_s11 + $0x7ac] sm:$0xf] }
 0x428   : > { %8548 = vmatpush.bf16.msrb.mxu0 %v9184_v52  ;;  %v9776_v52 = vor.u32 %v12401_v27, %v9773_v35  ;;  %v10144_v58 = vor.u32 %v12493_v36, %v10141_v2  ;;  %v9869_v10 = vld [vmem:[%s14081_s11 + $0x6b8] sm:$0xf0]  ;;  %v12489_v4 = vld [vmem:[%s14081_s11 + $0x8ac] sm:$0xf] }
 0x429   : > { %v10125_v19 = vld [vmem:[%s14081_s11 + $0x8b8] sm:$0xf0]  ;;  %v12389_v27 = vld [vmem:[%s14081_s11 + $0x58c] sm:$0xf] }
 0x42a   : > { %8561 = vmatpush.bf16.msrb.mxu1 %v9312_v54  ;;  %8574 = vmatpush.bf16.msrb.mxu2 %v9440_v55  ;;  %v10032_v54 = vor.u32 %v12465_v13, %v10029_v14  ;;  %v12397_v55 = vld [vmem:[%s14081_s11 + $0x5cc] sm:$0xf]  ;;  %v9725_v35 = vld [vmem:[%s14081_s11 + $0x598] sm:$0xf0]  ;;  %v10128_v15 = vor.u32 %v12489_v4, %v10125_v19 }
 0x42b   : > { %8587 = vmatpush.bf16.msrb.mxu3 %v9568_v53  ;;  %v9885_v53 = vld [vmem:[%s14081_s11 + $0x6d8] sm:$0xf0]  ;;  %v9760_v5 = vor.u32 %v12397_v55, %v9757_v56  ;;  %v12421_v37 = vld [vmem:[%s14081_s11 + $0x68c] sm:$0xf] }
 0x42c   : > { %8549 = vmatpush.bf16.msrb.mxu0 %v9168_v6  ;;  %v9888_v6 = vor.u32 %v12429_v57, %v9885_v53  ;;  %v12485_v13 = vld [vmem:[%s14081_s11 + $0x88c] sm:$0xf]  ;;  %v10109_v14 = vld [vmem:[%s14081_s11 + $0x898] sm:$0xf0] }
 0x42d   : > { %v9837_v56 = vld [vmem:[%s14081_s11 + $0x678] sm:$0xf0]  ;;  %v12449_v57 = vld [vmem:[%s14081_s11 + $0x76c] sm:$0xf] }
 0x42e   : > { %8562 = vmatpush.bf16.msrb.mxu1 %v9296_v8  ;;  %8575 = vmatpush.bf16.msrb.mxu2 %v9424_v9  ;;  %v9741_v8 = vld [vmem:[%s14081_s11 + $0x5b8] sm:$0xf0]  ;;  %v12425_v9 = vld [vmem:[%s14081_s11 + $0x6ac] sm:$0xf] }
 0x42f   : > { %8588 = vmatpush.bf16.msrb.mxu3 %v9552_v11  ;;  %v9997_v11 = vld [vmem:[%s14081_s11 + $0x7b8] sm:$0xf0]  ;;  %v9744_v24 = vor.u32 %v12393_v59, %v9741_v8  ;;  %v12381_v2 = vld [vmem:[%s14081_s11 + $0x54c] sm:$0xf] }
 0x430   : > { %8550 = vmatpush.bf16.msrb.mxu0 %v9152_v41  ;;  %v10000_v3 = vor.u32 %v12457_v61, %v9997_v11  ;;  %v9981_v41 = vld [vmem:[%s14081_s11 + $0x798] sm:$0xf0]  ;;  %v8344_v42 = vpop.f32.mrf.mxu0  ;;  %v12477_v11 = vld [vmem:[%s14081_s11 + $0x84c] sm:$0xf] }
 0x431   : > { %v10093_v53 = vld [vmem:[%s14081_s11 + $0x878] sm:$0xf0] }
 0x432   : > { %8563 = vmatpush.bf16.msrb.mxu1 %v9280_v46  ;;  %8576 = vmatpush.bf16.msrb.mxu2 %v9408_v47  ;;  %v9728_v46 = vor.u32 %v12389_v27, %v9725_v35  ;;  %v8357_v47 = vpop.f32.mrf.mxu1  ;;  %v9821_v8 = vld [vmem:[%s14081_s11 + $0x658] sm:$0xf0] }
 0x433   : > { %8589 = vmatpush.bf16.msrb.mxu3 %v9536_v49  ;;  %8551 = vmatmul.bf16.vlgmr.msrb.gmra.mxu0 %v14199_v50  ;;  %v9853_v50 = vld [vmem:[%s14081_s11 + $0x698] sm:$0xf0]  ;;  %v12385_v49 = vld [vmem:[%s14081_s11 + $0x56c] sm:$0xf] }
 0x434   : > { %8595 = vmatpush.bf16.msra.mxu0 %v9776_v52  ;;  %v9856_v48 = vor.u32 %v12421_v37, %v9853_v50  ;;  %v9709_v52 = vld [vmem:[%s14081_s11 + $0x578] sm:$0xf0]  ;;  %v12377_v37 = vld [vmem:[%s14081_s11 + $0x52c] sm:$0xf] }
 0x435   : > { %8577 = vmatmul.bf16.vlgmr.msrb.gmra.mxu2 %v14195_v45  ;;  %8564 = vmatmul.bf16.vlgmr.msrb.gmra.mxu1 %v14191_v43  ;;  %v9872_v45 = vor.u32 %v12425_v9, %v9869_v10  ;;  %v8345_v43 = vadd.f32 %v8344_v42, %v15546_v40  ;;  %v9965_v40 = vld [vmem:[%s14081_s11 + $0x778] sm:$0xf0]  ;;  %v9712_v44 = vor.u32 %v12385_v49, %v9709_v52  ;;  %v12445_v9 = vld [vmem:[%s14081_s11 + $0x74c] sm:$0xf] }
 0x436   : > { %8608 = vmatpush.bf16.msra.mxu1 %v9904_v38  ;;  %8621 = vmatpush.bf16.msra.mxu2 %v10032_v54  ;;  %v12417_v38 = vld [vmem:[%s14081_s11 + $0x66c] sm:$0xf]  ;;  %v10112_v54 = vor.u32 %v12485_v13, %v10109_v14  ;;  %v9968_v36 = vor.u32 %v12449_v57, %v9965_v40  ;;  %v10077_v4 = vld [vmem:[%s14081_s11 + $0x858] sm:$0xf0] }
 0x437   : > { %8634 = vmatpush.bf16.msra.mxu3 %v10160_v60  ;;  %v8358_v55 = vadd.f32 %v8357_v47, %v8345_v43  ;;  %v12481_v60 = vld [vmem:[%s14081_s11 + $0x86c] sm:$0xf]  ;;  %v9840_v51 = vor.u32 %v12417_v38, %v9837_v56  ;;  %v9933_v13 = vld [vmem:[%s14081_s11 + $0x738] sm:$0xf0] }
 0x438   : > { %8590 = vmatmul.bf16.vlgmr.msrb.gmra.mxu3 %v14229_v16  ;;  %8596 = vmatpush.bf16.msra.mxu0 %v9760_v5  ;;  %v12453_v16 = vld [vmem:[%s14081_s11 + $0x78c] sm:$0xf]  ;;  %v9693_v5 = vld [vmem:[%s14081_s11 + $0x558] sm:$0xf0]  ;;  %v8370_v59 = vpop.f32.mrf.mxu2  ;;  %v8346_v19 = vpop.f32.mrf.mxu0 }
 0x439   : > { %v9984_v26 = vor.u32 %v12453_v16, %v9981_v41  ;;  %v8371_v10 = vadd.f32 %v8370_v59, %v8358_v55  ;;  %v12409_v50 = vld [vmem:[%s14081_s11 + $0x62c] sm:$0xf]  ;;  %v10080_v16 = vor.u32 %v12477_v11, %v10077_v4  ;;  %v9805_v41 = vld [vmem:[%s14081_s11 + $0x638] sm:$0xf0] }
 0x43a   : > { %8609 = vmatpush.bf16.msra.mxu1 %v9888_v6  ;;  %8622 = vmatpush.bf16.msra.mxu2 %v10016_v7  ;;  %v12413_v6 = vld [vmem:[%s14081_s11 + $0x64c] sm:$0xf]  ;;  %v10096_v7 = vor.u32 %v12481_v60, %v10093_v53  ;;  %v10061_v43 = vld [vmem:[%s14081_s11 + $0x838] sm:$0xf0] }
 0x43b   : > { %8635 = vmatpush.bf16.msra.mxu3 %v10144_v58  ;;  %v9949_v58 = vld [vmem:[%s14081_s11 + $0x758] sm:$0xf0]  ;;  %v8383_v61 = vpop.f32.mrf.mxu3  ;;  %v9824_v27 = vor.u32 %v12413_v6, %v9821_v8  ;;  %v12441_v42 = vld [vmem:[%s14081_s11 + $0x72c] sm:$0xf] }
 0x43c   : > { %8597 = vmatpush.bf16.msra.mxu0 %v9744_v24  ;;  %v9696_v24 = vor.u32 %v12381_v2, %v9693_v5  ;;  %v9952_v35 = vor.u32 %v12445_v9, %v9949_v58  ;;  %v12473_v14 = vld [vmem:[%s14081_s11 + $0x82c] sm:$0xf]  ;;  %v9936_v49 = vor.u32 %v12441_v42, %v9933_v13  ;;  %v9789_v38 = vld [vmem:[%s14081_s11 + $0x618] sm:$0xf0] }
 0x43d   : > { %v12373_v47 = vld [vmem:[%s14081_s11 + $0x50c] sm:$0xf]  ;;  %v10064_v55 = vor.u32 %v12473_v14, %v10061_v43  ;;  %v9917_v56 = vld [vmem:[%s14081_s11 + $0x718] sm:$0xf0] }
 0x43e   : > { %8610 = vmatpush.bf16.msra.mxu1 %v9872_v45  ;;  %8623 = vmatpush.bf16.msra.mxu2 %v10000_v3  ;;  %v8359_v45 = vpop.f32.mrf.mxu1  ;;  %v15617_v3 = vadd.f32 %v8383_v61, %v8371_v10  ;;  %v12405_v52 = vld [vmem:[%s14081_s11 + $0x60c] sm:$0xf]  ;;  %v10045_v40 = vld [vmem:[%s14081_s11 + $0x818] sm:$0xf0] }
 0x43f   : > { %8636 = vmatpush.bf16.msra.mxu3 %v10128_v15  ;;  %v9677_v15 = vld [vmem:[%s14081_s11 + $0x538] sm:$0xf0]  ;;  %v12469_v57 = vld [vmem:[%s14081_s11 + $0x80c] sm:$0xf]  ;;  %v9792_v59 = vor.u32 %v12405_v52, %v9789_v38 }
 0x440   : > { %8598 = vmatpush.bf16.msra.mxu0 %v9728_v46  ;;  %v9680_v46 = vor.u32 %v12377_v37, %v9677_v15  ;;  %v8372_v60 = vpop.f32.mrf.mxu2  ;;  %v12529_v53 = vld [vmem:[%s14081_s11 + $0x9ec] sm:$0xf]  ;;  %v10413_v5 = vld [vmem:[%s14081_s11 + $0xaf8] sm:$0xf0]  ;;  %v10048_v10 = vor.u32 %v12469_v57, %v10045_v40 }
 0x441   : > { %v12593_v6 = vld [vmem:[%s14081_s11 + $0xbec] sm:$0xf]  ;;  %v10669_v58 = vld [vmem:[%s14081_s11 + $0xcf8] sm:$0xf0] }
 0x442   : > { %8611 = vmatpush.bf16.msra.mxu1 %v9856_v48  ;;  %8624 = vmatpush.bf16.msra.mxu2 %v9984_v26  ;;  %v9661_v48 = vld [vmem:[%s14081_s11 + $0x518] sm:$0xf0]  ;;  %v9808_v26 = vor.u32 %v12409_v50, %v9805_v41  ;;  %v12625_v9 = vld [vmem:[%s14081_s11 + $0xcec] sm:$0xf] }
 0x443   : > { %8637 = vmatpush.bf16.msra.mxu3 %v10112_v54  ;;  %v12437_v54 = vld [vmem:[%s14081_s11 + $0x70c] sm:$0xf]  ;;  %v9664_v2 = vor.u32 %v12373_v47, %v9661_v48  ;;  %v10525_v15 = vld [vmem:[%s14081_s11 + $0xbd8] sm:$0xf0] }
 0x444   : > { %8599 = vmatpush.bf16.msra.mxu0 %v9712_v44  ;;  %v10285_v44 = vld [vmem:[%s14081_s11 + $0x9f8] sm:$0xf0]  ;;  %v9920_v8 = vor.u32 %v12437_v54, %v9917_v56  ;;  %v12525_v19 = vld [vmem:[%s14081_s11 + $0x9cc] sm:$0xf] }
 0x445   : > { %v10288_v61 = vor.u32 %v12529_v53, %v10285_v44  ;;  %v12557_v45 = vld [vmem:[%s14081_s11 + $0xacc] sm:$0xf]  ;;  %v10253_v43 = vld [vmem:[%s14081_s11 + $0x9b8] sm:$0xf0] }
 0x446   : > { %8612 = vmatpush.bf16.msra.mxu1 %v9840_v51  ;;  %8625 = vmatpush.bf16.msra.mxu2 %v9968_v36  ;;  %v12561_v51 = vld [vmem:[%s14081_s11 + $0xaec] sm:$0xf]  ;;  %v8385_v36 = vpop.f32.mrf.mxu3  ;;  %v10381_v48 = vld [vmem:[%s14081_s11 + $0xab8] sm:$0xf0] }
 0x447   : > { %8638 = vmatpush.bf16.msra.mxu3 %v10096_v7  ;;  %v10541_v7 = vld [vmem:[%s14081_s11 + $0xbf8] sm:$0xf0]  ;;  %v10416_v11 = vor.u32 %v12561_v51, %v10413_v5  ;;  %v12589_v37 = vld [vmem:[%s14081_s11 + $0xbcc] sm:$0xf] }
 0x448   : > { %8600 = vmatpush.bf16.msra.mxu0 %v9696_v24  ;;  %v10544_v4 = vor.u32 %v12593_v6, %v10541_v7  ;;  %v10269_v24 = vld [vmem:[%s14081_s11 + $0x9d8] sm:$0xf0]  ;;  %v12621_v50 = vld [vmem:[%s14081_s11 + $0xccc] sm:$0xf]  ;;  %v10528_v13 = vor.u32 %v12589_v37, %v10525_v15 }
 0x449   : > { %v10272_v41 = vor.u32 %v12525_v19, %v10269_v24  ;;  %v12521_v14 = vld [vmem:[%s14081_s11 + $0x9ac] sm:$0xf]  ;;  %v10637_v38 = vld [vmem:[%s14081_s11 + $0xcb8] sm:$0xf0] }
 0x44a   : > { %8613 = vmatpush.bf16.msra.mxu1 %v9824_v27  ;;  %8626 = vmatpush.bf16.msra.mxu2 %v9952_v35  ;;  %v10672_v27 = vor.u32 %v12625_v9, %v10669_v58  ;;  %v10397_v35 = vld [vmem:[%s14081_s11 + $0xad8] sm:$0xf0]  ;;  %v12617_v52 = vld [vmem:[%s14081_s11 + $0xcac] sm:$0xf] }
 0x44b   : > { %8639 = vmatpush.bf16.msra.mxu3 %v10080_v16  ;;  %v10653_v16 = vld [vmem:[%s14081_s11 + $0xcd8] sm:$0xf0]  ;;  %v10400_v42 = vor.u32 %v12557_v45, %v10397_v35  ;;  %v12517_v56 = vld [vmem:[%s14081_s11 + $0x98c] sm:$0xf] }
 0x44c   : > { %8601 = vmatpush.bf16.msra.mxu0 %v9680_v46  ;;  %v12553_v46 = vld [vmem:[%s14081_s11 + $0xaac] sm:$0xf]  ;;  %v10656_v47 = vor.u32 %v12621_v50, %v10653_v16  ;;  %v10237_v57 = vld [vmem:[%s14081_s11 + $0x998] sm:$0xf0] }
 0x44d   : > { %v10384_v54 = vor.u32 %v12553_v46, %v10381_v48  ;;  %v10365_v40 = vld [vmem:[%s14081_s11 + $0xa98] sm:$0xf0]  ;;  %v12581_v60 = vld [vmem:[%s14081_s11 + $0xb8c] sm:$0xf] }
 0x44e   : > { %8614 = vmatpush.bf16.msra.mxu1 %v9808_v26  ;;  %8627 = vmatpush.bf16.msra.mxu2 %v9936_v49  ;;  %v12585_v26 = vld [vmem:[%s14081_s11 + $0xbac] sm:$0xf]  ;;  %v10509_v49 = vld [vmem:[%s14081_s11 + $0xbb8] sm:$0xf0] }
 0x44f   : > { %8640 = vmatpush.bf16.msra.mxu3 %v10064_v55  ;;  %v10512_v55 = vor.u32 %v12585_v26, %v10509_v49  ;;  %v10493_v53 = vld [vmem:[%s14081_s11 + $0xb98] sm:$0xf0]  ;;  %v12613_v44 = vld [vmem:[%s14081_s11 + $0xc8c] sm:$0xf] }
 0x450   : > { %8602 = vmatpush.bf16.msra.mxu0 %v9664_v2  ;;  %v10621_v51 = vld [vmem:[%s14081_s11 + $0xc98] sm:$0xf0]  ;;  %v10240_v2 = vor.u32 %v12517_v56, %v10237_v57  ;;  %v10496_v7 = vor.u32 %v12581_v60, %v10493_v53  ;;  %v12545_v9 = vld [vmem:[%s14081_s11 + $0xa6c] sm:$0xf] }
 0x451   : > { %v10624_v58 = vor.u32 %v12613_v44, %v10621_v51  ;;  %v10605_v19 = vld [vmem:[%s14081_s11 + $0xc78] sm:$0xf0]  ;;  %v12509_v35 = vld [vmem:[%s14081_s11 + $0x94c] sm:$0xf] }
 0x452   : > { %8615 = vmatpush.bf16.msra.mxu1 %v9792_v59  ;;  %8628 = vmatpush.bf16.msra.mxu2 %v9920_v8  ;;  %v8409_v5 = vpop.f32.mrf.mxu1  ;;  %v12513_v59 = vld [vmem:[%s14081_s11 + $0x96c] sm:$0xf]  ;;  %v10221_v8 = vld [vmem:[%s14081_s11 + $0x978] sm:$0xf0] }
 0x453   : > { %8641 = vmatpush.bf16.msra.mxu3 %v10048_v10  ;;  %8603 = vmatmul.bf16.vlgmr.msra.gmra.mxu0 %v14233_v18  ;;  %v10256_v18 = vor.u32 %v12521_v14, %v10253_v43  ;;  %v10224_v24 = vor.u32 %v12513_v59, %v10221_v8  ;;  %v10205_v37 = vld [vmem:[%s14081_s11 + $0x958] sm:$0xf0]  ;;  %v12541_v15 = vld [vmem:[%s14081_s11 + $0xa4c] sm:$0xf] }
 0x454   : > { %8647 = vmatpush.bf16.msrb.mxu0 %v10288_v61  ;;  %v10349_v61 = vld [vmem:[%s14081_s11 + $0xa78] sm:$0xf0]  ;;  %v12605_v46 = vld [vmem:[%s14081_s11 + $0xc4c] sm:$0xf]  ;;  %v10208_v26 = vor.u32 %v12509_v35, %v10205_v37 }
 0x455   : > { %8629 = vmatmul.bf16.vlgmr.msra.gmra.mxu2 %v14231_v17  ;;  %8616 = vmatmul.bf16.vlgmr.msra.gmra.mxu1 %v14224_v12  ;;  %v12549_v17 = vld [vmem:[%s14081_s11 + $0xa8c] sm:$0xf]  ;;  %v10640_v12 = vor.u32 %v12617_v52, %v10637_v38  ;;  %v10352_v45 = vor.u32 %v12545_v9, %v10349_v61  ;;  %v10573_v53 = vld [vmem:[%s14081_s11 + $0xc38] sm:$0xf0] }
 0x456   : > { %8660 = vmatpush.bf16.msrb.mxu1 %v10416_v11  ;;  %8673 = vmatpush.bf16.msrb.mxu2 %v10544_v4  ;;  %v10368_v6 = vor.u32 %v12549_v17, %v10365_v40  ;;  %v12577_v11 = vld [vmem:[%s14081_s11 + $0xb6c] sm:$0xf]  ;;  %v10317_v17 = vld [vmem:[%s14081_s11 + $0xa38] sm:$0xf0] }
 0x457   : > { %8686 = vmatpush.bf16.msrb.mxu3 %v10672_v27  ;;  %v12609_v4 = vld [vmem:[%s14081_s11 + $0xc6c] sm:$0xf]  ;;  %v10445_v40 = vld [vmem:[%s14081_s11 + $0xb38] sm:$0xf0] }
 0x458   : > { %8642 = vmatmul.bf16.vlgmr.msra.gmra.mxu3 %v14319_v28  ;;  %8648 = vmatpush.bf16.msrb.mxu0 %v10272_v41  ;;  %v8396_v28 = vpop.f32.mrf.mxu0  ;;  %v10608_v50 = vor.u32 %v12609_v4, %v10605_v19  ;;  %v8422_v16 = vpop.f32.mrf.mxu2  ;;  %v10333_v41 = vld [vmem:[%s14081_s11 + $0xa58] sm:$0xf0]  ;;  %v12537_v56 = vld [vmem:[%s14081_s11 + $0xa2c] sm:$0xf] }
 0x459   : > { %v8397_v36 = vadd.f32 %v8396_v28, %v15617_v3  ;;  %v10477_v3 = vld [vmem:[%s14081_s11 + $0xb78] sm:$0xf0]  ;;  %v10336_v38 = vor.u32 %v12541_v15, %v10333_v41  ;;  %v12601_v60 = vld [vmem:[%s14081_s11 + $0xc2c] sm:$0xf] }
 0x45a   : > { %8661 = vmatpush.bf16.msrb.mxu1 %v10400_v42  ;;  %8674 = vmatpush.bf16.msrb.mxu2 %v10528_v13  ;;  %v10480_v27 = vor.u32 %v12577_v11, %v10477_v3  ;;  %v12573_v42 = vld [vmem:[%s14081_s11 + $0xb4c] sm:$0xf]  ;;  %v10461_v13 = vld [vmem:[%s14081_s11 + $0xb58] sm:$0xf0]  ;;  %v8411_v49 = vpop.f32.mrf.mxu1  ;;  %v10576_v59 = vor.u32 %v12601_v60, %v10573_v53 }
 0x45b   : > { %8687 = vmatpush.bf16.msrb.mxu3 %v10656_v47  ;;  %v8410_v10 = vadd.f32 %v8409_v5, %v8397_v36  ;;  %v8435_v43 = vpop.f32.mrf.mxu3  ;;  %v10589_v47 = vld [vmem:[%s14081_s11 + $0xc58] sm:$0xf0]  ;;  %v12501_v44 = vld [vmem:[%s14081_s11 + $0x90c] sm:$0xf]  ;;  %v10320_v36 = vor.u32 %v12537_v56, %v10317_v17 }
 0x45c   : > { %8649 = vmatpush.bf16.msrb.mxu0 %v10256_v18  ;;  %v10464_v18 = vor.u32 %v12573_v42, %v10461_v13  ;;  %v10592_v57 = vor.u32 %v12605_v46, %v10589_v47  ;;  %v10173_v51 = vld [vmem:[%s14081_s11 + $0x918] sm:$0xf0]  ;;  %v12533_v5 = vld [vmem:[%s14081_s11 + $0xa0c] sm:$0xf] }
 0x45d   : > { %v8423_v14 = vadd.f32 %v8422_v16, %v8410_v10  ;;  %v10429_v8 = vld [vmem:[%s14081_s11 + $0xb18] sm:$0xf0]  ;;  %v12597_v9 = vld [vmem:[%s14081_s11 + $0xc0c] sm:$0xf]  ;;  %v10176_v19 = vor.u32 %v12501_v44, %v10173_v51 }
 0x45e   : > { %8662 = vmatpush.bf16.msrb.mxu1 %v10384_v54  ;;  %8675 = vmatpush.bf16.msrb.mxu2 %v10512_v55  ;;  %v12505_v54 = vld [vmem:[%s14081_s11 + $0x92c] sm:$0xf]  ;;  %v10189_v55 = vld [vmem:[%s14081_s11 + $0x938] sm:$0xf0] }
 0x45f   : > { %8688 = vmatpush.bf16.msrb.mxu3 %v10640_v12  ;;  %v15688_v52 = vadd.f32 %v8435_v43, %v8423_v14  ;;  %v12569_v12 = vld [vmem:[%s14081_s11 + $0xb2c] sm:$0xf]  ;;  %v10192_v28 = vor.u32 %v12505_v54, %v10189_v55  ;;  %v10797_v11 = vld [vmem:[%s14081_s11 + $0xdf8] sm:$0xf0] }
 0x460   : > { %8650 = vmatpush.bf16.msrb.mxu0 %v10240_v2  ;;  %v8398_v48 = vpop.f32.mrf.mxu0  ;;  %v10448_v2 = vor.u32 %v12569_v12, %v10445_v40  ;;  %v8424_v10 = vpop.f32.mrf.mxu2  ;;  %v12657_v61 = vld [vmem:[%s14081_s11 + $0xdec] sm:$0xf]  ;;  %v10781_v43 = vld [vmem:[%s14081_s11 + $0xdd8] sm:$0xf0] }
 0x461   : > { %v12689_v3 = vld [vmem:[%s14081_s11 + $0xeec] sm:$0xf]  ;;  %v10800_v41 = vor.u32 %v12657_v61, %v10797_v11  ;;  %v10909_v48 = vld [vmem:[%s14081_s11 + $0xed8] sm:$0xf0] }
 0x462   : > { %8663 = vmatpush.bf16.msrb.mxu1 %v10368_v6  ;;  %8676 = vmatpush.bf16.msrb.mxu2 %v10496_v7  ;;  %v10301_v6 = vld [vmem:[%s14081_s11 + $0xa18] sm:$0xf0]  ;;  %v12565_v7 = vld [vmem:[%s14081_s11 + $0xb0c] sm:$0xf] }
 0x463   : > { %8689 = vmatpush.bf16.msrb.mxu3 %v10624_v58  ;;  %v10557_v58 = vld [vmem:[%s14081_s11 + $0xc18] sm:$0xf0]  ;;  %v8437_v4 = vpop.f32.mrf.mxu3  ;;  %v10304_v35 = vor.u32 %v12533_v5, %v10301_v6  ;;  %v10432_v37 = vor.u32 %v12565_v7, %v10429_v8  ;;  %v12753_v15 = vld [vmem:[%s14081_s11 + $0x10ec] sm:$0xf] }
 0x464   : > { %8651 = vmatpush.bf16.msrb.mxu0 %v10224_v24  ;;  %v10925_v24 = vld [vmem:[%s14081_s11 + $0xef8] sm:$0xf0]  ;;  %v10560_v16 = vor.u32 %v12597_v9, %v10557_v58  ;;  %v12653_v14 = vld [vmem:[%s14081_s11 + $0xdcc] sm:$0xf] }
 0x465   : > { %v10928_v42 = vor.u32 %v12689_v3, %v10925_v24  ;;  %v12685_v46 = vld [vmem:[%s14081_s11 + $0xecc] sm:$0xf]  ;;  %v11037_v49 = vld [vmem:[%s14081_s11 + $0xfd8] sm:$0xf0]  ;;  %v10784_v54 = vor.u32 %v12653_v14, %v10781_v43 }
 0x466   : > { %8664 = vmatpush.bf16.msrb.mxu1 %v10352_v45  ;;  %8677 = vmatpush.bf16.msrb.mxu2 %v10480_v27  ;;  %v12721_v45 = vld [vmem:[%s14081_s11 + $0xfec] sm:$0xf]  ;;  %v11053_v27 = vld [vmem:[%s14081_s11 + $0xff8] sm:$0xf0]  ;;  %v10912_v55 = vor.u32 %v12685_v46, %v10909_v48 }
 0x467   : > { %8690 = vmatpush.bf16.msrb.mxu3 %v10608_v50  ;;  %v11181_v50 = vld [vmem:[%s14081_s11 + $0x10f8] sm:$0xf0]  ;;  %v11056_v13 = vor.u32 %v12721_v45, %v11053_v27  ;;  %v12681_v12 = vld [vmem:[%s14081_s11 + $0xeac] sm:$0xf] }
 0x468   : > { %8652 = vmatpush.bf16.msrb.mxu0 %v10208_v26  ;;  %v11184_v47 = vor.u32 %v12753_v15, %v11181_v50  ;;  %v12717_v26 = vld [vmem:[%s14081_s11 + $0xfcc] sm:$0xf]  ;;  %v10765_v17 = vld [vmem:[%s14081_s11 + $0xdb8] sm:$0xf0] }
 0x469   : > { %v11040_v56 = vor.u32 %v12717_v26, %v11037_v49  ;;  %v10893_v60 = vld [vmem:[%s14081_s11 + $0xeb8] sm:$0xf0]  ;;  %v12713_v53 = vld [vmem:[%s14081_s11 + $0xfac] sm:$0xf] }
 0x46a   : > { %8665 = vmatpush.bf16.msrb.mxu1 %v10336_v38  ;;  %8678 = vmatpush.bf16.msrb.mxu2 %v10464_v18  ;;  %v12749_v38 = vld [vmem:[%s14081_s11 + $0x10cc] sm:$0xf]  ;;  %v11165_v18 = vld [vmem:[%s14081_s11 + $0x10d8] sm:$0xf0] }
 0x46b   : > { %8691 = vmatpush.bf16.msrb.mxu3 %v10592_v57  ;;  %v12649_v57 = vld [vmem:[%s14081_s11 + $0xdac] sm:$0xf]  ;;  %v11168_v40 = vor.u32 %v12749_v38, %v11165_v18  ;;  %v11149_v51 = vld [vmem:[%s14081_s11 + $0x10b8] sm:$0xf0] }
 0x46c   : > { %8653 = vmatpush.bf16.msrb.mxu0 %v10192_v28  ;;  %v11021_v28 = vld [vmem:[%s14081_s11 + $0xfb8] sm:$0xf0]  ;;  %v12745_v44 = vld [vmem:[%s14081_s11 + $0x10ac] sm:$0xf] }
 0x46d   : > { %v12645_v5 = vld [vmem:[%s14081_s11 + $0xd8c] sm:$0xf]  ;;  %v10749_v6 = vld [vmem:[%s14081_s11 + $0xd98] sm:$0xf0] }
 0x46e   : > { %8666 = vmatpush.bf16.msrb.mxu1 %v10320_v36  ;;  %8679 = vmatpush.bf16.msrb.mxu2 %v10448_v2  ;;  %v10896_v36 = vor.u32 %v12681_v12, %v10893_v60  ;;  %v11024_v2 = vor.u32 %v12713_v53, %v11021_v28  ;;  %v10877_v7 = vld [vmem:[%s14081_s11 + $0xe98] sm:$0xf0]  ;;  %v12741_v9 = vld [vmem:[%s14081_s11 + $0x108c] sm:$0xf]  ;;  %v10752_v61 = vor.u32 %v12645_v5, %v10749_v6 }
 0x46f   : > { %8692 = vmatpush.bf16.msrb.mxu3 %v10576_v59  ;;  %v12709_v59 = vld [vmem:[%s14081_s11 + $0xf8c] sm:$0xf]  ;;  %v11005_v8 = vld [vmem:[%s14081_s11 + $0xf98] sm:$0xf0] }
 0x470   : > { %8654 = vmatpush.bf16.msrb.mxu0 %v10176_v19  ;;  %v11133_v58 = vld [vmem:[%s14081_s11 + $0x1098] sm:$0xf0]  ;;  %v11008_v4 = vor.u32 %v12709_v59, %v11005_v8  ;;  %v12641_v19 = vld [vmem:[%s14081_s11 + $0xd6c] sm:$0xf] }
 0x471   : > { %v10733_v24 = vld [vmem:[%s14081_s11 + $0xd78] sm:$0xf0]  ;;  %v12673_v45 = vld [vmem:[%s14081_s11 + $0xe6c] sm:$0xf]  ;;  %v11136_v27 = vor.u32 %v12741_v9, %v11133_v58 }
 0x472   : > { %8667 = vmatpush.bf16.msrb.mxu1 %v10304_v35  ;;  %8680 = vmatpush.bf16.msrb.mxu2 %v10432_v37  ;;  %v8461_v11 = vpop.f32.mrf.mxu1  ;;  %v10861_v37 = vld [vmem:[%s14081_s11 + $0xe78] sm:$0xf0]  ;;  %v12705_v15 = vld [vmem:[%s14081_s11 + $0xf6c] sm:$0xf] }
 0x473   : > { %8693 = vmatpush.bf16.msrb.mxu3 %v10560_v16  ;;  %8655 = vmatmul.bf16.vlgmr.msrb.gmra.mxu0 %v14325_v32  ;;  %v10768_v32 = vor.u32 %v12649_v57, %v10765_v17  ;;  %v12737_v50 = vld [vmem:[%s14081_s11 + $0x106c] sm:$0xf]  ;;  %v11117_v16 = vld [vmem:[%s14081_s11 + $0x1078] sm:$0xf0] }
 0x474   : > { %8699 = vmatpush.bf16.msra.mxu0 %v10800_v41  ;;  %v10736_v41 = vor.u32 %v12641_v19, %v10733_v24  ;;  %v12637_v14 = vld [vmem:[%s14081_s11 + $0xd4c] sm:$0xf]  ;;  %v10717_v43 = vld [vmem:[%s14081_s11 + $0xd58] sm:$0xf0] }
 0x475   : > { %8681 = vmatmul.bf16.vlgmr.msrb.gmra.mxu2 %v14327_v33  ;;  %8668 = vmatmul.bf16.vlgmr.msrb.gmra.mxu1 %v14323_v31  ;;  %v12677_v33 = vld [vmem:[%s14081_s11 + $0xe8c] sm:$0xf]  ;;  %v11152_v31 = vor.u32 %v12745_v44, %v11149_v51  ;;  %v10845_v26 = vld [vmem:[%s14081_s11 + $0xe58] sm:$0xf0]  ;;  %v10720_v17 = vor.u32 %v12637_v14, %v10717_v43 }
 0x476   : > { %8712 = vmatpush.bf16.msra.mxu1 %v10928_v42  ;;  %8725 = vmatpush.bf16.msra.mxu2 %v11056_v13  ;;  %v10880_v3 = vor.u32 %v12677_v33, %v10877_v7  ;;  %v10864_v42 = vor.u32 %v12673_v45, %v10861_v37  ;;  %v12669_v46 = vld [vmem:[%s14081_s11 + $0xe4c] sm:$0xf]  ;;  %v10973_v38 = vld [vmem:[%s14081_s11 + $0xf58] sm:$0xf0] }
 0x477   : > { %8738 = vmatpush.bf16.msra.mxu3 %v11184_v47  ;;  %v11120_v47 = vor.u32 %v12737_v50, %v11117_v16  ;;  %v12701_v49 = vld [vmem:[%s14081_s11 + $0xf4c] sm:$0xf]  ;;  %v10848_v60 = vor.u32 %v12669_v46, %v10845_v26  ;;  %v10701_v44 = vld [vmem:[%s14081_s11 + $0xd38] sm:$0xf0] }
 0x478   : > { %8694 = vmatmul.bf16.vlgmr.msrb.gmra.mxu3 %v14385_v62  ;;  %8700 = vmatpush.bf16.msra.mxu0 %v10784_v54  ;;  %v8448_v62 = vpop.f32.mrf.mxu0  ;;  %v8474_v48 = vpop.f32.mrf.mxu2  ;;  %v10976_v53 = vor.u32 %v12701_v49, %v10973_v38  ;;  %v12633_v28 = vld [vmem:[%s14081_s11 + $0xd2c] sm:$0xf]  ;;  %v10957_v5 = vld [vmem:[%s14081_s11 + $0xf38] sm:$0xf0] }
 0x479   : > { %v8449_v10 = vadd.f32 %v8448_v62, %v15688_v52  ;;  %v10989_v52 = vld [vmem:[%s14081_s11 + $0xf78] sm:$0xf0]  ;;  %v12665_v51 = vld [vmem:[%s14081_s11 + $0xe2c] sm:$0xf] }
 0x47a   : > { %8713 = vmatpush.bf16.msra.mxu1 %v10912_v55  ;;  %8726 = vmatpush.bf16.msra.mxu2 %v11040_v56  ;;  %v10992_v13 = vor.u32 %v12705_v15, %v10989_v52  ;;  %v12733_v55 = vld [vmem:[%s14081_s11 + $0x104c] sm:$0xf]  ;;  %v11101_v56 = vld [vmem:[%s14081_s11 + $0x1058] sm:$0xf0]  ;;  %v8463_v12 = vpop.f32.mrf.mxu1 }
 0x47b   : > { %8739 = vmatpush.bf16.msra.mxu3 %v11168_v40  ;;  %v8462_v35 = vadd.f32 %v8461_v11, %v8449_v10  ;;  %v8487_v54 = vpop.f32.mrf.mxu3  ;;  %v12729_v6 = vld [vmem:[%s14081_s11 + $0x102c] sm:$0xf]  ;;  %v11085_v33 = vld [vmem:[%s14081_s11 + $0x1038] sm:$0xf0] }
 0x47c   : > { %8701 = vmatpush.bf16.msra.mxu0 %v10768_v32  ;;  %v11104_v32 = vor.u32 %v12733_v55, %v11101_v56  ;;  %v12629_v7 = vld [vmem:[%s14081_s11 + $0xd0c] sm:$0xf]  ;;  %v10685_v59 = vld [vmem:[%s14081_s11 + $0xd18] sm:$0xf0] }
 0x47d   : > { %v8475_v18 = vadd.f32 %v8474_v48, %v8462_v35  ;;  %v12661_v9 = vld [vmem:[%s14081_s11 + $0xe0c] sm:$0xf]  ;;  %v10813_v58 = vld [vmem:[%s14081_s11 + $0xe18] sm:$0xf0]  ;;  %v10688_v37 = vor.u32 %v12629_v7, %v10685_v59 }
 0x47e   : > { %8714 = vmatpush.bf16.msra.mxu1 %v10896_v36  ;;  %8727 = vmatpush.bf16.msra.mxu2 %v11024_v2  ;;  %v10829_v36 = vld [vmem:[%s14081_s11 + $0xe38] sm:$0xf0]  ;;  %v12697_v2 = vld [vmem:[%s14081_s11 + $0xf2c] sm:$0xf]  ;;  %v10816_v16 = vor.u32 %v12661_v9, %v10813_v58 }
 0x47f   : > { %8740 = vmatpush.bf16.msra.mxu3 %v11152_v31  ;;  %v15759_v40 = vadd.f32 %v8487_v54, %v8475_v18  ;;  %v10704_v31 = vor.u32 %v12633_v28, %v10701_v44  ;;  %v10832_v8 = vor.u32 %v12665_v51, %v10829_v36  ;;  %v10960_v62 = vor.u32 %v12697_v2, %v10957_v5  ;;  %v12693_v10 = vld [vmem:[%s14081_s11 + $0xf0c] sm:$0xf]  ;;  %v10941_v11 = vld [vmem:[%s14081_s11 + $0xf18] sm:$0xf0] }
 0x480   : > { %8702 = vmatpush.bf16.msra.mxu0 %v10752_v61  ;;  %v8450_v57 = vpop.f32.mrf.mxu0  ;;  %v11088_v61 = vor.u32 %v12729_v6, %v11085_v33  ;;  %v8476_v19 = vpop.f32.mrf.mxu2  ;;  %v12785_v24 = vld [vmem:[%s14081_s11 + $0x11ec] sm:$0xf]  ;;  %v11309_v45 = vld [vmem:[%s14081_s11 + $0x11f8] sm:$0xf0] }
 0x481   : > { %v11437_v15 = vld [vmem:[%s14081_s11 + $0x12f8] sm:$0xf0]  ;;  %v12849_v52 = vld [vmem:[%s14081_s11 + $0x13ec] sm:$0xf]  ;;  %v11312_v43 = vor.u32 %v12785_v24, %v11309_v45 }
 0x482   : > { %8715 = vmatpush.bf16.msra.mxu1 %v10880_v3  ;;  %8728 = vmatpush.bf16.msra.mxu2 %v11008_v4  ;;  %v12725_v3 = vld [vmem:[%s14081_s11 + $0x100c] sm:$0xf]  ;;  %v11069_v4 = vld [vmem:[%s14081_s11 + $0x1018] sm:$0xf0] }
 0x483   : > { %8741 = vmatpush.bf16.msra.mxu3 %v11136_v27  ;;  %v12817_v27 = vld [vmem:[%s14081_s11 + $0x12ec] sm:$0xf]  ;;  %v8489_v35 = vpop.f32.mrf.mxu3  ;;  %v11565_v50 = vld [vmem:[%s14081_s11 + $0x13f8] sm:$0xf0]  ;;  %v11072_v14 = vor.u32 %v12725_v3, %v11069_v4 }
 0x484   : > { %8703 = vmatpush.bf16.msra.mxu0 %v10736_v41  ;;  %v10944_v41 = vor.u32 %v12693_v10, %v10941_v11  ;;  %v11440_v46 = vor.u32 %v12817_v27, %v11437_v15  ;;  %v12781_v48 = vld [vmem:[%s14081_s11 + $0x11cc] sm:$0xf]  ;;  %v11293_v26 = vld [vmem:[%s14081_s11 + $0x11d8] sm:$0xf0] }
 0x485   : > { %v12813_v49 = vld [vmem:[%s14081_s11 + $0x12cc] sm:$0xf]  ;;  %v11421_v18 = vld [vmem:[%s14081_s11 + $0x12d8] sm:$0xf0] }
 0x486   : > { %8716 = vmatpush.bf16.msra.mxu1 %v10864_v42  ;;  %8729 = vmatpush.bf16.msra.mxu2 %v10992_v13  ;;  %v12881_v42 = vld [vmem:[%s14081_s11 + $0x14ec] sm:$0xf]  ;;  %v11693_v13 = vld [vmem:[%s14081_s11 + $0x14f8] sm:$0xf0]  ;;  %v11424_v12 = vor.u32 %v12813_v49, %v11421_v18 }
 0x487   : > { %8742 = vmatpush.bf16.msra.mxu3 %v11120_v47  ;;  %v11568_v47 = vor.u32 %v12849_v52, %v11565_v50  ;;  %v11696_v38 = vor.u32 %v12881_v42, %v11693_v13  ;;  %v12845_v54 = vld [vmem:[%s14081_s11 + $0x13cc] sm:$0xf]  ;;  %v11549_v55 = vld [vmem:[%s14081_s11 + $0x13d8] sm:$0xf0] }
 0x488   : > { %8704 = vmatpush.bf16.msra.mxu0 %v10720_v17  ;;  %v12877_v56 = vld [vmem:[%s14081_s11 + $0x14cc] sm:$0xf]  ;;  %v11677_v57 = vld [vmem:[%s14081_s11 + $0x14d8] sm:$0xf0]  ;;  %v11296_v17 = vor.u32 %v12781_v48, %v11293_v26 }
 0x489   : > { %v11277_v28 = vld [vmem:[%s14081_s11 + $0x11b8] sm:$0xf0]  ;;  %v12809_v44 = vld [vmem:[%s14081_s11 + $0x12ac] sm:$0xf]  ;;  %v11680_v51 = vor.u32 %v12877_v56, %v11677_v57 }
 0x48a   : > { %8717 = vmatpush.bf16.msra.mxu1 %v10848_v60  ;;  %8730 = vmatpush.bf16.msra.mxu2 %v10976_v53  ;;  %v11552_v60 = vor.u32 %v12845_v54, %v11549_v55  ;;  %v12777_v53 = vld [vmem:[%s14081_s11 + $0x11ac] sm:$0xf]  ;;  %v11533_v2 = vld [vmem:[%s14081_s11 + $0x13b8] sm:$0xf0] }
 0x48b   : > { %8743 = vmatpush.bf16.msra.mxu3 %v11104_v32  ;;  %v11405_v32 = vld [vmem:[%s14081_s11 + $0x12b8] sm:$0xf0]  ;;  %v12841_v36 = vld [vmem:[%s14081_s11 + $0x13ac] sm:$0xf] }
 0x48c   : > { %8705 = vmatpush.bf16.msra.mxu0 %v10704_v31  ;;  %v12873_v5 = vld [vmem:[%s14081_s11 + $0x14ac] sm:$0xf]  ;;  %v11661_v6 = vld [vmem:[%s14081_s11 + $0x14b8] sm:$0xf0]  ;;  %v11408_v33 = vor.u32 %v12809_v44, %v11405_v32  ;;  %v11536_v31 = vor.u32 %v12841_v36, %v11533_v2 }
 0x48d   : > { %v12773_v7 = vld [vmem:[%s14081_s11 + $0x118c] sm:$0xf]  ;;  %v11261_v59 = vld [vmem:[%s14081_s11 + $0x1198] sm:$0xf0] }
 0x48e   : > { %8718 = vmatpush.bf16.msra.mxu1 %v10832_v8  ;;  %8731 = vmatpush.bf16.msra.mxu2 %v10960_v62  ;;  %v11389_v8 = vld [vmem:[%s14081_s11 + $0x1298] sm:$0xf0]  ;;  %v12837_v62 = vld [vmem:[%s14081_s11 + $0x138c] sm:$0xf]  ;;  %v11264_v11 = vor.u32 %v12773_v7, %v11261_v59 }
 0x48f   : > { %8744 = vmatpush.bf16.msra.mxu3 %v11088_v61  ;;  %v11517_v9 = vld [vmem:[%s14081_s11 + $0x1398] sm:$0xf0]  ;;  %v12869_v58 = vld [vmem:[%s14081_s11 + $0x148c] sm:$0xf] }
 0x490   : > { %8706 = vmatpush.bf16.msra.mxu0 %v10688_v37  ;;  %v11645_v10 = vld [vmem:[%s14081_s11 + $0x1498] sm:$0xf0]  ;;  %v11520_v19 = vor.u32 %v12837_v62, %v11517_v9  ;;  %v12769_v24 = vld [vmem:[%s14081_s11 + $0x116c] sm:$0xf] }
 0x491   : > { %v11245_v45 = vld [vmem:[%s14081_s11 + $0x1178] sm:$0xf0]  ;;  %v12801_v27 = vld [vmem:[%s14081_s11 + $0x126c] sm:$0xf]  ;;  %v11648_v35 = vor.u32 %v12869_v58, %v11645_v10 }
 0x492   : > { %8719 = vmatpush.bf16.msra.mxu1 %v10816_v16  ;;  %8732 = vmatpush.bf16.msra.mxu2 %v10944_v41  ;;  %v8513_v3 = vpop.f32.mrf.mxu1  ;;  %v11373_v15 = vld [vmem:[%s14081_s11 + $0x1278] sm:$0xf0]  ;;  %v12833_v52 = vld [vmem:[%s14081_s11 + $0x136c] sm:$0xf]  ;;  %v11248_v41 = vor.u32 %v12769_v24, %v11245_v45 }
 0x493   : > { %8745 = vmatpush.bf16.msra.mxu3 %v11072_v14  ;;  %8707 = vmatmul.bf16.vlgmr.msra.gmra.mxu0 %v14389_v0  ;;  %v11280_v0 = vor.u32 %v12777_v53, %v11277_v28  ;;  %v12865_v50 = vld [vmem:[%s14081_s11 + $0x146c] sm:$0xf]  ;;  %v11629_v16 = vld [vmem:[%s14081_s11 + $0x1478] sm:$0xf0]  ;;  %v11376_v42 = vor.u32 %v12801_v27, %v11373_v15 }
 0x494   : > { %8751 = vmatpush.bf16.msrb.mxu0 %v11312_v43  ;;  %v12765_v14 = vld [vmem:[%s14081_s11 + $0x114c] sm:$0xf]  ;;  %v11229_v43 = vld [vmem:[%s14081_s11 + $0x1158] sm:$0xf0] }
 0x495   : > { %8733 = vmatmul.bf16.vlgmr.msra.gmra.mxu2 %v14391_v1  ;;  %8720 = vmatmul.bf16.vlgmr.msra.gmra.mxu1 %v14387_v63  ;;  %v12805_v1 = vld [vmem:[%s14081_s11 + $0x128c] sm:$0xf]  ;;  %v11664_v63 = vor.u32 %v12873_v5, %v11661_v6  ;;  %v11357_v26 = vld [vmem:[%s14081_s11 + $0x1258] sm:$0xf0] }
 0x496   : > { %8764 = vmatpush.bf16.msrb.mxu1 %v11440_v46  ;;  %8777 = vmatpush.bf16.msrb.mxu2 %v11568_v47  ;;  %v11392_v4 = vor.u32 %v12805_v1, %v11389_v8  ;;  %v12797_v46 = vld [vmem:[%s14081_s11 + $0x124c] sm:$0xf]  ;;  %v11632_v47 = vor.u32 %v12865_v50, %v11629_v16  ;;  %v11613_v55 = vld [vmem:[%s14081_s11 + $0x1458] sm:$0xf0] }
 0x497   : > { %8790 = vmatpush.bf16.msrb.mxu3 %v11696_v38  ;;  %v12829_v49 = vld [vmem:[%s14081_s11 + $0x134c] sm:$0xf]  ;;  %v11485_v38 = vld [vmem:[%s14081_s11 + $0x1358] sm:$0xf0] }
 0x498   : > { %8746 = vmatmul.bf16.vlgmr.msra.gmra.mxu3 %v14474_v25  ;;  %8752 = vmatpush.bf16.msrb.mxu0 %v11296_v17  ;;  %v8500_v25 = vpop.f32.mrf.mxu0  ;;  %v8526_v48 = vpop.f32.mrf.mxu2  ;;  %v12861_v54 = vld [vmem:[%s14081_s11 + $0x144c] sm:$0xf]  ;;  %v11232_v17 = vor.u32 %v12765_v14, %v11229_v43  ;;  %v11488_v53 = vor.u32 %v12829_v49, %v11485_v38  ;;  %v11213_v44 = vld [vmem:[%s14081_s11 + $0x1138] sm:$0xf0] }
 0x499   : > { %v8501_v61 = vadd.f32 %v8500_v25, %v15759_v40  ;;  %v11501_v40 = vld [vmem:[%s14081_s11 + $0x1378] sm:$0xf0]  ;;  %v12761_v28 = vld [vmem:[%s14081_s11 + $0x112c] sm:$0xf]  ;;  %v11616_v32 = vor.u32 %v12861_v54, %v11613_v55 }
 0x49a   : > { %8765 = vmatpush.bf16.msrb.mxu1 %v11424_v12  ;;  %8778 = vmatpush.bf16.msrb.mxu2 %v11552_v60  ;;  %v11504_v13 = vor.u32 %v12833_v52, %v11501_v40  ;;  %v8515_v12 = vpop.f32.mrf.mxu1  ;;  %v11360_v60 = vor.u32 %v12797_v46, %v11357_v26  ;;  %v11341_v36 = vld [vmem:[%s14081_s11 + $0x1238] sm:$0xf0]  ;;  %v12825_v2 = vld [vmem:[%s14081_s11 + $0x132c] sm:$0xf] }
 0x49b   : > { %8791 = vmatpush.bf16.msrb.mxu3 %v11680_v51  ;;  %v8514_v37 = vadd.f32 %v8513_v3, %v8501_v61  ;;  %v15832_v56 = vpop.f32.mrf.mxu3  ;;  %v12793_v51 = vld [vmem:[%s14081_s11 + $0x122c] sm:$0xf]  ;;  %v11469_v5 = vld [vmem:[%s14081_s11 + $0x1338] sm:$0xf0] }
 0x49c   : > { %8753 = vmatpush.bf16.msrb.mxu0 %v11280_v0  ;;  %v12857_v6 = vld [vmem:[%s14081_s11 + $0x142c] sm:$0xf]  ;;  %v11597_v0 = vld [vmem:[%s14081_s11 + $0x1438] sm:$0xf0]  ;;  %v11344_v59 = vor.u32 %v12793_v51, %v11341_v36  ;;  %v11472_v1 = vor.u32 %v12825_v2, %v11469_v5 }
 0x49d   : > { %v15828_v18 = vadd.f32 %v8526_v48, %v8514_v37  ;;  %v11197_v7 = vld [vmem:[%s14081_s11 + $0x1118] sm:$0xf0]  ;;  %v12821_v62 = vld [vmem:[%s14081_s11 + $0x130c] sm:$0xf]  ;;  %v11600_v9 = vor.u32 %v12857_v6, %v11597_v0 }
 0x49e   : > { %8766 = vmatpush.bf16.msrb.mxu1 %v11408_v33  ;;  %8779 = vmatpush.bf16.msrb.mxu2 %v11536_v31  ;;  %v11216_v33 = vor.u32 %v12761_v28, %v11213_v44  ;;  %v12757_v31 = vld [vmem:[%s14081_s11 + $0x110c] sm:$0xf]  ;;  %v11325_v8 = vld [vmem:[%s14081_s11 + $0x1218] sm:$0xf0] }
 0x49f   : > { %8792 = vmatpush.bf16.msrb.mxu3 %v11664_v63  ;;  %v12789_v63 = vld [vmem:[%s14081_s11 + $0x120c] sm:$0xf]  ;;  %v11453_v25 = vld [vmem:[%s14081_s11 + $0x1318] sm:$0xf0]  ;;  %v11200_v24 = vor.u32 %v12757_v31, %v11197_v7 }
 0x4a0   : > { %8754 = vmatpush.bf16.msrb.mxu0 %v11264_v11  ;;  %v8502_v57 = vpop.f32.mrf.mxu0  ;;  %v12853_v58 = vld [vmem:[%s14081_s11 + $0x140c] sm:$0xf]  ;;  %v11581_v10 = vld [vmem:[%s14081_s11 + $0x1418] sm:$0xf0]  ;;  %v8528_v61 = vpop.f32.mrf.mxu2  ;;  %v11328_v37 = vor.u32 %v12789_v63, %v11325_v8  ;;  %v11456_v15 = vor.u32 %v12821_v62, %v11453_v25 }
 0x4a1   : > { %v12913_v11 = vld [vmem:[%s14081_s11 + $0x15ec] sm:$0xf]  ;;  %v11821_v3 = vld [vmem:[%s14081_s11 + $0x15f8] sm:$0xf0]  ;;  %v11584_v50 = vor.u32 %v12853_v58, %v11581_v10 }
 0x4a2   : > { %8767 = vmatpush.bf16.msrb.mxu1 %v11392_v4  ;;  %8780 = vmatpush.bf16.msrb.mxu2 %v11520_v19  ;;  %v12945_v4 = vld [vmem:[%s14081_s11 + $0x16ec] sm:$0xf]  ;;  %v11949_v45 = vld [vmem:[%s14081_s11 + $0x16f8] sm:$0xf0]  ;;  %v11824_v16 = vor.u32 %v12913_v11, %v11821_v3 }
 0x4a3   : > { %8793 = vmatpush.bf16.msrb.mxu3 %v11648_v35  ;;  %v8541_v19 = vpop.f32.mrf.mxu3  ;;  %v12977_v27 = vld [vmem:[%s14081_s11 + $0x17ec] sm:$0xf]  ;;  %v12077_v35 = vld [vmem:[%s14081_s11 + $0x17f8] sm:$0xf0] }
 0x4a4   : > { %8755 = vmatpush.bf16.msrb.mxu0 %v11248_v41  ;;  %v13009_v52 = vld [vmem:[%s14081_s11 + $0x18ec] sm:$0xf]  ;;  %v12205_v40 = vld [vmem:[%s14081_s11 + $0x18f8] sm:$0xf0]  ;;  %v11952_v41 = vor.u32 %v12945_v4, %v11949_v45 }
 0x4a5   : > { %v11805_v14 = vld [vmem:[%s14081_s11 + $0x15d8] sm:$0xf0]  ;;  %v12941_v43 = vld [vmem:[%s14081_s11 + $0x16cc] sm:$0xf]  ;;  %v12208_v46 = vor.u32 %v13009_v52, %v12205_v40 }
 0x4a6   : > { %8768 = vmatpush.bf16.msrb.mxu1 %v11376_v42  ;;  %8781 = vmatpush.bf16.msrb.mxu2 %v11504_v13  ;;  %v12080_v42 = vor.u32 %v12977_v27, %v12077_v35  ;;  %v12909_v13 = vld [vmem:[%s14081_s11 + $0x15cc] sm:$0xf]  ;;  %v12061_v26 = vld [vmem:[%s14081_s11 + $0x17d8] sm:$0xf0] }
 0x4a7   : > { %8794 = vmatpush.bf16.msrb.mxu3 %v11632_v47  ;;  %v11933_v47 = vld [vmem:[%s14081_s11 + $0x16d8] sm:$0xf0]  ;;  %v12973_v48 = vld [vmem:[%s14081_s11 + $0x17cc] sm:$0xf]  ;;  %v11808_v54 = vor.u32 %v12909_v13, %v11805_v14 }
 0x4a8   : > { %8756 = vmatpush.bf16.msrb.mxu0 %v11232_v17  ;;  %v13005_v49 = vld [vmem:[%s14081_s11 + $0x18cc] sm:$0xf]  ;;  %v12189_v38 = vld [vmem:[%s14081_s11 + $0x18d8] sm:$0xf0]  ;;  %v11936_v57 = vor.u32 %v12941_v43, %v11933_v47  ;;  %v12064_v17 = vor.u32 %v12973_v48, %v12061_v26 }
 0x4a9   : > { %v12905_v55 = vld [vmem:[%s14081_s11 + $0x15ac] sm:$0xf]  ;;  %v11789_v12 = vld [vmem:[%s14081_s11 + $0x15b8] sm:$0xf0]  ;;  %v12192_v44 = vor.u32 %v13005_v49, %v12189_v38 }
 0x4aa   : > { %8769 = vmatpush.bf16.msrb.mxu1 %v11360_v60  ;;  %8782 = vmatpush.bf16.msrb.mxu2 %v11488_v53  ;;  %v12937_v60 = vld [vmem:[%s14081_s11 + $0x16ac] sm:$0xf]  ;;  %v13090_v53 = vld [vmem:[%s14529_s27] sm:$0xf]  ;;  %v11917_v51 = vld [vmem:[%s14081_s11 + $0x16b8] sm:$0xf0] }
 0x4ab   : > { %8795 = vmatpush.bf16.msrb.mxu3 %v11616_v32  ;;  %v3492_v28 = vperm.slane %v13090_v53, 3  ;;  %v12969_v32 = vld [vmem:[%s14081_s11 + $0x17ac] sm:$0xf]  ;;  %v12045_v36 = vld [vmem:[%s14081_s11 + $0x17b8] sm:$0xf0]  ;;  %v11920_v6 = vor.u32 %v12937_v60, %v11917_v51 }
 0x4ac   : > { %8757 = vmatpush.bf16.msrb.mxu0 %v11216_v33  ;;  %v13001_v2 = vld [vmem:[%s14081_s11 + $0x18ac] sm:$0xf]  ;;  %v12173_v5 = vld [vmem:[%s14081_s11 + $0x18b8] sm:$0xf0]  ;;  %v12048_v0 = vor.u32 %v12969_v32, %v12045_v36 }
 0x4ad   : > { %v8540_v33 = vadd.f32 %v15832_v56, %v3492_v28  ;;  %v11773_v31 = vld [vmem:[%s14081_s11 + $0x1598] sm:$0xf0]  ;;  %v12176_v7 = vor.u32 %v13001_v2, %v12173_v5  ;;  %v12997_v63 = vld [vmem:[%s14081_s11 + $0x188c] sm:$0xf] }
 0x4ae   : > { %8770 = vmatpush.bf16.msrb.mxu1 %v11344_v59  ;;  %8783 = vmatpush.bf16.msrb.mxu2 %v11472_v1  ;;  %v11901_v59 = vld [vmem:[%s14081_s11 + $0x1698] sm:$0xf0]  ;;  %v12897_v58 = vld [vmem:[%s14081_s11 + $0x156c] sm:$0xf] }
 0x4af   : > { %8796 = vmatpush.bf16.msrb.mxu3 %v11600_v9  ;;  %v12029_v1 = vld [vmem:[%s14081_s11 + $0x1798] sm:$0xf0]  ;;  %v12929_v61 = vld [vmem:[%s14081_s11 + $0x166c] sm:$0xf] }
 0x4b0   : > { %8758 = vmatpush.bf16.msrb.mxu0 %v11200_v24  ;;  %v12157_v8 = vld [vmem:[%s14081_s11 + $0x1898] sm:$0xf0]  ;;  %v8552_v56 = vpop.f32.mrf.mxu0  ;;  %v12961_v24 = vld [vmem:[%s14081_s11 + $0x176c] sm:$0xf] }
 0x4b1   : > { %v11757_v10 = vld [vmem:[%s14081_s11 + $0x1578] sm:$0xf0]  ;;  %v8553_v11 = vadd.f32 %v8552_v56, %v8540_v33  ;;  %v12160_v4 = vor.u32 %v12997_v63, %v12157_v8  ;;  %v12993_v27 = vld [vmem:[%s14081_s11 + $0x186c] sm:$0xf] }
 0x4b2   : > { %8771 = vmatpush.bf16.msrb.mxu1 %v11328_v37  ;;  %8784 = vmatpush.bf16.msrb.mxu2 %v11456_v15  ;;  %v8565_v3 = vpop.f32.mrf.mxu1  ;;  %v11885_v19 = vld [vmem:[%s14081_s11 + $0x1678] sm:$0xf0]  ;;  %v11760_v15 = vor.u32 %v12897_v58, %v11757_v10  ;;  %v12957_v43 = vld [vmem:[%s14081_s11 + $0x174c] sm:$0xf] }
 0x4b3   : > { %8797 = vmatpush.bf16.msrb.mxu3 %v11584_v50  ;;  %8759 = vmatmul.bf16.vlgmr.msrb.gmra.mxu0 %v14480_v30  ;;  %v11792_v30 = vor.u32 %v12905_v55, %v11789_v12  ;;  %v12013_v45 = vld [vmem:[%s14081_s11 + $0x1778] sm:$0xf0]  ;;  %v8566_v37 = vadd.f32 %v8565_v3, %v8553_v11  ;;  %v11888_v52 = vor.u32 %v12929_v61, %v11885_v19  ;;  %v12893_v50 = vld [vmem:[%s14081_s11 + $0x154c] sm:$0xf] }
 0x4b4   : > { %8803 = vmatpush.bf16.msra.mxu0 %v11824_v16  ;;  %v12141_v35 = vld [vmem:[%s14081_s11 + $0x1878] sm:$0xf0]  ;;  %v12016_v40 = vor.u32 %v12961_v24, %v12013_v45  ;;  %v12989_v26 = vld [vmem:[%s14081_s11 + $0x184c] sm:$0xf] }
 0x4b5   : > { %8785 = vmatmul.bf16.vlgmr.msrb.gmra.mxu2 %v14482_v34  ;;  %8772 = vmatmul.bf16.vlgmr.msrb.gmra.mxu1 %v14478_v29  ;;  %v12901_v34 = vld [vmem:[%s14081_s11 + $0x158c] sm:$0xf]  ;;  %v11741_v16 = vld [vmem:[%s14081_s11 + $0x1558] sm:$0xf0]  ;;  %v12144_v13 = vor.u32 %v12993_v27, %v12141_v35 }
 0x4b6   : > { %8816 = vmatpush.bf16.msra.mxu1 %v11952_v41  ;;  %8829 = vmatpush.bf16.msra.mxu2 %v12080_v42  ;;  %v12933_v29 = vld [vmem:[%s14081_s11 + $0x168c] sm:$0xf]  ;;  %v11776_v62 = vor.u32 %v12901_v34, %v11773_v31  ;;  %v11869_v14 = vld [vmem:[%s14081_s11 + $0x1658] sm:$0xf0]  ;;  %v11744_v38 = vor.u32 %v12893_v50, %v11741_v16 }
 0x4b7   : > { %8842 = vmatpush.bf16.msra.mxu3 %v12208_v46  ;;  %v11904_v9 = vor.u32 %v12933_v29, %v11901_v59  ;;  %v12925_v41 = vld [vmem:[%s14081_s11 + $0x164c] sm:$0xf]  ;;  %v11997_v46 = vld [vmem:[%s14081_s11 + $0x1758] sm:$0xf0] }
 0x4b8   : > { %8798 = vmatmul.bf16.vlgmr.msrb.gmra.mxu3 %v14560_v20  ;;  %8804 = vmatpush.bf16.msra.mxu0 %v11808_v54  ;;  %v12965_v20 = vld [vmem:[%s14081_s11 + $0x178c] sm:$0xf]  ;;  %v8578_v42 = vpop.f32.mrf.mxu2  ;;  %v12125_v49 = vld [vmem:[%s14081_s11 + $0x1858] sm:$0xf0]  ;;  %v8554_v55 = vpop.f32.mrf.mxu0 }
 0x4b9   : > { %v12032_v25 = vor.u32 %v12965_v20, %v12029_v1  ;;  %v8579_v47 = vadd.f32 %v8578_v42, %v8566_v37  ;;  %v12889_v12 = vld [vmem:[%s14081_s11 + $0x152c] sm:$0xf]  ;;  %v11725_v60 = vld [vmem:[%s14081_s11 + $0x1538] sm:$0xf0] }
 0x4ba   : > { %8817 = vmatpush.bf16.msra.mxu1 %v11936_v57  ;;  %8830 = vmatpush.bf16.msra.mxu2 %v12064_v17  ;;  %v11872_v57 = vor.u32 %v12925_v41, %v11869_v14  ;;  %v12000_v17 = vor.u32 %v12957_v43, %v11997_v46  ;;  %v12921_v53 = vld [vmem:[%s14081_s11 + $0x162c] sm:$0xf]  ;;  %v8567_v28 = vpop.f32.mrf.mxu1  ;;  %v11853_v51 = vld [vmem:[%s14081_s11 + $0x1638] sm:$0xf0] }
 0x4bb   : > { %8843 = vmatpush.bf16.msra.mxu3 %v12192_v44  ;;  %v8591_v48 = vpop.f32.mrf.mxu3  ;;  %v12128_v44 = vor.u32 %v12989_v26, %v12125_v49  ;;  %v12953_v32 = vld [vmem:[%s14081_s11 + $0x172c] sm:$0xf]  ;;  %v11981_v36 = vld [vmem:[%s14081_s11 + $0x1738] sm:$0xf0] }
 0x4bc   : > { %8805 = vmatpush.bf16.msra.mxu0 %v11792_v30  ;;  %v8592_v54 = vadd.f32 %v8591_v48, %v8579_v47  ;;  %v12985_v2 = vld [vmem:[%s14081_s11 + $0x182c] sm:$0xf]  ;;  %v12109_v5 = vld [vmem:[%s14081_s11 + $0x1838] sm:$0xf0]  ;;  %v11728_v30 = vor.u32 %v12889_v12, %v11725_v60 }
 0x4bd   : > { %v12885_v33 = vld [vmem:[%s14081_s11 + $0x150c] sm:$0xf]  ;;  %v11709_v34 = vld [vmem:[%s14081_s11 + $0x1518] sm:$0xf0] }
 0x4be   : > { %8818 = vmatpush.bf16.msra.mxu1 %v11920_v6  ;;  %8831 = vmatpush.bf16.msra.mxu2 %v12048_v0  ;;  %v11856_v6 = vor.u32 %v12921_v53, %v11853_v51  ;;  %v11984_v0 = vor.u32 %v12953_v32, %v11981_v36  ;;  %v12917_v31 = vld [vmem:[%s14081_s11 + $0x160c] sm:$0xf]  ;;  %v11837_v59 = vld [vmem:[%s14081_s11 + $0x1618] sm:$0xf0]  ;;  %v11712_v56 = vor.u32 %v12885_v33, %v11709_v34 }
 0x4bf   : > { %8844 = vmatpush.bf16.msra.mxu3 %v12176_v7  ;;  %v12112_v7 = vor.u32 %v12985_v2, %v12109_v5  ;;  %v12949_v20 = vld [vmem:[%s14081_s11 + $0x170c] sm:$0xf]  ;;  %v11965_v1 = vld [vmem:[%s14081_s11 + $0x1718] sm:$0xf0] }
 0x4c0   : > { %8806 = vmatpush.bf16.msra.mxu0 %v11776_v62  ;;  %v8580_v29 = vpop.f32.mrf.mxu2  ;;  %v12981_v8 = vld [vmem:[%s14081_s11 + $0x180c] sm:$0xf]  ;;  %v12093_v62 = vld [vmem:[%s14081_s11 + $0x1818] sm:$0xf0] }
 0x4c1   : > { %v12096_v58 = vor.u32 %v12981_v8, %v12093_v62  ;;  %v13091_v10 = vld [vmem:[#allocation1] sm:$0xff] }
 0x4c2   : > { %8819 = vmatpush.bf16.msra.mxu1 %v11904_v9  ;;  %8832 = vmatpush.bf16.msra.mxu2 %v12032_v25  ;;  %v11840_v9 = vor.u32 %v12917_v31, %v11837_v59  ;;  %v11968_v25 = vor.u32 %v12949_v20, %v11965_v1 }
 0x4c3   : > { %8845 = vmatpush.bf16.msra.mxu3 %v12160_v4  ;;  %v8593_v63 = vpop.f32.mrf.mxu3 }
 0x4c4   : > { %8807 = vmatpush.bf16.msra.mxu0 %v11760_v15 }
 0x4c6   : > { %8820 = vmatpush.bf16.msra.mxu1 %v11888_v52  ;;  %8833 = vmatpush.bf16.msra.mxu2 %v12016_v40 }
 0x4c7   : > { %8846 = vmatpush.bf16.msra.mxu3 %v12144_v13 }
 0x4c8   : > { %8808 = vmatpush.bf16.msra.mxu0 %v11744_v38 }
 0x4ca   : > { %8821 = vmatpush.bf16.msra.mxu1 %v11872_v57  ;;  %8834 = vmatpush.bf16.msra.mxu2 %v12000_v17 }
 0x4cb   : > { %8847 = vmatpush.bf16.msra.mxu3 %v12128_v44 }
 0x4cc   : > { %8809 = vmatpush.bf16.msra.mxu0 %v11728_v30 }
 0x4ce   : > { %8822 = vmatpush.bf16.msra.mxu1 %v11856_v6  ;;  %8835 = vmatpush.bf16.msra.mxu2 %v11984_v0 }
 0x4cf   : > { %8848 = vmatpush.bf16.msra.mxu3 %v12112_v7 }
 0x4d0   : > { %8810 = vmatpush.bf16.msra.mxu0 %v11712_v56  ;;  %v8604_v61 = vpop.f32.mrf.mxu0 }
 0x4d1   : > { %v8605_v11 = vadd.f32 %v8604_v61, %v8592_v54 }
 0x4d2   : > { %8823 = vmatpush.bf16.msra.mxu1 %v11840_v9  ;;  %8836 = vmatpush.bf16.msra.mxu2 %v11968_v25  ;;  %v8617_v3 = vpop.f32.mrf.mxu1  ;;  %v8859_v9 = vrot.slane %v15395_v39, 3 }
 0x4d3   : > { %8849 = vmatpush.bf16.msra.mxu3 %v12096_v58  ;;  %8811 = vmatmul.bf16.vlgmr.msra.gmra.mxu0 %v14564_v22  ;;  %v8618_v4 = vadd.f32 %v8617_v3, %v8605_v11 }
 0x4d4   : > { %v8865_v11 = vsel %vm8862_vm0, %v15395_v39, %v8859_v9 }
 0x4d5   : > { %8824 = vmatmul.bf16.vlgmr.msra.gmra.mxu1 %v14562_v21  ;;  %8837 = vmatmul.bf16.vlgmr.msra.gmra.mxu2 %v14566_v23 }
 0x4d6   : > { %8850 = vmatmul.bf16.vlgmr.msra.gmra.mxu3 %v13091_v10 }
 0x4d8   : > { %v8630_v19 = vpop.f32.mrf.mxu2  ;;  %v8606_v27 = vpop.f32.mrf.mxu0 }
 0x4d9   : > { %v8631_v24 = vadd.f32 %v8630_v19, %v8618_v4 }
 0x4da   : > { %v8619_v35 = vpop.f32.mrf.mxu1 }
 0x4db   : > { %v8643_v45 = vpop.f32.mrf.mxu3 }
 0x4dc   : > { %v8644_v37 = vadd.f32 %v8643_v45, %v8631_v24 }
 0x4e0   : > { %v8632_v15 = vpop.f32.mrf.mxu2 }
 0x4e3   : > { %v8645_v52 = vpop.f32.mrf.mxu3 }
 0x4f0   : > { %v8656_v40 = vpop.f32.mrf.mxu0 }
 0x4f1   : > { %v8657_v22 = vadd.f32 %v8656_v40, %v8644_v37 }
 0x4f2   : > { %v8669_v50 = vpop.f32.mrf.mxu1 }
 0x4f3   : > { %v8670_v21 = vadd.f32 %v8669_v50, %v8657_v22 }
 0x4f8   : > { %v8682_v16 = vpop.f32.mrf.mxu2  ;;  %v8658_v42 = vpop.f32.mrf.mxu0 }
 0x4f9   : > { %v8683_v23 = vadd.f32 %v8682_v16, %v8670_v21 }
 0x4fa   : > { %v8671_v13 = vpop.f32.mrf.mxu1 }
 0x4fb   : > { %v8695_v41 = vpop.f32.mrf.mxu3 }
 0x4fc   : > { %v8696_v14 = vadd.f32 %v8695_v41, %v8683_v23 }
 0x500   : > { %v8684_v43 = vpop.f32.mrf.mxu2 }
 0x503   : > { %v8697_v46 = vpop.f32.mrf.mxu3 }
 0x510   : > { %v8708_v47 = vpop.f32.mrf.mxu0 }
 0x511   : > { %v8709_v60 = vadd.f32 %v8708_v47, %v8696_v14 }
 0x512   : > { %v8721_v48 = vpop.f32.mrf.mxu1 }
 0x513   : > { %v8722_v32 = vadd.f32 %v8721_v48, %v8709_v60 }
 0x518   : > { %v8734_v26 = vpop.f32.mrf.mxu2  ;;  %v8710_v38 = vpop.f32.mrf.mxu0 }
 0x519   : > { %v8735_v36 = vadd.f32 %v8734_v26, %v8722_v32 }
 0x51a   : > { %v8723_v54 = vpop.f32.mrf.mxu1 }
 0x51b   : > { %v8747_v49 = vpop.f32.mrf.mxu3 }
 0x51c   : > { %v8748_v30 = vadd.f32 %v8747_v49, %v8735_v36 }
 0x520   : > { %v8736_v55 = vpop.f32.mrf.mxu2 }
 0x523   : > { %v8749_v57 = vpop.f32.mrf.mxu3 }
 0x530   : > { %v8760_v17 = vpop.f32.mrf.mxu0 }
 0x531   : > { %v8761_v6 = vadd.f32 %v8760_v17, %v8748_v30 }
 0x532   : > { %v8773_v12 = vpop.f32.mrf.mxu1 }
 0x533   : > { %v8774_v0 = vadd.f32 %v8773_v12, %v8761_v6 }
 0x538   : > { %v8786_v53 = vpop.f32.mrf.mxu2  ;;  %v8762_v44 = vpop.f32.mrf.mxu0 }
 0x539   : > { %v8787_v33 = vadd.f32 %v8786_v53, %v8774_v0 }
 0x53a   : > { %v8775_v51 = vpop.f32.mrf.mxu1 }
 0x53b   : > { %v8799_v28 = vpop.f32.mrf.mxu3 }
 0x53c   : > { %v8800_v34 = vadd.f32 %v8799_v28, %v8787_v33 }
 0x540   : > { %v8788_v2 = vpop.f32.mrf.mxu2 }
 0x543   : > { %v8801_v5 = vpop.f32.mrf.mxu3 }
 0x550   : > { %v8812_v31 = vpop.f32.mrf.mxu0 }
 0x551   : > { %v8813_v7 = vadd.f32 %v8812_v31, %v8800_v34 }
 0x552   : > { %v8825_v29 = vpop.f32.mrf.mxu1 }
 0x553   : > { %v8826_v59 = vadd.f32 %v8825_v29, %v8813_v7 }
 0x558   : > { %v8838_v20 = vpop.f32.mrf.mxu2  ;;  %v8814_v8 = vpop.f32.mrf.mxu0 }
 0x559   : > { %v8839_v1 = vadd.f32 %v8838_v20, %v8826_v59  ;;  %v8851_v63 = vpop.f32.mrf.mxu3 }
 0x55a   : > { %v8827_v62 = vpop.f32.mrf.mxu1 }
 0x55b   : > { %v8852_v56 = vadd.f32 %v8851_v63, %v8839_v1 }
 0x55d   : > { %v8856_v25 = vpack.c.bf16 %v8852_v56, %v15828_v18 }
 0x55f   : > { %v8860_v58 = vrot.slane %v8856_v25, 6  ;;  %v8861_v10 = vrot.slane %v8856_v25, 1 }
 0x560   : > { %v8840_v61 = vpop.f32.mrf.mxu2 }
 0x561   : > { %v8869_v3 = vsel %vm8866_vm1, %v8860_v58, %v8861_v10  ;;  %v8853_v4 = vpop.f32.mrf.mxu3 }
 0x562   : > { %v8871_v19 = vsel %vm8870_vm2, %v8865_v11, %v8869_v3 }
 0x563   : > { %8873 = vst [vmem:[%s2681_s5] sm:$0xf] %v8871_v19 }
 0x564 PF: > { %s13_s16 = sadd.s32 1, %s13146_s16   ;;  %s15955_s12 = smov %s13134_s13 }
 0x565   : > { %p10_p12 = scmp.ge.s32.totalorder %s13_s16, 4   ;;  %s15956_s13 = smov %s13219_s20 }
 0x566   : > { %s15957_s14 = smov %s13142_s15  ;;  %s15958_s15 = smov %s15960_s17 }
 0x567   :  { %12 = sbr.rel (!%p10_p12) target bundleno = 3 (0x3), region = 123 }

</bundles_post_ra>
